<compile_context>
chip_gen: v6e
topology: v6e:2x2x1
jax: 0.10.0
libtpu: 0.0.40
codegen_flags: <defaults>
</compile_context>

<pallas_src>
import functools
import math

import jax
import jax.numpy as jnp
from jax.experimental import pallas as pl
from jax.experimental.pallas import tpu as pltpu


# ---------------------------------------------------------------------------
# Shared helper: bf16 MXU matmul with f32 accumulation (used by the kernel AND
# the pure-JAX reference so the numerics match).
# ---------------------------------------------------------------------------
def _mxu_dot(a, w_bf16):
    return jnp.dot(a.astype(jnp.bfloat16), w_bf16,
                   preferred_element_type=jnp.float32)


def _pick_batch_tile(B, L, target_rows=256):
    """Pick TB (sequences per grid step): TB*L rows fill the MXU, and when
    possible keep >= 2 grid steps so v7x's two TensorCores are both used."""
    divs = [d for d in range(1, B + 1) if B % d == 0]
    cands = [d for d in divs if d * L <= target_rows and B // d >= 2]
    if cands:
        return max(cands)
    cands = [d for d in divs if B // d >= 2]
    if cands:
        return min(cands, key=lambda d: abs(d * L - target_rows))
    return B  # B == 1


# ---------------------------------------------------------------------------
# The single fused kernel
# ---------------------------------------------------------------------------
def rupture_kernel(x_ref, *refs, num_conv, num_blocks, num_heads,
                   batch_tile, seq_len):
    # refs layout: [conv w/b interleaved (2*num_conv)] +
    #              [16 stacked transformer tensors] + [4 head tensors] + [o_ref]
    o_ref = refs[-1]
    conv_refs = refs[:2 * num_conv]
    (wq_ref, wk_ref, inqw_ref, inkw_ref, invw_ref,
     inqb_ref, inkb_ref, invb_ref, outw_ref, outb_ref,
     fw1_ref, fb1_ref, fw2_ref, fb2_ref, g_ref, beta_ref) = \
        refs[2 * num_conv: 2 * num_conv + 16]
    hw2_ref, hb2_ref, hwo_ref, hbo_ref = refs[2 * num_conv + 16:-1]

    bf16 = jnp.bfloat16

    # ---- conv_input + conv1 stack: register-accumulated concat, no scratch ----
    feats = []
    cur = x_ref[...]                                          # (TM, 5) f32
    for i in range(num_conv):
        w = conv_refs[2 * i][...]                             # (Cin, Cout) bf16
        b = conv_refs[2 * i + 1][...]                         # (1, Cout)  f32
        y = jnp.maximum(_mxu_dot(cur, w) + b, 0.0)
        feats.append(y)
        cur = feats[0] if len(feats) == 1 else jnp.concatenate(feats, axis=-1)
    h = cur                                                   # (TM, E) f32

    TM, E = h.shape
    TB, L = batch_tile, seq_len
    Dh = E // num_heads
    scale = 1.0 / math.sqrt(Dh)

    def layer_norm(z, g, beta):                               # f32 math
        mu = jnp.mean(z, axis=-1, keepdims=True)
        var = jnp.mean(jnp.square(z - mu), axis=-1, keepdims=True)
        return (z - mu) * jax.lax.rsqrt(var + 1e-5) * g + beta

    # ---- transformer encoder blocks (statically unrolled, resident weights) ----
    for n in range(num_blocks):
        g, beta = g_ref[n], beta_ref[n]                       # (1, E) each

        h_bf = h.astype(bf16)                                 # cast once, reuse
        q = jnp.dot(h_bf, wq_ref[n], preferred_element_type=jnp.float32)
        k = jnp.dot(h_bf, wk_ref[n], preferred_element_type=jnp.float32)
        q_bf = q.astype(bf16)
        k_bf = k.astype(bf16)       # value = key_projection(x)  (module quirk)

        q2 = jnp.dot(q_bf, inqw_ref[n], preferred_element_type=jnp.float32) + inqb_ref[n]
        k2 = jnp.dot(k_bf, inkw_ref[n], preferred_element_type=jnp.float32) + inkb_ref[n]
        v2 = jnp.dot(k_bf, invw_ref[n], preferred_element_type=jnp.float32) + invb_ref[n]

        # Per-head attention, batched over the TB sequences in this tile.
        q3 = q2.reshape(TB, L, E).astype(bf16)
        k3 = k2.reshape(TB, L, E).astype(bf16)
        v3 = v2.reshape(TB, L, E).astype(bf16)
        heads = []
        for hh in range(num_heads):
            cols = slice(hh * Dh, (hh + 1) * Dh)
            qh, kh, vh = q3[:, :, cols], k3[:, :, cols], v3[:, :, cols]
            s = jnp.einsum('bqd,bkd->bqk', qh, kh,
                           preferred_element_type=jnp.float32) * scale
            s = s - jnp.max(s, axis=-1, keepdims=True)
            p = jnp.exp(s)
            p = p * pl.reciprocal(jnp.sum(p, axis=-1, keepdims=True), approx=True)
            heads.append(jnp.einsum('bqk,bkd->bqd', p.astype(bf16), vh,
                                    preferred_element_type=jnp.float32))
        attn = jnp.concatenate(heads, axis=-1).reshape(TM, E)   # registers, no scratch
        attn = jnp.dot(attn.astype(bf16), outw_ref[n],
                       preferred_element_type=jnp.float32) + outb_ref[n]

        ln1 = layer_norm(h + attn, g, beta)                   # same LN params twice
        ff = jnp.maximum(jnp.dot(ln1.astype(bf16), fw1_ref[n],
                                 preferred_element_type=jnp.float32) + fb1_ref[n], 0.0)
        ff = jnp.dot(ff.astype(bf16), fw2_ref[n],
                     preferred_element_type=jnp.float32) + fb2_ref[n]
        h = layer_norm(ff + ln1, g, beta)

    # ---- conv2 + conv_output head (fused epilogue) ----
    h2 = jnp.maximum(_mxu_dot(h, hw2_ref[...]) + hb2_ref[...], 0.0)
    out = jnp.maximum(_mxu_dot(h2, hwo_ref[...]) + hbo_ref[...], 0.0)
    o_ref[...] = out                                          # (TM, 2)


def rupture_net2d_forward(x, params, config):
    """x: (B, L, 5) f32 -> (B, L, 2) f32 via a single fused pallas_call."""
    B, L, Cin = x.shape
    blocks = params['blocks']
    conv_w, conv_b = params['conv_stack']['weights'], params['conv_stack']['biases']
    head = params['head']
    num_conv = len(conv_w)
    NB = blocks['wq'].shape[0]
    nh = config['num_transformer_heads']

    TB = _pick_batch_tile(B, L)
    M, TM = B * L, TB * L

    flat_conv = []
    for w, b in zip(conv_w, conv_b):
        flat_conv += [w, b]
    names = ('wq', 'wk', 'in_q_w', 'in_k_w', 'in_v_w',
             'in_q_b', 'in_k_b', 'in_v_b', 'out_w', 'out_b',
             'w1', 'b1', 'w2', 'b2', 'ln_g', 'ln_b')
    t_args = [blocks[k] for k in names]
    head_args = [head['w2'], head['b2'], head['wo'], head['bo']]
    weight_args = flat_conv + t_args + head_args

    def resident_spec(a):                 # constant index map -> loaded once
        return pl.BlockSpec(a.shape, lambda i, _nd=a.ndim: (0,) * _nd)

    kernel = functools.partial(
        rupture_kernel, num_conv=num_conv, num_blocks=NB,
        num_heads=nh, batch_tile=TB, seq_len=L)

    out2d = pl.pallas_call(
        kernel,
        out_shape=jax.ShapeDtypeStruct((M, 2), jnp.float32),
        grid=(B // TB,),
        in_specs=[pl.BlockSpec((TM, Cin), lambda i: (i, 0))]
                 + [resident_spec(a) for a in weight_args],
        out_specs=pl.BlockSpec((TM, 2), lambda i: (i, 0)),
        compiler_params=pltpu.CompilerParams(dimension_semantics=("parallel",)),
    )(x.reshape(M, Cin), *weight_args)
    return out2d.reshape(B, L, 2)
    # TODO(synk): dropout omitted (inference mode -> identity), matching model.eval().


# ---------------------------------------------------------------------------
# Parameter init: weights pre-transposed + pre-split + bf16, biases (1, C) f32,
# transformer weights stacked along a leading block axis. Done ONCE here.
# ---------------------------------------------------------------------------
def init_params(config, key):
    ks = iter(jax.random.split(key, 256))

    def rnd(shape, scale=0.1):
        return scale * jax.random.normal(next(ks), shape, dtype=jnp.float32)

    def w_t(cout, cin):                   # PyTorch (Cout, Cin) -> stored (Cin, Cout) bf16
        return jnp.transpose(rnd((cout, cin))).astype(jnp.bfloat16)

    c1 = config['conv1_dim']
    conv_w = [w_t(c1, 5)]
    conv_b = [rnd((1, c1))]
    cur = c1
    for _ in range(config['conv1_layers']):
        conv_w.append(w_t(cur, cur))
        conv_b.append(rnd((1, cur)))
        cur *= 2
    E = cur
    H = config['transformer_hidden_dim']

    blocks = []
    for _ in range(config['num_transformer_blocks']):
        blocks.append({
            'wq': w_t(E, E), 'wk': w_t(E, E),
            # MHA in_proj pre-split into q/k/v pieces (each (E,E), pre-transposed)
            'in_q_w': w_t(E, E), 'in_k_w': w_t(E, E), 'in_v_w': w_t(E, E),
            'in_q_b': rnd((1, E)), 'in_k_b': rnd((1, E)), 'in_v_b': rnd((1, E)),
            'out_w': w_t(E, E), 'out_b': rnd((1, E)),
            'w1': w_t(H, E), 'b1': rnd((1, H)),
            'w2': w_t(E, H), 'b2': rnd((1, E)),
            'ln_g': jnp.ones((1, E), jnp.float32),
            'ln_b': jnp.zeros((1, E), jnp.float32),
        })
    stacked = {k: jnp.stack([blk[k] for blk in blocks]) for k in blocks[0]}

    c2 = config['conv2_dim']
    head = {'w2': w_t(c2, E), 'b2': rnd((1, c2)),
            'wo': w_t(2, c2), 'bo': rnd((1, 2))}

    return {'conv_stack': {'weights': conv_w, 'biases': conv_b},
            'blocks': stacked, 'head': head}


# ---------------------------------------------------------------------------
# Pure-JAX reference (same math, same bf16 matmul inputs) for a sanity check
# ---------------------------------------------------------------------------
def reference_forward(x, params, config):
    B, L, _ = x.shape
    h = x.reshape(B * L, -1)

    cs = params['conv_stack']
    feats, cur = [], h
    for w, b in zip(cs['weights'], cs['biases']):
        feats.append(jnp.maximum(_mxu_dot(cur, w) + b, 0.0))
        cur = jnp.concatenate(feats, axis=-1)
    h = cur

    blk = params['blocks']
    E = blk['wq'].shape[-1]
    nh = config['num_transformer_heads']
    Dh = E // nh
    scale = 1.0 / math.sqrt(Dh)
    h = h.reshape(B, L, E)
    for n in range(blk['wq'].shape[0]):
        q = _mxu_dot(h, blk['wq'][n])
        k = _mxu_dot(h, blk['wk'][n])
        v = k                                              # value = key_projection(x)
        q2 = _mxu_dot(q, blk['in_q_w'][n]) + blk['in_q_b'][n]
        k2 = _mxu_dot(k, blk['in_k_w'][n]) + blk['in_k_b'][n]
        v2 = _mxu_dot(v, blk['in_v_w'][n]) + blk['in_v_b'][n]
        q4 = q2.reshape(B, L, nh, Dh).transpose(0, 2, 1, 3)
        k4 = k2.reshape(B, L, nh, Dh).transpose(0, 2, 1, 3)
        v4 = v2.reshape(B, L, nh, Dh).transpose(0, 2, 1, 3)
        s = jnp.einsum('bhqd,bhkd->bhqk', q4.astype(jnp.bfloat16),
                       k4.astype(jnp.bfloat16),
                       preferred_element_type=jnp.float32) * scale
        p = jax.nn.softmax(s, axis=-1)
        a = jnp.einsum('bhqk,bhkd->bhqd', p.astype(jnp.bfloat16),
                       v4.astype(jnp.bfloat16),
                       preferred_element_type=jnp.float32)
        a = a.transpose(0, 2, 1, 3).reshape(B, L, E)
        a = _mxu_dot(a, blk['out_w'][n]) + blk['out_b'][n]

        g, beta = blk['ln_g'][n], blk['ln_b'][n]

        def ln(z):
            mu = z.mean(-1, keepdims=True)
            var = ((z - mu) ** 2).mean(-1, keepdims=True)
            return (z - mu) * jax.lax.rsqrt(var + 1e-5) * g + beta

        ln1 = ln(h + a)
        ff = jnp.maximum(_mxu_dot(ln1, blk['w1'][n]) + blk['b1'][n], 0.0)
        ff = _mxu_dot(ff, blk['w2'][n]) + blk['b2'][n]
        h = ln(ff + ln1)

    head = params['head']
    h = h.reshape(B * L, E)
    h = jnp.maximum(_mxu_dot(h, head['w2']) + head['b2'], 0.0)
    h = jnp.maximum(_mxu_dot(h, head['wo']) + head['bo'], 0.0)
    return h.reshape(B, L, 2)


if __name__ == "__main__":
    config = {
        'conv1_dim': 8,
        'conv1_layers': 2,                 # embed_dim = 8 * 2**2 = 32
        'num_transformer_blocks': 2,
        'num_transformer_heads': 4,
        'dropout_pro': 0.0,
        'transformer_hidden_dim': 64,
        'conv2_dim': 16,
    }
    B, L = 16, 16                          # TB=8 -> 128-row slabs, 2 parallel grid steps

    key = jax.random.PRNGKey(0)
    kx, kp = jax.random.split(key)
    x = jax.random.normal(kx, (B, L, 5), dtype=jnp.float32)
    params = init_params(config, kp)

    fwd = jax.jit(functools.partial(rupture_net2d_forward, config=config))
    out = jax.block_until_ready(fwd(x, params))
    assert out.shape == (B, L, 2)

    # Tolerance accounts for bf16 MXU inputs (mirrored in the reference) and the
    # EUP approximate reciprocal used in the in-kernel softmax.
    ref = reference_forward(x, params, config)
    assert jnp.allclose(out, ref, rtol=1e-2, atol=1e-2), "mismatch vs JAX reference"

    print("KERNEL_OK")
</pallas_src>

<mosaic_0001>
module attributes {stable_mosaic.version = 11 : i64} {
  func.func @rupture_kernel(%arg0: i32, %arg1: memref<128x5xf32, #tpu.memory_space<vmem>>, %arg2: memref<5x8xbf16, #tpu.memory_space<vmem>>, %arg3: memref<1x8xf32, #tpu.memory_space<vmem>>, %arg4: memref<8x8xbf16, #tpu.memory_space<vmem>>, %arg5: memref<1x8xf32, #tpu.memory_space<vmem>>, %arg6: memref<16x16xbf16, #tpu.memory_space<vmem>>, %arg7: memref<1x16xf32, #tpu.memory_space<vmem>>, %arg8: memref<2x32x32xbf16, #tpu.memory_space<vmem>>, %arg9: memref<2x32x32xbf16, #tpu.memory_space<vmem>>, %arg10: memref<2x32x32xbf16, #tpu.memory_space<vmem>>, %arg11: memref<2x32x32xbf16, #tpu.memory_space<vmem>>, %arg12: memref<2x32x32xbf16, #tpu.memory_space<vmem>>, %arg13: memref<2x1x32xf32, #tpu.memory_space<vmem>>, %arg14: memref<2x1x32xf32, #tpu.memory_space<vmem>>, %arg15: memref<2x1x32xf32, #tpu.memory_space<vmem>>, %arg16: memref<2x32x32xbf16, #tpu.memory_space<vmem>>, %arg17: memref<2x1x32xf32, #tpu.memory_space<vmem>>, %arg18: memref<2x32x64xbf16, #tpu.memory_space<vmem>>, %arg19: memref<2x1x64xf32, #tpu.memory_space<vmem>>, %arg20: memref<2x64x32xbf16, #tpu.memory_space<vmem>>, %arg21: memref<2x1x32xf32, #tpu.memory_space<vmem>>, %arg22: memref<2x1x32xf32, #tpu.memory_space<vmem>>, %arg23: memref<2x1x32xf32, #tpu.memory_space<vmem>>, %arg24: memref<32x16xbf16, #tpu.memory_space<vmem>>, %arg25: memref<1x16xf32, #tpu.memory_space<vmem>>, %arg26: memref<16x2xbf16, #tpu.memory_space<vmem>>, %arg27: memref<1x2xf32, #tpu.memory_space<vmem>>, %arg28: memref<128x2xf32, #tpu.memory_space<vmem>>) attributes {dimension_semantics = [#tpu.dimension_semantics<parallel>], iteration_bounds = array<i64: 2>, scalar_prefetch = 0 : i64, scratch_operands = 0 : i64, tpu.core_type = #tpu.core_type<tc>, window_params = [{transform_indices = @transform_0, window_bounds = array<i64: 128, 5>}, {pipeline_mode = #tpu.pipeline_mode<synchronous>, transform_indices = @transform_1, window_bounds = array<i64: 5, 8>}, {pipeline_mode = #tpu.pipeline_mode<synchronous>, transform_indices = @transform_2, window_bounds = array<i64: 1, 8>}, {pipeline_mode = #tpu.pipeline_mode<synchronous>, transform_indices = @transform_3, window_bounds = array<i64: 8, 8>}, {pipeline_mode = #tpu.pipeline_mode<synchronous>, transform_indices = @transform_4, window_bounds = array<i64: 1, 8>}, {pipeline_mode = #tpu.pipeline_mode<synchronous>, transform_indices = @transform_5, window_bounds = array<i64: 16, 16>}, {pipeline_mode = #tpu.pipeline_mode<synchronous>, transform_indices = @transform_6, window_bounds = array<i64: 1, 16>}, {pipeline_mode = #tpu.pipeline_mode<synchronous>, transform_indices = @transform_7, window_bounds = array<i64: 2, 32, 32>}, {pipeline_mode = #tpu.pipeline_mode<synchronous>, transform_indices = @transform_8, window_bounds = array<i64: 2, 32, 32>}, {pipeline_mode = #tpu.pipeline_mode<synchronous>, transform_indices = @transform_9, window_bounds = array<i64: 2, 32, 32>}, {pipeline_mode = #tpu.pipeline_mode<synchronous>, transform_indices = @transform_10, window_bounds = array<i64: 2, 32, 32>}, {pipeline_mode = #tpu.pipeline_mode<synchronous>, transform_indices = @transform_11, window_bounds = array<i64: 2, 32, 32>}, {pipeline_mode = #tpu.pipeline_mode<synchronous>, transform_indices = @transform_12, window_bounds = array<i64: 2, 1, 32>}, {pipeline_mode = #tpu.pipeline_mode<synchronous>, transform_indices = @transform_13, window_bounds = array<i64: 2, 1, 32>}, {pipeline_mode = #tpu.pipeline_mode<synchronous>, transform_indices = @transform_14, window_bounds = array<i64: 2, 1, 32>}, {pipeline_mode = #tpu.pipeline_mode<synchronous>, transform_indices = @transform_15, window_bounds = array<i64: 2, 32, 32>}, {pipeline_mode = #tpu.pipeline_mode<synchronous>, transform_indices = @transform_16, window_bounds = array<i64: 2, 1, 32>}, {pipeline_mode = #tpu.pipeline_mode<synchronous>, transform_indices = @transform_17, window_bounds = array<i64: 2, 32, 64>}, {pipeline_mode = #tpu.pipeline_mode<synchronous>, transform_indices = @transform_18, window_bounds = array<i64: 2, 1, 64>}, {pipeline_mode = #tpu.pipeline_mode<synchronous>, transform_indices = @transform_19, window_bounds = array<i64: 2, 64, 32>}, {pipeline_mode = #tpu.pipeline_mode<synchronous>, transform_indices = @transform_20, window_bounds = array<i64: 2, 1, 32>}, {pipeline_mode = #tpu.pipeline_mode<synchronous>, transform_indices = @transform_21, window_bounds = array<i64: 2, 1, 32>}, {pipeline_mode = #tpu.pipeline_mode<synchronous>, transform_indices = @transform_22, window_bounds = array<i64: 2, 1, 32>}, {pipeline_mode = #tpu.pipeline_mode<synchronous>, transform_indices = @transform_23, window_bounds = array<i64: 32, 16>}, {pipeline_mode = #tpu.pipeline_mode<synchronous>, transform_indices = @transform_24, window_bounds = array<i64: 1, 16>}, {pipeline_mode = #tpu.pipeline_mode<synchronous>, transform_indices = @transform_25, window_bounds = array<i64: 16, 2>}, {pipeline_mode = #tpu.pipeline_mode<synchronous>, transform_indices = @transform_26, window_bounds = array<i64: 1, 2>}, {transform_indices = @transform_27, window_bounds = array<i64: 128, 2>}]} {
    %c0 = arith.constant 0 : index
    %c0_0 = arith.constant 0 : index
    %0 = vector.load %arg1[%c0, %c0_0] : memref<128x5xf32, #tpu.memory_space<vmem>>, vector<128x5xf32>
    %c0_1 = arith.constant 0 : index
    %c0_2 = arith.constant 0 : index
    %1 = vector.load %arg2[%c0_1, %c0_2] : memref<5x8xbf16, #tpu.memory_space<vmem>>, vector<5x8xbf16>
    %c0_3 = arith.constant 0 : index
    %c0_4 = arith.constant 0 : index
    %2 = vector.load %arg3[%c0_3, %c0_4] : memref<1x8xf32, #tpu.memory_space<vmem>>, vector<1x8xf32>
    %3 = arith.truncf %0 : vector<128x5xf32> to vector<128x5xbf16>
    %cst = arith.constant dense<0.000000e+00> : vector<128x8xf32>
    %4 = tpu.matmul %3, %1, %cst {dimension_numbers = #tpu.dot_dimension_numbers<[1], [0], [0], [1], [0, 0, 1, 1], [], []>} : vector<128x5xbf16>, vector<5x8xbf16>, vector<128x8xf32> -> vector<128x8xf32>
    %5 = vector.broadcast %2 : vector<1x8xf32> to vector<128x8xf32>
    %6 = arith.addf %4, %5 : vector<128x8xf32>
    %cst_5 = arith.constant 0.000000e+00 : f32
    %7 = vector.broadcast %cst_5 : f32 to vector<128x8xf32>
    %8 = arith.maximumf %6, %7 : vector<128x8xf32>
    %c0_6 = arith.constant 0 : index
    %c0_7 = arith.constant 0 : index
    %9 = vector.load %arg4[%c0_6, %c0_7] : memref<8x8xbf16, #tpu.memory_space<vmem>>, vector<8x8xbf16>
    %c0_8 = arith.constant 0 : index
    %c0_9 = arith.constant 0 : index
    %10 = vector.load %arg5[%c0_8, %c0_9] : memref<1x8xf32, #tpu.memory_space<vmem>>, vector<1x8xf32>
    %11 = arith.truncf %8 : vector<128x8xf32> to vector<128x8xbf16>
    %cst_10 = arith.constant dense<0.000000e+00> : vector<128x8xf32>
    %12 = tpu.matmul %11, %9, %cst_10 {dimension_numbers = #tpu.dot_dimension_numbers<[1], [0], [0], [1], [0, 0, 1, 1], [], []>} : vector<128x8xbf16>, vector<8x8xbf16>, vector<128x8xf32> -> vector<128x8xf32>
    %13 = vector.broadcast %10 : vector<1x8xf32> to vector<128x8xf32>
    %14 = arith.addf %12, %13 : vector<128x8xf32>
    %cst_11 = arith.constant 0.000000e+00 : f32
    %15 = vector.broadcast %cst_11 : f32 to vector<128x8xf32>
    %16 = arith.maximumf %14, %15 : vector<128x8xf32>
    %17 = tpu.concatenate %8, %16 in 1 : vector<128x8xf32>, vector<128x8xf32> -> vector<128x16xf32>
    %c0_12 = arith.constant 0 : index
    %c0_13 = arith.constant 0 : index
    %18 = vector.load %arg6[%c0_12, %c0_13] : memref<16x16xbf16, #tpu.memory_space<vmem>>, vector<16x16xbf16>
    %c0_14 = arith.constant 0 : index
    %c0_15 = arith.constant 0 : index
    %19 = vector.load %arg7[%c0_14, %c0_15] : memref<1x16xf32, #tpu.memory_space<vmem>>, vector<1x16xf32>
    %20 = arith.truncf %17 : vector<128x16xf32> to vector<128x16xbf16>
    %cst_16 = arith.constant dense<0.000000e+00> : vector<128x16xf32>
    %21 = tpu.matmul %20, %18, %cst_16 {dimension_numbers = #tpu.dot_dimension_numbers<[1], [0], [0], [1], [0, 0, 1, 1], [], []>} : vector<128x16xbf16>, vector<16x16xbf16>, vector<128x16xf32> -> vector<128x16xf32>
    %22 = vector.broadcast %19 : vector<1x16xf32> to vector<128x16xf32>
    %23 = arith.addf %21, %22 : vector<128x16xf32>
    %cst_17 = arith.constant 0.000000e+00 : f32
    %24 = vector.broadcast %cst_17 : f32 to vector<128x16xf32>
    %25 = arith.maximumf %23, %24 : vector<128x16xf32>
    %26 = tpu.concatenate %8, %16, %25 in 1 : vector<128x8xf32>, vector<128x8xf32>, vector<128x16xf32> -> vector<128x32xf32>
    %c0_18 = arith.constant 0 : index
    %c0_19 = arith.constant 0 : index
    %c0_20 = arith.constant 0 : index
    %27 = vector.load %arg22[%c0_18, %c0_19, %c0_20] : memref<2x1x32xf32, #tpu.memory_space<vmem>>, vector<1x1x32xf32>
    %28 = vector.shape_cast %27 : vector<1x1x32xf32> to vector<1x32xf32>
    %c0_21 = arith.constant 0 : index
    %c0_22 = arith.constant 0 : index
    %c0_23 = arith.constant 0 : index
    %29 = vector.load %arg23[%c0_21, %c0_22, %c0_23] : memref<2x1x32xf32, #tpu.memory_space<vmem>>, vector<1x1x32xf32>
    %30 = vector.shape_cast %29 : vector<1x1x32xf32> to vector<1x32xf32>
    %31 = arith.truncf %26 : vector<128x32xf32> to vector<128x32xbf16>
    %c0_24 = arith.constant 0 : index
    %c0_25 = arith.constant 0 : index
    %c0_26 = arith.constant 0 : index
    %32 = vector.load %arg8[%c0_24, %c0_25, %c0_26] : memref<2x32x32xbf16, #tpu.memory_space<vmem>>, vector<1x32x32xbf16>
    %33 = vector.shape_cast %32 : vector<1x32x32xbf16> to vector<32x32xbf16>
    %cst_27 = arith.constant dense<0.000000e+00> : vector<128x32xf32>
    %34 = tpu.matmul %31, %33, %cst_27 {dimension_numbers = #tpu.dot_dimension_numbers<[1], [0], [0], [1], [0, 0, 1, 1], [], []>} : vector<128x32xbf16>, vector<32x32xbf16>, vector<128x32xf32> -> vector<128x32xf32>
    %c0_28 = arith.constant 0 : index
    %c0_29 = arith.constant 0 : index
    %c0_30 = arith.constant 0 : index
    %35 = vector.load %arg9[%c0_28, %c0_29, %c0_30] : memref<2x32x32xbf16, #tpu.memory_space<vmem>>, vector<1x32x32xbf16>
    %36 = vector.shape_cast %35 : vector<1x32x32xbf16> to vector<32x32xbf16>
    %cst_31 = arith.constant dense<0.000000e+00> : vector<128x32xf32>
    %37 = tpu.matmul %31, %36, %cst_31 {dimension_numbers = #tpu.dot_dimension_numbers<[1], [0], [0], [1], [0, 0, 1, 1], [], []>} : vector<128x32xbf16>, vector<32x32xbf16>, vector<128x32xf32> -> vector<128x32xf32>
    %38 = arith.truncf %34 : vector<128x32xf32> to vector<128x32xbf16>
    %39 = arith.truncf %37 : vector<128x32xf32> to vector<128x32xbf16>
    %c0_32 = arith.constant 0 : index
    %c0_33 = arith.constant 0 : index
    %c0_34 = arith.constant 0 : index
    %40 = vector.load %arg10[%c0_32, %c0_33, %c0_34] : memref<2x32x32xbf16, #tpu.memory_space<vmem>>, vector<1x32x32xbf16>
    %41 = vector.shape_cast %40 : vector<1x32x32xbf16> to vector<32x32xbf16>
    %cst_35 = arith.constant dense<0.000000e+00> : vector<128x32xf32>
    %42 = tpu.matmul %38, %41, %cst_35 {dimension_numbers = #tpu.dot_dimension_numbers<[1], [0], [0], [1], [0, 0, 1, 1], [], []>} : vector<128x32xbf16>, vector<32x32xbf16>, vector<128x32xf32> -> vector<128x32xf32>
    %c0_36 = arith.constant 0 : index
    %c0_37 = arith.constant 0 : index
    %c0_38 = arith.constant 0 : index
    %43 = vector.load %arg13[%c0_36, %c0_37, %c0_38] : memref<2x1x32xf32, #tpu.memory_space<vmem>>, vector<1x1x32xf32>
    %44 = vector.shape_cast %43 : vector<1x1x32xf32> to vector<1x32xf32>
    %45 = vector.broadcast %44 : vector<1x32xf32> to vector<128x32xf32>
    %46 = arith.addf %42, %45 : vector<128x32xf32>
    %c0_39 = arith.constant 0 : index
    %c0_40 = arith.constant 0 : index
    %c0_41 = arith.constant 0 : index
    %47 = vector.load %arg11[%c0_39, %c0_40, %c0_41] : memref<2x32x32xbf16, #tpu.memory_space<vmem>>, vector<1x32x32xbf16>
    %48 = vector.shape_cast %47 : vector<1x32x32xbf16> to vector<32x32xbf16>
    %cst_42 = arith.constant dense<0.000000e+00> : vector<128x32xf32>
    %49 = tpu.matmul %39, %48, %cst_42 {dimension_numbers = #tpu.dot_dimension_numbers<[1], [0], [0], [1], [0, 0, 1, 1], [], []>} : vector<128x32xbf16>, vector<32x32xbf16>, vector<128x32xf32> -> vector<128x32xf32>
    %c0_43 = arith.constant 0 : index
    %c0_44 = arith.constant 0 : index
    %c0_45 = arith.constant 0 : index
    %50 = vector.load %arg14[%c0_43, %c0_44, %c0_45] : memref<2x1x32xf32, #tpu.memory_space<vmem>>, vector<1x1x32xf32>
    %51 = vector.shape_cast %50 : vector<1x1x32xf32> to vector<1x32xf32>
    %52 = vector.broadcast %51 : vector<1x32xf32> to vector<128x32xf32>
    %53 = arith.addf %49, %52 : vector<128x32xf32>
    %c0_46 = arith.constant 0 : index
    %c0_47 = arith.constant 0 : index
    %c0_48 = arith.constant 0 : index
    %54 = vector.load %arg12[%c0_46, %c0_47, %c0_48] : memref<2x32x32xbf16, #tpu.memory_space<vmem>>, vector<1x32x32xbf16>
    %55 = vector.shape_cast %54 : vector<1x32x32xbf16> to vector<32x32xbf16>
    %cst_49 = arith.constant dense<0.000000e+00> : vector<128x32xf32>
    %56 = tpu.matmul %39, %55, %cst_49 {dimension_numbers = #tpu.dot_dimension_numbers<[1], [0], [0], [1], [0, 0, 1, 1], [], []>} : vector<128x32xbf16>, vector<32x32xbf16>, vector<128x32xf32> -> vector<128x32xf32>
    %c0_50 = arith.constant 0 : index
    %c0_51 = arith.constant 0 : index
    %c0_52 = arith.constant 0 : index
    %57 = vector.load %arg15[%c0_50, %c0_51, %c0_52] : memref<2x1x32xf32, #tpu.memory_space<vmem>>, vector<1x1x32xf32>
    %58 = vector.shape_cast %57 : vector<1x1x32xf32> to vector<1x32xf32>
    %59 = vector.broadcast %58 : vector<1x32xf32> to vector<128x32xf32>
    %60 = arith.addf %56, %59 : vector<128x32xf32>
    %61 = vector.shape_cast %46 : vector<128x32xf32> to vector<8x16x32xf32>
    %62 = arith.truncf %61 : vector<8x16x32xf32> to vector<8x16x32xbf16>
    %63 = vector.shape_cast %53 : vector<128x32xf32> to vector<8x16x32xf32>
    %64 = arith.truncf %63 : vector<8x16x32xf32> to vector<8x16x32xbf16>
    %65 = vector.shape_cast %60 : vector<128x32xf32> to vector<8x16x32xf32>
    %66 = arith.truncf %65 : vector<8x16x32xf32> to vector<8x16x32xbf16>
    %67 = vector.extract_strided_slice %62 {offsets = [0, 0, 0], sizes = [8, 16, 8], strides = [1, 1, 1]} : vector<8x16x32xbf16> to vector<8x16x8xbf16>
    %68 = vector.extract_strided_slice %64 {offsets = [0, 0, 0], sizes = [8, 16, 8], strides = [1, 1, 1]} : vector<8x16x32xbf16> to vector<8x16x8xbf16>
    %69 = vector.extract_strided_slice %66 {offsets = [0, 0, 0], sizes = [8, 16, 8], strides = [1, 1, 1]} : vector<8x16x32xbf16> to vector<8x16x8xbf16>
    "tpu.trace_start"() <{level = 10 : i32, message = "bqd,bkd->bqk"}> : () -> ()
    %cst_53 = arith.constant dense<0.000000e+00> : vector<8x16x16xf32>
    %70 = tpu.matmul %67, %68, %cst_53 {dimension_numbers = #tpu.dot_dimension_numbers<[2], [2], [1], [1], [0, 0, 0, 1, 1, 1], [0], [0]>} : vector<8x16x8xbf16>, vector<8x16x8xbf16>, vector<8x16x16xf32> -> vector<8x16x16xf32>
    "tpu.trace_stop"() : () -> ()
    %cst_54 = arith.constant 0.353553385 : f32
    %71 = vector.broadcast %cst_54 : f32 to vector<8x16x16xf32>
    %72 = arith.mulf %70, %71 : vector<8x16x16xf32>
    %cst_55 = arith.constant dense<0xFF800000> : vector<8x16xf32>
    %73 = vector.multi_reduction <maximumf>, %72, %cst_55 [2] : vector<8x16x16xf32> to vector<8x16xf32>
    %74 = vector.shape_cast %73 : vector<8x16xf32> to vector<8x16x1xf32>
    %75 = vector.broadcast %74 : vector<8x16x1xf32> to vector<8x16x16xf32>
    %76 = arith.subf %72, %75 : vector<8x16x16xf32>
    %77 = math.exp %76 : vector<8x16x16xf32>
    %cst_56 = arith.constant dense<0.000000e+00> : vector<8x16xf32>
    %78 = vector.multi_reduction <add>, %77, %cst_56 [2] : vector<8x16x16xf32> to vector<8x16xf32>
    %79 = vector.shape_cast %78 : vector<8x16xf32> to vector<8x16x1xf32>
    %80 = tpu.reciprocal %79 {approx = true} : vector<8x16x1xf32> -> vector<8x16x1xf32>
    %81 = vector.broadcast %80 : vector<8x16x1xf32> to vector<8x16x16xf32>
    %82 = arith.mulf %77, %81 : vector<8x16x16xf32>
    %83 = arith.truncf %82 : vector<8x16x16xf32> to vector<8x16x16xbf16>
    "tpu.trace_start"() <{level = 10 : i32, message = "bqk,bkd->bqd"}> : () -> ()
    %cst_57 = arith.constant dense<0.000000e+00> : vector<8x16x8xf32>
    %84 = tpu.matmul %83, %69, %cst_57 {dimension_numbers = #tpu.dot_dimension_numbers<[2], [1], [1], [2], [0, 0, 0, 1, 1, 2], [0], [0]>} : vector<8x16x16xbf16>, vector<8x16x8xbf16>, vector<8x16x8xf32> -> vector<8x16x8xf32>
    "tpu.trace_stop"() : () -> ()
    %85 = vector.extract_strided_slice %62 {offsets = [0, 0, 8], sizes = [8, 16, 8], strides = [1, 1, 1]} : vector<8x16x32xbf16> to vector<8x16x8xbf16>
    %86 = vector.extract_strided_slice %64 {offsets = [0, 0, 8], sizes = [8, 16, 8], strides = [1, 1, 1]} : vector<8x16x32xbf16> to vector<8x16x8xbf16>
    %87 = vector.extract_strided_slice %66 {offsets = [0, 0, 8], sizes = [8, 16, 8], strides = [1, 1, 1]} : vector<8x16x32xbf16> to vector<8x16x8xbf16>
    "tpu.trace_start"() <{level = 10 : i32, message = "bqd,bkd->bqk"}> : () -> ()
    %cst_58 = arith.constant dense<0.000000e+00> : vector<8x16x16xf32>
    %88 = tpu.matmul %85, %86, %cst_58 {dimension_numbers = #tpu.dot_dimension_numbers<[2], [2], [1], [1], [0, 0, 0, 1, 1, 1], [0], [0]>} : vector<8x16x8xbf16>, vector<8x16x8xbf16>, vector<8x16x16xf32> -> vector<8x16x16xf32>
    "tpu.trace_stop"() : () -> ()
    %cst_59 = arith.constant 0.353553385 : f32
    %89 = vector.broadcast %cst_59 : f32 to vector<8x16x16xf32>
    %90 = arith.mulf %88, %89 : vector<8x16x16xf32>
    %cst_60 = arith.constant dense<0xFF800000> : vector<8x16xf32>
    %91 = vector.multi_reduction <maximumf>, %90, %cst_60 [2] : vector<8x16x16xf32> to vector<8x16xf32>
    %92 = vector.shape_cast %91 : vector<8x16xf32> to vector<8x16x1xf32>
    %93 = vector.broadcast %92 : vector<8x16x1xf32> to vector<8x16x16xf32>
    %94 = arith.subf %90, %93 : vector<8x16x16xf32>
    %95 = math.exp %94 : vector<8x16x16xf32>
    %cst_61 = arith.constant dense<0.000000e+00> : vector<8x16xf32>
    %96 = vector.multi_reduction <add>, %95, %cst_61 [2] : vector<8x16x16xf32> to vector<8x16xf32>
    %97 = vector.shape_cast %96 : vector<8x16xf32> to vector<8x16x1xf32>
    %98 = tpu.reciprocal %97 {approx = true} : vector<8x16x1xf32> -> vector<8x16x1xf32>
    %99 = vector.broadcast %98 : vector<8x16x1xf32> to vector<8x16x16xf32>
    %100 = arith.mulf %95, %99 : vector<8x16x16xf32>
    %101 = arith.truncf %100 : vector<8x16x16xf32> to vector<8x16x16xbf16>
    "tpu.trace_start"() <{level = 10 : i32, message = "bqk,bkd->bqd"}> : () -> ()
    %cst_62 = arith.constant dense<0.000000e+00> : vector<8x16x8xf32>
    %102 = tpu.matmul %101, %87, %cst_62 {dimension_numbers = #tpu.dot_dimension_numbers<[2], [1], [1], [2], [0, 0, 0, 1, 1, 2], [0], [0]>} : vector<8x16x16xbf16>, vector<8x16x8xbf16>, vector<8x16x8xf32> -> vector<8x16x8xf32>
    "tpu.trace_stop"() : () -> ()
    %103 = vector.extract_strided_slice %62 {offsets = [0, 0, 16], sizes = [8, 16, 8], strides = [1, 1, 1]} : vector<8x16x32xbf16> to vector<8x16x8xbf16>
    %104 = vector.extract_strided_slice %64 {offsets = [0, 0, 16], sizes = [8, 16, 8], strides = [1, 1, 1]} : vector<8x16x32xbf16> to vector<8x16x8xbf16>
    %105 = vector.extract_strided_slice %66 {offsets = [0, 0, 16], sizes = [8, 16, 8], strides = [1, 1, 1]} : vector<8x16x32xbf16> to vector<8x16x8xbf16>
    "tpu.trace_start"() <{level = 10 : i32, message = "bqd,bkd->bqk"}> : () -> ()
    %cst_63 = arith.constant dense<0.000000e+00> : vector<8x16x16xf32>
    %106 = tpu.matmul %103, %104, %cst_63 {dimension_numbers = #tpu.dot_dimension_numbers<[2], [2], [1], [1], [0, 0, 0, 1, 1, 1], [0], [0]>} : vector<8x16x8xbf16>, vector<8x16x8xbf16>, vector<8x16x16xf32> -> vector<8x16x16xf32>
    "tpu.trace_stop"() : () -> ()
    %cst_64 = arith.constant 0.353553385 : f32
    %107 = vector.broadcast %cst_64 : f32 to vector<8x16x16xf32>
    %108 = arith.mulf %106, %107 : vector<8x16x16xf32>
    %cst_65 = arith.constant dense<0xFF800000> : vector<8x16xf32>
    %109 = vector.multi_reduction <maximumf>, %108, %cst_65 [2] : vector<8x16x16xf32> to vector<8x16xf32>
    %110 = vector.shape_cast %109 : vector<8x16xf32> to vector<8x16x1xf32>
    %111 = vector.broadcast %110 : vector<8x16x1xf32> to vector<8x16x16xf32>
    %112 = arith.subf %108, %111 : vector<8x16x16xf32>
    %113 = math.exp %112 : vector<8x16x16xf32>
    %cst_66 = arith.constant dense<0.000000e+00> : vector<8x16xf32>
    %114 = vector.multi_reduction <add>, %113, %cst_66 [2] : vector<8x16x16xf32> to vector<8x16xf32>
    %115 = vector.shape_cast %114 : vector<8x16xf32> to vector<8x16x1xf32>
    %116 = tpu.reciprocal %115 {approx = true} : vector<8x16x1xf32> -> vector<8x16x1xf32>
    %117 = vector.broadcast %116 : vector<8x16x1xf32> to vector<8x16x16xf32>
    %118 = arith.mulf %113, %117 : vector<8x16x16xf32>
    %119 = arith.truncf %118 : vector<8x16x16xf32> to vector<8x16x16xbf16>
    "tpu.trace_start"() <{level = 10 : i32, message = "bqk,bkd->bqd"}> : () -> ()
    %cst_67 = arith.constant dense<0.000000e+00> : vector<8x16x8xf32>
    %120 = tpu.matmul %119, %105, %cst_67 {dimension_numbers = #tpu.dot_dimension_numbers<[2], [1], [1], [2], [0, 0, 0, 1, 1, 2], [0], [0]>} : vector<8x16x16xbf16>, vector<8x16x8xbf16>, vector<8x16x8xf32> -> vector<8x16x8xf32>
    "tpu.trace_stop"() : () -> ()
    %121 = vector.extract_strided_slice %62 {offsets = [0, 0, 24], sizes = [8, 16, 8], strides = [1, 1, 1]} : vector<8x16x32xbf16> to vector<8x16x8xbf16>
    %122 = vector.extract_strided_slice %64 {offsets = [0, 0, 24], sizes = [8, 16, 8], strides = [1, 1, 1]} : vector<8x16x32xbf16> to vector<8x16x8xbf16>
    %123 = vector.extract_strided_slice %66 {offsets = [0, 0, 24], sizes = [8, 16, 8], strides = [1, 1, 1]} : vector<8x16x32xbf16> to vector<8x16x8xbf16>
    "tpu.trace_start"() <{level = 10 : i32, message = "bqd,bkd->bqk"}> : () -> ()
    %cst_68 = arith.constant dense<0.000000e+00> : vector<8x16x16xf32>
    %124 = tpu.matmul %121, %122, %cst_68 {dimension_numbers = #tpu.dot_dimension_numbers<[2], [2], [1], [1], [0, 0, 0, 1, 1, 1], [0], [0]>} : vector<8x16x8xbf16>, vector<8x16x8xbf16>, vector<8x16x16xf32> -> vector<8x16x16xf32>
    "tpu.trace_stop"() : () -> ()
    %cst_69 = arith.constant 0.353553385 : f32
    %125 = vector.broadcast %cst_69 : f32 to vector<8x16x16xf32>
    %126 = arith.mulf %124, %125 : vector<8x16x16xf32>
    %cst_70 = arith.constant dense<0xFF800000> : vector<8x16xf32>
    %127 = vector.multi_reduction <maximumf>, %126, %cst_70 [2] : vector<8x16x16xf32> to vector<8x16xf32>
    %128 = vector.shape_cast %127 : vector<8x16xf32> to vector<8x16x1xf32>
    %129 = vector.broadcast %128 : vector<8x16x1xf32> to vector<8x16x16xf32>
    %130 = arith.subf %126, %129 : vector<8x16x16xf32>
    %131 = math.exp %130 : vector<8x16x16xf32>
    %cst_71 = arith.constant dense<0.000000e+00> : vector<8x16xf32>
    %132 = vector.multi_reduction <add>, %131, %cst_71 [2] : vector<8x16x16xf32> to vector<8x16xf32>
    %133 = vector.shape_cast %132 : vector<8x16xf32> to vector<8x16x1xf32>
    %134 = tpu.reciprocal %133 {approx = true} : vector<8x16x1xf32> -> vector<8x16x1xf32>
    %135 = vector.broadcast %134 : vector<8x16x1xf32> to vector<8x16x16xf32>
    %136 = arith.mulf %131, %135 : vector<8x16x16xf32>
    %137 = arith.truncf %136 : vector<8x16x16xf32> to vector<8x16x16xbf16>
    "tpu.trace_start"() <{level = 10 : i32, message = "bqk,bkd->bqd"}> : () -> ()
    %cst_72 = arith.constant dense<0.000000e+00> : vector<8x16x8xf32>
    %138 = tpu.matmul %137, %123, %cst_72 {dimension_numbers = #tpu.dot_dimension_numbers<[2], [1], [1], [2], [0, 0, 0, 1, 1, 2], [0], [0]>} : vector<8x16x16xbf16>, vector<8x16x8xbf16>, vector<8x16x8xf32> -> vector<8x16x8xf32>
    "tpu.trace_stop"() : () -> ()
    %139 = tpu.concatenate %84, %102, %120, %138 in 2 : vector<8x16x8xf32>, vector<8x16x8xf32>, vector<8x16x8xf32>, vector<8x16x8xf32> -> vector<8x16x32xf32>
    %140 = vector.shape_cast %139 : vector<8x16x32xf32> to vector<128x32xf32>
    %141 = arith.truncf %140 : vector<128x32xf32> to vector<128x32xbf16>
    %c0_73 = arith.constant 0 : index
    %c0_74 = arith.constant 0 : index
    %c0_75 = arith.constant 0 : index
    %142 = vector.load %arg16[%c0_73, %c0_74, %c0_75] : memref<2x32x32xbf16, #tpu.memory_space<vmem>>, vector<1x32x32xbf16>
    %143 = vector.shape_cast %142 : vector<1x32x32xbf16> to vector<32x32xbf16>
    %cst_76 = arith.constant dense<0.000000e+00> : vector<128x32xf32>
    %144 = tpu.matmul %141, %143, %cst_76 {dimension_numbers = #tpu.dot_dimension_numbers<[1], [0], [0], [1], [0, 0, 1, 1], [], []>} : vector<128x32xbf16>, vector<32x32xbf16>, vector<128x32xf32> -> vector<128x32xf32>
    %c0_77 = arith.constant 0 : index
    %c0_78 = arith.constant 0 : index
    %c0_79 = arith.constant 0 : index
    %145 = vector.load %arg17[%c0_77, %c0_78, %c0_79] : memref<2x1x32xf32, #tpu.memory_space<vmem>>, vector<1x1x32xf32>
    %146 = vector.shape_cast %145 : vector<1x1x32xf32> to vector<1x32xf32>
    %147 = vector.broadcast %146 : vector<1x32xf32> to vector<128x32xf32>
    %148 = arith.addf %144, %147 : vector<128x32xf32>
    %149 = arith.addf %26, %148 : vector<128x32xf32>
    %cst_80 = arith.constant dense<0.000000e+00> : vector<128xf32>
    %150 = vector.multi_reduction <add>, %149, %cst_80 [1] : vector<128x32xf32> to vector<128xf32>
    %151 = vector.shape_cast %150 : vector<128xf32> to vector<128x1xf32>
    %cst_81 = arith.constant 3.200000e+01 : f32
    %152 = vector.broadcast %cst_81 : f32 to vector<128x1xf32>
    %153 = arith.divf %151, %152 : vector<128x1xf32>
    %154 = vector.broadcast %153 : vector<128x1xf32> to vector<128x32xf32>
    %155 = arith.subf %149, %154 : vector<128x32xf32>
    %156 = arith.mulf %155, %155 : vector<128x32xf32>
    %cst_82 = arith.constant dense<0.000000e+00> : vector<128xf32>
    %157 = vector.multi_reduction <add>, %156, %cst_82 [1] : vector<128x32xf32> to vector<128xf32>
    %158 = vector.shape_cast %157 : vector<128xf32> to vector<128x1xf32>
    %cst_83 = arith.constant 3.200000e+01 : f32
    %159 = vector.broadcast %cst_83 : f32 to vector<128x1xf32>
    %160 = arith.divf %158, %159 : vector<128x1xf32>
    %161 = vector.broadcast %153 : vector<128x1xf32> to vector<128x32xf32>
    %162 = arith.subf %149, %161 : vector<128x32xf32>
    %cst_84 = arith.constant 9.99999974E-6 : f32
    %163 = vector.broadcast %cst_84 : f32 to vector<128x1xf32>
    %164 = arith.addf %160, %163 : vector<128x1xf32>
    %165 = math.rsqrt %164 : vector<128x1xf32>
    %166 = vector.broadcast %165 : vector<128x1xf32> to vector<128x32xf32>
    %167 = arith.mulf %162, %166 : vector<128x32xf32>
    %168 = vector.broadcast %28 : vector<1x32xf32> to vector<128x32xf32>
    %169 = arith.mulf %167, %168 : vector<128x32xf32>
    %170 = vector.broadcast %30 : vector<1x32xf32> to vector<128x32xf32>
    %171 = arith.addf %169, %170 : vector<128x32xf32>
    %172 = arith.truncf %171 : vector<128x32xf32> to vector<128x32xbf16>
    %c0_85 = arith.constant 0 : index
    %c0_86 = arith.constant 0 : index
    %c0_87 = arith.constant 0 : index
    %173 = vector.load %arg18[%c0_85, %c0_86, %c0_87] : memref<2x32x64xbf16, #tpu.memory_space<vmem>>, vector<1x32x64xbf16>
    %174 = vector.shape_cast %173 : vector<1x32x64xbf16> to vector<32x64xbf16>
    %cst_88 = arith.constant dense<0.000000e+00> : vector<128x64xf32>
    %175 = tpu.matmul %172, %174, %cst_88 {dimension_numbers = #tpu.dot_dimension_numbers<[1], [0], [0], [1], [0, 0, 1, 1], [], []>} : vector<128x32xbf16>, vector<32x64xbf16>, vector<128x64xf32> -> vector<128x64xf32>
    %c0_89 = arith.constant 0 : index
    %c0_90 = arith.constant 0 : index
    %c0_91 = arith.constant 0 : index
    %176 = vector.load %arg19[%c0_89, %c0_90, %c0_91] : memref<2x1x64xf32, #tpu.memory_space<vmem>>, vector<1x1x64xf32>
    %177 = vector.shape_cast %176 : vector<1x1x64xf32> to vector<1x64xf32>
    %178 = vector.broadcast %177 : vector<1x64xf32> to vector<128x64xf32>
    %179 = arith.addf %175, %178 : vector<128x64xf32>
    %cst_92 = arith.constant 0.000000e+00 : f32
    %180 = vector.broadcast %cst_92 : f32 to vector<128x64xf32>
    %181 = arith.maximumf %179, %180 : vector<128x64xf32>
    %182 = arith.truncf %181 : vector<128x64xf32> to vector<128x64xbf16>
    %c0_93 = arith.constant 0 : index
    %c0_94 = arith.constant 0 : index
    %c0_95 = arith.constant 0 : index
    %183 = vector.load %arg20[%c0_93, %c0_94, %c0_95] : memref<2x64x32xbf16, #tpu.memory_space<vmem>>, vector<1x64x32xbf16>
    %184 = vector.shape_cast %183 : vector<1x64x32xbf16> to vector<64x32xbf16>
    %cst_96 = arith.constant dense<0.000000e+00> : vector<128x32xf32>
    %185 = tpu.matmul %182, %184, %cst_96 {dimension_numbers = #tpu.dot_dimension_numbers<[1], [0], [0], [1], [0, 0, 1, 1], [], []>} : vector<128x64xbf16>, vector<64x32xbf16>, vector<128x32xf32> -> vector<128x32xf32>
    %c0_97 = arith.constant 0 : index
    %c0_98 = arith.constant 0 : index
    %c0_99 = arith.constant 0 : index
    %186 = vector.load %arg21[%c0_97, %c0_98, %c0_99] : memref<2x1x32xf32, #tpu.memory_space<vmem>>, vector<1x1x32xf32>
    %187 = vector.shape_cast %186 : vector<1x1x32xf32> to vector<1x32xf32>
    %188 = vector.broadcast %187 : vector<1x32xf32> to vector<128x32xf32>
    %189 = arith.addf %185, %188 : vector<128x32xf32>
    %190 = arith.addf %189, %171 : vector<128x32xf32>
    %cst_100 = arith.constant dense<0.000000e+00> : vector<128xf32>
    %191 = vector.multi_reduction <add>, %190, %cst_100 [1] : vector<128x32xf32> to vector<128xf32>
    %192 = vector.shape_cast %191 : vector<128xf32> to vector<128x1xf32>
    %cst_101 = arith.constant 3.200000e+01 : f32
    %193 = vector.broadcast %cst_101 : f32 to vector<128x1xf32>
    %194 = arith.divf %192, %193 : vector<128x1xf32>
    %195 = vector.broadcast %194 : vector<128x1xf32> to vector<128x32xf32>
    %196 = arith.subf %190, %195 : vector<128x32xf32>
    %197 = arith.mulf %196, %196 : vector<128x32xf32>
    %cst_102 = arith.constant dense<0.000000e+00> : vector<128xf32>
    %198 = vector.multi_reduction <add>, %197, %cst_102 [1] : vector<128x32xf32> to vector<128xf32>
    %199 = vector.shape_cast %198 : vector<128xf32> to vector<128x1xf32>
    %cst_103 = arith.constant 3.200000e+01 : f32
    %200 = vector.broadcast %cst_103 : f32 to vector<128x1xf32>
    %201 = arith.divf %199, %200 : vector<128x1xf32>
    %202 = vector.broadcast %194 : vector<128x1xf32> to vector<128x32xf32>
    %203 = arith.subf %190, %202 : vector<128x32xf32>
    %cst_104 = arith.constant 9.99999974E-6 : f32
    %204 = vector.broadcast %cst_104 : f32 to vector<128x1xf32>
    %205 = arith.addf %201, %204 : vector<128x1xf32>
    %206 = math.rsqrt %205 : vector<128x1xf32>
    %207 = vector.broadcast %206 : vector<128x1xf32> to vector<128x32xf32>
    %208 = arith.mulf %203, %207 : vector<128x32xf32>
    %209 = vector.broadcast %28 : vector<1x32xf32> to vector<128x32xf32>
    %210 = arith.mulf %208, %209 : vector<128x32xf32>
    %211 = vector.broadcast %30 : vector<1x32xf32> to vector<128x32xf32>
    %212 = arith.addf %210, %211 : vector<128x32xf32>
    %c1 = arith.constant 1 : index
    %c0_105 = arith.constant 0 : index
    %c0_106 = arith.constant 0 : index
    %213 = vector.load %arg22[%c1, %c0_105, %c0_106] : memref<2x1x32xf32, #tpu.memory_space<vmem>>, vector<1x1x32xf32>
    %214 = vector.shape_cast %213 : vector<1x1x32xf32> to vector<1x32xf32>
    %c1_107 = arith.constant 1 : index
    %c0_108 = arith.constant 0 : index
    %c0_109 = arith.constant 0 : index
    %215 = vector.load %arg23[%c1_107, %c0_108, %c0_109] : memref<2x1x32xf32, #tpu.memory_space<vmem>>, vector<1x1x32xf32>
    %216 = vector.shape_cast %215 : vector<1x1x32xf32> to vector<1x32xf32>
    %217 = arith.truncf %212 : vector<128x32xf32> to vector<128x32xbf16>
    %c1_110 = arith.constant 1 : index
    %c0_111 = arith.constant 0 : index
    %c0_112 = arith.constant 0 : index
    %218 = vector.load %arg8[%c1_110, %c0_111, %c0_112] : memref<2x32x32xbf16, #tpu.memory_space<vmem>>, vector<1x32x32xbf16>
    %219 = vector.shape_cast %218 : vector<1x32x32xbf16> to vector<32x32xbf16>
    %cst_113 = arith.constant dense<0.000000e+00> : vector<128x32xf32>
    %220 = tpu.matmul %217, %219, %cst_113 {dimension_numbers = #tpu.dot_dimension_numbers<[1], [0], [0], [1], [0, 0, 1, 1], [], []>} : vector<128x32xbf16>, vector<32x32xbf16>, vector<128x32xf32> -> vector<128x32xf32>
    %c1_114 = arith.constant 1 : index
    %c0_115 = arith.constant 0 : index
    %c0_116 = arith.constant 0 : index
    %221 = vector.load %arg9[%c1_114, %c0_115, %c0_116] : memref<2x32x32xbf16, #tpu.memory_space<vmem>>, vector<1x32x32xbf16>
    %222 = vector.shape_cast %221 : vector<1x32x32xbf16> to vector<32x32xbf16>
    %cst_117 = arith.constant dense<0.000000e+00> : vector<128x32xf32>
    %223 = tpu.matmul %217, %222, %cst_117 {dimension_numbers = #tpu.dot_dimension_numbers<[1], [0], [0], [1], [0, 0, 1, 1], [], []>} : vector<128x32xbf16>, vector<32x32xbf16>, vector<128x32xf32> -> vector<128x32xf32>
    %224 = arith.truncf %220 : vector<128x32xf32> to vector<128x32xbf16>
    %225 = arith.truncf %223 : vector<128x32xf32> to vector<128x32xbf16>
    %c1_118 = arith.constant 1 : index
    %c0_119 = arith.constant 0 : index
    %c0_120 = arith.constant 0 : index
    %226 = vector.load %arg10[%c1_118, %c0_119, %c0_120] : memref<2x32x32xbf16, #tpu.memory_space<vmem>>, vector<1x32x32xbf16>
    %227 = vector.shape_cast %226 : vector<1x32x32xbf16> to vector<32x32xbf16>
    %cst_121 = arith.constant dense<0.000000e+00> : vector<128x32xf32>
    %228 = tpu.matmul %224, %227, %cst_121 {dimension_numbers = #tpu.dot_dimension_numbers<[1], [0], [0], [1], [0, 0, 1, 1], [], []>} : vector<128x32xbf16>, vector<32x32xbf16>, vector<128x32xf32> -> vector<128x32xf32>
    %c1_122 = arith.constant 1 : index
    %c0_123 = arith.constant 0 : index
    %c0_124 = arith.constant 0 : index
    %229 = vector.load %arg13[%c1_122, %c0_123, %c0_124] : memref<2x1x32xf32, #tpu.memory_space<vmem>>, vector<1x1x32xf32>
    %230 = vector.shape_cast %229 : vector<1x1x32xf32> to vector<1x32xf32>
    %231 = vector.broadcast %230 : vector<1x32xf32> to vector<128x32xf32>
    %232 = arith.addf %228, %231 : vector<128x32xf32>
    %c1_125 = arith.constant 1 : index
    %c0_126 = arith.constant 0 : index
    %c0_127 = arith.constant 0 : index
    %233 = vector.load %arg11[%c1_125, %c0_126, %c0_127] : memref<2x32x32xbf16, #tpu.memory_space<vmem>>, vector<1x32x32xbf16>
    %234 = vector.shape_cast %233 : vector<1x32x32xbf16> to vector<32x32xbf16>
    %cst_128 = arith.constant dense<0.000000e+00> : vector<128x32xf32>
    %235 = tpu.matmul %225, %234, %cst_128 {dimension_numbers = #tpu.dot_dimension_numbers<[1], [0], [0], [1], [0, 0, 1, 1], [], []>} : vector<128x32xbf16>, vector<32x32xbf16>, vector<128x32xf32> -> vector<128x32xf32>
    %c1_129 = arith.constant 1 : index
    %c0_130 = arith.constant 0 : index
    %c0_131 = arith.constant 0 : index
    %236 = vector.load %arg14[%c1_129, %c0_130, %c0_131] : memref<2x1x32xf32, #tpu.memory_space<vmem>>, vector<1x1x32xf32>
    %237 = vector.shape_cast %236 : vector<1x1x32xf32> to vector<1x32xf32>
    %238 = vector.broadcast %237 : vector<1x32xf32> to vector<128x32xf32>
    %239 = arith.addf %235, %238 : vector<128x32xf32>
    %c1_132 = arith.constant 1 : index
    %c0_133 = arith.constant 0 : index
    %c0_134 = arith.constant 0 : index
    %240 = vector.load %arg12[%c1_132, %c0_133, %c0_134] : memref<2x32x32xbf16, #tpu.memory_space<vmem>>, vector<1x32x32xbf16>
    %241 = vector.shape_cast %240 : vector<1x32x32xbf16> to vector<32x32xbf16>
    %cst_135 = arith.constant dense<0.000000e+00> : vector<128x32xf32>
    %242 = tpu.matmul %225, %241, %cst_135 {dimension_numbers = #tpu.dot_dimension_numbers<[1], [0], [0], [1], [0, 0, 1, 1], [], []>} : vector<128x32xbf16>, vector<32x32xbf16>, vector<128x32xf32> -> vector<128x32xf32>
    %c1_136 = arith.constant 1 : index
    %c0_137 = arith.constant 0 : index
    %c0_138 = arith.constant 0 : index
    %243 = vector.load %arg15[%c1_136, %c0_137, %c0_138] : memref<2x1x32xf32, #tpu.memory_space<vmem>>, vector<1x1x32xf32>
    %244 = vector.shape_cast %243 : vector<1x1x32xf32> to vector<1x32xf32>
    %245 = vector.broadcast %244 : vector<1x32xf32> to vector<128x32xf32>
    %246 = arith.addf %242, %245 : vector<128x32xf32>
    %247 = vector.shape_cast %232 : vector<128x32xf32> to vector<8x16x32xf32>
    %248 = arith.truncf %247 : vector<8x16x32xf32> to vector<8x16x32xbf16>
    %249 = vector.shape_cast %239 : vector<128x32xf32> to vector<8x16x32xf32>
    %250 = arith.truncf %249 : vector<8x16x32xf32> to vector<8x16x32xbf16>
    %251 = vector.shape_cast %246 : vector<128x32xf32> to vector<8x16x32xf32>
    %252 = arith.truncf %251 : vector<8x16x32xf32> to vector<8x16x32xbf16>
    %253 = vector.extract_strided_slice %248 {offsets = [0, 0, 0], sizes = [8, 16, 8], strides = [1, 1, 1]} : vector<8x16x32xbf16> to vector<8x16x8xbf16>
    %254 = vector.extract_strided_slice %250 {offsets = [0, 0, 0], sizes = [8, 16, 8], strides = [1, 1, 1]} : vector<8x16x32xbf16> to vector<8x16x8xbf16>
    %255 = vector.extract_strided_slice %252 {offsets = [0, 0, 0], sizes = [8, 16, 8], strides = [1, 1, 1]} : vector<8x16x32xbf16> to vector<8x16x8xbf16>
    "tpu.trace_start"() <{level = 10 : i32, message = "bqd,bkd->bqk"}> : () -> ()
    %cst_139 = arith.constant dense<0.000000e+00> : vector<8x16x16xf32>
    %256 = tpu.matmul %253, %254, %cst_139 {dimension_numbers = #tpu.dot_dimension_numbers<[2], [2], [1], [1], [0, 0, 0, 1, 1, 1], [0], [0]>} : vector<8x16x8xbf16>, vector<8x16x8xbf16>, vector<8x16x16xf32> -> vector<8x16x16xf32>
    "tpu.trace_stop"() : () -> ()
    %cst_140 = arith.constant 0.353553385 : f32
    %257 = vector.broadcast %cst_140 : f32 to vector<8x16x16xf32>
    %258 = arith.mulf %256, %257 : vector<8x16x16xf32>
    %cst_141 = arith.constant dense<0xFF800000> : vector<8x16xf32>
    %259 = vector.multi_reduction <maximumf>, %258, %cst_141 [2] : vector<8x16x16xf32> to vector<8x16xf32>
    %260 = vector.shape_cast %259 : vector<8x16xf32> to vector<8x16x1xf32>
    %261 = vector.broadcast %260 : vector<8x16x1xf32> to vector<8x16x16xf32>
    %262 = arith.subf %258, %261 : vector<8x16x16xf32>
    %263 = math.exp %262 : vector<8x16x16xf32>
    %cst_142 = arith.constant dense<0.000000e+00> : vector<8x16xf32>
    %264 = vector.multi_reduction <add>, %263, %cst_142 [2] : vector<8x16x16xf32> to vector<8x16xf32>
    %265 = vector.shape_cast %264 : vector<8x16xf32> to vector<8x16x1xf32>
    %266 = tpu.reciprocal %265 {approx = true} : vector<8x16x1xf32> -> vector<8x16x1xf32>
    %267 = vector.broadcast %266 : vector<8x16x1xf32> to vector<8x16x16xf32>
    %268 = arith.mulf %263, %267 : vector<8x16x16xf32>
    %269 = arith.truncf %268 : vector<8x16x16xf32> to vector<8x16x16xbf16>
    "tpu.trace_start"() <{level = 10 : i32, message = "bqk,bkd->bqd"}> : () -> ()
    %cst_143 = arith.constant dense<0.000000e+00> : vector<8x16x8xf32>
    %270 = tpu.matmul %269, %255, %cst_143 {dimension_numbers = #tpu.dot_dimension_numbers<[2], [1], [1], [2], [0, 0, 0, 1, 1, 2], [0], [0]>} : vector<8x16x16xbf16>, vector<8x16x8xbf16>, vector<8x16x8xf32> -> vector<8x16x8xf32>
    "tpu.trace_stop"() : () -> ()
    %271 = vector.extract_strided_slice %248 {offsets = [0, 0, 8], sizes = [8, 16, 8], strides = [1, 1, 1]} : vector<8x16x32xbf16> to vector<8x16x8xbf16>
    %272 = vector.extract_strided_slice %250 {offsets = [0, 0, 8], sizes = [8, 16, 8], strides = [1, 1, 1]} : vector<8x16x32xbf16> to vector<8x16x8xbf16>
    %273 = vector.extract_strided_slice %252 {offsets = [0, 0, 8], sizes = [8, 16, 8], strides = [1, 1, 1]} : vector<8x16x32xbf16> to vector<8x16x8xbf16>
    "tpu.trace_start"() <{level = 10 : i32, message = "bqd,bkd->bqk"}> : () -> ()
    %cst_144 = arith.constant dense<0.000000e+00> : vector<8x16x16xf32>
    %274 = tpu.matmul %271, %272, %cst_144 {dimension_numbers = #tpu.dot_dimension_numbers<[2], [2], [1], [1], [0, 0, 0, 1, 1, 1], [0], [0]>} : vector<8x16x8xbf16>, vector<8x16x8xbf16>, vector<8x16x16xf32> -> vector<8x16x16xf32>
    "tpu.trace_stop"() : () -> ()
    %cst_145 = arith.constant 0.353553385 : f32
    %275 = vector.broadcast %cst_145 : f32 to vector<8x16x16xf32>
    %276 = arith.mulf %274, %275 : vector<8x16x16xf32>
    %cst_146 = arith.constant dense<0xFF800000> : vector<8x16xf32>
    %277 = vector.multi_reduction <maximumf>, %276, %cst_146 [2] : vector<8x16x16xf32> to vector<8x16xf32>
    %278 = vector.shape_cast %277 : vector<8x16xf32> to vector<8x16x1xf32>
    %279 = vector.broadcast %278 : vector<8x16x1xf32> to vector<8x16x16xf32>
    %280 = arith.subf %276, %279 : vector<8x16x16xf32>
    %281 = math.exp %280 : vector<8x16x16xf32>
    %cst_147 = arith.constant dense<0.000000e+00> : vector<8x16xf32>
    %282 = vector.multi_reduction <add>, %281, %cst_147 [2] : vector<8x16x16xf32> to vector<8x16xf32>
    %283 = vector.shape_cast %282 : vector<8x16xf32> to vector<8x16x1xf32>
    %284 = tpu.reciprocal %283 {approx = true} : vector<8x16x1xf32> -> vector<8x16x1xf32>
    %285 = vector.broadcast %284 : vector<8x16x1xf32> to vector<8x16x16xf32>
    %286 = arith.mulf %281, %285 : vector<8x16x16xf32>
    %287 = arith.truncf %286 : vector<8x16x16xf32> to vector<8x16x16xbf16>
    "tpu.trace_start"() <{level = 10 : i32, message = "bqk,bkd->bqd"}> : () -> ()
    %cst_148 = arith.constant dense<0.000000e+00> : vector<8x16x8xf32>
    %288 = tpu.matmul %287, %273, %cst_148 {dimension_numbers = #tpu.dot_dimension_numbers<[2], [1], [1], [2], [0, 0, 0, 1, 1, 2], [0], [0]>} : vector<8x16x16xbf16>, vector<8x16x8xbf16>, vector<8x16x8xf32> -> vector<8x16x8xf32>
    "tpu.trace_stop"() : () -> ()
    %289 = vector.extract_strided_slice %248 {offsets = [0, 0, 16], sizes = [8, 16, 8], strides = [1, 1, 1]} : vector<8x16x32xbf16> to vector<8x16x8xbf16>
    %290 = vector.extract_strided_slice %250 {offsets = [0, 0, 16], sizes = [8, 16, 8], strides = [1, 1, 1]} : vector<8x16x32xbf16> to vector<8x16x8xbf16>
    %291 = vector.extract_strided_slice %252 {offsets = [0, 0, 16], sizes = [8, 16, 8], strides = [1, 1, 1]} : vector<8x16x32xbf16> to vector<8x16x8xbf16>
    "tpu.trace_start"() <{level = 10 : i32, message = "bqd,bkd->bqk"}> : () -> ()
    %cst_149 = arith.constant dense<0.000000e+00> : vector<8x16x16xf32>
    %292 = tpu.matmul %289, %290, %cst_149 {dimension_numbers = #tpu.dot_dimension_numbers<[2], [2], [1], [1], [0, 0, 0, 1, 1, 1], [0], [0]>} : vector<8x16x8xbf16>, vector<8x16x8xbf16>, vector<8x16x16xf32> -> vector<8x16x16xf32>
    "tpu.trace_stop"() : () -> ()
    %cst_150 = arith.constant 0.353553385 : f32
    %293 = vector.broadcast %cst_150 : f32 to vector<8x16x16xf32>
    %294 = arith.mulf %292, %293 : vector<8x16x16xf32>
    %cst_151 = arith.constant dense<0xFF800000> : vector<8x16xf32>
    %295 = vector.multi_reduction <maximumf>, %294, %cst_151 [2] : vector<8x16x16xf32> to vector<8x16xf32>
    %296 = vector.shape_cast %295 : vector<8x16xf32> to vector<8x16x1xf32>
    %297 = vector.broadcast %296 : vector<8x16x1xf32> to vector<8x16x16xf32>
    %298 = arith.subf %294, %297 : vector<8x16x16xf32>
    %299 = math.exp %298 : vector<8x16x16xf32>
    %cst_152 = arith.constant dense<0.000000e+00> : vector<8x16xf32>
    %300 = vector.multi_reduction <add>, %299, %cst_152 [2] : vector<8x16x16xf32> to vector<8x16xf32>
    %301 = vector.shape_cast %300 : vector<8x16xf32> to vector<8x16x1xf32>
    %302 = tpu.reciprocal %301 {approx = true} : vector<8x16x1xf32> -> vector<8x16x1xf32>
    %303 = vector.broadcast %302 : vector<8x16x1xf32> to vector<8x16x16xf32>
    %304 = arith.mulf %299, %303 : vector<8x16x16xf32>
    %305 = arith.truncf %304 : vector<8x16x16xf32> to vector<8x16x16xbf16>
    "tpu.trace_start"() <{level = 10 : i32, message = "bqk,bkd->bqd"}> : () -> ()
    %cst_153 = arith.constant dense<0.000000e+00> : vector<8x16x8xf32>
    %306 = tpu.matmul %305, %291, %cst_153 {dimension_numbers = #tpu.dot_dimension_numbers<[2], [1], [1], [2], [0, 0, 0, 1, 1, 2], [0], [0]>} : vector<8x16x16xbf16>, vector<8x16x8xbf16>, vector<8x16x8xf32> -> vector<8x16x8xf32>
    "tpu.trace_stop"() : () -> ()
    %307 = vector.extract_strided_slice %248 {offsets = [0, 0, 24], sizes = [8, 16, 8], strides = [1, 1, 1]} : vector<8x16x32xbf16> to vector<8x16x8xbf16>
    %308 = vector.extract_strided_slice %250 {offsets = [0, 0, 24], sizes = [8, 16, 8], strides = [1, 1, 1]} : vector<8x16x32xbf16> to vector<8x16x8xbf16>
    %309 = vector.extract_strided_slice %252 {offsets = [0, 0, 24], sizes = [8, 16, 8], strides = [1, 1, 1]} : vector<8x16x32xbf16> to vector<8x16x8xbf16>
    "tpu.trace_start"() <{level = 10 : i32, message = "bqd,bkd->bqk"}> : () -> ()
    %cst_154 = arith.constant dense<0.000000e+00> : vector<8x16x16xf32>
    %310 = tpu.matmul %307, %308, %cst_154 {dimension_numbers = #tpu.dot_dimension_numbers<[2], [2], [1], [1], [0, 0, 0, 1, 1, 1], [0], [0]>} : vector<8x16x8xbf16>, vector<8x16x8xbf16>, vector<8x16x16xf32> -> vector<8x16x16xf32>
    "tpu.trace_stop"() : () -> ()
    %cst_155 = arith.constant 0.353553385 : f32
    %311 = vector.broadcast %cst_155 : f32 to vector<8x16x16xf32>
    %312 = arith.mulf %310, %311 : vector<8x16x16xf32>
    %cst_156 = arith.constant dense<0xFF800000> : vector<8x16xf32>
    %313 = vector.multi_reduction <maximumf>, %312, %cst_156 [2] : vector<8x16x16xf32> to vector<8x16xf32>
    %314 = vector.shape_cast %313 : vector<8x16xf32> to vector<8x16x1xf32>
    %315 = vector.broadcast %314 : vector<8x16x1xf32> to vector<8x16x16xf32>
    %316 = arith.subf %312, %315 : vector<8x16x16xf32>
    %317 = math.exp %316 : vector<8x16x16xf32>
    %cst_157 = arith.constant dense<0.000000e+00> : vector<8x16xf32>
    %318 = vector.multi_reduction <add>, %317, %cst_157 [2] : vector<8x16x16xf32> to vector<8x16xf32>
    %319 = vector.shape_cast %318 : vector<8x16xf32> to vector<8x16x1xf32>
    %320 = tpu.reciprocal %319 {approx = true} : vector<8x16x1xf32> -> vector<8x16x1xf32>
    %321 = vector.broadcast %320 : vector<8x16x1xf32> to vector<8x16x16xf32>
    %322 = arith.mulf %317, %321 : vector<8x16x16xf32>
    %323 = arith.truncf %322 : vector<8x16x16xf32> to vector<8x16x16xbf16>
    "tpu.trace_start"() <{level = 10 : i32, message = "bqk,bkd->bqd"}> : () -> ()
    %cst_158 = arith.constant dense<0.000000e+00> : vector<8x16x8xf32>
    %324 = tpu.matmul %323, %309, %cst_158 {dimension_numbers = #tpu.dot_dimension_numbers<[2], [1], [1], [2], [0, 0, 0, 1, 1, 2], [0], [0]>} : vector<8x16x16xbf16>, vector<8x16x8xbf16>, vector<8x16x8xf32> -> vector<8x16x8xf32>
    "tpu.trace_stop"() : () -> ()
    %325 = tpu.concatenate %270, %288, %306, %324 in 2 : vector<8x16x8xf32>, vector<8x16x8xf32>, vector<8x16x8xf32>, vector<8x16x8xf32> -> vector<8x16x32xf32>
    %326 = vector.shape_cast %325 : vector<8x16x32xf32> to vector<128x32xf32>
    %327 = arith.truncf %326 : vector<128x32xf32> to vector<128x32xbf16>
    %c1_159 = arith.constant 1 : index
    %c0_160 = arith.constant 0 : index
    %c0_161 = arith.constant 0 : index
    %328 = vector.load %arg16[%c1_159, %c0_160, %c0_161] : memref<2x32x32xbf16, #tpu.memory_space<vmem>>, vector<1x32x32xbf16>
    %329 = vector.shape_cast %328 : vector<1x32x32xbf16> to vector<32x32xbf16>
    %cst_162 = arith.constant dense<0.000000e+00> : vector<128x32xf32>
    %330 = tpu.matmul %327, %329, %cst_162 {dimension_numbers = #tpu.dot_dimension_numbers<[1], [0], [0], [1], [0, 0, 1, 1], [], []>} : vector<128x32xbf16>, vector<32x32xbf16>, vector<128x32xf32> -> vector<128x32xf32>
    %c1_163 = arith.constant 1 : index
    %c0_164 = arith.constant 0 : index
    %c0_165 = arith.constant 0 : index
    %331 = vector.load %arg17[%c1_163, %c0_164, %c0_165] : memref<2x1x32xf32, #tpu.memory_space<vmem>>, vector<1x1x32xf32>
    %332 = vector.shape_cast %331 : vector<1x1x32xf32> to vector<1x32xf32>
    %333 = vector.broadcast %332 : vector<1x32xf32> to vector<128x32xf32>
    %334 = arith.addf %330, %333 : vector<128x32xf32>
    %335 = arith.addf %212, %334 : vector<128x32xf32>
    %cst_166 = arith.constant dense<0.000000e+00> : vector<128xf32>
    %336 = vector.multi_reduction <add>, %335, %cst_166 [1] : vector<128x32xf32> to vector<128xf32>
    %337 = vector.shape_cast %336 : vector<128xf32> to vector<128x1xf32>
    %cst_167 = arith.constant 3.200000e+01 : f32
    %338 = vector.broadcast %cst_167 : f32 to vector<128x1xf32>
    %339 = arith.divf %337, %338 : vector<128x1xf32>
    %340 = vector.broadcast %339 : vector<128x1xf32> to vector<128x32xf32>
    %341 = arith.subf %335, %340 : vector<128x32xf32>
    %342 = arith.mulf %341, %341 : vector<128x32xf32>
    %cst_168 = arith.constant dense<0.000000e+00> : vector<128xf32>
    %343 = vector.multi_reduction <add>, %342, %cst_168 [1] : vector<128x32xf32> to vector<128xf32>
    %344 = vector.shape_cast %343 : vector<128xf32> to vector<128x1xf32>
    %cst_169 = arith.constant 3.200000e+01 : f32
    %345 = vector.broadcast %cst_169 : f32 to vector<128x1xf32>
    %346 = arith.divf %344, %345 : vector<128x1xf32>
    %347 = vector.broadcast %339 : vector<128x1xf32> to vector<128x32xf32>
    %348 = arith.subf %335, %347 : vector<128x32xf32>
    %cst_170 = arith.constant 9.99999974E-6 : f32
    %349 = vector.broadcast %cst_170 : f32 to vector<128x1xf32>
    %350 = arith.addf %346, %349 : vector<128x1xf32>
    %351 = math.rsqrt %350 : vector<128x1xf32>
    %352 = vector.broadcast %351 : vector<128x1xf32> to vector<128x32xf32>
    %353 = arith.mulf %348, %352 : vector<128x32xf32>
    %354 = vector.broadcast %214 : vector<1x32xf32> to vector<128x32xf32>
    %355 = arith.mulf %353, %354 : vector<128x32xf32>
    %356 = vector.broadcast %216 : vector<1x32xf32> to vector<128x32xf32>
    %357 = arith.addf %355, %356 : vector<128x32xf32>
    %358 = arith.truncf %357 : vector<128x32xf32> to vector<128x32xbf16>
    %c1_171 = arith.constant 1 : index
    %c0_172 = arith.constant 0 : index
    %c0_173 = arith.constant 0 : index
    %359 = vector.load %arg18[%c1_171, %c0_172, %c0_173] : memref<2x32x64xbf16, #tpu.memory_space<vmem>>, vector<1x32x64xbf16>
    %360 = vector.shape_cast %359 : vector<1x32x64xbf16> to vector<32x64xbf16>
    %cst_174 = arith.constant dense<0.000000e+00> : vector<128x64xf32>
    %361 = tpu.matmul %358, %360, %cst_174 {dimension_numbers = #tpu.dot_dimension_numbers<[1], [0], [0], [1], [0, 0, 1, 1], [], []>} : vector<128x32xbf16>, vector<32x64xbf16>, vector<128x64xf32> -> vector<128x64xf32>
    %c1_175 = arith.constant 1 : index
    %c0_176 = arith.constant 0 : index
    %c0_177 = arith.constant 0 : index
    %362 = vector.load %arg19[%c1_175, %c0_176, %c0_177] : memref<2x1x64xf32, #tpu.memory_space<vmem>>, vector<1x1x64xf32>
    %363 = vector.shape_cast %362 : vector<1x1x64xf32> to vector<1x64xf32>
    %364 = vector.broadcast %363 : vector<1x64xf32> to vector<128x64xf32>
    %365 = arith.addf %361, %364 : vector<128x64xf32>
    %cst_178 = arith.constant 0.000000e+00 : f32
    %366 = vector.broadcast %cst_178 : f32 to vector<128x64xf32>
    %367 = arith.maximumf %365, %366 : vector<128x64xf32>
    %368 = arith.truncf %367 : vector<128x64xf32> to vector<128x64xbf16>
    %c1_179 = arith.constant 1 : index
    %c0_180 = arith.constant 0 : index
    %c0_181 = arith.constant 0 : index
    %369 = vector.load %arg20[%c1_179, %c0_180, %c0_181] : memref<2x64x32xbf16, #tpu.memory_space<vmem>>, vector<1x64x32xbf16>
    %370 = vector.shape_cast %369 : vector<1x64x32xbf16> to vector<64x32xbf16>
    %cst_182 = arith.constant dense<0.000000e+00> : vector<128x32xf32>
    %371 = tpu.matmul %368, %370, %cst_182 {dimension_numbers = #tpu.dot_dimension_numbers<[1], [0], [0], [1], [0, 0, 1, 1], [], []>} : vector<128x64xbf16>, vector<64x32xbf16>, vector<128x32xf32> -> vector<128x32xf32>
    %c1_183 = arith.constant 1 : index
    %c0_184 = arith.constant 0 : index
    %c0_185 = arith.constant 0 : index
    %372 = vector.load %arg21[%c1_183, %c0_184, %c0_185] : memref<2x1x32xf32, #tpu.memory_space<vmem>>, vector<1x1x32xf32>
    %373 = vector.shape_cast %372 : vector<1x1x32xf32> to vector<1x32xf32>
    %374 = vector.broadcast %373 : vector<1x32xf32> to vector<128x32xf32>
    %375 = arith.addf %371, %374 : vector<128x32xf32>
    %376 = arith.addf %375, %357 : vector<128x32xf32>
    %cst_186 = arith.constant dense<0.000000e+00> : vector<128xf32>
    %377 = vector.multi_reduction <add>, %376, %cst_186 [1] : vector<128x32xf32> to vector<128xf32>
    %378 = vector.shape_cast %377 : vector<128xf32> to vector<128x1xf32>
    %cst_187 = arith.constant 3.200000e+01 : f32
    %379 = vector.broadcast %cst_187 : f32 to vector<128x1xf32>
    %380 = arith.divf %378, %379 : vector<128x1xf32>
    %381 = vector.broadcast %380 : vector<128x1xf32> to vector<128x32xf32>
    %382 = arith.subf %376, %381 : vector<128x32xf32>
    %383 = arith.mulf %382, %382 : vector<128x32xf32>
    %cst_188 = arith.constant dense<0.000000e+00> : vector<128xf32>
    %384 = vector.multi_reduction <add>, %383, %cst_188 [1] : vector<128x32xf32> to vector<128xf32>
    %385 = vector.shape_cast %384 : vector<128xf32> to vector<128x1xf32>
    %cst_189 = arith.constant 3.200000e+01 : f32
    %386 = vector.broadcast %cst_189 : f32 to vector<128x1xf32>
    %387 = arith.divf %385, %386 : vector<128x1xf32>
    %388 = vector.broadcast %380 : vector<128x1xf32> to vector<128x32xf32>
    %389 = arith.subf %376, %388 : vector<128x32xf32>
    %cst_190 = arith.constant 9.99999974E-6 : f32
    %390 = vector.broadcast %cst_190 : f32 to vector<128x1xf32>
    %391 = arith.addf %387, %390 : vector<128x1xf32>
    %392 = math.rsqrt %391 : vector<128x1xf32>
    %393 = vector.broadcast %392 : vector<128x1xf32> to vector<128x32xf32>
    %394 = arith.mulf %389, %393 : vector<128x32xf32>
    %395 = vector.broadcast %214 : vector<1x32xf32> to vector<128x32xf32>
    %396 = arith.mulf %394, %395 : vector<128x32xf32>
    %397 = vector.broadcast %216 : vector<1x32xf32> to vector<128x32xf32>
    %398 = arith.addf %396, %397 : vector<128x32xf32>
    %c0_191 = arith.constant 0 : index
    %c0_192 = arith.constant 0 : index
    %399 = vector.load %arg24[%c0_191, %c0_192] : memref<32x16xbf16, #tpu.memory_space<vmem>>, vector<32x16xbf16>
    %400 = arith.truncf %398 : vector<128x32xf32> to vector<128x32xbf16>
    %cst_193 = arith.constant dense<0.000000e+00> : vector<128x16xf32>
    %401 = tpu.matmul %400, %399, %cst_193 {dimension_numbers = #tpu.dot_dimension_numbers<[1], [0], [0], [1], [0, 0, 1, 1], [], []>} : vector<128x32xbf16>, vector<32x16xbf16>, vector<128x16xf32> -> vector<128x16xf32>
    %c0_194 = arith.constant 0 : index
    %c0_195 = arith.constant 0 : index
    %402 = vector.load %arg25[%c0_194, %c0_195] : memref<1x16xf32, #tpu.memory_space<vmem>>, vector<1x16xf32>
    %403 = vector.broadcast %402 : vector<1x16xf32> to vector<128x16xf32>
    %404 = arith.addf %401, %403 : vector<128x16xf32>
    %cst_196 = arith.constant 0.000000e+00 : f32
    %405 = vector.broadcast %cst_196 : f32 to vector<128x16xf32>
    %406 = arith.maximumf %404, %405 : vector<128x16xf32>
    %c0_197 = arith.constant 0 : index
    %c0_198 = arith.constant 0 : index
    %407 = vector.load %arg26[%c0_197, %c0_198] : memref<16x2xbf16, #tpu.memory_space<vmem>>, vector<16x2xbf16>
    %408 = arith.truncf %406 : vector<128x16xf32> to vector<128x16xbf16>
    %cst_199 = arith.constant dense<0.000000e+00> : vector<128x2xf32>
    %409 = tpu.matmul %408, %407, %cst_199 {dimension_numbers = #tpu.dot_dimension_numbers<[1], [0], [0], [1], [0, 0, 1, 1], [], []>} : vector<128x16xbf16>, vector<16x2xbf16>, vector<128x2xf32> -> vector<128x2xf32>
    %c0_200 = arith.constant 0 : index
    %c0_201 = arith.constant 0 : index
    %410 = vector.load %arg27[%c0_200, %c0_201] : memref<1x2xf32, #tpu.memory_space<vmem>>, vector<1x2xf32>
    %411 = vector.broadcast %410 : vector<1x2xf32> to vector<128x2xf32>
    %412 = arith.addf %409, %411 : vector<128x2xf32>
    %cst_202 = arith.constant 0.000000e+00 : f32
    %413 = vector.broadcast %cst_202 : f32 to vector<128x2xf32>
    %414 = arith.maximumf %412, %413 : vector<128x2xf32>
    %c0_203 = arith.constant 0 : index
    %c0_204 = arith.constant 0 : index
    %415 = vector.load %arg28[%c0_203, %c0_204] : memref<128x2xf32, #tpu.memory_space<vmem>>, vector<128x2xf32>
    tpu.vector_store %arg28[%c0_203, %c0_204], %414 {strides = array<i32>} : memref<128x2xf32, #tpu.memory_space<vmem>>, vector<128x2xf32>,
    return
  }
  func.func @transform_0(%arg0: i32) -> (i32, i32) {
    %c0_i32 = arith.constant 0 : i32
    %c0_i32_0 = arith.constant 0 : i32
    return %arg0, %c0_i32 : i32, i32
  }
  func.func @transform_1(%arg0: i32) -> (i32, i32) {
    %c0_i32 = arith.constant 0 : i32
    %c0_i32_0 = arith.constant 0 : i32
    %c0_i32_1 = arith.constant 0 : i32
    return %c0_i32, %c0_i32_0 : i32, i32
  }
  func.func @transform_2(%arg0: i32) -> (i32, i32) {
    %c0_i32 = arith.constant 0 : i32
    %c0_i32_0 = arith.constant 0 : i32
    %c0_i32_1 = arith.constant 0 : i32
    return %c0_i32, %c0_i32_0 : i32, i32
  }
  func.func @transform_3(%arg0: i32) -> (i32, i32) {
    %c0_i32 = arith.constant 0 : i32
    %c0_i32_0 = arith.constant 0 : i32
    %c0_i32_1 = arith.constant 0 : i32
    return %c0_i32, %c0_i32_0 : i32, i32
  }
  func.func @transform_4(%arg0: i32) -> (i32, i32) {
    %c0_i32 = arith.constant 0 : i32
    %c0_i32_0 = arith.constant 0 : i32
    %c0_i32_1 = arith.constant 0 : i32
    return %c0_i32, %c0_i32_0 : i32, i32
  }
  func.func @transform_5(%arg0: i32) -> (i32, i32) {
    %c0_i32 = arith.constant 0 : i32
    %c0_i32_0 = arith.constant 0 : i32
    %c0_i32_1 = arith.constant 0 : i32
    return %c0_i32, %c0_i32_0 : i32, i32
  }
  func.func @transform_6(%arg0: i32) -> (i32, i32) {
    %c0_i32 = arith.constant 0 : i32
    %c0_i32_0 = arith.constant 0 : i32
    %c0_i32_1 = arith.constant 0 : i32
    return %c0_i32, %c0_i32_0 : i32, i32
  }
  func.func @transform_7(%arg0: i32) -> (i32, i32, i32) {
    %c0_i32 = arith.constant 0 : i32
    %c0_i32_0 = arith.constant 0 : i32
    %c0_i32_1 = arith.constant 0 : i32
    %c0_i32_2 = arith.constant 0 : i32
    return %c0_i32, %c0_i32_0, %c0_i32_1 : i32, i32, i32
  }
  func.func @transform_8(%arg0: i32) -> (i32, i32, i32) {
    %c0_i32 = arith.constant 0 : i32
    %c0_i32_0 = arith.constant 0 : i32
    %c0_i32_1 = arith.constant 0 : i32
    %c0_i32_2 = arith.constant 0 : i32
    return %c0_i32, %c0_i32_0, %c0_i32_1 : i32, i32, i32
  }
  func.func @transform_9(%arg0: i32) -> (i32, i32, i32) {
    %c0_i32 = arith.constant 0 : i32
    %c0_i32_0 = arith.constant 0 : i32
    %c0_i32_1 = arith.constant 0 : i32
    %c0_i32_2 = arith.constant 0 : i32
    return %c0_i32, %c0_i32_0, %c0_i32_1 : i32, i32, i32
  }
  func.func @transform_10(%arg0: i32) -> (i32, i32, i32) {
    %c0_i32 = arith.constant 0 : i32
    %c0_i32_0 = arith.constant 0 : i32
    %c0_i32_1 = arith.constant 0 : i32
    %c0_i32_2 = arith.constant 0 : i32
    return %c0_i32, %c0_i32_0, %c0_i32_1 : i32, i32, i32
  }
  func.func @transform_11(%arg0: i32) -> (i32, i32, i32) {
    %c0_i32 = arith.constant 0 : i32
    %c0_i32_0 = arith.constant 0 : i32
    %c0_i32_1 = arith.constant 0 : i32
    %c0_i32_2 = arith.constant 0 : i32
    return %c0_i32, %c0_i32_0, %c0_i32_1 : i32, i32, i32
  }
  func.func @transform_12(%arg0: i32) -> (i32, i32, i32) {
    %c0_i32 = arith.constant 0 : i32
    %c0_i32_0 = arith.constant 0 : i32
    %c0_i32_1 = arith.constant 0 : i32
    %c0_i32_2 = arith.constant 0 : i32
    return %c0_i32, %c0_i32_0, %c0_i32_1 : i32, i32, i32
  }
  func.func @transform_13(%arg0: i32) -> (i32, i32, i32) {
    %c0_i32 = arith.constant 0 : i32
    %c0_i32_0 = arith.constant 0 : i32
    %c0_i32_1 = arith.constant 0 : i32
    %c0_i32_2 = arith.constant 0 : i32
    return %c0_i32, %c0_i32_0, %c0_i32_1 : i32, i32, i32
  }
  func.func @transform_14(%arg0: i32) -> (i32, i32, i32) {
    %c0_i32 = arith.constant 0 : i32
    %c0_i32_0 = arith.constant 0 : i32
    %c0_i32_1 = arith.constant 0 : i32
    %c0_i32_2 = arith.constant 0 : i32
    return %c0_i32, %c0_i32_0, %c0_i32_1 : i32, i32, i32
  }
  func.func @transform_15(%arg0: i32) -> (i32, i32, i32) {
    %c0_i32 = arith.constant 0 : i32
    %c0_i32_0 = arith.constant 0 : i32
    %c0_i32_1 = arith.constant 0 : i32
    %c0_i32_2 = arith.constant 0 : i32
    return %c0_i32, %c0_i32_0, %c0_i32_1 : i32, i32, i32
  }
  func.func @transform_16(%arg0: i32) -> (i32, i32, i32) {
    %c0_i32 = arith.constant 0 : i32
    %c0_i32_0 = arith.constant 0 : i32
    %c0_i32_1 = arith.constant 0 : i32
    %c0_i32_2 = arith.constant 0 : i32
    return %c0_i32, %c0_i32_0, %c0_i32_1 : i32, i32, i32
  }
  func.func @transform_17(%arg0: i32) -> (i32, i32, i32) {
    %c0_i32 = arith.constant 0 : i32
    %c0_i32_0 = arith.constant 0 : i32
    %c0_i32_1 = arith.constant 0 : i32
    %c0_i32_2 = arith.constant 0 : i32
    return %c0_i32, %c0_i32_0, %c0_i32_1 : i32, i32, i32
  }
  func.func @transform_18(%arg0: i32) -> (i32, i32, i32) {
    %c0_i32 = arith.constant 0 : i32
    %c0_i32_0 = arith.constant 0 : i32
    %c0_i32_1 = arith.constant 0 : i32
    %c0_i32_2 = arith.constant 0 : i32
    return %c0_i32, %c0_i32_0, %c0_i32_1 : i32, i32, i32
  }
  func.func @transform_19(%arg0: i32) -> (i32, i32, i32) {
    %c0_i32 = arith.constant 0 : i32
    %c0_i32_0 = arith.constant 0 : i32
    %c0_i32_1 = arith.constant 0 : i32
    %c0_i32_2 = arith.constant 0 : i32
    return %c0_i32, %c0_i32_0, %c0_i32_1 : i32, i32, i32
  }
  func.func @transform_20(%arg0: i32) -> (i32, i32, i32) {
    %c0_i32 = arith.constant 0 : i32
    %c0_i32_0 = arith.constant 0 : i32
    %c0_i32_1 = arith.constant 0 : i32
    %c0_i32_2 = arith.constant 0 : i32
    return %c0_i32, %c0_i32_0, %c0_i32_1 : i32, i32, i32
  }
  func.func @transform_21(%arg0: i32) -> (i32, i32, i32) {
    %c0_i32 = arith.constant 0 : i32
    %c0_i32_0 = arith.constant 0 : i32
    %c0_i32_1 = arith.constant 0 : i32
    %c0_i32_2 = arith.constant 0 : i32
    return %c0_i32, %c0_i32_0, %c0_i32_1 : i32, i32, i32
  }
  func.func @transform_22(%arg0: i32) -> (i32, i32, i32) {
    %c0_i32 = arith.constant 0 : i32
    %c0_i32_0 = arith.constant 0 : i32
    %c0_i32_1 = arith.constant 0 : i32
    %c0_i32_2 = arith.constant 0 : i32
    return %c0_i32, %c0_i32_0, %c0_i32_1 : i32, i32, i32
  }
  func.func @transform_23(%arg0: i32) -> (i32, i32) {
    %c0_i32 = arith.constant 0 : i32
    %c0_i32_0 = arith.constant 0 : i32
    %c0_i32_1 = arith.constant 0 : i32
    return %c0_i32, %c0_i32_0 : i32, i32
  }
  func.func @transform_24(%arg0: i32) -> (i32, i32) {
    %c0_i32 = arith.constant 0 : i32
    %c0_i32_0 = arith.constant 0 : i32
    %c0_i32_1 = arith.constant 0 : i32
    return %c0_i32, %c0_i32_0 : i32, i32
  }
  func.func @transform_25(%arg0: i32) -> (i32, i32) {
    %c0_i32 = arith.constant 0 : i32
    %c0_i32_0 = arith.constant 0 : i32
    %c0_i32_1 = arith.constant 0 : i32
    return %c0_i32, %c0_i32_0 : i32, i32
  }
  func.func @transform_26(%arg0: i32) -> (i32, i32) {
    %c0_i32 = arith.constant 0 : i32
    %c0_i32_0 = arith.constant 0 : i32
    %c0_i32_1 = arith.constant 0 : i32
    return %c0_i32, %c0_i32_0 : i32, i32
  }
  func.func @transform_27(%arg0: i32) -> (i32, i32) {
    %c0_i32 = arith.constant 0 : i32
    %c0_i32_0 = arith.constant 0 : i32
    return %arg0, %c0_i32 : i32, i32
  }
}

</mosaic_0001>

<bundles_post_ra>
// kernel: rupture_net2d_forward.1
= control target key start
LH: loop header
LB: loop body
LE: loop exit
PB: predicated region body
PF: predicated region fallthrough
CT: control target
= control target key end

     0   :  { %s21603_s0 = inlined_call_operand.vmem [shape: f32[256,5], index: 0, kind: input, shape index: {}]   ;;  %s21604_s1 = inlined_call_operand.vmem [shape: bf16[5,8], index: 1, kind: input, shape index: {}]   ;;  %s21605_s2 = inlined_call_operand.vmem [shape: f32[1,8], index: 2, kind: input, shape index: {}]   ;;  %s21606_s3 = inlined_call_operand.vmem [shape: bf16[8,8], index: 3, kind: input, shape index: {}]   ;;  %s21607_s4 = inlined_call_operand.vmem [shape: f32[1,8], index: 4, kind: input, shape index: {}]   ;;  %s21608_s5 = inlined_call_operand.vmem [shape: bf16[16,16], index: 5, kind: input, shape index: {}]   ;;  %s21609_s6 = inlined_call_operand.vmem [shape: f32[1,16], index: 6, kind: input, shape index: {}]   ;;  %s21610_s7 = inlined_call_operand.vmem [shape: bf16[2,32,32], index: 7, kind: input, shape index: {}]   ;;  %s21611_s8 = inlined_call_operand.vmem [shape: bf16[2,32,32], index: 8, kind: input, shape index: {}]   ;;  %s21612_s9 = inlined_call_operand.vmem [shape: bf16[2,32,32], index: 9, kind: input, shape index: {}]   ;;  %s21613_s10 = inlined_call_operand.vmem [shape: bf16[2,32,32], index: 10, kind: input, shape index: {}]   ;;  %s21614_s11 = inlined_call_operand.vmem [shape: bf16[2,32,32], index: 11, kind: input, shape index: {}]   ;;  %s21615_s12 = inlined_call_operand.vmem [shape: f32[2,1,32], index: 12, kind: input, shape index: {}]   ;;  %s21616_s13 = inlined_call_operand.vmem [shape: f32[2,1,32], index: 13, kind: input, shape index: {}]   ;;  %s21617_s14 = inlined_call_operand.vmem [shape: f32[2,1,32], index: 14, kind: input, shape index: {}]   ;;  %s21618_s15 = inlined_call_operand.vmem [shape: bf16[2,32,32], index: 15, kind: input, shape index: {}]   ;;  %s21619_s16 = inlined_call_operand.vmem [shape: f32[2,1,32], index: 16, kind: input, shape index: {}]   ;;  %s21620_s17 = inlined_call_operand.vmem [shape: bf16[2,32,64], index: 17, kind: input, shape index: {}]   ;;  %s21621_s18 = inlined_call_operand.vmem [shape: f32[2,1,64], index: 18, kind: input, shape index: {}]   ;;  %s21622_s19 = inlined_call_operand.vmem [shape: bf16[2,64,32], index: 19, kind: input, shape index: {}]   ;;  %s21623_s20 = inlined_call_operand.vmem [shape: f32[2,1,32], index: 20, kind: input, shape index: {}]   ;;  %s21624_s21 = inlined_call_operand.vmem [shape: f32[2,1,32], index: 21, kind: input, shape index: {}]   ;;  %s21625_s22 = inlined_call_operand.vmem [shape: f32[2,1,32], index: 22, kind: input, shape index: {}]   ;;  %s21626_s23 = inlined_call_operand.vmem [shape: bf16[32,16], index: 23, kind: input, shape index: {}]   ;;  %s21627_s24 = inlined_call_operand.vmem [shape: f32[1,16], index: 24, kind: input, shape index: {}]   ;;  %s21628_s25 = inlined_call_operand.vmem [shape: bf16[16,2], index: 25, kind: input, shape index: {}]   ;;  %s21629_s26 = inlined_call_operand.vmem [shape: f32[1,2], index: 26, kind: input, shape index: {}]   ;;  %s21630_s27 = inlined_call_operand.vmem [shape: f32[256,2], index: 27, kind: output, shape index: {}]  }
   0x1   :  { %21698 = sst [smem:[#allocation42_spill]] %s21603_s0 }
   0x2   :  { %21699 = sst [smem:[#allocation43_spill]] %s21604_s1 }
   0x3   :  { %21700 = sst [smem:[#allocation44_spill]] %s21605_s2 }
   0x4   :  { %21701 = sst [smem:[#allocation45_spill]] %s21606_s3 }
   0x5   :  { %21702 = sst [smem:[#allocation46_spill]] %s21607_s4 }
   0x6   :  { %21703 = sst [smem:[#allocation47_spill]] %s21608_s5 }
   0x7   :  { %21704 = sst [smem:[#allocation48_spill]] %s21609_s6 }
   0x8   :  { %21705 = sst [smem:[#allocation49_spill]] %s21610_s7  ;;  %s16792_s7 = smov 0  }
   0x9   :  { %21706 = sst [smem:[#allocation50_spill]] %s21611_s8 }
   0xa   :  { %21707 = sst [smem:[#allocation51_spill]] %s21612_s9 }
   0xb   :  { %21708 = sst [smem:[#allocation52_spill]] %s21613_s10 }
   0xc   :  { %21709 = sst [smem:[#allocation53_spill]] %s21614_s11 }
   0xd LB: > { %21710 = sst [smem:[#allocation2_spill]] %s16641_s7  ;;  %s13628_s4 = sadd.s32 4294967295, %s16641_s7   ;;  %s16641_s7 = sphi %s16792_s7, %s37_s7  }
   0xe   : > { %p13632_p0 = scmp.ge.s32.totalorder %s16641_s7, 1  ;;  %p738_p1 = scmp.lt.s32.totalorder %s16641_s7, 3 }
  0x10   : > { %p739_p2 = pnand %p13632_p0, %p738_p1 }
  0x12   : > { %742 = sbr.rel (%p739_p2) target bundleno = 9613 (0x258d), region = 128 }
  0x17   : > { %s21711_s9 = sld [smem:[#allocation43_spill]]  ;;  %vm880_vm0 = vcmask 1041408   ;;  %vm881_vm1 = vcmask 1042432   ;;  %s13633_s5 = sshll.u32 %s13628_s4, 4  ;;  %v16643_v1 = vmov 65535   ;;  %vm855_vm2 = vcmask 39936  }
  0x18   : > { %v882_v2 = vsel %vm880_vm0, 4294967295, %v16643_v1  ;;  %p811_p3 = scmp.lt.s32.totalorder %s13633_s5, 31  ;;  %s21712_s29 = sld [smem:[#allocation42_spill]]  ;;  %vm1041_vm3 = vcmask 1043456   ;;  %vm1016_vm4 = vcmask 64512   ;;  %vm1261_vm5 = vcmask 130048  }
  0x19   : > { %v883_v3 = vsel %vm881_vm1, %v882_v2, 0  ;;  %s21713_s2 = sld [smem:[#allocation45_spill]]  ;;  %s21670_s6 = smov 8   ;;  %vm1505_vm6 = vcmask 261120   ;;  %vm16647_vm7 = vmmov 0   ;;  %vm6316_vm8 = vcmask 195584  }
  0x1a   : > { %s21909_s5 = smov (!%p811_p3, %s13633_s5), 31  ;;  %s21714_s8 = sld [smem:[#allocation44_spill]]  ;;  %vm6969_vm9 = vcmask 523264   ;;  %vm13555_vm10 = vcmask 15360  }
  0x1b   : > { %s21636_s28 = sshll.u32 %s21909_s5, 3  ;;  %s21715_s0 = sld [smem:[#allocation47_spill]] }
  0x1c   : > { %s21717_s3 = sld [smem:[#allocation49_spill]]  ;;  %s21637_s4 = smov 16  }
  0x1d   : > { %v839_v0 = vld [vmem:[%s21711_s9] sm:$0x7]  ;;  %s21718_s30 = sld [smem:[#allocation50_spill]]  ;;  %s21664_s11 = smov 104  }
  0x1e   : > { %v885_v4 = vand.u32 %v883_v3, %v839_v0  ;;  %s814_s1 = scalar_lea.vmem %s21712_s29, %s21636_s28  ;;  %s21738_s10 = sld [smem:[#allocation53_spill]] }
  0x1f   : > { %v823_v5 = vld [vmem:[%s814_s1] sm:$0xff]  ;;  %v824_v6 = vld [vmem:[%s814_s1 + $0x8] sm:$0xff]  ;;  %v825_v7 = vld [vmem:[%s814_s1 + $0x10] sm:$0xff]  ;;  %s21666_s29 = smov 112   ;;  %s21829_s9 = smov 120  }
  0x20   : > { %14506 = vmatprep.subr.bf16.mxu0 %v885_v4  ;;  %15694 = vmatprep.subr.bf16.mxu1 %v885_v4  ;;  %v841_v8 = vpack.c.bf16 %v824_v6, %v823_v5  ;;  %v826_v9 = vld [vmem:[%s814_s1 + $0x18] sm:$0xff]  ;;  %v827_v10 = vld [vmem:[%s814_s1 + $0x20] sm:$0xff]  ;;  %v828_v11 = vld [vmem:[%s814_s1 + $0x28] sm:$0xff]  ;;  %s21846_s28 = smov 112   ;;  %s21854_s7 = smov 104  }
  0x21   : > { %14507 = vmatpush3.bf16.msra.mxu0 %v885_v4  ;;  %15695 = vmatpush3.bf16.msra.mxu1 %v885_v4  ;;  %v842_v12 = vpack.c.bf16 %v826_v9, %v825_v7  ;;  %v843_v13 = vpack.c.bf16 %v828_v11, %v827_v10  ;;  %v831_v14 = vld [vmem:[%s814_s1 + $0x40] sm:$0xff]  ;;  %v832_v15 = vld [vmem:[%s814_s1 + $0x48] sm:$0xff]  ;;  %v833_v16 = vld [vmem:[%s814_s1 + $0x50] sm:$0xff] }
  0x22   : > { %14508 = vmatprep.mubr.msk.bf16.mxu0 %vm855_vm2, %v841_v8  ;;  %v834_v17 = vld [vmem:[%s814_s1 + $0x58] sm:$0xff]  ;;  %v829_v18 = vld [vmem:[%s814_s1 + $0x30] sm:$0xff]  ;;  %v845_v19 = vpack.c.bf16 %v832_v15, %v831_v14  ;;  %v835_v21 = vld [vmem:[%s814_s1 + $0x60] sm:$0xff] }
  0x23   : > { %v846_v20 = vpack.c.bf16 %v834_v17, %v833_v16  ;;  %v836_v22 = vld [vmem:[%s814_s1 + $0x68] sm:$0xff]  ;;  %v830_v23 = vld [vmem:[%s814_s1 + $0x38] sm:$0xff]  ;;  %v837_v25 = vld [vmem:[%s814_s1 + $0x70] sm:$0xff] }
  0x24   : > { %14509 = vmatmul.mubr.msk.bf16.vlgmr.msra.gmra.mxu0 %vm855_vm2, %v842_v12  ;;  %v847_v24 = vpack.c.bf16 %v836_v22, %v835_v21  ;;  %14516 = vmatprep.mubr.msk.bf16.mxu1 %vm855_vm2, %v845_v19  ;;  %v838_v26 = vld [vmem:[%s814_s1 + $0x78] sm:$0xff]  ;;  %v844_v27 = vpack.c.bf16 %v830_v23, %v829_v18  ;;  %v1000_v29 = vld [vmem:[%s21713_s2] sm:$0xf]  ;;  %s21716_s1 = sld [smem:[#allocation46_spill]] }
  0x25   : > { %14512 = vmatprep.mubr.msk.bf16.mxu0 %vm855_vm2, %v843_v13  ;;  %14517 = vmatmul.mubr.msk.bf16.vlgmr.msra.gmra.mxu1 %vm855_vm2, %v846_v20  ;;  %v848_v28 = vpack.c.bf16 %v838_v26, %v837_v25  ;;  %v1043_v30 = vsel %vm1041_vm3, %v1000_v29, 0  ;;  %v13637_v33 = vld [vmem:[%s21714_s8] ss:$0 sm:$0xff]  ;;  %s21719_s2 = sld [smem:[#allocation48_spill]]  ;;  %s21906_s8 = sshll.u32 %s21909_s5, 3 }
  0x26   : > { %14520 = vmatprep.mubr.msk.bf16.mxu1 %vm855_vm2, %v847_v24  ;;  %15696 = vmatprep.subr.msk.bf16.mxu1 %vm1041_vm3, %v1000_v29  ;;  %v15954_v24 = vld [vmem:[%s21715_s0] sm:$0xff]   ;;  %s21736_s0 = sld [smem:[#allocation51_spill]] }
  0x27   : > { %14525 = vmatpush3.bf16.msra.mxu1 %v1043_v30  ;;  %14542 = vmatprep.subr.bf16.mxu0 %v15954_v24 }
  0x28   : > { %14543 = vmatpush3.bf16.msra.mxu0 %v15954_v24 }
  0x2a   : > { %v13646_v25 = vld [vmem:[%s21716_s1] ss:$0 sm:$0xff]  ;;  %s21737_s1 = sld [smem:[#allocation52_spill]] }
  0x2c   : > { %14513 = vmatmul.mubr.msk.bf16.gmra.mxu0 %vm855_vm2, %v844_v27 }
  0x2d   : > { %14521 = vmatmul.mubr.msk.bf16.gmra.mxu1 %vm855_vm2, %v848_v28 }
  0xe4   : > { %v14510_v31 = vpop.f32.mrf.mxu0 }
  0xe5   : > { %v14518_v34 = vpop.f32.mrf.mxu1  ;;  %v16829_v39 = vadd.f32 %v14510_v31, %v13637_v33 }
  0xe6   : > { %v921_v32 = vpop.f32.mrf.mxu0  ;;  %v16877_v10 = vadd.f32 %v14518_v34, %v13637_v33 }
  0xe7   : > { %v16825_v36 = vadd.f32 %v13637_v33, %v921_v32  ;;  %v953_v38 = vpop.f32.mrf.mxu1  ;;  %v986_v48 = vmax.f32 %v16829_v39, 0.0 }
  0xe8   : > { %v14511_v35 = vpop.f32.mrf.mxu0  ;;  %v16841_v51 = vadd.f32 %v13637_v33, %v953_v38  ;;  %v994_v15 = vmax.f32 %v16877_v10, 0.0 }
  0xe9   : > { %v16827_v37 = vadd.f32 %v14511_v35, %v13637_v33  ;;  %v14519_v42 = vpop.f32.mrf.mxu1  ;;  %v984_v45 = vmax.f32 %v16825_v36, 0.0 }
  0xea   : > { %v924_v40 = vpop.f32.mrf.mxu0  ;;  %v992_v61 = vmax.f32 %v16841_v51, 0.0  ;;  %v16883_v12 = vadd.f32 %v14519_v42, %v13637_v33 }
  0xeb   : > { %v16831_v41 = vadd.f32 %v13637_v33, %v924_v40  ;;  %v987_v43 = vmax.f32 %v16827_v37, 0.0  ;;  %v956_v47 = vpop.f32.mrf.mxu1 }
  0xec   : > { %v14514_v44 = vpop.f32.mrf.mxu0  ;;  %v16843_v52 = vadd.f32 %v13637_v33, %v956_v47  ;;  %v995_v16 = vmax.f32 %v16883_v12, 0.0 }
  0xed   : > { %v985_v46 = vmax.f32 %v16831_v41, 0.0  ;;  %v14522_v53 = vpop.f32.mrf.mxu1  ;;  %v1003_v54 = vpack.c.bf16 %v987_v43, %v986_v48  ;;  %v16854_v59 = vadd.f32 %v14514_v44, %v13637_v33 }
  0xee   : > { %v937_v49 = vpop.f32.mrf.mxu0  ;;  %v993_v63 = vmax.f32 %v16843_v52, 0.0  ;;  %v1007_v18 = vpack.c.bf16 %v995_v16, %v994_v15  ;;  %v16900_v19 = vadd.f32 %v14522_v53, %v13637_v33 }
  0xef   : > { %v1002_v50 = vpack.c.bf16 %v985_v46, %v984_v45  ;;  %v16849_v56 = vadd.f32 %v13637_v33, %v937_v49  ;;  %v969_v58 = vpop.f32.mrf.mxu1  ;;  %v990_v5 = vmax.f32 %v16854_v59, 0.0 }
  0xf0   : > { %v14515_v55 = vpop.f32.mrf.mxu0  ;;  %v1006_v7 = vpack.c.bf16 %v993_v63, %v992_v61  ;;  %v16873_v8 = vadd.f32 %v13637_v33, %v969_v58  ;;  %v998_v21 = vmax.f32 %v16900_v19, 0.0  ;;  %v15957_v19 = vld [vmem:[%s21717_s3] sm:$0xff]  }
  0xf1   : > { %v16851_v57 = vadd.f32 %v14515_v55, %v13637_v33  ;;  %14526 = vmatprep.mubr.msk.bf16.mxu1 %vm1016_vm4, %v1002_v50  ;;  %v14523_v0 = vpop.f32.mrf.mxu1  ;;  %v988_v2 = vmax.f32 %v16849_v56, 0.0 }
  0xf2   : > { %v940_v60 = vpop.f32.mrf.mxu0  ;;  %14527 = vmatmul.mubr.msk.bf16.vlgmr.msra.gmra.mxu1 %vm1016_vm4, %v1003_v54  ;;  %v996_v13 = vmax.f32 %v16873_v8, 0.0  ;;  %v16902_v20 = vadd.f32 %v14523_v0, %v13637_v33 }
  0xf3   : > { %v16858_v62 = vadd.f32 %v13637_v33, %v940_v60  ;;  %v991_v1 = vmax.f32 %v16851_v57, 0.0  ;;  %v972_v4 = vpop.f32.mrf.mxu1 }
  0xf4   : > { %v16875_v9 = vadd.f32 %v13637_v33, %v972_v4  ;;  %v999_v22 = vmax.f32 %v16902_v20, 0.0  ;;  %v15958_v20 = vld [vmem:[%s21718_s30] sm:$0xff]  }
  0xf5   : > { %v989_v3 = vmax.f32 %v16858_v62, 0.0  ;;  %v1005_v11 = vpack.c.bf16 %v991_v1, %v990_v5 }
  0xf6   : > { %v997_v14 = vmax.f32 %v16875_v9, 0.0  ;;  %v1009_v23 = vpack.c.bf16 %v999_v22, %v998_v21 }
  0xf7   : > { %v1004_v6 = vpack.c.bf16 %v989_v3, %v988_v2 }
  0xf8   : > { %v1008_v17 = vpack.c.bf16 %v997_v14, %v996_v13 }
  0xf9   : > { %14530 = vmatprep.mubr.msk.bf16.mxu1 %vm1016_vm4, %v1004_v6 }
  0xfa   : > { %14531 = vmatmul.mubr.msk.bf16.gmra.mxu1 %vm1016_vm4, %v1005_v11 }
  0xfb   : > { %14534 = vmatprep.mubr.msk.bf16.mxu1 %vm1016_vm4, %v1006_v7 }
 0x102   : > { %14535 = vmatmul.mubr.msk.bf16.gmra.mxu1 %vm1016_vm4, %v1007_v18 }
 0x103   : > { %14538 = vmatprep.mubr.msk.bf16.mxu1 %vm1016_vm4, %v1008_v17 }
 0x10a   : > { %14539 = vmatmul.mubr.msk.bf16.gmra.mxu1 %vm1016_vm4, %v1009_v23 }
 0x1b2   : > { %v14528_v26 = vpop.f32.mrf.mxu1 }
 0x1b3   : > { %v1088_v27 = vadd.f32 %v14528_v26, %v13646_v25 }
 0x1b4   : > { %v1079_v28 = vpop.f32.mrf.mxu1 }
 0x1b5   : > { %v1144_v29 = vmax.f32 %v1088_v27, 0.0  ;;  %v1080_v30 = vadd.f32 %v13646_v25, %v1079_v28 }
 0x1b6   : > { %v14529_v31 = vpop.f32.mrf.mxu1 }
 0x1b7   : > { %v1142_v32 = vmax.f32 %v1080_v30, 0.0  ;;  %v1091_v33 = vadd.f32 %v14529_v31, %v13646_v25  ;;  %1178 = vrot.lane.b32.xlu1 %v1144_v29, %s21670_s6 }
 0x1b8   : > { %v1082_v34 = vpop.f32.mrf.mxu1 }
 0x1b9   : > { %v1145_v35 = vmax.f32 %v1091_v33, 0.0  ;;  %v1083_v38 = vadd.f32 %v13646_v25, %v1082_v34  ;;  %1174 = vrot.lane.b32.xlu0 %v1142_v32, %s21670_s6 }
 0x1ba   : > { %v14532_v40 = vpop.f32.mrf.mxu1 }
 0x1bb   : > { %v1143_v42 = vmax.f32 %v1083_v38, 0.0  ;;  %1180 = vrot.lane.b32.xlu1 %v1145_v35, %s21670_s6  ;;  %v1104_v50 = vadd.f32 %v14532_v40, %v13646_v25 }
 0x1bc   : > { %v1095_v44 = vpop.f32.mrf.mxu1 }
 0x1bd   : > { %v1096_v47 = vadd.f32 %v13646_v25, %v1095_v44  ;;  %1176 = vrot.lane.b32.xlu0 %v1143_v42, %s21670_s6  ;;  %v1148_v60 = vmax.f32 %v1104_v50, 0.0 }
 0x1be   : > { %v14533_v49 = vpop.f32.mrf.mxu1 }
 0x1bf   : > { %v1146_v53 = vmax.f32 %v1096_v47, 0.0  ;;  %v1107_v0 = vadd.f32 %v14533_v49, %v13646_v25 }
 0x1c0   : > { %v1098_v54 = vpop.f32.mrf.mxu1 }
 0x1c1   : > { %v1099_v55 = vadd.f32 %v13646_v25, %v1098_v54  ;;  %1182 = vrot.lane.b32.xlu0 %v1146_v53, %s21670_s6  ;;  %v1149_v17 = vmax.f32 %v1107_v0, 0.0 }
 0x1c2   : > { %v14536_v58 = vpop.f32.mrf.mxu1 }
 0x1c3   : > { %v1147_v4 = vmax.f32 %v1099_v55, 0.0  ;;  %v1120_v18 = vadd.f32 %v14536_v58, %v13646_v25 }
 0x1c4   : > { %v1111_v6 = vpop.f32.mrf.mxu1 }
 0x1c5   : > { %v1112_v7 = vadd.f32 %v13646_v25, %v1111_v6  ;;  %1184 = vrot.lane.b32.xlu1 %v1147_v4, %s21670_s6  ;;  %1186 = vrot.lane.b32.xlu0 %v1148_v60, %s21670_s6  ;;  %v1152_v28 = vmax.f32 %v1120_v18, 0.0 }
 0x1c6   : > { %v14537_v11 = vpop.f32.mrf.mxu1 }
 0x1c7   : > { %v1150_v23 = vmax.f32 %v1112_v7, 0.0  ;;  %v1123_v29 = vadd.f32 %v14537_v11, %v13646_v25 }
 0x1c8   : > { %v1114_v24 = vpop.f32.mrf.mxu1 }
 0x1c9   : > { %v1115_v26 = vadd.f32 %v13646_v25, %v1114_v24  ;;  %1188 = vrot.lane.b32.xlu1 %v1149_v17, %s21670_s6  ;;  %1190 = vrot.lane.b32.xlu0 %v1150_v23, %s21670_s6  ;;  %v1153_v34 = vmax.f32 %v1123_v29, 0.0 }
 0x1ca   : > { %v14540_v27 = vpop.f32.mrf.mxu1 }
 0x1cb   : > { %v1151_v30 = vmax.f32 %v1115_v26, 0.0  ;;  %v1136_v35 = vadd.f32 %v14540_v27, %v13646_v25 }
 0x1cc   : > { %v1127_v31 = vpop.f32.mrf.mxu1 }
 0x1cd   : > { %v1128_v32 = vadd.f32 %v13646_v25, %v1127_v31  ;;  %1192 = vrot.lane.b32.xlu1 %v1151_v30, %s21670_s6  ;;  %1194 = vrot.lane.b32.xlu0 %v1152_v28, %s21670_s6  ;;  %v1156_v44 = vmax.f32 %v1136_v35, 0.0 }
 0x1ce   : > { %v14541_v33 = vpop.f32.mrf.mxu1 }
 0x1cf   : > { %v1154_v38 = vmax.f32 %v1128_v32, 0.0  ;;  %v1139_v47 = vadd.f32 %v14541_v33, %v13646_v25 }
 0x1d0   : > { %v1130_v40 = vpop.f32.mrf.mxu1 }
 0x1d1   : > { %v1131_v42 = vadd.f32 %v13646_v25, %v1130_v40  ;;  %1196 = vrot.lane.b32.xlu1 %v1153_v34, %s21670_s6  ;;  %1198 = vrot.lane.b32.xlu0 %v1154_v38, %s21670_s6  ;;  %v1157_v50 = vmax.f32 %v1139_v47, 0.0 }
 0x1d3   : > { %v1155_v49 = vmax.f32 %v1131_v42, 0.0 }
 0x1d5   : > { %1200 = vrot.lane.b32.xlu1 %v1155_v49, %s21670_s6  ;;  %1202 = vrot.lane.b32.xlu0 %v1156_v44, %s21670_s6 }
 0x1d9   : > { %1204 = vrot.lane.b32.xlu1 %v1157_v50, %s21670_s6 }
 0x229   : > { %v1179_v53 = vpop.permute.xlu1 %1178 }
 0x22a   : > { %v16953_v4 = vsel %vm1016_vm4, %v986_v48, %v1179_v53 }
 0x22b   : > { %v1175_v54 = vpop.permute.xlu0 %1174 }
 0x22c   : > { %v16943_v25 = vsel %vm1016_vm4, %v984_v45, %v1175_v54 }
 0x22d   : > { %v1181_v55 = vpop.permute.xlu1 %1180 }
 0x22e   : > { %v16938_v58 = vsel %vm1016_vm4, %v987_v43, %v1181_v55 }
 0x22f   : > { %v1177_v60 = vpop.permute.xlu0 %1176  ;;  %v1242_v36 = vpack.c.bf16 %v16938_v58, %v16953_v4 }
 0x230   : > { %v16948_v0 = vsel %vm1016_vm4, %v985_v46, %v1177_v60 }
 0x231   : > { %v1241_v37 = vpack.c.bf16 %v16948_v0, %v16943_v25 }
 0x233   : > { %14544 = vmatprep.mubr.msk.bf16.mxu0 %vm1261_vm5, %v1241_v37  ;;  %v1183_v43 = vpop.permute.xlu0 %1182 }
 0x234   : > { %14545 = vmatmul.mubr.msk.bf16.vlgmr.msra.gmra.mxu0 %vm1261_vm5, %v1242_v36  ;;  %v16964_v39 = vsel %vm1016_vm4, %v988_v2, %v1183_v43 }
 0x237   : > { %v1185_v41 = vpop.permute.xlu1 %1184  ;;  %v1187_v45 = vpop.permute.xlu0 %1186 }
 0x238   : > { %v16969_v46 = vsel %vm1016_vm4, %v989_v3, %v1185_v41  ;;  %v16977_v11 = vsel %vm1016_vm4, %v990_v5, %v1187_v45 }
 0x239   : > { %v1243_v48 = vpack.c.bf16 %v16969_v46, %v16964_v39 }
 0x23b   : > { %v1189_v6 = vpop.permute.xlu1 %1188  ;;  %14548 = vmatprep.mubr.msk.bf16.mxu0 %vm1261_vm5, %v1243_v48  ;;  %v1191_v7 = vpop.permute.xlu0 %1190 }
 0x23c   : > { %v16982_v56 = vsel %vm1016_vm4, %v991_v1, %v1189_v6  ;;  %v16990_v17 = vsel %vm1016_vm4, %v992_v61, %v1191_v7 }
 0x23d   : > { %v1244_v62 = vpack.c.bf16 %v16982_v56, %v16977_v11 }
 0x23f   : > { %v1193_v2 = vpop.permute.xlu1 %1192  ;;  %14549 = vmatmul.mubr.msk.bf16.gmra.mxu0 %vm1261_vm5, %v1244_v62  ;;  %v1195_v3 = vpop.permute.xlu0 %1194 }
 0x240   : > { %v16995_v59 = vsel %vm1016_vm4, %v993_v63, %v1193_v2  ;;  %v17003_v18 = vsel %vm1016_vm4, %v994_v15, %v1195_v3 }
 0x241   : > { %v1245_v57 = vpack.c.bf16 %v16995_v59, %v16990_v17 }
 0x243   : > { %v1197_v1 = vpop.permute.xlu1 %1196  ;;  %14552 = vmatprep.mubr.msk.bf16.mxu0 %vm1261_vm5, %v1245_v57  ;;  %v1199_v5 = vpop.permute.xlu0 %1198 }
 0x244   : > { %v17008_v51 = vsel %vm1016_vm4, %v995_v16, %v1197_v1  ;;  %v17016_v63 = vsel %vm1016_vm4, %v996_v13, %v1199_v5  ;;  %v15955_v13 = vld [vmem:[%s21717_s3 + $0x8] sm:$0xff]  }
 0x245   : > { %v1246_v52 = vpack.c.bf16 %v17008_v51, %v17003_v18  ;;  %14560 = vmatprep.subr.bf16.mxu1 %v15955_v13 }
 0x246   : > { %14561 = vmatpush3.bf16.msra.mxu1 %v15955_v13 }
 0x247   : > { %v1201_v61 = vpop.permute.xlu1 %1200  ;;  %14553 = vmatmul.mubr.msk.bf16.gmra.mxu0 %vm1261_vm5, %v1246_v52  ;;  %v1203_v15 = vpop.permute.xlu0 %1202  ;;  %14562 = vmatprep.subr.bf16.mxu1 %v15957_v19 }
 0x248   : > { %v17021_v10 = vsel %vm1016_vm4, %v997_v14, %v1201_v61  ;;  %v17029_v23 = vsel %vm1016_vm4, %v998_v21, %v1203_v15  ;;  %v15956_v14 = vld [vmem:[%s21718_s30 + $0x8] sm:$0xff]  }
 0x249   : > { %v1247_v12 = vpack.c.bf16 %v17021_v10, %v17016_v63  ;;  %14580 = vmatprep.subr.bf16.mxu0 %v15956_v14 }
 0x24a   : > { %14581 = vmatpush3.bf16.msra.mxu0 %v15956_v14  ;;  %14563 = vmatpush3.bf16.msra.mxu1 %v15957_v19 }
 0x24b   : > { %v1205_v16 = vpop.permute.xlu1 %1204  ;;  %14556 = vmatprep.mubr.msk.bf16.mxu0 %vm1261_vm5, %v1247_v12  ;;  %14582 = vmatprep.subr.bf16.mxu0 %v15958_v20 }
 0x24c   : > { %v17034_v8 = vsel %vm1016_vm4, %v999_v22, %v1205_v16  ;;  %v13655_v22 = vld [vmem:[%s21719_s2] ss:$0 sm:$0xff]  ;;  %s21764_s2 = smov 16  }
 0x24d   : > { %v1248_v9 = vpack.c.bf16 %v17034_v8, %v17029_v23 }
 0x24e   : > { %14583 = vmatpush3.bf16.msra.mxu0 %v15958_v20 }
 0x24f   : > { %14557 = vmatmul.mubr.msk.bf16.gmra.mxu0 %vm1261_vm5, %v1248_v9 }
 0x2f4   : > { %v14546_v21 = vpop.f32.mrf.mxu0 }
 0x2f5   : > { %v1329_v28 = vadd.f32 %v14546_v21, %v13655_v22 }
 0x2f6   : > { %v1320_v24 = vpop.f32.mrf.mxu0 }
 0x2f7   : > { %v1321_v26 = vadd.f32 %v13655_v22, %v1320_v24  ;;  %v1385_v32 = vmax.f32 %v1329_v28, 0.0 }
 0x2f8   : > { %v14547_v27 = vpop.f32.mrf.mxu0 }
 0x2f9   : > { %v1383_v29 = vmax.f32 %v1321_v26, 0.0  ;;  %v1332_v33 = vadd.f32 %v14547_v27, %v13655_v22 }
 0x2fa   : > { %v1323_v30 = vpop.f32.mrf.mxu0 }
 0x2fb   : > { %v1324_v31 = vadd.f32 %v13655_v22, %v1323_v30  ;;  %1415 = vrot.lane.b32.xlu0 %v1383_v29, %s21637_s4  ;;  %v1386_v38 = vmax.f32 %v1332_v33, 0.0 }
 0x2fd   : > { %v1384_v34 = vmax.f32 %v1324_v31, 0.0 }
 0x2ff   : > { %1417 = vrot.lane.b32.xlu1 %v1384_v34, %s21637_s4  ;;  %1419 = vrot.lane.b32.xlu0 %v1385_v32, %s21637_s4  ;;  %v14550_v35 = vpop.f32.mrf.mxu0 }
 0x300   : > { %v1345_v47 = vadd.f32 %v14550_v35, %v13655_v22 }
 0x301   : > { %v1336_v40 = vpop.f32.mrf.mxu0 }
 0x302   : > { %v1337_v42 = vadd.f32 %v13655_v22, %v1336_v40  ;;  %v1389_v55 = vmax.f32 %v1345_v47, 0.0 }
 0x303   : > { %1421 = vrot.lane.b32.xlu1 %v1386_v38, %s21637_s4  ;;  %v14551_v44 = vpop.f32.mrf.mxu0 }
 0x304   : > { %v1387_v49 = vmax.f32 %v1337_v42, 0.0  ;;  %v1348_v60 = vadd.f32 %v14551_v44, %v13655_v22 }
 0x305   : > { %v1339_v50 = vpop.f32.mrf.mxu0 }
 0x306   : > { %v1340_v53 = vadd.f32 %v13655_v22, %v1339_v50  ;;  %1423 = vrot.lane.b32.xlu0 %v1387_v49, %s21637_s4  ;;  %v1390_v45 = vmax.f32 %v1348_v60, 0.0 }
 0x307   : > { %v14554_v54 = vpop.f32.mrf.mxu0 }
 0x308   : > { %v1388_v37 = vmax.f32 %v1340_v53, 0.0  ;;  %v1361_v48 = vadd.f32 %v14554_v54, %v13655_v22 }
 0x309   : > { %v1352_v36 = vpop.f32.mrf.mxu0 }
 0x30a   : > { %v1353_v43 = vadd.f32 %v13655_v22, %v1352_v36  ;;  %1425 = vrot.lane.b32.xlu1 %v1388_v37, %s21637_s4  ;;  %1427 = vrot.lane.b32.xlu0 %v1389_v55, %s21637_s4  ;;  %v1393_v3 = vmax.f32 %v1361_v48, 0.0  ;;  %v15963_v48 = vld [vmem:[%s21738_s10 + $0x8] sm:$0xff]  }
 0x30b   : > { %v14555_v41 = vpop.f32.mrf.mxu0 }
 0x30c   : > { %v1391_v6 = vmax.f32 %v1353_v43, 0.0  ;;  %v1364_v57 = vadd.f32 %v14555_v41, %v13655_v22  ;;  %v15959_v41 = vld [vmem:[%s21736_s0 + $0x8] sm:$0xff]  }
 0x30d   : > { %v1355_v7 = vpop.f32.mrf.mxu0  ;;  %14600 = vmatprep.subr.bf16.mxu1 %v15959_v41 }
 0x30e   : > { %v1356_v62 = vadd.f32 %v13655_v22, %v1355_v7  ;;  %1429 = vrot.lane.b32.xlu1 %v1390_v45, %s21637_s4  ;;  %1431 = vrot.lane.b32.xlu0 %v1391_v6, %s21637_s4  ;;  %v1394_v12 = vmax.f32 %v1364_v57, 0.0  ;;  %v15962_v45 = vld [vmem:[%s21737_s1] sm:$0xff]  }
 0x30f   : > { %v14558_v2 = vpop.f32.mrf.mxu0 }
 0x310   : > { %v1392_v1 = vmax.f32 %v1356_v62, 0.0  ;;  %v1377_v15 = vadd.f32 %v14558_v2, %v13655_v22 }
 0x311   : > { %v1368_v5 = vpop.f32.mrf.mxu0 }
 0x312   : > { %v1369_v52 = vadd.f32 %v13655_v22, %v1368_v5  ;;  %1433 = vrot.lane.b32.xlu1 %v1392_v1, %s21637_s4  ;;  %1435 = vrot.lane.b32.xlu0 %v1393_v3, %s21637_s4  ;;  %v1397_v14 = vmax.f32 %v1377_v15, 0.0 }
 0x313   : > { %v14559_v61 = vpop.f32.mrf.mxu0 }
 0x314   : > { %v1395_v16 = vmax.f32 %v1369_v52, 0.0  ;;  %v1380_v19 = vadd.f32 %v14559_v61, %v13655_v22 }
 0x315   : > { %v1371_v9 = vpop.f32.mrf.mxu0 }
 0x316   : > { %v1372_v13 = vadd.f32 %v13655_v22, %v1371_v9  ;;  %1437 = vrot.lane.b32.xlu1 %v1394_v12, %s21637_s4  ;;  %1439 = vrot.lane.b32.xlu0 %v1395_v16, %s21637_s4  ;;  %v1398_v21 = vmax.f32 %v1380_v19, 0.0  ;;  %v15964_v16 = vld [vmem:[%s21738_s10] sm:$0xff]  }
 0x318   : > { %v1396_v20 = vmax.f32 %v1372_v13, 0.0 }
 0x31a   : > { %1441 = vrot.lane.b32.xlu1 %v1396_v20, %s21637_s4  ;;  %1443 = vrot.lane.b32.xlu0 %v1397_v14, %s21637_s4 }
 0x31e   : > { %1445 = vrot.lane.b32.xlu1 %v1398_v21, %s21637_s4  ;;  %s21672_s4 = smov 120  }
 0x36d   : > { %v1416_v24 = vpop.permute.xlu0 %1415 }
 0x36e   : > { %v17072_v27 = vsel %vm1261_vm5, %v16943_v25, %v1416_v24 }
 0x36f   : > { %21720 = vst [vmem:[#allocation3_spill] sm:$0xff] %v17072_v27 }
 0x371   : > { %v1418_v26 = vpop.permute.xlu1 %1417  ;;  %v1420_v29 = vpop.permute.xlu0 %1419 }
 0x372   : > { %v17076_v28 = vsel %vm1261_vm5, %v16948_v0, %v1418_v26  ;;  %v17084_v31 = vsel %vm1261_vm5, %v16953_v4, %v1420_v29 }
 0x373   : > { %21721 = vst [vmem:[#allocation4_spill] sm:$0xff] %v17076_v28  ;;  %v1481_v22 = vpack.c.bf16 %v17076_v28, %v17072_v27  ;;  %21722 = vst [vmem:[#allocation5_spill] sm:$0xff] %v17084_v31 }
 0x375   : > { %v1422_v30 = vpop.permute.xlu1 %1421  ;;  %14564 = vmatprep.mubr.msk.bf16.mxu1 %vm1505_vm6, %v1481_v22  ;;  %14584 = vmatprep.mubr.msk.bf16.mxu0 %vm1505_vm6, %v1481_v22 }
 0x376   : > { %v17088_v25 = vsel %vm1261_vm5, %v16938_v58, %v1422_v30 }
 0x377   : > { %21723 = vst [vmem:[#allocation6_spill] sm:$0xff] %v17088_v25  ;;  %v1482_v0 = vpack.c.bf16 %v17088_v25, %v17084_v31 }
 0x378   : > { %v1424_v32 = vpop.permute.xlu0 %1423 }
 0x379   : > { %14565 = vmatmul.mubr.msk.bf16.vlgmr.msra.gmra.mxu1 %vm1505_vm6, %v1482_v0  ;;  %14585 = vmatmul.mubr.msk.bf16.vlgmr.msra.gmra.mxu0 %vm1505_vm6, %v1482_v0  ;;  %v17096_v35 = vsel %vm1261_vm5, %v16964_v39, %v1424_v32 }
 0x37a   : > { %21724 = vst [vmem:[#allocation7_spill] sm:$0xff] %v17096_v35  ;;  %14601 = vmatpush3.bf16.msra.mxu1 %v15959_v41 }
 0x37c   : > { %v1426_v33 = vpop.permute.xlu1 %1425  ;;  %v1428_v34 = vpop.permute.xlu0 %1427 }
 0x37d   : > { %v17100_v4 = vsel %vm1261_vm5, %v16969_v46, %v1426_v33  ;;  %v17108_v42 = vsel %vm1261_vm5, %v16977_v11, %v1428_v34 }
 0x37e   : > { %21725 = vst [vmem:[#allocation8_spill] sm:$0xff] %v17100_v4  ;;  %v1483_v58 = vpack.c.bf16 %v17100_v4, %v17096_v35  ;;  %21726 = vst [vmem:[#allocation9_spill] sm:$0xff] %v17108_v42 }
 0x380   : > { %v1430_v38 = vpop.permute.xlu1 %1429  ;;  %14568 = vmatprep.mubr.msk.bf16.mxu1 %vm1505_vm6, %v1483_v58  ;;  %14588 = vmatprep.mubr.msk.bf16.mxu0 %vm1505_vm6, %v1483_v58  ;;  %v1432_v40 = vpop.permute.xlu0 %1431 }
 0x381   : > { %v17112_v39 = vsel %vm1261_vm5, %v16982_v56, %v1430_v38  ;;  %v17120_v49 = vsel %vm1261_vm5, %v16990_v17, %v1432_v40 }
 0x382   : > { %21727 = vst [vmem:[#allocation10_spill] sm:$0xff] %v17112_v39  ;;  %v1484_v46 = vpack.c.bf16 %v17112_v39, %v17108_v42  ;;  %21728 = vst [vmem:[#allocation11_spill] sm:$0xff] %v17120_v49 }
 0x384   : > { %v1434_v44 = vpop.permute.xlu1 %1433  ;;  %14569 = vmatmul.mubr.msk.bf16.gmra.mxu1 %vm1505_vm6, %v1484_v46  ;;  %14589 = vmatmul.mubr.msk.bf16.gmra.mxu0 %vm1505_vm6, %v1484_v46  ;;  %v1436_v47 = vpop.permute.xlu0 %1435 }
 0x385   : > { %v17124_v11 = vsel %vm1261_vm5, %v16995_v59, %v1434_v44  ;;  %v17132_v54 = vsel %vm1261_vm5, %v17003_v18, %v1436_v47 }
 0x386   : > { %21729 = vst [vmem:[#allocation12_spill] sm:$0xff] %v17124_v11  ;;  %v1485_v56 = vpack.c.bf16 %v17124_v11, %v17120_v49  ;;  %21730 = vst [vmem:[#allocation13_spill] sm:$0xff] %v17132_v54 }
 0x388   : > { %v1438_v50 = vpop.permute.xlu1 %1437  ;;  %14572 = vmatprep.mubr.msk.bf16.mxu1 %vm1505_vm6, %v1485_v56  ;;  %14592 = vmatprep.mubr.msk.bf16.mxu0 %vm1505_vm6, %v1485_v56  ;;  %v1440_v53 = vpop.permute.xlu0 %1439 }
 0x389   : > { %v17136_v17 = vsel %vm1261_vm5, %v17008_v51, %v1438_v50  ;;  %v17144_v60 = vsel %vm1261_vm5, %v17016_v63, %v1440_v53 }
 0x38a   : > { %21731 = vst [vmem:[#allocation14_spill] sm:$0xff] %v17136_v17  ;;  %v1486_v59 = vpack.c.bf16 %v17136_v17, %v17132_v54  ;;  %21732 = vst [vmem:[#allocation15_spill] sm:$0xff] %v17144_v60 }
 0x38c   : > { %v1442_v55 = vpop.permute.xlu1 %1441  ;;  %14573 = vmatmul.mubr.msk.bf16.gmra.mxu1 %vm1505_vm6, %v1486_v59  ;;  %14593 = vmatmul.mubr.msk.bf16.gmra.mxu0 %vm1505_vm6, %v1486_v59  ;;  %v1444_v37 = vpop.permute.xlu0 %1443 }
 0x38d   : > { %v17148_v18 = vsel %vm1261_vm5, %v17021_v10, %v1442_v55  ;;  %v17156_v43 = vsel %vm1261_vm5, %v17029_v23, %v1444_v37  ;;  %v15960_v23 = vld [vmem:[%s21737_s1 + $0x8] sm:$0xff]  }
 0x38e   : > { %21733 = vst [vmem:[#allocation16_spill] sm:$0xff] %v17148_v18  ;;  %v1487_v51 = vpack.c.bf16 %v17148_v18, %v17144_v60  ;;  %21734 = vst [vmem:[#allocation17_spill] sm:$0xff] %v17156_v43  ;;  %14620 = vmatprep.subr.bf16.mxu0 %v15960_v23 }
 0x38f   : > { %14621 = vmatpush3.bf16.msra.mxu0 %v15960_v23 }
 0x390   : > { %v1446_v36 = vpop.permute.xlu1 %1445  ;;  %14576 = vmatprep.mubr.msk.bf16.mxu1 %vm1505_vm6, %v1487_v51  ;;  %14596 = vmatprep.mubr.msk.bf16.mxu0 %vm1505_vm6, %v1487_v51 }
 0x391   : > { %v17160_v63 = vsel %vm1261_vm5, %v17034_v8, %v1446_v36  ;;  %v15961_v8 = vld [vmem:[%s21736_s0] sm:$0xff]   ;;  %14622 = vmatprep.subr.bf16.mxu0 %v15962_v45 }
 0x392   : > { %21735 = vst [vmem:[#allocation18_spill] sm:$0xff] %v17160_v63  ;;  %v1488_v10 = vpack.c.bf16 %v17160_v63, %v17156_v43  ;;  %14602 = vmatprep.subr.bf16.mxu1 %v15961_v8 }
 0x393   : > { %14603 = vmatpush3.bf16.msra.mxu1 %v15961_v8  ;;  %14623 = vmatpush3.bf16.msra.mxu0 %v15962_v45 }
 0x394   : > { %14577 = vmatmul.mubr.msk.bf16.gmra.mxu1 %vm1505_vm6, %v1488_v10  ;;  %14597 = vmatmul.mubr.msk.bf16.gmra.mxu0 %vm1505_vm6, %v1488_v10 }
 0x395   : > { %14640 = vmatprep.subr.bf16.mxu1 %v15963_v48 }
 0x439   : > { %v14566_v6 = vpop.f32.mrf.mxu1  ;;  %v14586_v7 = vpop.f32.mrf.mxu0 }
 0x43b   : > { %v1564_v62 = vpop.f32.mrf.mxu1  ;;  %v1677_v2 = vpop.f32.mrf.mxu0 }
 0x43d   : > { %v14567_v3 = vpop.f32.mrf.mxu1  ;;  %v14587_v57 = vpop.f32.mrf.mxu0 }
 0x43e   : > { %v1741_v12 = vpack.c.bf16 %v14567_v3, %v14566_v6  ;;  %v1749_v15 = vpack.c.bf16 %v14587_v57, %v14586_v7  ;;  %v21639_v7 = vmov 0.0   ;;  %v17217_v3 = vld [vmem:[%s21616_s13] ss:$0 sm:$0xff] }
 0x43f   : > { %v1567_v1 = vpop.f32.mrf.mxu1  ;;  %v1680_v5 = vpop.f32.mrf.mxu0  ;;  %14660 = vmatprep.subr.bf16.mxu0 %v21639_v7 }
 0x440   : > { %v1740_v52 = vpack.c.bf16 %v1567_v1, %v1564_v62  ;;  %v1748_v61 = vpack.c.bf16 %v1680_v5, %v1677_v2 }
 0x442   : > { %14604 = vmatprep.mubr.msk.bf16.mxu1 %vm1505_vm6, %v1740_v52  ;;  %14624 = vmatprep.mubr.msk.bf16.mxu0 %vm1505_vm6, %v1748_v61 }
 0x443   : > { %14605 = vmatmul.mubr.msk.bf16.vlgmr.msra.gmra.mxu1 %vm1505_vm6, %v1741_v12  ;;  %14625 = vmatmul.mubr.msk.bf16.vlgmr.msra.gmra.mxu0 %vm1505_vm6, %v1749_v15 }
 0x444   : > { %v14570_v9 = vpop.f32.mrf.mxu1  ;;  %v14590_v13 = vpop.f32.mrf.mxu0  ;;  %14641 = vmatpush3.bf16.msra.mxu1 %v15963_v48 }
 0x445   : > { %14642 = vmatprep.subr.bf16.mxu1 %v15964_v16 }
 0x446   : > { %v1580_v14 = vpop.f32.mrf.mxu1  ;;  %v1693_v19 = vpop.f32.mrf.mxu0 }
 0x448   : > { %v14571_v20 = vpop.f32.mrf.mxu1  ;;  %v14591_v21 = vpop.f32.mrf.mxu0  ;;  %14643 = vmatpush3.bf16.msra.mxu1 %v15964_v16 }
 0x449   : > { %v1743_v30 = vpack.c.bf16 %v14571_v20, %v14570_v9  ;;  %v1751_v0 = vpack.c.bf16 %v14591_v21, %v14590_v13  ;;  %14666 = vmatprep.subr.bf16.mxu1 %v21639_v7  ;;  %v17232_v21 = vld [vmem:[%s21615_s12] ss:$0 sm:$0xff] }
 0x44a   : > { %v1583_v24 = vpop.f32.mrf.mxu1  ;;  %v1696_v26 = vpop.f32.mrf.mxu0 }
 0x44b   : > { %v1742_v22 = vpack.c.bf16 %v1583_v24, %v1580_v14  ;;  %v1750_v29 = vpack.c.bf16 %v1696_v26, %v1693_v19 }
 0x44c   : > { %v14574_v32 = vpop.f32.mrf.mxu1  ;;  %v14594_v33 = vpop.f32.mrf.mxu0 }
 0x44d   : > { %14608 = vmatprep.mubr.msk.bf16.mxu1 %vm1505_vm6, %v1742_v22  ;;  %14628 = vmatprep.mubr.msk.bf16.mxu0 %vm1505_vm6, %v1750_v29 }
 0x44e   : > { %v1596_v34 = vpop.f32.mrf.mxu1  ;;  %v1709_v58 = vpop.f32.mrf.mxu0  ;;  %14609 = vmatmul.mubr.msk.bf16.gmra.mxu1 %vm1505_vm6, %v1743_v30  ;;  %14629 = vmatmul.mubr.msk.bf16.gmra.mxu0 %vm1505_vm6, %v1751_v0 }
 0x450   : > { %v14575_v38 = vpop.f32.mrf.mxu1  ;;  %v14595_v40 = vpop.f32.mrf.mxu0 }
 0x451   : > { %v1745_v50 = vpack.c.bf16 %v14575_v38, %v14574_v32  ;;  %v1753_v53 = vpack.c.bf16 %v14595_v40, %v14594_v33 }
 0x452   : > { %v1599_v46 = vpop.f32.mrf.mxu1  ;;  %v1712_v44 = vpop.f32.mrf.mxu0 }
 0x453   : > { %v1744_v47 = vpack.c.bf16 %v1599_v46, %v1596_v34  ;;  %v1752_v56 = vpack.c.bf16 %v1712_v44, %v1709_v58 }
 0x454   : > { %v14578_v59 = vpop.f32.mrf.mxu1  ;;  %v14598_v55 = vpop.f32.mrf.mxu0 }
 0x455   : > { %14612 = vmatprep.mubr.msk.bf16.mxu1 %vm1505_vm6, %v1744_v47  ;;  %14632 = vmatprep.mubr.msk.bf16.mxu0 %vm1505_vm6, %v1752_v56 }
 0x456   : > { %v1612_v51 = vpop.f32.mrf.mxu1  ;;  %v1725_v37 = vpop.f32.mrf.mxu0  ;;  %14613 = vmatmul.mubr.msk.bf16.gmra.mxu1 %vm1505_vm6, %v1745_v50  ;;  %14633 = vmatmul.mubr.msk.bf16.gmra.mxu0 %vm1505_vm6, %v1753_v53 }
 0x458   : > { %v14579_v36 = vpop.f32.mrf.mxu1  ;;  %v14599_v10 = vpop.f32.mrf.mxu0 }
 0x459   : > { %v1747_v48 = vpack.c.bf16 %v14579_v36, %v14578_v59  ;;  %v1755_v6 = vpack.c.bf16 %v14599_v10, %v14598_v55 }
 0x45a   : > { %v1615_v41 = vpop.f32.mrf.mxu1  ;;  %v1728_v23 = vpop.f32.mrf.mxu0 }
 0x45b   : > { %v1746_v8 = vpack.c.bf16 %v1615_v41, %v1612_v51  ;;  %v1754_v45 = vpack.c.bf16 %v1728_v23, %v1725_v37 }
 0x45d   : > { %14616 = vmatprep.mubr.msk.bf16.mxu1 %vm1505_vm6, %v1746_v8  ;;  %14636 = vmatprep.mubr.msk.bf16.mxu0 %vm1505_vm6, %v1754_v45 }
 0x45e   : > { %14617 = vmatmul.mubr.msk.bf16.gmra.mxu1 %vm1505_vm6, %v1747_v48  ;;  %14637 = vmatmul.mubr.msk.bf16.gmra.mxu0 %vm1505_vm6, %v1755_v6 }
 0x45f   : > { %14644 = vmatprep.mubr.msk.bf16.mxu1 %vm1505_vm6, %v1748_v61  ;;  %14662 = vmatprep.mubr.msk.bf16.mxu0 %vm16647_vm7, %v21639_v7 }
 0x466   : > { %14645 = vmatmul.mubr.msk.bf16.vlgmr.msra.gmra.mxu1 %vm1505_vm6, %v1749_v15 }
 0x467   : > { %14648 = vmatprep.mubr.msk.bf16.mxu1 %vm1505_vm6, %v1750_v29 }
 0x46e   : > { %14649 = vmatmul.mubr.msk.bf16.gmra.mxu1 %vm1505_vm6, %v1751_v0 }
 0x46f   : > { %14652 = vmatprep.mubr.msk.bf16.mxu1 %vm1505_vm6, %v1752_v56 }
 0x476   : > { %14653 = vmatmul.mubr.msk.bf16.gmra.mxu1 %vm1505_vm6, %v1753_v53 }
 0x477   : > { %14656 = vmatprep.mubr.msk.bf16.mxu1 %vm1505_vm6, %v1754_v45 }
 0x47e   : > { %14657 = vmatmul.mubr.msk.bf16.gmra.mxu1 %vm1505_vm6, %v1755_v6 }
 0x47f   : > { %14668 = vmatprep.mubr.msk.bf16.mxu1 %vm16647_vm7, %v21639_v7 }
 0x503   : > { %v14606_v62 = vpop.f32.mrf.mxu1  ;;  %v14626_v2 = vpop.f32.mrf.mxu0 }
 0x504   : > { %v1990_v52 = vadd.f32 %v14626_v2, %v17217_v3  ;;  %v1846_v30 = vadd.f32 %v14606_v62, %v17232_v21 }
 0x505   : > { %v1837_v57 = vpop.f32.mrf.mxu1  ;;  %v1981_v1 = vpop.f32.mrf.mxu0 }
 0x506   : > { %v1982_v16 = vadd.f32 %v17217_v3, %v1981_v1  ;;  %v1838_v34 = vadd.f32 %v17232_v21, %v1837_v57 }
 0x507   : > { %v14627_v5 = vpop.f32.mrf.mxu0  ;;  %v14607_v61 = vpop.f32.mrf.mxu1 }
 0x508   : > { %v1993_v12 = vadd.f32 %v14627_v5, %v17217_v3  ;;  %v1849_v24 = vadd.f32 %v14607_v61, %v17232_v21 }
 0x509   : > { %v1984_v15 = vpop.f32.mrf.mxu0  ;;  %v1840_v14 = vpop.f32.mrf.mxu1 }
 0x50a   : > { %v17222_v9 = vpack.c.bf16 %v1993_v12, %v1990_v52  ;;  %v1985_v13 = vadd.f32 %v17217_v3, %v1984_v15  ;;  %v1841_v0 = vadd.f32 %v17232_v21, %v1840_v14  ;;  %v17242_v58 = vpack.c.bf16 %v1849_v24, %v1846_v30 }
 0x50c   : > { %v17225_v19 = vpack.c.bf16 %v1985_v13, %v1982_v16  ;;  %v2239_v20 = vsel %vm1016_vm4, %v17222_v9, 0  ;;  %v17246_v47 = vpack.c.bf16 %v1841_v0, %v1838_v34 }
 0x50d   : > { %14667 = vmatpush3.bf16.xpose.msra.mxu1 %v2239_v20 }
 0x50e   : > { %v14610_v26 = vpop.f32.mrf.mxu1  ;;  %v14630_v22 = vpop.f32.mrf.mxu0  ;;  %v2192_v29 = vsel %vm1016_vm4, %v17225_v19, 0  ;;  %14678 = vmatprep.subr.bf16.mxu1 %v21639_v7 }
 0x50f   : > { %14661 = vmatpush3.bf16.xpose.msra.mxu0 %v2192_v29  ;;  %v2006_v46 = vadd.f32 %v14630_v22, %v17217_v3  ;;  %v1862_v1 = vadd.f32 %v14610_v26, %v17232_v21 }
 0x510   : > { %v1853_v32 = vpop.f32.mrf.mxu1  ;;  %v1997_v33 = vpop.f32.mrf.mxu0  ;;  %14672 = vmatprep.subr.bf16.mxu0 %v21639_v7 }
 0x511   : > { %v1998_v53 = vadd.f32 %v17217_v3, %v1997_v33  ;;  %v1854_v61 = vadd.f32 %v17232_v21, %v1853_v32 }
 0x512   : > { %v14611_v38 = vpop.f32.mrf.mxu1  ;;  %v14631_v40 = vpop.f32.mrf.mxu0 }
 0x513   : > { %v2009_v44 = vadd.f32 %v14631_v40, %v17217_v3  ;;  %v1865_v45 = vadd.f32 %v14611_v38, %v17232_v21 }
 0x514   : > { %v1856_v56 = vpop.f32.mrf.mxu1  ;;  %v2000_v50 = vpop.f32.mrf.mxu0  ;;  %14669 = vmatmul.mubr.msk.bf16.vlgmr.msra.gmra.mxu1 %vm1016_vm4, %v17242_v58 }
 0x515   : > { %v17251_v59 = vpack.c.bf16 %v2009_v44, %v2006_v46  ;;  %v2001_v55 = vadd.f32 %v17217_v3, %v2000_v50  ;;  %14680 = vmatprep.mubr.msk.bf16.mxu1 %vm16647_vm7, %v21639_v7  ;;  %v1857_v62 = vadd.f32 %v17232_v21, %v1856_v56  ;;  %v17278_v13 = vpack.c.bf16 %v1865_v45, %v1862_v1 }
 0x516   : > { %v14614_v51 = vpop.f32.mrf.mxu1  ;;  %v14634_v37 = vpop.f32.mrf.mxu0  ;;  %14663 = vmatmul.mubr.msk.bf16.vlgmr.msra.gmra.mxu0 %vm1016_vm4, %v17246_v47 }
 0x517   : > { %v17258_v36 = vpack.c.bf16 %v2001_v55, %v1998_v53  ;;  %14674 = vmatprep.mubr.msk.bf16.mxu0 %vm16647_vm7, %v21639_v7  ;;  %v2333_v23 = vsel %vm1016_vm4, %v17251_v59, 0  ;;  %v2022_v2 = vadd.f32 %v14634_v37, %v17217_v3  ;;  %v17280_v24 = vpack.c.bf16 %v1857_v62, %v1854_v61 }
 0x518   : > { %v1869_v10 = vpop.f32.mrf.mxu1  ;;  %v2013_v41 = vpop.f32.mrf.mxu0  ;;  %14679 = vmatpush3.bf16.xpose.msra.mxu1 %v2333_v23  ;;  %v1878_v44 = vadd.f32 %v14614_v51, %v17232_v21 }
 0x519   : > { %v2286_v8 = vsel %vm1016_vm4, %v17258_v36, 0  ;;  %14690 = vmatprep.subr.bf16.mxu1 %v21639_v7  ;;  %v2014_v12 = vadd.f32 %v17217_v3, %v2013_v41  ;;  %v1870_v53 = vadd.f32 %v17232_v21, %v1869_v10  ;;  %v13707_v10 = vld [vmem:[%s21617_s14] ss:$0 sm:$0xff] }
 0x51a   : > { %v14615_v48 = vpop.f32.mrf.mxu1  ;;  %v14635_v6 = vpop.f32.mrf.mxu0  ;;  %14673 = vmatpush3.bf16.xpose.msra.mxu0 %v2286_v8 }
 0x51b   : > { %v2025_v57 = vadd.f32 %v14635_v6, %v17217_v3  ;;  %14684 = vmatprep.subr.bf16.mxu0 %v21639_v7  ;;  %v1881_v32 = vadd.f32 %v14615_v48, %v17232_v21 }
 0x51c   : > { %v1872_v5 = vpop.f32.mrf.mxu1  ;;  %v2016_v52 = vpop.f32.mrf.mxu0 }
 0x51d   : > { %v17275_v15 = vpack.c.bf16 %v2025_v57, %v2022_v2  ;;  %v2017_v16 = vadd.f32 %v17217_v3, %v2016_v52  ;;  %v1873_v38 = vadd.f32 %v17232_v21, %v1872_v5  ;;  %v17308_v23 = vpack.c.bf16 %v1881_v32, %v1878_v44 }
 0x51e   : > { %v14618_v14 = vpop.f32.mrf.mxu1  ;;  %v14638_v20 = vpop.f32.mrf.mxu0 }
 0x51f   : > { %v17282_v22 = vpack.c.bf16 %v2017_v16, %v2014_v12  ;;  %14681 = vmatmul.mubr.msk.bf16.vlgmr.msra.gmra.mxu1 %vm1016_vm4, %v17278_v13  ;;  %v2427_v30 = vsel %vm1016_vm4, %v17275_v15, 0  ;;  %v2038_v40 = vadd.f32 %v14638_v20, %v17217_v3  ;;  %v17310_v45 = vpack.c.bf16 %v1873_v38, %v1870_v53 }
 0x520   : > { %v1885_v26 = vpop.f32.mrf.mxu1  ;;  %v2029_v29 = vpop.f32.mrf.mxu0  ;;  %14691 = vmatpush3.bf16.xpose.msra.mxu1 %v2427_v30  ;;  %14692 = vmatprep.mubr.msk.bf16.mxu1 %vm16647_vm7, %v21639_v7  ;;  %v1894_v52 = vadd.f32 %v14618_v14, %v17232_v21 }
 0x521   : > { %14675 = vmatmul.mubr.msk.bf16.vlgmr.msra.gmra.mxu0 %vm1016_vm4, %v17280_v24  ;;  %v2380_v0 = vsel %vm1016_vm4, %v17282_v22, 0  ;;  %14702 = vmatprep.subr.bf16.mxu1 %v21639_v7  ;;  %v2030_v55 = vadd.f32 %v17217_v3, %v2029_v29  ;;  %v1886_v12 = vadd.f32 %v17232_v21, %v1885_v26 }
 0x522   : > { %v14619_v33 = vpop.f32.mrf.mxu1  ;;  %v14639_v34 = vpop.f32.mrf.mxu0  ;;  %14685 = vmatpush3.bf16.xpose.msra.mxu0 %v2380_v0  ;;  %14686 = vmatprep.mubr.msk.bf16.mxu0 %vm16647_vm7, %v21639_v7 }
 0x523   : > { %v2041_v46 = vadd.f32 %v14639_v34, %v17217_v3  ;;  %14696 = vmatprep.subr.bf16.mxu0 %v21639_v7  ;;  %v1897_v62 = vadd.f32 %v14619_v33, %v17232_v21 }
 0x524   : > { %v1888_v56 = vpop.f32.mrf.mxu1  ;;  %v2032_v50 = vpop.f32.mrf.mxu0 }
 0x525   : > { %v17305_v37 = vpack.c.bf16 %v2041_v46, %v2038_v40  ;;  %v2033_v41 = vadd.f32 %v17217_v3, %v2032_v50  ;;  %v1889_v57 = vadd.f32 %v17232_v21, %v1888_v56  ;;  %v17337_v30 = vpack.c.bf16 %v1897_v62, %v1894_v52 }
 0x526   : > { %v14646_v8 = vpop.f32.mrf.mxu1 }
 0x527   : > { %v17312_v48 = vpack.c.bf16 %v2033_v41, %v2030_v55  ;;  %v2521_v51 = vsel %vm1016_vm4, %v17305_v37, 0  ;;  %14693 = vmatmul.mubr.msk.bf16.vlgmr.msra.gmra.mxu1 %vm1016_vm4, %v17308_v23  ;;  %v2110_v1 = vadd.f32 %v14646_v8, %v13707_v10  ;;  %v17339_v32 = vpack.c.bf16 %v1889_v57, %v1886_v12 }
 0x528   : > { %v2101_v6 = vpop.f32.mrf.mxu1  ;;  %14703 = vmatpush3.bf16.xpose.msra.mxu1 %v2521_v51  ;;  %14704 = vmatprep.mubr.msk.bf16.mxu1 %vm16647_vm7, %v21639_v7 }
 0x529   : > { %14687 = vmatmul.mubr.msk.bf16.vlgmr.msra.gmra.mxu0 %vm1016_vm4, %v17310_v45  ;;  %v2474_v3 = vsel %vm1016_vm4, %v17312_v48, 0  ;;  %14714 = vmatprep.subr.bf16.mxu1 %v21639_v7  ;;  %v2102_v16 = vadd.f32 %v13707_v10, %v2101_v6 }
 0x52a   : > { %v14647_v2 = vpop.f32.mrf.mxu1  ;;  %14697 = vmatpush3.bf16.xpose.msra.mxu0 %v2474_v3  ;;  %14698 = vmatprep.mubr.msk.bf16.mxu0 %vm16647_vm7, %v21639_v7 }
 0x52b   : > { %v2113_v5 = vadd.f32 %v14647_v2, %v13707_v10  ;;  %14708 = vmatprep.subr.bf16.mxu0 %v21639_v7 }
 0x52c   : > { %v2104_v61 = vpop.f32.mrf.mxu1 }
 0x52d   : > { %v17335_v20 = vpack.c.bf16 %v2113_v5, %v2110_v1  ;;  %v2105_v29 = vadd.f32 %v13707_v10, %v2104_v61 }
 0x52e   : > { %v14650_v0 = vpop.f32.mrf.mxu1 }
 0x52f   : > { %v17341_v33 = vpack.c.bf16 %v2105_v29, %v2102_v16  ;;  %v2126_v34 = vadd.f32 %v14650_v0, %v13707_v10  ;;  %14705 = vmatmul.mubr.msk.bf16.vlgmr.msra.gmra.mxu1 %vm1016_vm4, %v17337_v30 }
 0x530   : > { %v2117_v14 = vpop.f32.mrf.mxu1  ;;  %14715 = vmatpush3.bf16.msra.mxu1 %v17335_v20  ;;  %14716 = vmatprep.mubr.msk.bf16.mxu1 %vm16647_vm7, %v21639_v7 }
 0x531   : > { %v2118_v38 = vadd.f32 %v13707_v10, %v2117_v14  ;;  %14699 = vmatmul.mubr.msk.bf16.vlgmr.msra.gmra.mxu0 %vm1016_vm4, %v17339_v32  ;;  %14726 = vmatprep.subr.bf16.mxu1 %v21639_v7 }
 0x532   : > { %v14651_v21 = vpop.f32.mrf.mxu1  ;;  %14709 = vmatpush3.bf16.msra.mxu0 %v17341_v33  ;;  %14710 = vmatprep.mubr.msk.bf16.mxu0 %vm16647_vm7, %v21639_v7 }
 0x533   : > { %v2129_v26 = vadd.f32 %v14651_v21, %v13707_v10  ;;  %14720 = vmatprep.subr.bf16.mxu0 %v21639_v7 }
 0x534   : > { %v2120_v40 = vpop.f32.mrf.mxu1 }
 0x535   : > { %v17355_v46 = vpack.c.bf16 %v2129_v26, %v2126_v34  ;;  %v2121_v44 = vadd.f32 %v13707_v10, %v2120_v40 }
 0x536   : > { %v14654_v56 = vpop.f32.mrf.mxu1 }
 0x537   : > { %v17357_v50 = vpack.c.bf16 %v2121_v44, %v2118_v38  ;;  %v2142_v53 = vadd.f32 %v14654_v56, %v13707_v10 }
 0x538   : > { %v2133_v55 = vpop.f32.mrf.mxu1 }
 0x539   : > { %v2134_v41 = vadd.f32 %v13707_v10, %v2133_v55 }
 0x53a   : > { %v14655_v8 = vpop.f32.mrf.mxu1 }
 0x53b   : > { %v2145_v51 = vadd.f32 %v14655_v8, %v13707_v10 }
 0x53c   : > { %v2136_v6 = vpop.f32.mrf.mxu1 }
 0x53d   : > { %v17359_v3 = vpack.c.bf16 %v2145_v51, %v2142_v53  ;;  %v2137_v62 = vadd.f32 %v13707_v10, %v2136_v6 }
 0x53e   : > { %v14658_v2 = vpop.f32.mrf.mxu1 }
 0x53f   : > { %v17361_v57 = vpack.c.bf16 %v2137_v62, %v2134_v41  ;;  %v2158_v1 = vadd.f32 %v14658_v2, %v13707_v10 }
 0x540   : > { %v2149_v5 = vpop.f32.mrf.mxu1 }
 0x541   : > { %v2150_v52 = vadd.f32 %v13707_v10, %v2149_v5 }
 0x542   : > { %v14659_v61 = vpop.f32.mrf.mxu1 }
 0x543   : > { %v2161_v12 = vadd.f32 %v14659_v61, %v13707_v10 }
 0x544   : > { %v2152_v16 = vpop.f32.mrf.mxu1 }
 0x545   : > { %v17363_v29 = vpack.c.bf16 %v2161_v12, %v2158_v1  ;;  %v2153_v0 = vadd.f32 %v13707_v10, %v2152_v16 }
 0x547   : > { %v17365_v34 = vpack.c.bf16 %v2153_v0, %v2150_v52 }
 0x5d4   : > { %v2275_v14 = vpop.f32.mrf.mxu1 }
 0x5d5   : > { %v17369_v56 = vmul.f32 0.35355338, %v2275_v14 }
 0x5d6   : > { %v2228_v38 = vpop.f32.mrf.mxu0  ;;  %v14670_v21 = vpop.f32.mrf.mxu1 }
 0x5d7   : > { %v17367_v26 = vmul.f32 0.35355338, %v2228_v38  ;;  %v2586_v62 = vsel %vm1261_vm5, %v17369_v56, -inf }
 0x5d8   : > { %v14664_v40 = vpop.f32.mrf.mxu0  ;;  %v2278_v44 = vpop.f32.mrf.mxu1 }
 0x5d9   : > { %v2580_v53 = vsel %vm1261_vm5, %v17367_v26, -inf  ;;  %v17375_v51 = vmul.f32 0.35355338, %v2278_v44 }
 0x5da   : > { %2581 = vmax.xlane.f32.xlu0 %v2580_v53  ;;  %v2231_v55 = vpop.f32.mrf.mxu0  ;;  %v14671_v41 = vpop.f32.mrf.mxu1 }
 0x5db   : > { %v17373_v8 = vmul.f32 0.35355338, %v2231_v55  ;;  %v2589_v5 = vsel %vm1261_vm5, %v17375_v51, -inf }
 0x5dc   : > { %v14665_v10 = vpop.f32.mrf.mxu0 }
 0x5dd   : > { %v2583_v6 = vsel %vm1261_vm5, %v17373_v8, -inf }
 0x5de   : > { %2584 = vmax.xlane.f32.xlu1 %v2583_v6  ;;  %2587 = vmax.xlane.f32.xlu0 %v2586_v62 }
 0x5df   : > { %v2369_v2 = vpop.f32.mrf.mxu1 }
 0x5e0   : > { %v17385_v16 = vmul.f32 0.35355338, %v2369_v2 }
 0x5e1   : > { %v2322_v1 = vpop.f32.mrf.mxu0  ;;  %v14682_v61 = vpop.f32.mrf.mxu1 }
 0x5e2   : > { %v17383_v52 = vmul.f32 0.35355338, %v2322_v1  ;;  %2590 = vmax.xlane.f32.xlu0 %v2589_v5  ;;  %v2598_v10 = vsel %vm1261_vm5, %v17385_v16, -inf }
 0x5e3   : > { %v14676_v12 = vpop.f32.mrf.mxu0  ;;  %v2372_v0 = vpop.f32.mrf.mxu1 }
 0x5e4   : > { %v2592_v14 = vsel %vm1261_vm5, %v17383_v52, -inf  ;;  %v17391_v53 = vmul.f32 0.35355338, %v2372_v0 }
 0x5e5   : > { %2593 = vmax.xlane.f32.xlu1 %v2592_v14  ;;  %v2325_v38 = vpop.f32.mrf.mxu0  ;;  %v14683_v40 = vpop.f32.mrf.mxu1 }
 0x5e6   : > { %v17389_v21 = vmul.f32 0.35355338, %v2325_v38  ;;  %v2601_v0 = vsel %vm1261_vm5, %v17391_v53, -inf }
 0x5e7   : > { %v14677_v44 = vpop.f32.mrf.mxu0  ;;  %v2463_v55 = vpop.f32.mrf.mxu1 }
 0x5e8   : > { %v2595_v41 = vsel %vm1261_vm5, %v17389_v21, -inf  ;;  %v17399_v5 = vmul.f32 0.35355338, %v2463_v55 }
 0x5e9   : > { %v2416_v6 = vpop.f32.mrf.mxu0  ;;  %2596 = vmax.xlane.f32.xlu0 %v2595_v41  ;;  %2599 = vmax.xlane.f32.xlu1 %v2598_v10  ;;  %v14694_v2 = vpop.f32.mrf.mxu1 }
 0x5ea   : > { %v17397_v62 = vmul.f32 0.35355338, %v2416_v6  ;;  %v2610_v6 = vsel %vm1261_vm5, %v17399_v5, -inf }
 0x5eb   : > { %v14688_v1 = vpop.f32.mrf.mxu0  ;;  %v2466_v61 = vpop.f32.mrf.mxu1 }
 0x5ec   : > { %v2604_v12 = vsel %vm1261_vm5, %v17397_v62, -inf  ;;  %v17407_v41 = vmul.f32 0.35355338, %v2466_v61 }
 0x5ed   : > { %v2419_v14 = vpop.f32.mrf.mxu0  ;;  %2605 = vmax.xlane.f32.xlu1 %v2604_v12  ;;  %2602 = vmax.xlane.f32.xlu0 %v2601_v0  ;;  %v14695_v40 = vpop.f32.mrf.mxu1 }
 0x5ee   : > { %v17405_v38 = vmul.f32 0.35355338, %v2419_v14  ;;  %v2613_v61 = vsel %vm1261_vm5, %v17407_v41, -inf }
 0x5ef   : > { %v14689_v44 = vpop.f32.mrf.mxu0  ;;  %v2557_v10 = vpop.f32.mrf.mxu1 }
 0x5f0   : > { %v2607_v55 = vsel %vm1261_vm5, %v17405_v38, -inf  ;;  %v17415_v14 = vmul.f32 0.35355338, %v2557_v10 }
 0x5f1   : > { %2608 = vmax.xlane.f32.xlu0 %v2607_v55  ;;  %2611 = vmax.xlane.f32.xlu1 %v2610_v6  ;;  %v2510_v2 = vpop.f32.mrf.mxu0  ;;  %v14706_v12 = vpop.f32.mrf.mxu1 }
 0x5f2   : > { %v17413_v1 = vmul.f32 0.35355338, %v2510_v2  ;;  %v2622_v10 = vsel %vm1261_vm5, %v17415_v14, -inf }
 0x5f3   : > { %v14700_v0 = vpop.f32.mrf.mxu0  ;;  %v2560_v40 = vpop.f32.mrf.mxu1 }
 0x5f4   : > { %v2616_v44 = vsel %vm1261_vm5, %v17413_v1, -inf  ;;  %v17423_v2 = vmul.f32 0.35355338, %v2560_v40 }
 0x5f5   : > { %2614 = vmax.xlane.f32.xlu0 %v2613_v61  ;;  %2617 = vmax.xlane.f32.xlu1 %v2616_v44  ;;  %v2513_v7 = vpop.f32.mrf.mxu0  ;;  %v14707_v63 = vpop.f32.mrf.mxu1 }
 0x5f6   : > { %v17421_v55 = vmul.f32 0.35355338, %v2513_v7  ;;  %v2625_v0 = vsel %vm1261_vm5, %v17423_v2, -inf }
 0x5f7   : > { %v14701_v6 = vpop.f32.mrf.mxu0 }
 0x5f8   : > { %v2619_v12 = vsel %vm1261_vm5, %v17421_v55, -inf }
 0x5f9   : > { %2623 = vmax.xlane.f32.xlu1 %v2622_v10  ;;  %2620 = vmax.xlane.f32.xlu0 %v2619_v12 }
 0x5fd   : > { %2626 = vmax.xlane.f32.xlu0 %v2625_v0 }
 0x60a   : > { %3120 = vrot.lane.b32.xlu1 %v17225_v19, %s21672_s4 }
 0x663   : > { %v2582_v63 = vpop.xlane.xlu0 %2581 }
 0x664   : > { %v2628_v7 = vsub.f32 %v17367_v26, %v2582_v63 }
 0x666   : > { %v2644_v10 = vmul.f32 1.442695, %v2628_v7 }
 0x667   : > { %v2585_v40 = vpop.xlane.xlu1 %2584  ;;  %v2588_v61 = vpop.xlane.xlu0 %2587 }
 0x668   : > { %v2630_v44 = vsub.f32 %v17369_v56, %v2588_v61  ;;  %v2629_v6 = vsub.f32 %v17373_v8, %v2585_v40 }
 0x66a   : > { %v2648_v18 = vmul.f32 1.442695, %v2630_v44  ;;  %v2646_v0 = vmul.f32 1.442695, %v2629_v6 }
 0x66b   : > { %v2591_v12 = vpop.xlane.xlu0 %2590 }
 0x66c   : > { %v2631_v43 = vsub.f32 %v17375_v51, %v2591_v12  ;;  %15994 = vpow2.f32 %v2648_v18 }
 0x66d   : > { %15996 = vpow2.f32 %v2644_v10 }
 0x66e   : > { %v2650_v60 = vmul.f32 1.442695, %v2631_v43  ;;  %v2594_v17 = vpop.xlane.xlu1 %2593 }
 0x66f   : > { %v2632_v26 = vsub.f32 %v17383_v52, %v2594_v17 }
 0x670   : > { %15998 = vpow2.f32 %v2650_v60 }
 0x671   : > { %16000 = vpow2.f32 %v2646_v0  ;;  %v2652_v8 = vmul.f32 1.442695, %v2632_v26 }
 0x672   : > { %v2597_v63 = vpop.xlane.xlu0 %2596  ;;  %v2600_v11 = vpop.xlane.xlu1 %2599 }
 0x673   : > { %v2634_v56 = vsub.f32 %v17385_v16, %v2600_v11  ;;  %v2633_v7 = vsub.f32 %v17389_v21, %v2597_v63 }
 0x675   : > { %v2656_v61 = vmul.f32 1.442695, %v2634_v56  ;;  %v2654_v60 = vmul.f32 1.442695, %v2633_v7 }
 0x676   : > { %v2606_v40 = vpop.xlane.xlu1 %2605  ;;  %v2603_v44 = vpop.xlane.xlu0 %2602 }
 0x677   : > { %v2635_v18 = vsub.f32 %v17391_v53, %v2603_v44  ;;  %16002 = vpow2.f32 %v2656_v61  ;;  %v2636_v17 = vsub.f32 %v17397_v62, %v2606_v40 }
 0x678   : > { %16004 = vpow2.f32 %v2652_v8 }
 0x679   : > { %v2658_v43 = vmul.f32 1.442695, %v2635_v18  ;;  %v17441_v51 = vpop.eup %15994  ;;  %v2660_v12 = vmul.f32 1.442695, %v2636_v17 }
 0x67a   : > { %v2609_v52 = vpop.xlane.xlu0 %2608  ;;  %v2612_v6 = vpop.xlane.xlu1 %2611  ;;  %v2682_v16 = vsel %vm1261_vm5, %v17441_v51, 0.0 }
 0x67b   : > { %v2638_v11 = vsub.f32 %v17399_v5, %v2612_v6  ;;  %v17447_v21 = vpop.eup %15996  ;;  %16006 = vpow2.f32 %v2658_v43  ;;  %2683 = vadd.xlane.f32.xlu1 %v2682_v16  ;;  %v2637_v0 = vsub.f32 %v17405_v38, %v2609_v52 }
 0x67c   : > { %16008 = vpow2.f32 %v2654_v60  ;;  %v2676_v61 = vsel %vm1261_vm5, %v17447_v21, 0.0 }
 0x67d   : > { %v17449_v53 = vpop.eup %15998  ;;  %v2664_v10 = vmul.f32 1.442695, %v2638_v11  ;;  %v2662_v7 = vmul.f32 1.442695, %v2637_v0 }
 0x67e   : > { %v2615_v26 = vpop.xlane.xlu0 %2614  ;;  %v2618_v62 = vpop.xlane.xlu1 %2617  ;;  %v2685_v63 = vsel %vm1261_vm5, %v17449_v53, 0.0 }
 0x67f   : > { %v17454_v5 = vpop.eup %16000  ;;  %v2639_v56 = vsub.f32 %v17407_v41, %v2615_v26  ;;  %2686 = vadd.xlane.f32.xlu0 %v2685_v63  ;;  %16010 = vpow2.f32 %v2664_v10  ;;  %2677 = vadd.xlane.f32.xlu1 %v2676_v61  ;;  %v2640_v38 = vsub.f32 %v17413_v1, %v2618_v62 }
 0x680   : > { %16012 = vpow2.f32 %v2660_v12  ;;  %v2679_v18 = vsel %vm1261_vm5, %v17454_v5, 0.0 }
 0x681   : > { %v2666_v8 = vmul.f32 1.442695, %v2639_v56  ;;  %v2668_v17 = vmul.f32 1.442695, %v2640_v38 }
 0x682   : > { %v2624_v40 = vpop.xlane.xlu1 %2623  ;;  %v2621_v44 = vpop.xlane.xlu0 %2620 }
 0x683   : > { %16014 = vpow2.f32 %v2666_v8  ;;  %v2642_v43 = vsub.f32 %v17415_v14, %v2624_v40  ;;  %2680 = vadd.xlane.f32.xlu0 %v2679_v18  ;;  %v2641_v52 = vsub.f32 %v17421_v55, %v2621_v44 }
 0x684   : > { %v17463_v41 = vpop.eup %16002  ;;  %16016 = vpow2.f32 %v2662_v7 }
 0x685   : > { %v2672_v60 = vmul.f32 1.442695, %v2642_v43  ;;  %v2694_v6 = vsel %vm1261_vm5, %v17463_v41, 0.0  ;;  %v17468_v11 = vpop.eup %16004  ;;  %v2670_v12 = vmul.f32 1.442695, %v2641_v52 }
 0x686   : > { %v2627_v1 = vpop.xlane.xlu0 %2626  ;;  %2695 = vadd.xlane.f32.xlu1 %v2694_v6  ;;  %v2688_v0 = vsel %vm1261_vm5, %v17468_v11, 0.0 }
 0x687   : > { %16018 = vpow2.f32 %v2672_v60  ;;  %v2643_v16 = vsub.f32 %v17423_v2, %v2627_v1 }
 0x688   : > { %v17471_v10 = vpop.eup %16006  ;;  %16020 = vpow2.f32 %v2668_v17 }
 0x689   : > { %v2674_v14 = vmul.f32 1.442695, %v2643_v16  ;;  %v2697_v55 = vsel %vm1261_vm5, %v17471_v10, 0.0  ;;  %v17477_v26 = vpop.eup %16008  ;;  %v17545_v16 = vpop.permute.xlu1 %3120 }
 0x68a   : > { %2689 = vadd.xlane.f32.xlu1 %v2688_v0  ;;  %2698 = vadd.xlane.f32.xlu0 %v2697_v55  ;;  %v2691_v63 = vsel %vm1261_vm5, %v17477_v26, 0.0 }
 0x68b   : > { %16022 = vpow2.f32 %v2674_v14 }
 0x68c   : > { %v17479_v62 = vpop.eup %16010  ;;  %16024 = vpow2.f32 %v2670_v12 }
 0x68d   : > { %v2706_v2 = vsel %vm1261_vm5, %v17479_v62, 0.0  ;;  %v17485_v56 = vpop.eup %16012 }
 0x68e   : > { %2707 = vadd.xlane.f32.xlu1 %v2706_v2  ;;  %2692 = vadd.xlane.f32.xlu0 %v2691_v63  ;;  %v2700_v7 = vsel %vm1261_vm5, %v17485_v56, 0.0 }
 0x690   : > { %v17487_v61 = vpop.eup %16014 }
 0x691   : > { %v2709_v8 = vsel %vm1261_vm5, %v17487_v61, 0.0  ;;  %v17493_v38 = vpop.eup %16016 }
 0x692   : > { %2701 = vadd.xlane.f32.xlu1 %v2700_v7  ;;  %2710 = vadd.xlane.f32.xlu0 %v2709_v8  ;;  %v2703_v18 = vsel %vm1261_vm5, %v17493_v38, 0.0 }
 0x694   : > { %v17495_v40 = vpop.eup %16018 }
 0x695   : > { %v2718_v44 = vsel %vm1261_vm5, %v17495_v40, 0.0  ;;  %v17501_v43 = vpop.eup %16020 }
 0x696   : > { %2719 = vadd.xlane.f32.xlu1 %v2718_v44  ;;  %2704 = vadd.xlane.f32.xlu0 %v2703_v18  ;;  %v2712_v52 = vsel %vm1261_vm5, %v17501_v43, 0.0 }
 0x698   : > { %v17503_v60 = vpop.eup %16022 }
 0x699   : > { %v2721_v17 = vsel %vm1261_vm5, %v17503_v60, 0.0  ;;  %v17509_v6 = vpop.eup %16024 }
 0x69a   : > { %2713 = vadd.xlane.f32.xlu1 %v2712_v52  ;;  %2722 = vadd.xlane.f32.xlu0 %v2721_v17  ;;  %v2715_v1 = vsel %vm1261_vm5, %v17509_v6, 0.0 }
 0x69e   : > { %2716 = vadd.xlane.f32.xlu0 %v2715_v1 }
 0x6ab   : > { %3117 = vrot.lane.b32.xlu1 %v17246_v47, %s21672_s4 }
 0x6af   : > { %3226 = vrot.lane.b32.xlu1 %v17258_v36, %s21672_s4 }
 0x6b3   : > { %3279 = vrot.lane.b32.xlu1 %v17251_v59, %s21672_s4 }
 0x6b4   : > { %3173 = vrot.lane.b32.xlu0 %v17222_v9, %s21672_s4 }
 0x6b7   : > { %3332 = vrot.lane.b32.xlu1 %v17282_v22, %s21672_s4 }
 0x6b8   : > { %3170 = vrot.lane.b32.xlu0 %v17242_v58, %s21672_s4 }
 0x6bb   : > { %3385 = vrot.lane.b32.xlu1 %v17275_v15, %s21672_s4 }
 0x6bc   : > { %3223 = vrot.lane.b32.xlu0 %v17280_v24, %s21672_s4 }
 0x6bf   : > { %3438 = vrot.lane.b32.xlu1 %v17312_v48, %s21672_s4 }
 0x6c0   : > { %3276 = vrot.lane.b32.xlu0 %v17278_v13, %s21672_s4 }
 0x6c3   : > { %3491 = vrot.lane.b32.xlu1 %v17305_v37, %s21672_s4 }
 0x6c4   : > { %3329 = vrot.lane.b32.xlu0 %v17310_v45, %s21672_s4 }
 0x6c7   : > { %3488 = vrot.lane.b32.xlu1 %v17337_v30, %s21672_s4 }
 0x6c8   : > { %3382 = vrot.lane.b32.xlu0 %v17308_v23, %s21672_s4 }
 0x6cb   : > { %3741 = vrot.lane.b32.xlu1 %v17341_v33, %s21672_s4 }
 0x6cc   : > { %3435 = vrot.lane.b32.xlu0 %v17339_v32, %s21672_s4 }
 0x704   : > { %v2684_v14 = vpop.xlane.xlu1 %2683 }
 0x705   : > { %16026 = vrcp.f32 %v2684_v14 }
 0x708   : > { %v2687_v12 = vpop.xlane.xlu0 %2686  ;;  %v2678_v0 = vpop.xlane.xlu1 %2677 }
 0x709   : > { %16028 = vrcp.f32 %v2687_v12 }
 0x70a   : > { %16030 = vrcp.f32 %v2678_v0 }
 0x70c   : > { %v2681_v55 = vpop.xlane.xlu0 %2680 }
 0x70d   : > { %16032 = vrcp.f32 %v2681_v55 }
 0x70f   : > { %v2696_v2 = vpop.xlane.xlu1 %2695 }
 0x710   : > { %16034 = vrcp.f32 %v2696_v2 }
 0x712   : > { %v16027_v63 = vpop.eup %16026 }
 0x713   : > { %v2690_v8 = vpop.xlane.xlu1 %2689  ;;  %v2699_v7 = vpop.xlane.xlu0 %2698  ;;  %v2742_v18 = vmul.f32 %v16027_v63, %v17441_v51  ;;  %v21739_v63 = vmov 0.0  }
 0x714   : > { %16036 = vrcp.f32 %v2699_v7 }
 0x715   : > { %16038 = vrcp.f32 %v2690_v8 }
 0x716   : > { %v16029_v44 = vpop.eup %16028 }
 0x717   : > { %v2743_v17 = vmul.f32 %v16029_v44, %v17449_v53  ;;  %v16031_v52 = vpop.eup %16030  ;;  %v2708_v1 = vpop.xlane.xlu1 %2707 }
 0x718   : > { %v2693_v14 = vpop.xlane.xlu0 %2692  ;;  %v2740_v0 = vmul.f32 %v16031_v52, %v17447_v21 }
 0x719   : > { %v2757_v54 = vpack.c.bf16 %v2743_v17, %v2742_v18  ;;  %16040 = vrcp.f32 %v2693_v14 }
 0x71a   : > { %v16033_v12 = vpop.eup %16032  ;;  %16042 = vrcp.f32 %v2708_v1 }
 0x71b   : > { %14717 = vmatmul.mubr.msk.bf16.vlgmr.msra.gmra.mxu1 %vm1261_vm5, %v2757_v54  ;;  %v2741_v55 = vmul.f32 %v16033_v12, %v17454_v5  ;;  %v2702_v2 = vpop.xlane.xlu1 %2701 }
 0x71c   : > { %14727 = vmatpush3.bf16.msra.mxu1 %v17355_v46  ;;  %v2711_v51 = vpop.xlane.xlu0 %2710  ;;  %14728 = vmatprep.mubr.msk.bf16.mxu1 %vm16647_vm7, %v21739_v63 }
 0x71d   : > { %v2756_v53 = vpack.c.bf16 %v2741_v55, %v2740_v0  ;;  %14738 = vmatprep.subr.bf16.mxu1 %v21739_v63  ;;  %16044 = vrcp.f32 %v2711_v51  ;;  %v16035_v5 = vpop.eup %16034 }
 0x71e   : > { %16046 = vrcp.f32 %v2702_v2  ;;  %v2746_v18 = vmul.f32 %v16035_v5, %v17463_v41 }
 0x71f   : > { %14711 = vmatmul.mubr.msk.bf16.vlgmr.msra.gmra.mxu0 %vm1261_vm5, %v2756_v53  ;;  %v2720_v54 = vpop.xlane.xlu1 %2719 }
 0x720   : > { %14721 = vmatpush3.bf16.msra.mxu0 %v17357_v50  ;;  %v2705_v21 = vpop.xlane.xlu0 %2704  ;;  %14722 = vmatprep.mubr.msk.bf16.mxu0 %vm16647_vm7, %v21739_v63 }
 0x721   : > { %14732 = vmatprep.subr.bf16.mxu0 %v21739_v63  ;;  %16048 = vrcp.f32 %v2705_v21  ;;  %v16037_v8 = vpop.eup %16036 }
 0x722   : > { %16050 = vrcp.f32 %v2720_v54  ;;  %v2747_v17 = vmul.f32 %v16037_v8, %v17471_v10  ;;  %v16039_v52 = vpop.eup %16038 }
 0x723   : > { %v2714_v7 = vpop.xlane.xlu1 %2713  ;;  %v2744_v0 = vmul.f32 %v16039_v52, %v17468_v11 }
 0x724   : > { %v2723_v44 = vpop.xlane.xlu0 %2722  ;;  %v2759_v1 = vpack.c.bf16 %v2747_v17, %v2746_v18 }
 0x725   : > { %16052 = vrcp.f32 %v2723_v44 }
 0x726   : > { %v16041_v14 = vpop.eup %16040  ;;  %16054 = vrcp.f32 %v2714_v7  ;;  %14729 = vmatmul.mubr.msk.bf16.vlgmr.msra.gmra.mxu1 %vm1261_vm5, %v2759_v1 }
 0x727   : > { %v2745_v55 = vmul.f32 %v16041_v14, %v17477_v26  ;;  %v16043_v2 = vpop.eup %16042  ;;  %14739 = vmatpush3.bf16.msra.mxu1 %v17359_v3  ;;  %v3118_v51 = vpop.permute.xlu1 %3117  ;;  %14740 = vmatprep.mubr.msk.bf16.mxu1 %vm16647_vm7, %v21739_v63 }
 0x728   : > { %v2717_v12 = vpop.xlane.xlu0 %2716  ;;  %14750 = vmatprep.subr.bf16.mxu1 %v21739_v63  ;;  %v2750_v53 = vmul.f32 %v16043_v2, %v17479_v62 }
 0x729   : > { %16056 = vrcp.f32 %v2717_v12  ;;  %v2758_v41 = vpack.c.bf16 %v2745_v55, %v2744_v0 }
 0x72a   : > { %v16045_v10 = vpop.eup %16044 }
 0x72b   : > { %14723 = vmatmul.mubr.msk.bf16.vlgmr.msra.gmra.mxu0 %vm1261_vm5, %v2758_v41  ;;  %v2751_v11 = vmul.f32 %v16045_v10, %v17487_v61  ;;  %v16047_v54 = vpop.eup %16046  ;;  %v3227_v5 = vpop.permute.xlu1 %3226  ;;  %v3126_v41 = vsel %vm1016_vm4, %v17545_v16, 0 }
 0x72c   : > { %14733 = vmatpush3.bf16.msra.mxu0 %v17361_v57  ;;  %14734 = vmatprep.mubr.msk.bf16.mxu0 %vm16647_vm7, %v21739_v63  ;;  %v2748_v8 = vmul.f32 %v16047_v54, %v17485_v56  ;;  %v3174_v44 = vpop.permute.xlu0 %3173 }
 0x72d   : > { %v2761_v26 = vpack.c.bf16 %v2751_v11, %v2750_v53  ;;  %14744 = vmatprep.subr.bf16.mxu0 %v21739_v63  ;;  %v3179_v2 = vsel %vm1016_vm4, %v3174_v44, 0  ;;  %v3232_v53 = vsel %vm1016_vm4, %v3227_v5, 0 }
 0x72e   : > { %v16049_v21 = vpop.eup %16048 }
 0x72f   : > { %14741 = vmatmul.mubr.msk.bf16.vlgmr.msra.gmra.mxu1 %vm1261_vm5, %v2761_v26  ;;  %v2749_v7 = vmul.f32 %v16049_v21, %v17493_v38  ;;  %v16051_v62 = vpop.eup %16050  ;;  %v3280_v1 = vpop.permute.xlu1 %3279 }
 0x730   : > { %14751 = vmatpush3.bf16.msra.mxu1 %v17363_v29  ;;  %14752 = vmatprep.mubr.msk.bf16.mxu1 %vm16647_vm7, %v21739_v63  ;;  %v2754_v52 = vmul.f32 %v16051_v62, %v17495_v40  ;;  %v3171_v12 = vpop.permute.xlu0 %3170 }
 0x731   : > { %v2760_v61 = vpack.c.bf16 %v2749_v7, %v2748_v8  ;;  %14762 = vmatprep.subr.bf16.mxu1 %v21739_v63 }
 0x732   : > { %v16053_v18 = vpop.eup %16052 }
 0x733   : > { %v16055_v17 = vpop.eup %16054  ;;  %14735 = vmatmul.mubr.msk.bf16.vlgmr.msra.gmra.mxu0 %vm1261_vm5, %v2760_v61  ;;  %v2755_v56 = vmul.f32 %v16053_v18, %v17503_v60  ;;  %v3333_v60 = vpop.permute.xlu1 %3332 }
 0x734   : > { %14745 = vmatpush3.bf16.msra.mxu0 %v17365_v34  ;;  %14746 = vmatprep.mubr.msk.bf16.mxu0 %vm16647_vm7, %v21739_v63  ;;  %v2752_v0 = vmul.f32 %v16055_v17, %v17501_v43  ;;  %v3224_v43 = vpop.permute.xlu0 %3223 }
 0x735   : > { %v2763_v14 = vpack.c.bf16 %v2755_v56, %v2754_v52  ;;  %14756 = vmatprep.subr.bf16.mxu0 %v21739_v63 }
 0x736   : > { %v16057_v38 = vpop.eup %16056 }
 0x737   : > { %v2753_v55 = vmul.f32 %v16057_v38, %v17509_v6  ;;  %14753 = vmatmul.mubr.msk.bf16.vlgmr.msra.gmra.mxu1 %vm1261_vm5, %v2763_v14  ;;  %v3285_v6 = vsel %vm1016_vm4, %v3280_v1, 0  ;;  %v3386_v10 = vpop.permute.xlu1 %3385 }
 0x738   : > { %14763 = vmatpush3.bf16.xpose.msra.mxu1 %v3179_v2  ;;  %14764 = vmatprep.mubr.msk.bf16.mxu1 %vm16647_vm7, %v21739_v63  ;;  %v3277_v16 = vpop.permute.xlu0 %3276  ;;  %v3391_v54 = vsel %vm1016_vm4, %v3386_v10, 0 }
 0x739   : > { %v2762_v40 = vpack.c.bf16 %v2753_v55, %v2752_v0  ;;  %14774 = vmatprep.subr.bf16.mxu1 %v21739_v63 }
 0x73b   : > { %14747 = vmatmul.mubr.msk.bf16.vlgmr.msra.gmra.mxu0 %vm1261_vm5, %v2762_v40  ;;  %v3439_v11 = vpop.permute.xlu1 %3438 }
 0x73c   : > { %14757 = vmatpush3.bf16.xpose.msra.mxu0 %v3126_v41  ;;  %14758 = vmatprep.mubr.msk.bf16.mxu0 %vm16647_vm7, %v21739_v63  ;;  %v3330_v26 = vpop.permute.xlu0 %3329  ;;  %v3444_v7 = vsel %vm1016_vm4, %v3439_v11, 0 }
 0x73d   : > { %14768 = vmatprep.subr.bf16.mxu0 %v21739_v63 }
 0x73f   : > { %14765 = vmatmul.mubr.msk.bf16.vlgmr.msra.gmra.mxu1 %vm1016_vm4, %v3171_v12  ;;  %v3492_v21 = vpop.permute.xlu1 %3491 }
 0x740   : > { %14775 = vmatpush3.bf16.xpose.msra.mxu1 %v3285_v6  ;;  %14776 = vmatprep.mubr.msk.bf16.mxu1 %vm16647_vm7, %v21739_v63  ;;  %v3383_v5 = vpop.permute.xlu0 %3382  ;;  %v3497_v8 = vsel %vm1016_vm4, %v3492_v21, 0 }
 0x741   : > { %14786 = vmatprep.subr.bf16.mxu1 %v21739_v63 }
 0x743   : > { %14759 = vmatmul.mubr.msk.bf16.vlgmr.msra.gmra.mxu0 %vm1016_vm4, %v3118_v51  ;;  %v3338_v51 = vsel %vm1016_vm4, %v3333_v60, 0  ;;  %v3489_v62 = vpop.permute.xlu1 %3488 }
 0x744   : > { %14769 = vmatpush3.bf16.xpose.msra.mxu0 %v3232_v53  ;;  %14770 = vmatprep.mubr.msk.bf16.mxu0 %vm16647_vm7, %v21739_v63  ;;  %v3436_v44 = vpop.permute.xlu0 %3435 }
 0x745   : > { %14780 = vmatprep.subr.bf16.mxu0 %v21739_v63 }
 0x747   : > { %14777 = vmatmul.mubr.msk.bf16.vlgmr.msra.gmra.mxu1 %vm1016_vm4, %v3277_v16  ;;  %v3742_v61 = vpop.permute.xlu1 %3741 }
 0x748   : > { %14787 = vmatpush3.bf16.xpose.msra.mxu1 %v3391_v54  ;;  %14788 = vmatprep.mubr.msk.bf16.mxu1 %vm16647_vm7, %v21739_v63 }
 0x749   : > { %14798 = vmatprep.subr.bf16.mxu1 %v21739_v63 }
 0x74b   : > { %14771 = vmatmul.mubr.msk.bf16.vlgmr.msra.gmra.mxu0 %vm1016_vm4, %v3224_v43 }
 0x74c   : > { %14781 = vmatpush3.bf16.xpose.msra.mxu0 %v3338_v51  ;;  %14782 = vmatprep.mubr.msk.bf16.mxu0 %vm16647_vm7, %v21739_v63 }
 0x74d   : > { %14792 = vmatprep.subr.bf16.mxu0 %v21739_v63 }
 0x74f   : > { %14789 = vmatmul.mubr.msk.bf16.vlgmr.msra.gmra.mxu1 %vm1016_vm4, %v3383_v5 }
 0x750   : > { %14799 = vmatpush3.bf16.xpose.msra.mxu1 %v3497_v8  ;;  %14800 = vmatprep.mubr.msk.bf16.mxu1 %vm16647_vm7, %v21739_v63 }
 0x751   : > { %14810 = vmatprep.subr.bf16.mxu1 %v21739_v63 }
 0x753   : > { %14783 = vmatmul.mubr.msk.bf16.vlgmr.msra.gmra.mxu0 %vm1016_vm4, %v3330_v26 }
 0x754   : > { %14793 = vmatpush3.bf16.xpose.msra.mxu0 %v3444_v7  ;;  %14794 = vmatprep.mubr.msk.bf16.mxu0 %vm16647_vm7, %v21739_v63 }
 0x755   : > { %14804 = vmatprep.subr.bf16.mxu0 %v21739_v63 }
 0x757   : > { %14801 = vmatmul.mubr.msk.bf16.vlgmr.msra.gmra.mxu1 %vm1016_vm4, %v3489_v62 }
 0x758   : > { %14812 = vmatprep.mubr.msk.bf16.mxu1 %vm16647_vm7, %v21739_v63 }
 0x75b   : > { %14795 = vmatmul.mubr.msk.bf16.vlgmr.msra.gmra.mxu0 %vm1016_vm4, %v3436_v44 }
 0x75c   : > { %14805 = vmatpush3.bf16.msra.mxu0 %v3742_v61  ;;  %14806 = vmatprep.mubr.msk.bf16.mxu0 %vm16647_vm7, %v21739_v63 }
 0x75d   : > { %14816 = vmatprep.subr.bf16.mxu0 %v21739_v63 }
 0x7db   : > { %v17641_v18 = vpop.f32.mrf.mxu1 }
 0x7dc   : > { %21740 = vst [vmem:[#allocation19_spill] sm:$0xff] %v17641_v18 }
 0x7dd   : > { %v14718_v17 = vpop.f32.mrf.mxu1 }
 0x7df   : > { %v17643_v52 = vpop.f32.mrf.mxu0  ;;  %v17645_v56 = vpop.f32.mrf.mxu1 }
 0x7e0   : > { %21741 = vst [vmem:[#allocation20_spill] sm:$0xff] %v17643_v52  ;;  %21742 = vst [vmem:[#allocation21_spill] sm:$0xff] %v17645_v56 }
 0x7e1   : > { %v14712_v1 = vpop.f32.mrf.mxu0  ;;  %v14719_v38 = vpop.f32.mrf.mxu1 }
 0x7e3   : > { %v17647_v14 = vpop.f32.mrf.mxu0 }
 0x7e4   : > { %21743 = vst [vmem:[#allocation22_spill] sm:$0xff] %v17647_v14 }
 0x7e5   : > { %v14713_v12 = vpop.f32.mrf.mxu0 }
 0x7e6   : > { %v17649_v0 = vpop.f32.mrf.mxu1 }
 0x7e7   : > { %21744 = vst [vmem:[#allocation23_spill] sm:$0xff] %v17649_v0 }
 0x7e8   : > { %v14730_v55 = vpop.f32.mrf.mxu1 }
 0x7ea   : > { %v17653_v40 = vpop.f32.mrf.mxu1 }
 0x7eb   : > { %v17651_v2 = vpop.f32.mrf.mxu0  ;;  %21746 = vst [vmem:[#allocation25_spill] sm:$0xff] %v17653_v40 }
 0x7ec   : > { %21745 = vst [vmem:[#allocation24_spill] sm:$0xff] %v17651_v2  ;;  %v14731_v41 = vpop.f32.mrf.mxu1 }
 0x7ed   : > { %v14724_v60 = vpop.f32.mrf.mxu0 }
 0x7ef   : > { %v17655_v43 = vpop.f32.mrf.mxu0  ;;  %v17657_v6 = vpop.f32.mrf.mxu1 }
 0x7f0   : > { %21747 = vst [vmem:[#allocation26_spill] sm:$0xff] %v17655_v43  ;;  %21748 = vst [vmem:[#allocation27_spill] sm:$0xff] %v17657_v6 }
 0x7f1   : > { %v14725_v10 = vpop.f32.mrf.mxu0  ;;  %v14742_v16 = vpop.f32.mrf.mxu1 }
 0x7f3   : > { %v17659_v53 = vpop.f32.mrf.mxu0  ;;  %v17661_v11 = vpop.f32.mrf.mxu1 }
 0x7f4   : > { %21749 = vst [vmem:[#allocation28_spill] sm:$0xff] %v17659_v53  ;;  %21750 = vst [vmem:[#allocation29_spill] sm:$0xff] %v17661_v11 }
 0x7f5   : > { %v14736_v54 = vpop.f32.mrf.mxu0  ;;  %v14743_v26 = vpop.f32.mrf.mxu1 }
 0x7f7   : > { %v17663_v51 = vpop.f32.mrf.mxu0  ;;  %v17665_v21 = vpop.f32.mrf.mxu1 }
 0x7f8   : > { %21751 = vst [vmem:[#allocation30_spill] sm:$0xff] %v17663_v51  ;;  %21752 = vst [vmem:[#allocation31_spill] sm:$0xff] %v17665_v21 }
 0x7f9   : > { %v14737_v5 = vpop.f32.mrf.mxu0  ;;  %v14754_v8 = vpop.f32.mrf.mxu1 }
 0x7fb   : > { %v17667_v7 = vpop.f32.mrf.mxu0  ;;  %v17669_v62 = vpop.f32.mrf.mxu1 }
 0x7fc   : > { %21753 = vst [vmem:[#allocation32_spill] sm:$0xff] %v17667_v7  ;;  %21754 = vst [vmem:[#allocation33_spill] sm:$0xff] %v17669_v62 }
 0x7fd   : > { %v14748_v44 = vpop.f32.mrf.mxu0  ;;  %v14755_v61 = vpop.f32.mrf.mxu1 }
 0x7ff   : > { %v17671_v17 = vpop.f32.mrf.mxu0  ;;  %v3215_v1 = vpop.f32.mrf.mxu1 }
 0x800   : > { %21755 = vst [vmem:[#allocation34_spill] sm:$0xff] %v17671_v17  ;;  %v17673_v38 = vmul.f32 0.35355338, %v3215_v1 }
 0x801   : > { %v14749_v12 = vpop.f32.mrf.mxu0  ;;  %v14766_v55 = vpop.f32.mrf.mxu1 }
 0x802   : > { %v3562_v60 = vsel %vm1261_vm5, %v17673_v38, -inf }
 0x803   : > { %3563 = vmax.xlane.f32.xlu0 %v3562_v60  ;;  %v3162_v41 = vpop.f32.mrf.mxu0  ;;  %v3218_v10 = vpop.f32.mrf.mxu1 }
 0x804   : > { %v17677_v16 = vmul.f32 0.35355338, %v3162_v41  ;;  %v17679_v5 = vmul.f32 0.35355338, %v3218_v10 }
 0x805   : > { %v14760_v54 = vpop.f32.mrf.mxu0  ;;  %v14767_v26 = vpop.f32.mrf.mxu1 }
 0x806   : > { %v3556_v8 = vsel %vm1261_vm5, %v17677_v16, -inf  ;;  %v3565_v60 = vsel %vm1261_vm5, %v17679_v5, -inf }
 0x807   : > { %v3321_v44 = vpop.f32.mrf.mxu1  ;;  %3557 = vmax.xlane.f32.xlu0 %v3556_v8  ;;  %v3165_v61 = vpop.f32.mrf.mxu0 }
 0x808   : > { %v17683_v1 = vmul.f32 0.35355338, %v3165_v61  ;;  %v17685_v49 = vmul.f32 0.35355338, %v3321_v44 }
 0x809   : > { %v14761_v12 = vpop.f32.mrf.mxu0  ;;  %v14778_v55 = vpop.f32.mrf.mxu1 }
 0x80a   : > { %v3559_v41 = vsel %vm1261_vm5, %v17683_v1, -inf  ;;  %v3574_v12 = vsel %vm1261_vm5, %v17685_v49, -inf }
 0x80b   : > { %v3324_v10 = vpop.f32.mrf.mxu1  ;;  %3566 = vmax.xlane.f32.xlu0 %v3565_v60  ;;  %3560 = vmax.xlane.f32.xlu1 %v3559_v41  ;;  %v3268_v54 = vpop.f32.mrf.mxu0 }
 0x80c   : > { %v17691_v26 = vmul.f32 0.35355338, %v3324_v10  ;;  %v17693_v61 = vmul.f32 0.35355338, %v3268_v54 }
 0x80d   : > { %v14772_v8 = vpop.f32.mrf.mxu0  ;;  %v14779_v39 = vpop.f32.mrf.mxu1 }
 0x80e   : > { %v3577_v44 = vsel %vm1261_vm5, %v17691_v26, -inf  ;;  %v3568_v39 = vsel %vm1261_vm5, %v17693_v61, -inf }
 0x80f   : > { %v3427_v55 = vpop.f32.mrf.mxu1  ;;  %3578 = vmax.xlane.f32.xlu0 %v3577_v44  ;;  %3575 = vmax.xlane.f32.xlu1 %v3574_v12  ;;  %v3271_v4 = vpop.f32.mrf.mxu0 }
 0x810   : > { %v17699_v42 = vmul.f32 0.35355338, %v3271_v4  ;;  %v17701_v10 = vmul.f32 0.35355338, %v3427_v55 }
 0x811   : > { %v14773_v60 = vpop.f32.mrf.mxu0  ;;  %v14790_v41 = vpop.f32.mrf.mxu1 }
 0x812   : > { %v3571_v54 = vsel %vm1261_vm5, %v17699_v42, -inf  ;;  %v3586_v55 = vsel %vm1261_vm5, %v17701_v10, -inf }
 0x813   : > { %v3430_v8 = vpop.f32.mrf.mxu1  ;;  %3569 = vmax.xlane.f32.xlu1 %v3568_v39  ;;  %3572 = vmax.xlane.f32.xlu0 %v3571_v54  ;;  %v3374_v35 = vpop.f32.mrf.mxu0 }
 0x814   : > { %v17707_v25 = vmul.f32 0.35355338, %v3430_v8  ;;  %v17709_v4 = vmul.f32 0.35355338, %v3374_v35 }
 0x815   : > { %v14784_v44 = vpop.f32.mrf.mxu0  ;;  %v14791_v12 = vpop.f32.mrf.mxu1 }
 0x816   : > { %v3589_v60 = vsel %vm1261_vm5, %v17707_v25, -inf  ;;  %v3580_v35 = vsel %vm1261_vm5, %v17709_v4, -inf }
 0x817   : > { %v3533_v41 = vpop.f32.mrf.mxu1  ;;  %3587 = vmax.xlane.f32.xlu1 %v3586_v55  ;;  %3590 = vmax.xlane.f32.xlu0 %v3589_v60  ;;  %v3377_v28 = vpop.f32.mrf.mxu0 }
 0x818   : > { %v17715_v31 = vmul.f32 0.35355338, %v3377_v28  ;;  %v17717_v8 = vmul.f32 0.35355338, %v3533_v41 }
 0x819   : > { %v14785_v39 = vpop.f32.mrf.mxu0  ;;  %v14802_v54 = vpop.f32.mrf.mxu1 }
 0x81a   : > { %v3583_v44 = vsel %vm1261_vm5, %v17715_v31, -inf  ;;  %v3598_v41 = vsel %vm1261_vm5, %v17717_v8, -inf }
 0x81b   : > { %v3536_v12 = vpop.f32.mrf.mxu1  ;;  %3581 = vmax.xlane.f32.xlu1 %v3580_v35  ;;  %3584 = vmax.xlane.f32.xlu0 %v3583_v44  ;;  %v3480_v27 = vpop.f32.mrf.mxu0 }
 0x81c   : > { %v17723_v7 = vmul.f32 0.35355338, %v3536_v12  ;;  %v17725_v28 = vmul.f32 0.35355338, %v3480_v27 }
 0x81d   : > { %v14796_v55 = vpop.f32.mrf.mxu0  ;;  %v14803_v60 = vpop.f32.mrf.mxu1 }
 0x81e   : > { %v3601_v39 = vsel %vm1261_vm5, %v17723_v7, -inf  ;;  %v3592_v44 = vsel %vm1261_vm5, %v17725_v28, -inf }
 0x81f   : > { %3599 = vmax.xlane.f32.xlu1 %v3598_v41  ;;  %3602 = vmax.xlane.f32.xlu0 %v3601_v39  ;;  %v3483_v54 = vpop.f32.mrf.mxu0 }
 0x820   : > { %v17731_v17 = vmul.f32 0.35355338, %v3483_v54 }
 0x821   : > { %v14797_v35 = vpop.f32.mrf.mxu0 }
 0x822   : > { %v3595_v12 = vsel %vm1261_vm5, %v17731_v17, -inf }
 0x823   : > { %3593 = vmax.xlane.f32.xlu1 %v3592_v44  ;;  %3596 = vmax.xlane.f32.xlu0 %v3595_v12 }
 0x834   : > { %3837 = vrot.lane.b32.xlu1 %v17357_v50, %s21672_s4 }
 0x838   : > { %3885 = vrot.lane.b32.xlu1 %v17355_v46, %s21672_s4 }
 0x839   : > { %3789 = vrot.lane.b32.xlu0 %v17335_v20, %s21672_s4 }
 0x83c   : > { %3981 = vrot.lane.b32.xlu1 %v17359_v3, %s21672_s4 }
 0x83d   : > { %3933 = vrot.lane.b32.xlu0 %v17361_v57, %s21672_s4 }
 0x840   : > { %4077 = vrot.lane.b32.xlu1 %v17363_v29, %s21672_s4 }
 0x841   : > { %4029 = vrot.lane.b32.xlu0 %v17365_v34, %s21672_s4  ;;  %s21855_s4 = smov 8  }
 0x88c   : > { %v3564_v27 = vpop.xlane.xlu0 %3563 }
 0x88d   : > { %v3606_v55 = vsub.f32 %v17673_v38, %v3564_v27 }
 0x88f   : > { %v3624_v60 = vmul.f32 1.442695, %v3606_v55 }
 0x890   : > { %v3558_v41 = vpop.xlane.xlu0 %3557 }
 0x891   : > { %16058 = vpow2.f32 %v3624_v60  ;;  %v3604_v39 = vsub.f32 %v17677_v16, %v3558_v41 }
 0x893   : > { %v3620_v54 = vmul.f32 1.442695, %v3604_v39 }
 0x894   : > { %v3567_v35 = vpop.xlane.xlu0 %3566  ;;  %v3561_v44 = vpop.xlane.xlu1 %3560 }
 0x895   : > { %16060 = vpow2.f32 %v3620_v54  ;;  %v3607_v12 = vsub.f32 %v17679_v5, %v3567_v35  ;;  %v3605_v21 = vsub.f32 %v17683_v1, %v3561_v44 }
 0x897   : > { %v3626_v62 = vmul.f32 1.442695, %v3607_v12  ;;  %v3622_v53 = vmul.f32 1.442695, %v3605_v21 }
 0x898   : > { %v3579_v51 = vpop.xlane.xlu0 %3578  ;;  %v3576_v6 = vpop.xlane.xlu1 %3575 }
 0x899   : > { %16062 = vpow2.f32 %v3626_v62  ;;  %v3611_v38 = vsub.f32 %v17691_v26, %v3579_v51  ;;  %v3610_v27 = vsub.f32 %v17685_v49, %v3576_v6 }
 0x89a   : > { %16064 = vpow2.f32 %v3622_v53 }
 0x89b   : > { %v3634_v55 = vmul.f32 1.442695, %v3611_v38  ;;  %v3632_v16 = vmul.f32 1.442695, %v3610_v27 }
 0x89c   : > { %v3570_v60 = vpop.xlane.xlu1 %3569  ;;  %v3573_v41 = vpop.xlane.xlu0 %3572 }
 0x89d   : > { %16066 = vpow2.f32 %v3634_v55  ;;  %v3608_v39 = vsub.f32 %v17693_v61, %v3570_v60  ;;  %v3609_v5 = vsub.f32 %v17699_v42, %v3573_v41 }
 0x89e   : > { %v17759_v1 = vpop.eup %16058  ;;  %16068 = vpow2.f32 %v3632_v16 }
 0x89f   : > { %v3628_v21 = vmul.f32 1.442695, %v3608_v39  ;;  %v3630_v54 = vmul.f32 1.442695, %v3609_v5  ;;  %v3658_v51 = vsel %vm1261_vm5, %v17759_v1, 0.0 }
 0x8a0   : > { %v3588_v62 = vpop.xlane.xlu1 %3587  ;;  %v3591_v49 = vpop.xlane.xlu0 %3590  ;;  %3659 = vadd.xlane.f32.xlu1 %v3658_v51 }
 0x8a1   : > { %16070 = vpow2.f32 %v3628_v21  ;;  %v3614_v6 = vsub.f32 %v17701_v10, %v3588_v62  ;;  %v3615_v53 = vsub.f32 %v17707_v25, %v3591_v49 }
 0x8a2   : > { %v17765_v26 = vpop.eup %16060  ;;  %16072 = vpow2.f32 %v3630_v54 }
 0x8a3   : > { %v3640_v42 = vmul.f32 1.442695, %v3614_v6  ;;  %v3642_v61 = vmul.f32 1.442695, %v3615_v53  ;;  %v3652_v35 = vsel %vm1261_vm5, %v17765_v26, 0.0 }
 0x8a4   : > { %v3582_v44 = vpop.xlane.xlu1 %3581  ;;  %v3585_v12 = vpop.xlane.xlu0 %3584  ;;  %3653 = vadd.xlane.f32.xlu1 %v3652_v35 }
 0x8a5   : > { %16074 = vpow2.f32 %v3640_v42  ;;  %v3612_v38 = vsub.f32 %v17709_v4, %v3582_v44  ;;  %v3613_v27 = vsub.f32 %v17715_v31, %v3585_v12 }
 0x8a6   : > { %v17771_v55 = vpop.eup %16062  ;;  %16076 = vpow2.f32 %v3642_v61 }
 0x8a7   : > { %v3636_v25 = vmul.f32 1.442695, %v3612_v38  ;;  %v3638_v10 = vmul.f32 1.442695, %v3613_v27  ;;  %v3661_v16 = vsel %vm1261_vm5, %v17771_v55, 0.0  ;;  %v17775_v60 = vpop.eup %16064 }
 0x8a8   : > { %v3600_v41 = vpop.xlane.xlu1 %3599  ;;  %v3603_v39 = vpop.xlane.xlu0 %3602  ;;  %3662 = vadd.xlane.f32.xlu0 %v3661_v16  ;;  %v3655_v62 = vsel %vm1261_vm5, %v17775_v60, 0.0 }
 0x8a9   : > { %16078 = vpow2.f32 %v3636_v25  ;;  %v3618_v5 = vsub.f32 %v17717_v8, %v3600_v41  ;;  %v3619_v4 = vsub.f32 %v17723_v7, %v3603_v39 }
 0x8aa   : > { %v17779_v21 = vpop.eup %16066  ;;  %16080 = vpow2.f32 %v3638_v10 }
 0x8ab   : > { %v17781_v31 = vpop.eup %16068  ;;  %v3648_v54 = vmul.f32 1.442695, %v3618_v5  ;;  %v3650_v51 = vmul.f32 1.442695, %v3619_v4  ;;  %v3673_v61 = vsel %vm1261_vm5, %v17779_v21, 0.0 }
 0x8ac   : > { %v3670_v49 = vsel %vm1261_vm5, %v17781_v31, 0.0  ;;  %v3594_v6 = vpop.xlane.xlu1 %3593  ;;  %3656 = vadd.xlane.f32.xlu0 %v3655_v62  ;;  %v3597_v53 = vpop.xlane.xlu0 %3596 }
 0x8ad   : > { %16082 = vpow2.f32 %v3648_v54  ;;  %3671 = vadd.xlane.f32.xlu1 %v3670_v49  ;;  %v3616_v7 = vsub.f32 %v17725_v28, %v3594_v6  ;;  %v3617_v8 = vsub.f32 %v17731_v17, %v3597_v53 }
 0x8ae   : > { %v17789_v42 = vpop.eup %16070  ;;  %16084 = vpow2.f32 %v3650_v51 }
 0x8af   : > { %v3644_v35 = vmul.f32 1.442695, %v3616_v7  ;;  %v3646_v44 = vmul.f32 1.442695, %v3617_v8  ;;  %v3664_v12 = vsel %vm1261_vm5, %v17789_v42, 0.0  ;;  %v17795_v38 = vpop.eup %16072 }
 0x8b0   : > { %3674 = vadd.xlane.f32.xlu0 %v3673_v61  ;;  %v3790_v27 = vpop.permute.xlu0 %3789  ;;  %v3667_v25 = vsel %vm1261_vm5, %v17795_v38, 0.0  ;;  %v3838_v61 = vpop.permute.xlu1 %3837 }
 0x8b1   : > { %16086 = vpow2.f32 %v3644_v35  ;;  %3665 = vadd.xlane.f32.xlu1 %v3664_v12  ;;  %14811 = vmatpush3.bf16.msra.mxu1 %v3790_v27 }
 0x8b2   : > { %v17797_v28 = vpop.eup %16074  ;;  %14822 = vmatprep.subr.bf16.mxu1 %v21739_v63  ;;  %16088 = vpow2.f32 %v3646_v44 }
 0x8b3   : > { %v3682_v17 = vsel %vm1261_vm5, %v17797_v28, 0.0  ;;  %v17804_v10 = vpop.eup %16076 }
 0x8b4   : > { %3668 = vadd.xlane.f32.xlu0 %v3667_v25  ;;  %v3685_v39 = vsel %vm1261_vm5, %v17804_v10, 0.0  ;;  %v3886_v35 = vpop.permute.xlu1 %3885  ;;  %v17866_v12 = vpop.permute.xlu0 %3933 }
 0x8b5   : > { %3683 = vadd.xlane.f32.xlu1 %v3682_v17 }
 0x8b6   : > { %v17806_v16 = vpop.eup %16078 }
 0x8b7   : > { %v3676_v41 = vsel %vm1261_vm5, %v17806_v16, 0.0  ;;  %v17812_v5 = vpop.eup %16080 }
 0x8b8   : > { %3686 = vadd.xlane.f32.xlu0 %v3685_v39  ;;  %v3679_v51 = vsel %vm1261_vm5, %v17812_v5, 0.0  ;;  %v3982_v44 = vpop.permute.xlu1 %3981  ;;  %v17870_v25 = vpop.permute.xlu0 %4029 }
 0x8b9   : > { %3677 = vadd.xlane.f32.xlu1 %v3676_v41 }
 0x8ba   : > { %v17814_v4 = vpop.eup %16082 }
 0x8bb   : > { %v3694_v54 = vsel %vm1261_vm5, %v17814_v4, 0.0  ;;  %v17820_v62 = vpop.eup %16084 }
 0x8bc   : > { %3680 = vadd.xlane.f32.xlu0 %v3679_v51  ;;  %v3697_v53 = vsel %vm1261_vm5, %v17820_v62, 0.0  ;;  %v17868_v27 = vpop.permute.xlu1 %4077 }
 0x8bd   : > { %3695 = vadd.xlane.f32.xlu1 %v3694_v54 }
 0x8be   : > { %v17822_v49 = vpop.eup %16086 }
 0x8bf   : > { %v3688_v6 = vsel %vm1261_vm5, %v17822_v49, 0.0  ;;  %v17828_v7 = vpop.eup %16088 }
 0x8c0   : > { %3698 = vadd.xlane.f32.xlu0 %v3697_v53  ;;  %v3691_v8 = vsel %vm1261_vm5, %v17828_v7, 0.0 }
 0x8c1   : > { %3689 = vadd.xlane.f32.xlu1 %v3688_v6 }
 0x8c4   : > { %3692 = vadd.xlane.f32.xlu0 %v3691_v8 }
 0x8d2   : > { %4177 = vrot.lane.b32.xlu1 %v17222_v9, %s21666_s29 }
 0x8d6   : > { %4228 = vrot.lane.b32.xlu1 %v17258_v36, %s21666_s29 }
 0x8da   : > { %4279 = vrot.lane.b32.xlu1 %v17251_v59, %s21666_s29  ;;  %4126 = vrot.lane.b32.xlu0 %v17225_v19, %s21666_s29 }
 0x8de   : > { %4330 = vrot.lane.b32.xlu1 %v17282_v22, %s21666_s29  ;;  %4124 = vrot.lane.b32.xlu0 %v17246_v47, %s21666_s29 }
 0x8e2   : > { %4381 = vrot.lane.b32.xlu1 %v17275_v15, %s21666_s29  ;;  %4175 = vrot.lane.b32.xlu0 %v17242_v58, %s21666_s29 }
 0x8e6   : > { %4432 = vrot.lane.b32.xlu1 %v17312_v48, %s21666_s29  ;;  %4226 = vrot.lane.b32.xlu0 %v17280_v24, %s21666_s29 }
 0x8ea   : > { %4483 = vrot.lane.b32.xlu1 %v17305_v37, %s21666_s29  ;;  %4277 = vrot.lane.b32.xlu0 %v17278_v13, %s21666_s29 }
 0x8ee   : > { %4481 = vrot.lane.b32.xlu1 %v17337_v30, %s21666_s29  ;;  %4328 = vrot.lane.b32.xlu0 %v17310_v45, %s21666_s29 }
 0x8f2   : > { %4732 = vrot.lane.b32.xlu1 %v17341_v33, %s21666_s29  ;;  %4379 = vrot.lane.b32.xlu0 %v17308_v23, %s21666_s29 }
 0x8f6   : > { %4430 = vrot.lane.b32.xlu0 %v17339_v32, %s21666_s29 }
 0x929   : > { %v3660_v17 = vpop.xlane.xlu1 %3659 }
 0x92a   : > { %16090 = vrcp.f32 %v3660_v17 }
 0x92d   : > { %v3654_v41 = vpop.xlane.xlu1 %3653 }
 0x931   : > { %v3663_v39 = vpop.xlane.xlu0 %3662 }
 0x932   : > { %16092 = vrcp.f32 %v3663_v39 }
 0x933   : > { %16094 = vrcp.f32 %v3654_v41 }
 0x935   : > { %v3657_v54 = vpop.xlane.xlu0 %3656 }
 0x936   : > { %v3672_v51 = vpop.xlane.xlu1 %3671  ;;  %16096 = vrcp.f32 %v3657_v54 }
 0x937   : > { %16098 = vrcp.f32 %v3672_v51  ;;  %v16091_v8 = vpop.eup %16090 }
 0x938   : > { %v3718_v0 = vmul.f32 %v16091_v8, %v17759_v1 }
 0x939   : > { %v3675_v6 = vpop.xlane.xlu0 %3674 }
 0x93a   : > { %v3666_v53 = vpop.xlane.xlu1 %3665  ;;  %16100 = vrcp.f32 %v3675_v6 }
 0x93b   : > { %16102 = vrcp.f32 %v3666_v53 }
 0x93d   : > { %v3669_v11 = vpop.xlane.xlu0 %3668 }
 0x93e   : > { %v3684_v2 = vpop.xlane.xlu1 %3683  ;;  %16104 = vrcp.f32 %v3669_v11 }
 0x93f   : > { %v16093_v43 = vpop.eup %16092  ;;  %16106 = vrcp.f32 %v3684_v2 }
 0x940   : > { %v3719_v17 = vmul.f32 %v16093_v43, %v17771_v55  ;;  %v16095_v39 = vpop.eup %16094 }
 0x941   : > { %v3687_v41 = vpop.xlane.xlu0 %3686  ;;  %v3716_v6 = vmul.f32 %v16095_v39, %v17765_v26 }
 0x942   : > { %v3678_v40 = vpop.xlane.xlu1 %3677  ;;  %16108 = vrcp.f32 %v3687_v41  ;;  %v3733_v54 = vpack.c.bf16 %v3719_v17, %v3718_v0 }
 0x943   : > { %v16097_v51 = vpop.eup %16096  ;;  %16110 = vrcp.f32 %v3678_v40 }
 0x944   : > { %14813 = vmatmul.mubr.msk.bf16.vlgmr.msra.gmra.mxu1 %vm1261_vm5, %v3733_v54  ;;  %v3717_v53 = vmul.f32 %v16097_v51, %v17775_v60  ;;  %v16099_v11 = vpop.eup %16098 }
 0x945   : > { %14823 = vmatpush3.bf16.msra.mxu1 %v3886_v35  ;;  %v3681_v52 = vpop.xlane.xlu0 %3680  ;;  %14824 = vmatprep.mubr.msk.bf16.mxu1 %vm16647_vm7, %v21739_v63  ;;  %v3722_v40 = vmul.f32 %v16099_v11, %v17781_v31 }
 0x946   : > { %v3696_v2 = vpop.xlane.xlu1 %3695  ;;  %16112 = vrcp.f32 %v3681_v52  ;;  %v3732_v43 = vpack.c.bf16 %v3717_v53, %v3716_v6  ;;  %14834 = vmatprep.subr.bf16.mxu1 %v21739_v63 }
 0x947   : > { %v16101_v0 = vpop.eup %16100  ;;  %16114 = vrcp.f32 %v3696_v2 }
 0x948   : > { %v3723_v1 = vmul.f32 %v16101_v0, %v17779_v21  ;;  %14807 = vmatmul.mubr.msk.bf16.vlgmr.msra.gmra.mxu0 %vm1261_vm5, %v3732_v43  ;;  %v16103_v26 = vpop.eup %16102 }
 0x949   : > { %14817 = vmatpush3.bf16.msra.mxu0 %v3838_v61  ;;  %v3699_v55 = vpop.xlane.xlu0 %3698  ;;  %14818 = vmatprep.mubr.msk.bf16.mxu0 %vm16647_vm7, %v21739_v63  ;;  %v3720_v21 = vmul.f32 %v16103_v26, %v17789_v42 }
 0x94a   : > { %v3690_v60 = vpop.xlane.xlu1 %3689  ;;  %16116 = vrcp.f32 %v3699_v55  ;;  %v3735_v52 = vpack.c.bf16 %v3723_v1, %v3722_v40  ;;  %14828 = vmatprep.subr.bf16.mxu0 %v21739_v63 }
 0x94b   : > { %v16105_v35 = vpop.eup %16104  ;;  %16118 = vrcp.f32 %v3690_v60 }
 0x94c   : > { %14825 = vmatmul.mubr.msk.bf16.vlgmr.msra.gmra.mxu1 %vm1261_vm5, %v3735_v52  ;;  %v3721_v31 = vmul.f32 %v16105_v35, %v17795_v38  ;;  %v16107_v8 = vpop.eup %16106 }
 0x94d   : > { %14835 = vmatpush3.bf16.msra.mxu1 %v3982_v44  ;;  %v3693_v61 = vpop.xlane.xlu0 %3692  ;;  %14836 = vmatprep.mubr.msk.bf16.mxu1 %vm16647_vm7, %v21739_v63  ;;  %v3726_v54 = vmul.f32 %v16107_v8, %v17797_v28 }
 0x94e   : > { %v4178_v17 = vpop.permute.xlu1 %4177  ;;  %16120 = vrcp.f32 %v3693_v61  ;;  %v3734_v39 = vpack.c.bf16 %v3721_v31, %v3720_v21  ;;  %14846 = vmatprep.subr.bf16.mxu1 %v21739_v63 }
 0x94f   : > { %v16109_v41 = vpop.eup %16108 }
 0x950   : > { %v3727_v51 = vmul.f32 %v16109_v41, %v17804_v10  ;;  %14819 = vmatmul.mubr.msk.bf16.vlgmr.msra.gmra.mxu0 %vm1261_vm5, %v3734_v39  ;;  %v16111_v42 = vpop.eup %16110 }
 0x951   : > { %14829 = vmatpush3.bf16.msra.mxu0 %v17866_v12  ;;  %v4127_v38 = vpop.permute.xlu0 %4126  ;;  %14830 = vmatprep.mubr.msk.bf16.mxu0 %vm16647_vm7, %v21739_v63  ;;  %v3724_v11 = vmul.f32 %v16111_v42, %v17806_v16 }
 0x952   : > { %v3737_v44 = vpack.c.bf16 %v3727_v51, %v3726_v54  ;;  %14840 = vmatprep.subr.bf16.mxu0 %v21739_v63  ;;  %v4229_v53 = vpop.permute.xlu1 %4228  ;;  %v4132_v52 = vsel %vm1016_vm4, %v4127_v38, 0 }
 0x953   : > { %v16113_v6 = vpop.eup %16112  ;;  %v4234_v31 = vsel %vm1016_vm4, %v4229_v53, 0 }
 0x954   : > { %v3725_v28 = vmul.f32 %v16113_v6, %v17812_v5  ;;  %14837 = vmatmul.mubr.msk.bf16.vlgmr.msra.gmra.mxu1 %vm1261_vm5, %v3737_v44  ;;  %v16115_v10 = vpop.eup %16114 }
 0x955   : > { %14847 = vmatpush3.bf16.msra.mxu1 %v17868_v27  ;;  %v4125_v2 = vpop.permute.xlu0 %4124  ;;  %14848 = vmatprep.mubr.msk.bf16.mxu1 %vm16647_vm7, %v21739_v63  ;;  %v3730_v0 = vmul.f32 %v16115_v10, %v17814_v4  ;;  %v4183_v4 = vsel %vm1016_vm4, %v4178_v17, 0 }
 0x956   : > { %v3736_v12 = vpack.c.bf16 %v3725_v28, %v3724_v11  ;;  %14858 = vmatprep.subr.bf16.mxu1 %v21739_v63  ;;  %v4280_v5 = vpop.permute.xlu1 %4279 }
 0x957   : > { %v16117_v43 = vpop.eup %16116 }
 0x958   : > { %v3731_v40 = vmul.f32 %v16117_v43, %v17820_v62  ;;  %14831 = vmatmul.mubr.msk.bf16.vlgmr.msra.gmra.mxu0 %vm1261_vm5, %v3736_v12  ;;  %v16119_v16 = vpop.eup %16118 }
 0x959   : > { %14841 = vmatpush3.bf16.msra.mxu0 %v17870_v25  ;;  %14842 = vmatprep.mubr.msk.bf16.mxu0 %vm16647_vm7, %v21739_v63  ;;  %v4176_v26 = vpop.permute.xlu0 %4175  ;;  %v3728_v55 = vmul.f32 %v16119_v16, %v17822_v49  ;;  %v4285_v49 = vsel %vm1016_vm4, %v4280_v5, 0 }
 0x95a   : > { %v3739_v27 = vpack.c.bf16 %v3731_v40, %v3730_v0  ;;  %14852 = vmatprep.subr.bf16.mxu0 %v21739_v63  ;;  %v4331_v60 = vpop.permute.xlu1 %4330 }
 0x95b   : > { %v16121_v1 = vpop.eup %16120  ;;  %v4336_v39 = vsel %vm1016_vm4, %v4331_v60, 0 }
 0x95c   : > { %v3729_v62 = vmul.f32 %v16121_v1, %v17828_v7  ;;  %14849 = vmatmul.mubr.msk.bf16.vlgmr.msra.gmra.mxu1 %vm1261_vm5, %v3739_v27 }
 0x95d   : > { %14859 = vmatpush3.bf16.xpose.msra.mxu1 %v4183_v4  ;;  %14860 = vmatprep.mubr.msk.bf16.mxu1 %vm16647_vm7, %v21739_v63  ;;  %v4227_v35 = vpop.permute.xlu0 %4226 }
 0x95e   : > { %v3738_v25 = vpack.c.bf16 %v3729_v62, %v3728_v55  ;;  %14870 = vmatprep.subr.bf16.mxu1 %v21739_v63  ;;  %v4382_v7 = vpop.permute.xlu1 %4381 }
 0x95f   : > { %v4387_v61 = vsel %vm1016_vm4, %v4382_v7, 0 }
 0x960   : > { %14843 = vmatmul.mubr.msk.bf16.vlgmr.msra.gmra.mxu0 %vm1261_vm5, %v3738_v25 }
 0x961   : > { %14853 = vmatpush3.bf16.xpose.msra.mxu0 %v4132_v52  ;;  %14854 = vmatprep.mubr.msk.bf16.mxu0 %vm16647_vm7, %v21739_v63  ;;  %v4278_v21 = vpop.permute.xlu0 %4277 }
 0x962   : > { %14864 = vmatprep.subr.bf16.mxu0 %v21739_v63  ;;  %v4433_v8 = vpop.permute.xlu1 %4432 }
 0x963   : > { %v4438_v42 = vsel %vm1016_vm4, %v4433_v8, 0 }
 0x964   : > { %14861 = vmatmul.mubr.msk.bf16.vlgmr.msra.gmra.mxu1 %vm1016_vm4, %v4176_v26 }
 0x965   : > { %14871 = vmatpush3.bf16.xpose.msra.mxu1 %v4285_v49  ;;  %14872 = vmatprep.mubr.msk.bf16.mxu1 %vm16647_vm7, %v21739_v63  ;;  %v4329_v17 = vpop.permute.xlu0 %4328 }
 0x966   : > { %14882 = vmatprep.subr.bf16.mxu1 %v21739_v63  ;;  %v4484_v41 = vpop.permute.xlu1 %4483 }
 0x967   : > { %v4489_v51 = vsel %vm1016_vm4, %v4484_v41, 0 }
 0x968   : > { %14855 = vmatmul.mubr.msk.bf16.vlgmr.msra.gmra.mxu0 %vm1016_vm4, %v4125_v2 }
 0x969   : > { %14865 = vmatpush3.bf16.xpose.msra.mxu0 %v4234_v31  ;;  %14866 = vmatprep.mubr.msk.bf16.mxu0 %vm16647_vm7, %v21739_v63  ;;  %v4380_v54 = vpop.permute.xlu0 %4379 }
 0x96a   : > { %14876 = vmatprep.subr.bf16.mxu0 %v21739_v63  ;;  %v4482_v38 = vpop.permute.xlu1 %4481 }
 0x96c   : > { %14873 = vmatmul.mubr.msk.bf16.vlgmr.msra.gmra.mxu1 %vm1016_vm4, %v4278_v21 }
 0x96d   : > { %14883 = vmatpush3.bf16.xpose.msra.mxu1 %v4387_v61  ;;  %14884 = vmatprep.mubr.msk.bf16.mxu1 %vm16647_vm7, %v21739_v63  ;;  %v4431_v44 = vpop.permute.xlu0 %4430 }
 0x96e   : > { %14894 = vmatprep.subr.bf16.mxu1 %v21739_v63  ;;  %v4733_v6 = vpop.permute.xlu1 %4732 }
 0x970   : > { %14867 = vmatmul.mubr.msk.bf16.vlgmr.msra.gmra.mxu0 %vm1016_vm4, %v4227_v35 }
 0x971   : > { %14877 = vmatpush3.bf16.xpose.msra.mxu0 %v4336_v39  ;;  %14878 = vmatprep.mubr.msk.bf16.mxu0 %vm16647_vm7, %v21739_v63 }
 0x972   : > { %14888 = vmatprep.subr.bf16.mxu0 %v21739_v63 }
 0x974   : > { %14885 = vmatmul.mubr.msk.bf16.vlgmr.msra.gmra.mxu1 %vm1016_vm4, %v4380_v54 }
 0x975   : > { %14895 = vmatpush3.bf16.xpose.msra.mxu1 %v4489_v51  ;;  %14896 = vmatprep.mubr.msk.bf16.mxu1 %vm16647_vm7, %v21739_v63 }
 0x976   : > { %14906 = vmatprep.subr.bf16.mxu1 %v21739_v63 }
 0x978   : > { %14879 = vmatmul.mubr.msk.bf16.vlgmr.msra.gmra.mxu0 %vm1016_vm4, %v4329_v17 }
 0x979   : > { %14889 = vmatpush3.bf16.xpose.msra.mxu0 %v4438_v42  ;;  %14890 = vmatprep.mubr.msk.bf16.mxu0 %vm16647_vm7, %v21739_v63 }
 0x97a   : > { %14900 = vmatprep.subr.bf16.mxu0 %v21739_v63 }
 0x97c   : > { %14897 = vmatmul.mubr.msk.bf16.vlgmr.msra.gmra.mxu1 %vm1016_vm4, %v4482_v38 }
 0x97d   : > { %14908 = vmatprep.mubr.msk.bf16.mxu1 %vm16647_vm7, %v21739_v63 }
 0x980   : > { %14891 = vmatmul.mubr.msk.bf16.vlgmr.msra.gmra.mxu0 %vm1016_vm4, %v4431_v44 }
 0x981   : > { %14901 = vmatpush3.bf16.msra.mxu0 %v4733_v6  ;;  %14902 = vmatprep.mubr.msk.bf16.mxu0 %vm16647_vm7, %v21739_v63 }
 0x982   : > { %14912 = vmatprep.subr.bf16.mxu0 %v21739_v63 }
 0xa04   : > { %v17962_v53 = vpop.f32.mrf.mxu1 }
 0xa06   : > { %v14814_v11 = vpop.f32.mrf.mxu1 }
 0xa08   : > { %v17964_v28 = vpop.f32.mrf.mxu0  ;;  %v17966_v10 = vpop.f32.mrf.mxu1 }
 0xa0a   : > { %v14808_v12 = vpop.f32.mrf.mxu0  ;;  %v14815_v43 = vpop.f32.mrf.mxu1 }
 0xa0c   : > { %v17970_v0 = vpop.f32.mrf.mxu0  ;;  %v17972_v40 = vpop.f32.mrf.mxu1 }
 0xa0e   : > { %v14809_v5 = vpop.f32.mrf.mxu0  ;;  %v14826_v27 = vpop.f32.mrf.mxu1 }
 0xa10   : > { %v17976_v1 = vpop.f32.mrf.mxu0  ;;  %v17978_v26 = vpop.f32.mrf.mxu1 }
 0xa11   : > { %21756 = vst [vmem:[#allocation35_spill] sm:$0xff] %v17976_v1 }
 0xa12   : > { %v14820_v4 = vpop.f32.mrf.mxu0  ;;  %v14827_v62 = vpop.f32.mrf.mxu1 }
 0xa14   : > { %v17982_v25 = vpop.f32.mrf.mxu0  ;;  %v17984_v60 = vpop.f32.mrf.mxu1 }
 0xa16   : > { %v14821_v35 = vpop.f32.mrf.mxu0  ;;  %v14838_v49 = vpop.f32.mrf.mxu1 }
 0xa18   : > { %v17988_v7 = vpop.f32.mrf.mxu0  ;;  %v17990_v21 = vpop.f32.mrf.mxu1 }
 0xa19   : > { %21757 = vst [vmem:[#allocation36_spill] sm:$0xff] %v17988_v7 }
 0xa1a   : > { %v14832_v8 = vpop.f32.mrf.mxu0  ;;  %v14839_v61 = vpop.f32.mrf.mxu1 }
 0xa1c   : > { %v17994_v17 = vpop.f32.mrf.mxu0  ;;  %v17996_v39 = vpop.f32.mrf.mxu1 }
 0xa1d   : > { %21758 = vst [vmem:[#allocation37_spill] sm:$0xff] %v17994_v17  ;;  %21759 = vst [vmem:[#allocation38_spill] sm:$0xff] %v17996_v39 }
 0xa1e   : > { %v14833_v54 = vpop.f32.mrf.mxu0  ;;  %v14850_v51 = vpop.f32.mrf.mxu1 }
 0xa20   : > { %v18000_v42 = vpop.f32.mrf.mxu0  ;;  %v18002_v38 = vpop.f32.mrf.mxu1 }
 0xa21   : > { %21760 = vst [vmem:[#allocation39_spill] sm:$0xff] %v18000_v42  ;;  %21761 = vst [vmem:[#allocation40_spill] sm:$0xff] %v18002_v38 }
 0xa22   : > { %v14844_v6 = vpop.f32.mrf.mxu0  ;;  %v14851_v11 = vpop.f32.mrf.mxu1 }
 0xa24   : > { %v18006_v12 = vpop.f32.mrf.mxu0  ;;  %v4219_v43 = vpop.f32.mrf.mxu1 }
 0xa25   : > { %21762 = vst [vmem:[#allocation41_spill] sm:$0xff] %v18006_v12  ;;  %v18010_v27 = vmul.f32 0.35355338, %v4219_v43 }
 0xa26   : > { %v14845_v4 = vpop.f32.mrf.mxu0  ;;  %v14862_v62 = vpop.f32.mrf.mxu1 }
 0xa27   : > { %v4554_v35 = vsel %vm1261_vm5, %v18010_v27, -inf }
 0xa28   : > { %4555 = vmax.xlane.f32.xlu0 %v4554_v35  ;;  %v4168_v49 = vpop.f32.mrf.mxu0  ;;  %v4222_v8 = vpop.f32.mrf.mxu1 }
 0xa29   : > { %v18014_v61 = vmul.f32 0.35355338, %v4168_v49  ;;  %v18016_v6 = vmul.f32 0.35355338, %v4222_v8 }
 0xa2a   : > { %v14856_v54 = vpop.f32.mrf.mxu0  ;;  %v14863_v51 = vpop.f32.mrf.mxu1 }
 0xa2b   : > { %v4548_v11 = vsel %vm1261_vm5, %v18014_v61, -inf  ;;  %v4557_v35 = vsel %vm1261_vm5, %v18016_v6, -inf }
 0xa2c   : > { %v4321_v5 = vpop.f32.mrf.mxu1  ;;  %4549 = vmax.xlane.f32.xlu0 %v4548_v11  ;;  %v4171_v43 = vpop.f32.mrf.mxu0 }
 0xa2d   : > { %v18020_v4 = vmul.f32 0.35355338, %v4171_v43  ;;  %v18022_v41 = vmul.f32 0.35355338, %v4321_v5 }
 0xa2e   : > { %v14857_v62 = vpop.f32.mrf.mxu0  ;;  %v14874_v44 = vpop.f32.mrf.mxu1 }
 0xa2f   : > { %v4551_v49 = vsel %vm1261_vm5, %v18020_v4, -inf  ;;  %v4566_v5 = vsel %vm1261_vm5, %v18022_v41, -inf }
 0xa30   : > { %v4324_v8 = vpop.f32.mrf.mxu1  ;;  %4558 = vmax.xlane.f32.xlu0 %v4557_v35  ;;  %4552 = vmax.xlane.f32.xlu1 %v4551_v49  ;;  %v4270_v54 = vpop.f32.mrf.mxu0 }
 0xa31   : > { %v18028_v51 = vmul.f32 0.35355338, %v4324_v8  ;;  %v18030_v43 = vmul.f32 0.35355338, %v4270_v54 }
 0xa32   : > { %v14868_v11 = vpop.f32.mrf.mxu0  ;;  %v14875_v52 = vpop.f32.mrf.mxu1 }
 0xa33   : > { %v4569_v44 = vsel %vm1261_vm5, %v18028_v51, -inf  ;;  %v4560_v52 = vsel %vm1261_vm5, %v18030_v43, -inf }
 0xa34   : > { %v4423_v62 = vpop.f32.mrf.mxu1  ;;  %4570 = vmax.xlane.f32.xlu0 %v4569_v44  ;;  %4567 = vmax.xlane.f32.xlu1 %v4566_v5  ;;  %v4273_v31 = vpop.f32.mrf.mxu0 }
 0xa35   : > { %v18036_v16 = vmul.f32 0.35355338, %v4273_v31  ;;  %v18038_v8 = vmul.f32 0.35355338, %v4423_v62 }
 0xa36   : > { %v14869_v35 = vpop.f32.mrf.mxu0  ;;  %v14886_v49 = vpop.f32.mrf.mxu1 }
 0xa37   : > { %v4563_v54 = vsel %vm1261_vm5, %v18036_v16, -inf  ;;  %v4578_v62 = vsel %vm1261_vm5, %v18038_v8, -inf }
 0xa38   : > { %v4426_v11 = vpop.f32.mrf.mxu1  ;;  %4561 = vmax.xlane.f32.xlu1 %v4560_v52  ;;  %4564 = vmax.xlane.f32.xlu0 %v4563_v54  ;;  %v4372_v55 = vpop.f32.mrf.mxu0 }
 0xa39   : > { %v18044_v2 = vmul.f32 0.35355338, %v4426_v11  ;;  %v18046_v31 = vmul.f32 0.35355338, %v4372_v55 }
 0xa3a   : > { %v14880_v44 = vpop.f32.mrf.mxu0  ;;  %v14887_v5 = vpop.f32.mrf.mxu1 }
 0xa3b   : > { %v4581_v35 = vsel %vm1261_vm5, %v18044_v2, -inf  ;;  %v4572_v55 = vsel %vm1261_vm5, %v18046_v31, -inf }
 0xa3c   : > { %v4525_v49 = vpop.f32.mrf.mxu1  ;;  %4579 = vmax.xlane.f32.xlu1 %v4578_v62  ;;  %4582 = vmax.xlane.f32.xlu0 %v4581_v35  ;;  %v4375_v14 = vpop.f32.mrf.mxu0 }
 0xa3d   : > { %v18052_v18 = vmul.f32 0.35355338, %v4375_v14  ;;  %v18054_v11 = vmul.f32 0.35355338, %v4525_v49 }
 0xa3e   : > { %v14881_v52 = vpop.f32.mrf.mxu0  ;;  %v14898_v54 = vpop.f32.mrf.mxu1 }
 0xa3f   : > { %v4575_v44 = vsel %vm1261_vm5, %v18052_v18, -inf  ;;  %v4590_v49 = vsel %vm1261_vm5, %v18054_v11, -inf }
 0xa40   : > { %v4528_v5 = vpop.f32.mrf.mxu1  ;;  %4573 = vmax.xlane.f32.xlu1 %v4572_v55  ;;  %4576 = vmax.xlane.f32.xlu0 %v4575_v44  ;;  %v4474_v56 = vpop.f32.mrf.mxu0 }
 0xa41   : > { %v18060_v42 = vmul.f32 0.35355338, %v4528_v5  ;;  %v18062_v14 = vmul.f32 0.35355338, %v4474_v56 }
 0xa42   : > { %v14892_v62 = vpop.f32.mrf.mxu0  ;;  %v14899_v35 = vpop.f32.mrf.mxu1 }
 0xa43   : > { %v4593_v52 = vsel %vm1261_vm5, %v18060_v42, -inf  ;;  %v4584_v44 = vsel %vm1261_vm5, %v18062_v14, -inf }
 0xa44   : > { %4591 = vmax.xlane.f32.xlu1 %v4590_v49  ;;  %4594 = vmax.xlane.f32.xlu0 %v4593_v52  ;;  %v4477_v54 = vpop.f32.mrf.mxu0 }
 0xa45   : > { %v18068_v12 = vmul.f32 0.35355338, %v4477_v54 }
 0xa46   : > { %v14893_v55 = vpop.f32.mrf.mxu0 }
 0xa47   : > { %v4587_v5 = vsel %vm1261_vm5, %v18068_v12, -inf }
 0xa48   : > { %4585 = vmax.xlane.f32.xlu1 %v4584_v44  ;;  %4588 = vmax.xlane.f32.xlu0 %v4587_v5 }
 0xa59   : > { %4826 = vrot.lane.b32.xlu1 %v17357_v50, %s21666_s29 }
 0xa5d   : > { %4873 = vrot.lane.b32.xlu1 %v17355_v46, %s21666_s29 }
 0xa5e   : > { %4779 = vrot.lane.b32.xlu0 %v17335_v20, %s21666_s29 }
 0xa61   : > { %4967 = vrot.lane.b32.xlu1 %v17359_v3, %s21666_s29 }
 0xa62   : > { %4920 = vrot.lane.b32.xlu0 %v17361_v57, %s21666_s29 }
 0xa65   : > { %5061 = vrot.lane.b32.xlu1 %v17363_v29, %s21666_s29 }
 0xa66   : > { %5014 = vrot.lane.b32.xlu0 %v17365_v34, %s21666_s29  ;;  %s21668_s29 = smov 24  }
 0xab1   : > { %v4556_v56 = vpop.xlane.xlu0 %4555 }
 0xab2   : > { %v4598_v62 = vsub.f32 %v18010_v27, %v4556_v56 }
 0xab4   : > { %v4616_v35 = vmul.f32 1.442695, %v4598_v62 }
 0xab5   : > { %v4550_v49 = vpop.xlane.xlu0 %4549 }
 0xab6   : > { %16122 = vpow2.f32 %v4616_v35  ;;  %v4596_v52 = vsub.f32 %v18014_v61, %v4550_v49 }
 0xab8   : > { %v4612_v54 = vmul.f32 1.442695, %v4596_v52 }
 0xab9   : > { %v4559_v55 = vpop.xlane.xlu0 %4558  ;;  %v4553_v44 = vpop.xlane.xlu1 %4552 }
 0xaba   : > { %16124 = vpow2.f32 %v4612_v54  ;;  %v4599_v5 = vsub.f32 %v18016_v6, %v4559_v55  ;;  %v4597_v39 = vsub.f32 %v18020_v4, %v4553_v44 }
 0xabc   : > { %v4618_v38 = vmul.f32 1.442695, %v4599_v5  ;;  %v4614_v7 = vmul.f32 1.442695, %v4597_v39 }
 0xabd   : > { %v4571_v17 = vpop.xlane.xlu0 %4570  ;;  %v4568_v1 = vpop.xlane.xlu1 %4567 }
 0xabe   : > { %16126 = vpow2.f32 %v4618_v38  ;;  %v4603_v27 = vsub.f32 %v18028_v51, %v4571_v17  ;;  %v4602_v56 = vsub.f32 %v18022_v41, %v4568_v1 }
 0xabf   : > { %16128 = vpow2.f32 %v4614_v7 }
 0xac0   : > { %v4626_v62 = vmul.f32 1.442695, %v4603_v27  ;;  %v4624_v61 = vmul.f32 1.442695, %v4602_v56 }
 0xac1   : > { %v4562_v35 = vpop.xlane.xlu1 %4561  ;;  %v4565_v49 = vpop.xlane.xlu0 %4564 }
 0xac2   : > { %16130 = vpow2.f32 %v4626_v62  ;;  %v4600_v52 = vsub.f32 %v18030_v43, %v4562_v35  ;;  %v4601_v6 = vsub.f32 %v18036_v16, %v4565_v49 }
 0xac3   : > { %v18096_v4 = vpop.eup %16122  ;;  %16132 = vpow2.f32 %v4624_v61 }
 0xac4   : > { %v4620_v39 = vmul.f32 1.442695, %v4600_v52  ;;  %v4622_v54 = vmul.f32 1.442695, %v4601_v6  ;;  %v4650_v17 = vsel %vm1261_vm5, %v18096_v4, 0.0 }
 0xac5   : > { %v4580_v38 = vpop.xlane.xlu1 %4579  ;;  %v4583_v1 = vpop.xlane.xlu0 %4582  ;;  %4651 = vadd.xlane.f32.xlu1 %v4650_v17 }
 0xac6   : > { %16134 = vpow2.f32 %v4620_v39  ;;  %v4606_v7 = vsub.f32 %v18038_v8, %v4580_v38  ;;  %v4607_v41 = vsub.f32 %v18044_v2, %v4583_v1 }
 0xac7   : > { %v18102_v51 = vpop.eup %16124  ;;  %16136 = vpow2.f32 %v4622_v54 }
 0xac8   : > { %v4632_v16 = vmul.f32 1.442695, %v4606_v7  ;;  %v4634_v43 = vmul.f32 1.442695, %v4607_v41  ;;  %v4644_v55 = vsel %vm1261_vm5, %v18102_v51, 0.0 }
 0xac9   : > { %v4574_v44 = vpop.xlane.xlu1 %4573  ;;  %v4577_v5 = vpop.xlane.xlu0 %4576  ;;  %4645 = vadd.xlane.f32.xlu1 %v4644_v55 }
 0xaca   : > { %16138 = vpow2.f32 %v4632_v16  ;;  %v4604_v27 = vsub.f32 %v18046_v31, %v4574_v44  ;;  %v4605_v56 = vsub.f32 %v18052_v18, %v4577_v5 }
 0xacb   : > { %v18108_v62 = vpop.eup %16126  ;;  %16140 = vpow2.f32 %v4634_v43 }
 0xacc   : > { %v4628_v2 = vmul.f32 1.442695, %v4604_v27  ;;  %v4630_v8 = vmul.f32 1.442695, %v4605_v56  ;;  %v4653_v61 = vsel %vm1261_vm5, %v18108_v62, 0.0  ;;  %v18112_v35 = vpop.eup %16128 }
 0xacd   : > { %v4592_v49 = vpop.xlane.xlu1 %4591  ;;  %v4595_v52 = vpop.xlane.xlu0 %4594  ;;  %4654 = vadd.xlane.f32.xlu0 %v4653_v61  ;;  %v4647_v38 = vsel %vm1261_vm5, %v18112_v35, 0.0 }
 0xace   : > { %16142 = vpow2.f32 %v4628_v2  ;;  %v4610_v6 = vsub.f32 %v18054_v11, %v4592_v49  ;;  %v4611_v31 = vsub.f32 %v18060_v42, %v4595_v52 }
 0xacf   : > { %v18116_v39 = vpop.eup %16130  ;;  %16144 = vpow2.f32 %v4630_v8 }
 0xad0   : > { %v18118_v18 = vpop.eup %16132  ;;  %v4640_v54 = vmul.f32 1.442695, %v4610_v6  ;;  %v4642_v17 = vmul.f32 1.442695, %v4611_v31  ;;  %v4665_v43 = vsel %vm1261_vm5, %v18116_v39, 0.0 }
 0xad1   : > { %v4662_v1 = vsel %vm1261_vm5, %v18118_v18, 0.0  ;;  %v4586_v7 = vpop.xlane.xlu1 %4585  ;;  %4648 = vadd.xlane.f32.xlu0 %v4647_v38  ;;  %v4589_v41 = vpop.xlane.xlu0 %4588 }
 0xad2   : > { %16146 = vpow2.f32 %v4640_v54  ;;  %4663 = vadd.xlane.f32.xlu1 %v4662_v1  ;;  %v4608_v42 = vsub.f32 %v18062_v14, %v4586_v7  ;;  %v4609_v11 = vsub.f32 %v18068_v12, %v4589_v41 }
 0xad3   : > { %v18126_v16 = vpop.eup %16134  ;;  %16148 = vpow2.f32 %v4642_v17 }
 0xad4   : > { %v4636_v55 = vmul.f32 1.442695, %v4608_v42  ;;  %v4638_v44 = vmul.f32 1.442695, %v4609_v11  ;;  %v4656_v5 = vsel %vm1261_vm5, %v18126_v16, 0.0  ;;  %v18132_v27 = vpop.eup %16136 }
 0xad5   : > { %4666 = vadd.xlane.f32.xlu0 %v4665_v43  ;;  %v4780_v56 = vpop.permute.xlu0 %4779  ;;  %v4659_v2 = vsel %vm1261_vm5, %v18132_v27, 0.0 }
 0xad6   : > { %16150 = vpow2.f32 %v4636_v55  ;;  %4657 = vadd.xlane.f32.xlu1 %v4656_v5  ;;  %14907 = vmatpush3.bf16.msra.mxu1 %v4780_v56 }
 0xad7   : > { %v18134_v14 = vpop.eup %16138  ;;  %14918 = vmatprep.subr.bf16.mxu1 %v21739_v63  ;;  %16152 = vpow2.f32 %v4638_v44 }
 0xad8   : > { %v4674_v12 = vsel %vm1261_vm5, %v18134_v14, 0.0  ;;  %v18141_v8 = vpop.eup %16140 }
 0xad9   : > { %4660 = vadd.xlane.f32.xlu0 %v4659_v2  ;;  %v4677_v52 = vsel %vm1261_vm5, %v18141_v8, 0.0 }
 0xada   : > { %4675 = vadd.xlane.f32.xlu1 %v4674_v12 }
 0xadb   : > { %v18143_v61 = vpop.eup %16142 }
 0xadc   : > { %v4668_v49 = vsel %vm1261_vm5, %v18143_v61, 0.0  ;;  %v18149_v6 = vpop.eup %16144 }
 0xadd   : > { %4678 = vadd.xlane.f32.xlu0 %v4677_v52  ;;  %v4671_v17 = vsel %vm1261_vm5, %v18149_v6, 0.0 }
 0xade   : > { %4669 = vadd.xlane.f32.xlu1 %v4668_v49 }
 0xadf   : > { %v18151_v31 = vpop.eup %16146 }
 0xae0   : > { %v4686_v54 = vsel %vm1261_vm5, %v18151_v31, 0.0  ;;  %v18157_v38 = vpop.eup %16148 }
 0xae1   : > { %4672 = vadd.xlane.f32.xlu0 %v4671_v17  ;;  %v4689_v41 = vsel %vm1261_vm5, %v18157_v38, 0.0 }
 0xae2   : > { %4687 = vadd.xlane.f32.xlu1 %v4686_v54 }
 0xae3   : > { %v18159_v1 = vpop.eup %16150 }
 0xae4   : > { %v4680_v7 = vsel %vm1261_vm5, %v18159_v1, 0.0  ;;  %v18165_v42 = vpop.eup %16152 }
 0xae5   : > { %4690 = vadd.xlane.f32.xlu0 %v4689_v41  ;;  %v4683_v11 = vsel %vm1261_vm5, %v18165_v42, 0.0 }
 0xae6   : > { %4681 = vadd.xlane.f32.xlu1 %v4680_v7 }
 0xae9   : > { %4684 = vadd.xlane.f32.xlu0 %v4683_v11 }
 0xaf7   : > { %5161 = vrot.lane.b32.xlu1 %v17222_v9, %s21664_s11  ;;  %v4827_v9 = vpop.permute.xlu1 %4826 }
 0xafb   : > { %5212 = vrot.lane.b32.xlu1 %v17258_v36, %s21664_s11 }
 0xaff   : > { %5263 = vrot.lane.b32.xlu1 %v17251_v59, %s21664_s11  ;;  %5110 = vrot.lane.b32.xlu0 %v17225_v19, %s21664_s11  ;;  %v4874_v19 = vpop.permute.xlu1 %4873 }
 0xb03   : > { %5314 = vrot.lane.b32.xlu1 %v17282_v22, %s21664_s11  ;;  %5108 = vrot.lane.b32.xlu0 %v17246_v47, %s21664_s11  ;;  %v18203_v47 = vpop.permute.xlu0 %4920 }
 0xb07   : > { %5365 = vrot.lane.b32.xlu1 %v17275_v15, %s21664_s11  ;;  %5159 = vrot.lane.b32.xlu0 %v17242_v58, %s21664_s11  ;;  %v4968_v58 = vpop.permute.xlu1 %4967  ;;  %v18207_v15 = vpop.permute.xlu0 %5014 }
 0xb0b   : > { %5416 = vrot.lane.b32.xlu1 %v17312_v48, %s21664_s11  ;;  %5210 = vrot.lane.b32.xlu0 %v17280_v24, %s21664_s11  ;;  %v18205_v59 = vpop.permute.xlu1 %5061 }
 0xb0f   : > { %5467 = vrot.lane.b32.xlu1 %v17305_v37, %s21664_s11  ;;  %5261 = vrot.lane.b32.xlu0 %v17278_v13, %s21664_s11 }
 0xb13   : > { %5465 = vrot.lane.b32.xlu1 %v17337_v30, %s21664_s11  ;;  %5312 = vrot.lane.b32.xlu0 %v17310_v45, %s21664_s11 }
 0xb17   : > { %5716 = vrot.lane.b32.xlu1 %v17341_v33, %s21664_s11  ;;  %5363 = vrot.lane.b32.xlu0 %v17308_v23, %s21664_s11 }
 0xb1b   : > { %5414 = vrot.lane.b32.xlu0 %v17339_v32, %s21664_s11 }
 0xb4e   : > { %v4652_v36 = vpop.xlane.xlu1 %4651 }
 0xb4f   : > { %16154 = vrcp.f32 %v4652_v36 }
 0xb52   : > { %v4646_v13 = vpop.xlane.xlu1 %4645 }
 0xb56   : > { %v4655_v24 = vpop.xlane.xlu0 %4654 }
 0xb57   : > { %16156 = vrcp.f32 %v4655_v24 }
 0xb58   : > { %16158 = vrcp.f32 %v4646_v13 }
 0xb5a   : > { %v4649_v22 = vpop.xlane.xlu0 %4648 }
 0xb5b   : > { %v4664_v37 = vpop.xlane.xlu1 %4663  ;;  %16160 = vrcp.f32 %v4649_v22 }
 0xb5c   : > { %16162 = vrcp.f32 %v4664_v37  ;;  %v16155_v48 = vpop.eup %16154 }
 0xb5d   : > { %v4710_v43 = vmul.f32 %v16155_v48, %v18096_v4 }
 0xb5e   : > { %v4667_v23 = vpop.xlane.xlu0 %4666 }
 0xb5f   : > { %v4658_v45 = vpop.xlane.xlu1 %4657  ;;  %16164 = vrcp.f32 %v4667_v23 }
 0xb60   : > { %16166 = vrcp.f32 %v4658_v45 }
 0xb62   : > { %v4661_v30 = vpop.xlane.xlu0 %4660 }
 0xb63   : > { %v4676_v32 = vpop.xlane.xlu1 %4675  ;;  %16168 = vrcp.f32 %v4661_v30 }
 0xb64   : > { %v16157_v33 = vpop.eup %16156  ;;  %16170 = vrcp.f32 %v4676_v32 }
 0xb65   : > { %v4711_v55 = vmul.f32 %v16157_v33, %v18108_v62  ;;  %v16159_v44 = vpop.eup %16158 }
 0xb66   : > { %v4679_v5 = vpop.xlane.xlu0 %4678  ;;  %v4708_v49 = vmul.f32 %v16159_v44, %v18102_v51 }
 0xb67   : > { %v4670_v56 = vpop.xlane.xlu1 %4669  ;;  %16172 = vrcp.f32 %v4679_v5  ;;  %v4725_v12 = vpack.c.bf16 %v4711_v55, %v4710_v43 }
 0xb68   : > { %v16161_v2 = vpop.eup %16160  ;;  %16174 = vrcp.f32 %v4670_v56 }
 0xb69   : > { %v4709_v52 = vmul.f32 %v16161_v2, %v18112_v35  ;;  %14909 = vmatmul.mubr.msk.bf16.vlgmr.msra.gmra.mxu1 %vm1261_vm5, %v4725_v12  ;;  %v16163_v54 = vpop.eup %16162 }
 0xb6a   : > { %14919 = vmatpush3.bf16.msra.mxu1 %v4874_v19  ;;  %v4673_v17 = vpop.xlane.xlu0 %4672  ;;  %14920 = vmatprep.mubr.msk.bf16.mxu1 %vm16647_vm7, %v21739_v63  ;;  %v4714_v41 = vmul.f32 %v16163_v54, %v18118_v18 }
 0xb6b   : > { %v4688_v4 = vpop.xlane.xlu1 %4687  ;;  %16176 = vrcp.f32 %v4673_v17  ;;  %v4724_v62 = vpack.c.bf16 %v4709_v52, %v4708_v49  ;;  %14930 = vmatprep.subr.bf16.mxu1 %v21739_v63 }
 0xb6c   : > { %v16165_v7 = vpop.eup %16164  ;;  %16178 = vrcp.f32 %v4688_v4 }
 0xb6d   : > { %v4715_v51 = vmul.f32 %v16165_v7, %v18116_v39  ;;  %14903 = vmatmul.mubr.msk.bf16.vlgmr.msra.gmra.mxu0 %vm1261_vm5, %v4724_v62  ;;  %v16167_v35 = vpop.eup %16166 }
 0xb6e   : > { %14913 = vmatpush3.bf16.msra.mxu0 %v4827_v9  ;;  %v4691_v11 = vpop.xlane.xlu0 %4690  ;;  %14914 = vmatprep.mubr.msk.bf16.mxu0 %vm16647_vm7, %v21739_v63  ;;  %v4712_v24 = vmul.f32 %v16167_v35, %v18126_v16 }
 0xb6f   : > { %v4682_v19 = vpop.xlane.xlu1 %4681  ;;  %16180 = vrcp.f32 %v4691_v11  ;;  %v4727_v36 = vpack.c.bf16 %v4715_v51, %v4714_v41  ;;  %14924 = vmatprep.subr.bf16.mxu0 %v21739_v63 }
 0xb70   : > { %v16169_v13 = vpop.eup %16168  ;;  %16182 = vrcp.f32 %v4682_v19 }
 0xb71   : > { %v4713_v18 = vmul.f32 %v16169_v13, %v18132_v27  ;;  %14921 = vmatmul.mubr.msk.bf16.vlgmr.msra.gmra.mxu1 %vm1261_vm5, %v4727_v36  ;;  %v16171_v39 = vpop.eup %16170 }
 0xb72   : > { %14931 = vmatpush3.bf16.msra.mxu1 %v4968_v58  ;;  %v4685_v9 = vpop.xlane.xlu0 %4684  ;;  %14932 = vmatprep.mubr.msk.bf16.mxu1 %vm16647_vm7, %v21739_v63  ;;  %v4718_v45 = vmul.f32 %v16171_v39, %v18134_v14 }
 0xb73   : > { %v5162_v22 = vpop.permute.xlu1 %5161  ;;  %16184 = vrcp.f32 %v4685_v9  ;;  %v4726_v37 = vpack.c.bf16 %v4713_v18, %v4712_v24  ;;  %14942 = vmatprep.subr.bf16.mxu1 %v21739_v63 }
 0xb74   : > { %v16173_v23 = vpop.eup %16172 }
 0xb75   : > { %v4719_v16 = vmul.f32 %v16173_v23, %v18141_v8  ;;  %14915 = vmatmul.mubr.msk.bf16.vlgmr.msra.gmra.mxu0 %vm1261_vm5, %v4726_v37  ;;  %v16175_v27 = vpop.eup %16174 }
 0xb76   : > { %14925 = vmatpush3.bf16.msra.mxu0 %v18203_v47  ;;  %v5111_v58 = vpop.permute.xlu0 %5110  ;;  %14926 = vmatprep.mubr.msk.bf16.mxu0 %vm16647_vm7, %v21739_v63  ;;  %v4716_v33 = vmul.f32 %v16175_v27, %v18143_v61 }
 0xb77   : > { %v4729_v48 = vpack.c.bf16 %v4719_v16, %v4718_v45  ;;  %14936 = vmatprep.subr.bf16.mxu0 %v21739_v63  ;;  %v5213_v32 = vpop.permute.xlu1 %5212  ;;  %v5116_v52 = vsel %vm1016_vm4, %v5111_v58, 0 }
 0xb78   : > { %v16177_v30 = vpop.eup %16176  ;;  %v5218_v4 = vsel %vm1016_vm4, %v5213_v32, 0 }
 0xb79   : > { %v4717_v14 = vmul.f32 %v16177_v30, %v18149_v6  ;;  %14933 = vmatmul.mubr.msk.bf16.vlgmr.msra.gmra.mxu1 %vm1261_vm5, %v4729_v48  ;;  %v16179_v8 = vpop.eup %16178 }
 0xb7a   : > { %14943 = vmatpush3.bf16.msra.mxu1 %v18205_v59  ;;  %v5109_v43 = vpop.permute.xlu0 %5108  ;;  %14944 = vmatprep.mubr.msk.bf16.mxu1 %vm16647_vm7, %v21739_v63  ;;  %v4722_v44 = vmul.f32 %v16179_v8, %v18151_v31  ;;  %v5167_v31 = vsel %vm1016_vm4, %v5162_v22, 0 }
 0xb7b   : > { %v4728_v47 = vpack.c.bf16 %v4717_v14, %v4716_v33  ;;  %14954 = vmatprep.subr.bf16.mxu1 %v21739_v63  ;;  %v5264_v6 = vpop.permute.xlu1 %5263 }
 0xb7c   : > { %v16181_v55 = vpop.eup %16180 }
 0xb7d   : > { %v4723_v5 = vmul.f32 %v16181_v55, %v18157_v38  ;;  %14927 = vmatmul.mubr.msk.bf16.vlgmr.msra.gmra.mxu0 %vm1261_vm5, %v4728_v47  ;;  %v16183_v61 = vpop.eup %16182 }
 0xb7e   : > { %14937 = vmatpush3.bf16.msra.mxu0 %v18207_v15  ;;  %14938 = vmatprep.mubr.msk.bf16.mxu0 %vm16647_vm7, %v21739_v63  ;;  %v5160_v12 = vpop.permute.xlu0 %5159  ;;  %v4720_v2 = vmul.f32 %v16183_v61, %v18159_v1  ;;  %v5269_v1 = vsel %vm1016_vm4, %v5264_v6, 0 }
 0xb7f   : > { %v4731_v59 = vpack.c.bf16 %v4723_v5, %v4722_v44  ;;  %14948 = vmatprep.subr.bf16.mxu0 %v21739_v63  ;;  %v5315_v49 = vpop.permute.xlu1 %5314 }
 0xb80   : > { %v16185_v56 = vpop.eup %16184  ;;  %v5320_v51 = vsel %vm1016_vm4, %v5315_v49, 0 }
 0xb81   : > { %v4721_v38 = vmul.f32 %v16185_v56, %v18165_v42  ;;  %14945 = vmatmul.mubr.msk.bf16.vlgmr.msra.gmra.mxu1 %vm1261_vm5, %v4731_v59 }
 0xb82   : > { %14955 = vmatpush3.bf16.xpose.msra.mxu1 %v5167_v31  ;;  %14956 = vmatprep.mubr.msk.bf16.mxu1 %vm16647_vm7, %v21739_v63  ;;  %v5211_v54 = vpop.permute.xlu0 %5210 }
 0xb83   : > { %v4730_v15 = vpack.c.bf16 %v4721_v38, %v4720_v2  ;;  %14966 = vmatprep.subr.bf16.mxu1 %v21739_v63  ;;  %v5366_v42 = vpop.permute.xlu1 %5365 }
 0xb84   : > { %v5371_v7 = vsel %vm1016_vm4, %v5366_v42, 0 }
 0xb85   : > { %14939 = vmatmul.mubr.msk.bf16.vlgmr.msra.gmra.mxu0 %vm1261_vm5, %v4730_v15 }
 0xb86   : > { %14949 = vmatpush3.bf16.xpose.msra.mxu0 %v5116_v52  ;;  %14950 = vmatprep.mubr.msk.bf16.mxu0 %vm16647_vm7, %v21739_v63  ;;  %v5262_v17 = vpop.permute.xlu0 %5261 }
 0xb87   : > { %14960 = vmatprep.subr.bf16.mxu0 %v21739_v63  ;;  %v5417_v62 = vpop.permute.xlu1 %5416 }
 0xb88   : > { %v5422_v36 = vsel %vm1016_vm4, %v5417_v62, 0 }
 0xb89   : > { %14957 = vmatmul.mubr.msk.bf16.vlgmr.msra.gmra.mxu1 %vm1016_vm4, %v5160_v12 }
 0xb8a   : > { %14967 = vmatpush3.bf16.xpose.msra.mxu1 %v5269_v1  ;;  %14968 = vmatprep.mubr.msk.bf16.mxu1 %vm16647_vm7, %v21739_v63  ;;  %v5313_v41 = vpop.permute.xlu0 %5312 }
 0xb8b   : > { %14978 = vmatprep.subr.bf16.mxu1 %v21739_v63  ;;  %v5468_v35 = vpop.permute.xlu1 %5467 }
 0xb8c   : > { %v5473_v19 = vsel %vm1016_vm4, %v5468_v35, 0 }
 0xb8d   : > { %14951 = vmatmul.mubr.msk.bf16.vlgmr.msra.gmra.mxu0 %vm1016_vm4, %v5109_v43 }
 0xb8e   : > { %14961 = vmatpush3.bf16.xpose.msra.mxu0 %v5218_v4  ;;  %14962 = vmatprep.mubr.msk.bf16.mxu0 %vm16647_vm7, %v21739_v63  ;;  %v5364_v11 = vpop.permute.xlu0 %5363 }
 0xb8f   : > { %14972 = vmatprep.subr.bf16.mxu0 %v21739_v63  ;;  %v5466_v13 = vpop.permute.xlu1 %5465 }
 0xb91   : > { %14969 = vmatmul.mubr.msk.bf16.vlgmr.msra.gmra.mxu1 %vm1016_vm4, %v5262_v17 }
 0xb92   : > { %14979 = vmatpush3.bf16.xpose.msra.mxu1 %v5371_v7  ;;  %14980 = vmatprep.mubr.msk.bf16.mxu1 %vm16647_vm7, %v21739_v63  ;;  %v5415_v24 = vpop.permute.xlu0 %5414 }
 0xb93   : > { %14990 = vmatprep.subr.bf16.mxu1 %v21739_v63  ;;  %v5717_v18 = vpop.permute.xlu1 %5716 }
 0xb95   : > { %14963 = vmatmul.mubr.msk.bf16.vlgmr.msra.gmra.mxu0 %vm1016_vm4, %v5211_v54 }
 0xb96   : > { %14973 = vmatpush3.bf16.xpose.msra.mxu0 %v5320_v51  ;;  %14974 = vmatprep.mubr.msk.bf16.mxu0 %vm16647_vm7, %v21739_v63 }
 0xb97   : > { %14984 = vmatprep.subr.bf16.mxu0 %v21739_v63 }
 0xb99   : > { %14981 = vmatmul.mubr.msk.bf16.vlgmr.msra.gmra.mxu1 %vm1016_vm4, %v5364_v11 }
 0xb9a   : > { %14991 = vmatpush3.bf16.xpose.msra.mxu1 %v5473_v19  ;;  %14992 = vmatprep.mubr.msk.bf16.mxu1 %vm16647_vm7, %v21739_v63 }
 0xb9b   : > { %15002 = vmatprep.subr.bf16.mxu1 %v21739_v63 }
 0xb9d   : > { %14975 = vmatmul.mubr.msk.bf16.vlgmr.msra.gmra.mxu0 %vm1016_vm4, %v5313_v41 }
 0xb9e   : > { %14985 = vmatpush3.bf16.xpose.msra.mxu0 %v5422_v36  ;;  %14986 = vmatprep.mubr.msk.bf16.mxu0 %vm16647_vm7, %v21739_v63 }
 0xb9f   : > { %14996 = vmatprep.subr.bf16.mxu0 %v21739_v63 }
 0xba1   : > { %14993 = vmatmul.mubr.msk.bf16.vlgmr.msra.gmra.mxu1 %vm1016_vm4, %v5466_v13 }
 0xba2   : > { %15004 = vmatprep.mubr.msk.bf16.mxu1 %vm16647_vm7, %v21739_v63 }
 0xba5   : > { %14987 = vmatmul.mubr.msk.bf16.vlgmr.msra.gmra.mxu0 %vm1016_vm4, %v5415_v24 }
 0xba6   : > { %14997 = vmatpush3.bf16.msra.mxu0 %v5717_v18  ;;  %14998 = vmatprep.mubr.msk.bf16.mxu0 %vm16647_vm7, %v21739_v63 }
 0xba7   : > { %15008 = vmatprep.subr.bf16.mxu0 %v21739_v63 }
 0xc29   : > { %v18299_v39 = vpop.f32.mrf.mxu1 }
 0xc2b   : > { %v14910_v9 = vpop.f32.mrf.mxu1 }
 0xc2d   : > { %v18301_v22 = vpop.f32.mrf.mxu0  ;;  %v18303_v37 = vpop.f32.mrf.mxu1 }
 0xc2e   : > { %v15729_v23 = vpack.i.bf16 %v18303_v37, %v18299_v39 }
 0xc2f   : > { %v14904_v45 = vpop.f32.mrf.mxu0  ;;  %v14911_v16 = vpop.f32.mrf.mxu1 }
 0xc31   : > { %v18307_v27 = vpop.f32.mrf.mxu0  ;;  %v18309_v58 = vpop.f32.mrf.mxu1 }
 0xc32   : > { %v15724_v48 = vpack.i.bf16 %v18307_v27, %v18301_v22 }
 0xc33   : > { %v14905_v30 = vpop.f32.mrf.mxu0  ;;  %v14922_v32 = vpop.f32.mrf.mxu1 }
 0xc35   : > { %v18313_v33 = vpop.f32.mrf.mxu0  ;;  %v18315_v14 = vpop.f32.mrf.mxu1 }
 0xc36   : > { %v15749_v8 = vpack.i.bf16 %v18315_v14, %v18309_v58 }
 0xc37   : > { %v14916_v43 = vpop.f32.mrf.mxu0  ;;  %v14923_v47 = vpop.f32.mrf.mxu1 }
 0xc39   : > { %v18319_v55 = vpop.f32.mrf.mxu0  ;;  %v18321_v44 = vpop.f32.mrf.mxu1 }
 0xc3a   : > { %v15744_v5 = vpack.i.bf16 %v18319_v55, %v18313_v33 }
 0xc3b   : > { %v14917_v61 = vpop.f32.mrf.mxu0  ;;  %v14934_v6 = vpop.f32.mrf.mxu1 }
 0xc3d   : > { %v18325_v59 = vpop.f32.mrf.mxu0  ;;  %v18327_v56 = vpop.f32.mrf.mxu1 }
 0xc3e   : > { %v15779_v12 = vpack.i.bf16 %v18327_v56, %v18321_v44  ;;  %v21773_v56 = vld [vmem:[#allocation40_spill] sm:$0xff] }
 0xc3f   : > { %v14928_v2 = vpop.f32.mrf.mxu0  ;;  %v14935_v31 = vpop.f32.mrf.mxu1 }
 0xc41   : > { %v18331_v38 = vpop.f32.mrf.mxu0  ;;  %v18333_v15 = vpop.f32.mrf.mxu1 }
 0xc42   : > { %v15774_v49 = vpack.i.bf16 %v18331_v38, %v18325_v59  ;;  %v21776_v59 = vld [vmem:[#allocation41_spill] sm:$0xff]  ;;  %v21777_v38 = vld [vmem:[#allocation39_spill] sm:$0xff] }
 0xc43   : > { %v14929_v52 = vpop.f32.mrf.mxu0  ;;  %v14946_v54 = vpop.f32.mrf.mxu1 }
 0xc45   : > { %v18337_v1 = vpop.f32.mrf.mxu0  ;;  %v18339_v42 = vpop.f32.mrf.mxu1 }
 0xc47   : > { %v14940_v4 = vpop.f32.mrf.mxu0  ;;  %v14947_v62 = vpop.f32.mrf.mxu1 }
 0xc49   : > { %v18343_v7 = vpop.f32.mrf.mxu0  ;;  %v5203_v41 = vpop.f32.mrf.mxu1 }
 0xc4a   : > { %v18347_v35 = vmul.f32 0.35355338, %v5203_v41 }
 0xc4b   : > { %v14941_v11 = vpop.f32.mrf.mxu0  ;;  %v14958_v19 = vpop.f32.mrf.mxu1 }
 0xc4c   : > { %v5538_v36 = vsel %vm1261_vm5, %v18347_v35, -inf }
 0xc4d   : > { %5539 = vmax.xlane.f32.xlu0 %v5538_v36  ;;  %v5152_v13 = vpop.f32.mrf.mxu0  ;;  %v5206_v24 = vpop.f32.mrf.mxu1 }
 0xc4e   : > { %v18351_v18 = vmul.f32 0.35355338, %v5152_v13  ;;  %v18353_v16 = vmul.f32 0.35355338, %v5206_v24 }
 0xc4f   : > { %v14952_v9 = vpop.f32.mrf.mxu0  ;;  %v14959_v45 = vpop.f32.mrf.mxu1 }
 0xc50   : > { %v5532_v30 = vsel %vm1261_vm5, %v18351_v18, -inf  ;;  %v5541_v31 = vsel %vm1261_vm5, %v18353_v16, -inf }
 0xc51   : > { %v5305_v32 = vpop.f32.mrf.mxu1  ;;  %5533 = vmax.xlane.f32.xlu0 %v5532_v30  ;;  %v5155_v43 = vpop.f32.mrf.mxu0 }
 0xc52   : > { %v18357_v47 = vmul.f32 0.35355338, %v5155_v43  ;;  %v18359_v2 = vmul.f32 0.35355338, %v5305_v32 }
 0xc53   : > { %v14953_v61 = vpop.f32.mrf.mxu0  ;;  %v14970_v6 = vpop.f32.mrf.mxu1 }
 0xc54   : > { %v5535_v52 = vsel %vm1261_vm5, %v18357_v47, -inf  ;;  %v5550_v13 = vsel %vm1261_vm5, %v18359_v2, -inf }
 0xc55   : > { %v5308_v54 = vpop.f32.mrf.mxu1  ;;  %5542 = vmax.xlane.f32.xlu0 %v5541_v31  ;;  %5536 = vmax.xlane.f32.xlu1 %v5535_v52  ;;  %v5254_v4 = vpop.f32.mrf.mxu0 }
 0xc56   : > { %v18365_v62 = vmul.f32 0.35355338, %v5308_v54  ;;  %v18367_v19 = vmul.f32 0.35355338, %v5254_v4 }
 0xc57   : > { %v14964_v41 = vpop.f32.mrf.mxu0  ;;  %v14971_v11 = vpop.f32.mrf.mxu1 }
 0xc58   : > { %v5553_v36 = vsel %vm1261_vm5, %v18365_v62, -inf  ;;  %v5544_v61 = vsel %vm1261_vm5, %v18367_v19, -inf }
 0xc59   : > { %v5407_v24 = vpop.f32.mrf.mxu1  ;;  %5554 = vmax.xlane.f32.xlu0 %v5553_v36  ;;  %5551 = vmax.xlane.f32.xlu1 %v5550_v13  ;;  %v5257_v9 = vpop.f32.mrf.mxu0 }
 0xc5a   : > { %v18373_v45 = vmul.f32 0.35355338, %v5257_v9  ;;  %v18375_v43 = vmul.f32 0.35355338, %v5407_v24 }
 0xc5b   : > { %v14965_v30 = vpop.f32.mrf.mxu0  ;;  %v14982_v32 = vpop.f32.mrf.mxu1 }
 0xc5c   : > { %v5547_v6 = vsel %vm1261_vm5, %v18373_v45, -inf  ;;  %v5562_v36 = vsel %vm1261_vm5, %v18375_v43, -inf }
 0xc5d   : > { %v5410_v31 = vpop.f32.mrf.mxu1  ;;  %5545 = vmax.xlane.f32.xlu1 %v5544_v61  ;;  %5548 = vmax.xlane.f32.xlu0 %v5547_v6  ;;  %v5356_v52 = vpop.f32.mrf.mxu0 }
 0xc5e   : > { %v18381_v54 = vmul.f32 0.35355338, %v5410_v31  ;;  %v18383_v11 = vmul.f32 0.35355338, %v5356_v52 }
 0xc5f   : > { %v14976_v4 = vpop.f32.mrf.mxu0  ;;  %v14983_v41 = vpop.f32.mrf.mxu1 }
 0xc60   : > { %v5565_v13 = vsel %vm1261_vm5, %v18381_v54, -inf  ;;  %v5556_v31 = vsel %vm1261_vm5, %v18383_v11, -inf }
 0xc61   : > { %v5509_v24 = vpop.f32.mrf.mxu1  ;;  %5563 = vmax.xlane.f32.xlu1 %v5562_v36  ;;  %5566 = vmax.xlane.f32.xlu0 %v5565_v13  ;;  %v5359_v9 = vpop.f32.mrf.mxu0 }
 0xc62   : > { %v18389_v30 = vmul.f32 0.35355338, %v5359_v9  ;;  %v18391_v6 = vmul.f32 0.35355338, %v5509_v24 }
 0xc63   : > { %v14977_v32 = vpop.f32.mrf.mxu0  ;;  %v14994_v61 = vpop.f32.mrf.mxu1 }
 0xc64   : > { %v5559_v52 = vsel %vm1261_vm5, %v18389_v30, -inf  ;;  %v5574_v24 = vsel %vm1261_vm5, %v18391_v6, -inf }
 0xc65   : > { %v5512_v4 = vpop.f32.mrf.mxu1  ;;  %5557 = vmax.xlane.f32.xlu1 %v5556_v31  ;;  %5560 = vmax.xlane.f32.xlu0 %v5559_v52  ;;  %v5458_v41 = vpop.f32.mrf.mxu0 }
 0xc66   : > { %v18397_v51 = vmul.f32 0.35355338, %v5512_v4  ;;  %v18399_v9 = vmul.f32 0.35355338, %v5458_v41 }
 0xc67   : > { %v14988_v36 = vpop.f32.mrf.mxu0  ;;  %v14995_v13 = vpop.f32.mrf.mxu1 }
 0xc68   : > { %v5577_v32 = vsel %vm1261_vm5, %v18397_v51, -inf  ;;  %v5568_v52 = vsel %vm1261_vm5, %v18399_v9, -inf }
 0xc69   : > { %5575 = vmax.xlane.f32.xlu1 %v5574_v24  ;;  %5578 = vmax.xlane.f32.xlu0 %v5577_v32  ;;  %v5461_v61 = vpop.f32.mrf.mxu0 }
 0xc6a   : > { %v18405_v17 = vmul.f32 0.35355338, %v5461_v61 }
 0xc6b   : > { %v14989_v31 = vpop.f32.mrf.mxu0 }
 0xc6c   : > { %v5571_v4 = vsel %vm1261_vm5, %v18405_v17, -inf }
 0xc6d   : > { %5569 = vmax.xlane.f32.xlu1 %v5568_v52  ;;  %5572 = vmax.xlane.f32.xlu0 %v5571_v4 }
 0xc7e   : > { %5810 = vrot.lane.b32.xlu1 %v17357_v50, %s21664_s11 }
 0xc82   : > { %5857 = vrot.lane.b32.xlu1 %v17355_v46, %s21664_s11 }
 0xc83   : > { %5763 = vrot.lane.b32.xlu0 %v17335_v20, %s21664_s11 }
 0xc86   : > { %5951 = vrot.lane.b32.xlu1 %v17359_v3, %s21664_s11 }
 0xc87   : > { %5904 = vrot.lane.b32.xlu0 %v17361_v57, %s21664_s11 }
 0xcd6   : > { %v5540_v41 = vpop.xlane.xlu0 %5539 }
 0xcd7   : > { %v5582_v36 = vsub.f32 %v18347_v35, %v5540_v41 }
 0xcd9   : > { %v5600_v13 = vmul.f32 1.442695, %v5582_v36 }
 0xcda   : > { %v5534_v24 = vpop.xlane.xlu0 %5533 }
 0xcdb   : > { %16186 = vpow2.f32 %v5600_v13  ;;  %v5580_v50 = vsub.f32 %v18351_v18, %v5534_v24 }
 0xcdd   : > { %v5596_v32 = vmul.f32 1.442695, %v5580_v50 }
 0xcde   : > { %v5543_v61 = vpop.xlane.xlu0 %5542  ;;  %v5537_v46 = vpop.xlane.xlu1 %5536 }
 0xcdf   : > { %16188 = vpow2.f32 %v5596_v32  ;;  %v5583_v20 = vsub.f32 %v18353_v16, %v5543_v61  ;;  %v5581_v31 = vsub.f32 %v18357_v47, %v5537_v46 }
 0xce1   : > { %v5602_v3 = vmul.f32 1.442695, %v5583_v20  ;;  %v5598_v52 = vmul.f32 1.442695, %v5581_v31 }
 0xce2   : > { %v5555_v4 = vpop.xlane.xlu0 %5554  ;;  %v5552_v57 = vpop.xlane.xlu1 %5551 }
 0xce3   : > { %16190 = vpow2.f32 %v5602_v3  ;;  %v5587_v35 = vsub.f32 %v18365_v62, %v5555_v4  ;;  %v5586_v41 = vsub.f32 %v18359_v2, %v5552_v57 }
 0xce4   : > { %16192 = vpow2.f32 %v5598_v52 }
 0xce5   : > { %v5610_v36 = vmul.f32 1.442695, %v5587_v35  ;;  %v5608_v18 = vmul.f32 1.442695, %v5586_v41 }
 0xce6   : > { %v5546_v13 = vpop.xlane.xlu1 %5545  ;;  %v5549_v24 = vpop.xlane.xlu0 %5548 }
 0xce7   : > { %16194 = vpow2.f32 %v5610_v36  ;;  %v5584_v50 = vsub.f32 %v18367_v19, %v5546_v13  ;;  %v5585_v16 = vsub.f32 %v18373_v45, %v5549_v24 }
 0xce8   : > { %v18429_v47 = vpop.eup %16186  ;;  %16196 = vpow2.f32 %v5608_v18 }
 0xce9   : > { %v5604_v32 = vmul.f32 1.442695, %v5584_v50  ;;  %v5606_v61 = vmul.f32 1.442695, %v5585_v16  ;;  %v5634_v62 = vsel %vm1261_vm5, %v18429_v47, 0.0 }
 0xcea   : > { %v5564_v46 = vpop.xlane.xlu1 %5563  ;;  %v5567_v2 = vpop.xlane.xlu0 %5566  ;;  %5635 = vadd.xlane.f32.xlu1 %v5634_v62 }
 0xceb   : > { %16198 = vpow2.f32 %v5604_v32  ;;  %v5590_v20 = vsub.f32 %v18375_v43, %v5564_v46  ;;  %v5591_v31 = vsub.f32 %v18381_v54, %v5567_v2 }
 0xcec   : > { %v18435_v3 = vpop.eup %16188  ;;  %16200 = vpow2.f32 %v5606_v61 }
 0xced   : > { %v5616_v19 = vmul.f32 1.442695, %v5590_v20  ;;  %v5618_v45 = vmul.f32 1.442695, %v5591_v31  ;;  %v5628_v52 = vsel %vm1261_vm5, %v18435_v3, 0.0 }
 0xcee   : > { %v5558_v4 = vpop.xlane.xlu1 %5557  ;;  %v5561_v57 = vpop.xlane.xlu0 %5560  ;;  %5629 = vadd.xlane.f32.xlu1 %v5628_v52 }
 0xcef   : > { %16202 = vpow2.f32 %v5616_v19  ;;  %v5588_v35 = vsub.f32 %v18383_v11, %v5558_v4  ;;  %v5589_v41 = vsub.f32 %v18389_v30, %v5561_v57 }
 0xcf0   : > { %v18441_v36 = vpop.eup %16190  ;;  %16204 = vpow2.f32 %v5618_v45 }
 0xcf1   : > { %v5612_v43 = vmul.f32 1.442695, %v5588_v35  ;;  %v5614_v54 = vmul.f32 1.442695, %v5589_v41  ;;  %v5637_v18 = vsel %vm1261_vm5, %v18441_v36, 0.0  ;;  %v18445_v13 = vpop.eup %16192 }
 0xcf2   : > { %v5576_v24 = vpop.xlane.xlu1 %5575  ;;  %v5579_v50 = vpop.xlane.xlu0 %5578  ;;  %5638 = vadd.xlane.f32.xlu0 %v5637_v18  ;;  %v5631_v46 = vsel %vm1261_vm5, %v18445_v13, 0.0 }
 0xcf3   : > { %16206 = vpow2.f32 %v5612_v43  ;;  %v5594_v16 = vsub.f32 %v18391_v6, %v5576_v24  ;;  %v5595_v11 = vsub.f32 %v18397_v51, %v5579_v50 }
 0xcf4   : > { %v18449_v32 = vpop.eup %16194  ;;  %16208 = vpow2.f32 %v5614_v54 }
 0xcf5   : > { %v18451_v30 = vpop.eup %16196  ;;  %v5624_v61 = vmul.f32 1.442695, %v5594_v16  ;;  %v5626_v62 = vmul.f32 1.442695, %v5595_v11  ;;  %v5649_v45 = vsel %vm1261_vm5, %v18449_v32, 0.0 }
 0xcf6   : > { %v5646_v2 = vsel %vm1261_vm5, %v18451_v30, 0.0  ;;  %v5570_v20 = vpop.xlane.xlu1 %5569  ;;  %5632 = vadd.xlane.f32.xlu0 %v5631_v46  ;;  %v5573_v31 = vpop.xlane.xlu0 %5572 }
 0xcf7   : > { %16210 = vpow2.f32 %v5624_v61  ;;  %5647 = vadd.xlane.f32.xlu1 %v5646_v2  ;;  %v5592_v51 = vsub.f32 %v18399_v9, %v5570_v20  ;;  %v5593_v6 = vsub.f32 %v18405_v17, %v5573_v31 }
 0xcf8   : > { %v18459_v19 = vpop.eup %16198  ;;  %16212 = vpow2.f32 %v5626_v62 }
 0xcf9   : > { %v5620_v52 = vmul.f32 1.442695, %v5592_v51  ;;  %v5622_v4 = vmul.f32 1.442695, %v5593_v6  ;;  %v5640_v57 = vsel %vm1261_vm5, %v18459_v19, 0.0  ;;  %v18465_v35 = vpop.eup %16200 }
 0xcfa   : > { %5650 = vadd.xlane.f32.xlu0 %v5649_v45  ;;  %v5764_v41 = vpop.permute.xlu0 %5763  ;;  %v5643_v43 = vsel %vm1261_vm5, %v18465_v35, 0.0  ;;  %v21763_v45 = vpack.i.bf16 %v17966_v10, %v17962_v53  ;;  %v21768_v53 = vld [vmem:[#allocation35_spill] sm:$0xff]  ;;  %v21770_v10 = vld [vmem:[#allocation37_spill] sm:$0xff] }
 0xcfb   : > { %16214 = vpow2.f32 %v5620_v52  ;;  %5641 = vadd.xlane.f32.xlu1 %v5640_v57  ;;  %15003 = vmatpush3.bf16.msra.mxu1 %v5764_v41  ;;  %v21765_v52 = vpack.i.bf16 %v17978_v26, %v17972_v40  ;;  %v5811_v26 = vpop.permute.xlu1 %5810 }
 0xcfc   : > { %v18467_v9 = vpop.eup %16202  ;;  %15014 = vmatprep.subr.bf16.mxu1 %v21739_v63  ;;  %16216 = vpow2.f32 %v5622_v4 }
 0xcfd   : > { %v5658_v17 = vsel %vm1261_vm5, %v18467_v9, 0.0  ;;  %v18474_v54 = vpop.eup %16204 }
 0xcfe   : > { %5644 = vadd.xlane.f32.xlu0 %v5643_v43  ;;  %v5661_v50 = vsel %vm1261_vm5, %v18474_v54, 0.0 }
 0xcff   : > { %5659 = vadd.xlane.f32.xlu1 %v5658_v17  ;;  %v5858_v39 = vpop.permute.xlu1 %5857 }
 0xd00   : > { %v18476_v18 = vpop.eup %16206 }
 0xd01   : > { %v5652_v24 = vsel %vm1261_vm5, %v18476_v18, 0.0  ;;  %v18482_v16 = vpop.eup %16208 }
 0xd02   : > { %5662 = vadd.xlane.f32.xlu0 %v5661_v50  ;;  %v5655_v62 = vsel %vm1261_vm5, %v18482_v16, 0.0 }
 0xd03   : > { %5653 = vadd.xlane.f32.xlu1 %v5652_v24  ;;  %v5952_v22 = vpop.permute.xlu1 %5951 }
 0xd04   : > { %v18484_v11 = vpop.eup %16210 }
 0xd05   : > { %v5670_v61 = vsel %vm1261_vm5, %v18484_v11, 0.0  ;;  %v18490_v46 = vpop.eup %16212 }
 0xd06   : > { %5656 = vadd.xlane.f32.xlu0 %v5655_v62  ;;  %v5673_v31 = vsel %vm1261_vm5, %v18490_v46, 0.0 }
 0xd07   : > { %5671 = vadd.xlane.f32.xlu1 %v5670_v61 }
 0xd08   : > { %v18492_v2 = vpop.eup %16214 }
 0xd09   : > { %v5664_v20 = vsel %vm1261_vm5, %v18492_v2, 0.0  ;;  %v18498_v51 = vpop.eup %16216 }
 0xd0a   : > { %5674 = vadd.xlane.f32.xlu0 %v5673_v31  ;;  %v5667_v6 = vsel %vm1261_vm5, %v18498_v51, 0.0 }
 0xd0b   : > { %5665 = vadd.xlane.f32.xlu1 %v5664_v20 }
 0xd0e   : > { %5668 = vadd.xlane.f32.xlu0 %v5667_v6 }
 0xd1c   : > { %6045 = vrot.lane.b32.xlu1 %v17363_v29, %s21664_s11  ;;  %v21766_v29 = vpack.i.bf16 %v17970_v0, %v17964_v28  ;;  %v21769_v28 = vpack.i.bf16 %v17982_v25, %v21768_v53  ;;  %v21771_v0 = vld [vmem:[#allocation36_spill] sm:$0xff] }
 0xd1d   : > { %v21772_v40 = vpack.i.bf16 %v21770_v10, %v21771_v0 }
 0xd20   : > { %15720 = vrot.lane.b32.xlu1 %v21763_v45, %s21670_s6 }
 0xd24   : > { %15730 = vrot.lane.b32.xlu1 %v15729_v23, %s21764_s2  ;;  %5998 = vrot.lane.b32.xlu0 %v17365_v34, %s21664_s11  ;;  %v21767_v34 = vpack.i.bf16 %v17990_v21, %v17984_v60  ;;  %v18546_v21 = vpop.permute.xlu0 %5904 }
 0xd28   : > { %15740 = vrot.lane.b32.xlu1 %v21765_v52, %s21670_s6  ;;  %15715 = vrot.lane.b32.xlu0 %v21766_v29, %s21670_s6 }
 0xd2c   : > { %15750 = vrot.lane.b32.xlu1 %v15749_v8, %s21764_s2  ;;  %15725 = vrot.lane.b32.xlu0 %v15724_v48, %s21764_s2 }
 0xd30   : > { %15760 = vrot.lane.b32.xlu1 %v21767_v34, %s21670_s6  ;;  %15735 = vrot.lane.b32.xlu0 %v21769_v28, %s21670_s6 }
 0xd34   : > { %15745 = vrot.lane.b32.xlu0 %v15744_v5, %s21764_s2 }
 0xd38   : > { %15755 = vrot.lane.b32.xlu0 %v21772_v40, %s21670_s6 }
 0xd73   : > { %v5636_v60 = vpop.xlane.xlu1 %5635 }
 0xd74   : > { %16218 = vrcp.f32 %v5636_v60 }
 0xd77   : > { %v5630_v37 = vpop.xlane.xlu1 %5629 }
 0xd7b   : > { %v5639_v25 = vpop.xlane.xlu0 %5638 }
 0xd7c   : > { %16220 = vrcp.f32 %v5639_v25 }
 0xd7d   : > { %16222 = vrcp.f32 %v5630_v37 }
 0xd7f   : > { %v5633_v23 = vpop.xlane.xlu0 %5632 }
 0xd80   : > { %v5648_v27 = vpop.xlane.xlu1 %5647  ;;  %16224 = vrcp.f32 %v5633_v23 }
 0xd81   : > { %16226 = vrcp.f32 %v5648_v27  ;;  %v16219_v33 = vpop.eup %16218 }
 0xd82   : > { %v5694_v5 = vmul.f32 %v16219_v33, %v18429_v47 }
 0xd83   : > { %v5651_v58 = vpop.xlane.xlu0 %5650 }
 0xd84   : > { %v5642_v48 = vpop.xlane.xlu1 %5641  ;;  %16228 = vrcp.f32 %v5651_v58 }
 0xd85   : > { %16230 = vrcp.f32 %v5642_v48 }
 0xd87   : > { %v5645_v14 = vpop.xlane.xlu0 %5644 }
 0xd88   : > { %v5660_v8 = vpop.xlane.xlu1 %5659  ;;  %16232 = vrcp.f32 %v5645_v14 }
 0xd89   : > { %v16221_v55 = vpop.eup %16220  ;;  %16234 = vrcp.f32 %v5660_v8 }
 0xd8a   : > { %v5695_v4 = vmul.f32 %v16221_v55, %v18441_v36  ;;  %v16223_v57 = vpop.eup %16222 }
 0xd8b   : > { %v5663_v41 = vpop.xlane.xlu0 %5662  ;;  %v5692_v50 = vmul.f32 %v16223_v57, %v18435_v3 }
 0xd8c   : > { %v5654_v17 = vpop.xlane.xlu1 %5653  ;;  %16236 = vrcp.f32 %v5663_v41  ;;  %v5709_v43 = vpack.c.bf16 %v5695_v4, %v5694_v5 }
 0xd8d   : > { %v16225_v24 = vpop.eup %16224  ;;  %16238 = vrcp.f32 %v5654_v17 }
 0xd8e   : > { %v5693_v61 = vmul.f32 %v16225_v24, %v18445_v13  ;;  %15005 = vmatmul.mubr.msk.bf16.vlgmr.msra.gmra.mxu1 %vm1261_vm5, %v5709_v43  ;;  %v16227_v62 = vpop.eup %16226 }
 0xd8f   : > { %15015 = vmatpush3.bf16.msra.mxu1 %v5858_v39  ;;  %v5657_v20 = vpop.xlane.xlu0 %5656  ;;  %15016 = vmatprep.mubr.msk.bf16.mxu1 %vm16647_vm7, %v21739_v63  ;;  %v5698_v6 = vmul.f32 %v16227_v62, %v18451_v30 }
 0xd90   : > { %v5672_v47 = vpop.xlane.xlu1 %5671  ;;  %16240 = vrcp.f32 %v5657_v20  ;;  %v5708_v36 = vpack.c.bf16 %v5693_v61, %v5692_v50  ;;  %15026 = vmatprep.subr.bf16.mxu1 %v21739_v63 }
 0xd91   : > { %v16229_v31 = vpop.eup %16228  ;;  %16242 = vrcp.f32 %v5672_v47 }
 0xd92   : > { %v5699_v3 = vmul.f32 %v16229_v31, %v18449_v32  ;;  %14999 = vmatmul.mubr.msk.bf16.vlgmr.msra.gmra.mxu0 %vm1261_vm5, %v5708_v36  ;;  %v16231_v13 = vpop.eup %16230 }
 0xd93   : > { %15009 = vmatpush3.bf16.msra.mxu0 %v5811_v26  ;;  %v5675_v45 = vpop.xlane.xlu0 %5674  ;;  %15010 = vmatprep.mubr.msk.bf16.mxu0 %vm16647_vm7, %v21739_v63  ;;  %v5696_v53 = vmul.f32 %v16231_v13, %v18459_v19 }
 0xd94   : > { %v5666_v52 = vpop.xlane.xlu1 %5665  ;;  %16244 = vrcp.f32 %v5675_v45  ;;  %v5711_v29 = vpack.c.bf16 %v5699_v3, %v5698_v6  ;;  %15020 = vmatprep.subr.bf16.mxu0 %v21739_v63 }
 0xd95   : > { %v16233_v34 = vpop.eup %16232  ;;  %16246 = vrcp.f32 %v5666_v52 }
 0xd96   : > { %v5697_v30 = vmul.f32 %v16233_v34, %v18465_v35  ;;  %15017 = vmatmul.mubr.msk.bf16.vlgmr.msra.gmra.mxu1 %vm1261_vm5, %v5711_v29  ;;  %v16235_v32 = vpop.eup %16234 }
 0xd97   : > { %15027 = vmatpush3.bf16.msra.mxu1 %v5952_v22  ;;  %v5669_v28 = vpop.xlane.xlu0 %5668  ;;  %15028 = vmatprep.mubr.msk.bf16.mxu1 %vm16647_vm7, %v21739_v63  ;;  %v5702_v40 = vmul.f32 %v16235_v32, %v18467_v9 }
 0xd98   : > { %16248 = vrcp.f32 %v5669_v28  ;;  %v5710_v10 = vpack.c.bf16 %v5697_v30, %v5696_v53  ;;  %15038 = vmatprep.subr.bf16.mxu1 %v21739_v63  ;;  %v6046_v37 = vpop.permute.xlu1 %6045 }
 0xd99   : > { %v16237_v0 = vpop.eup %16236 }
 0xd9a   : > { %v5703_v19 = vmul.f32 %v16237_v0, %v18474_v54  ;;  %15011 = vmatmul.mubr.msk.bf16.vlgmr.msra.gmra.mxu0 %vm1261_vm5, %v5710_v10  ;;  %v16239_v35 = vpop.eup %16238 }
 0xd9b   : > { %15021 = vmatpush3.bf16.msra.mxu0 %v18546_v21  ;;  %15022 = vmatprep.mubr.msk.bf16.mxu0 %vm16647_vm7, %v21739_v63  ;;  %v5700_v22 = vmul.f32 %v16239_v35, %v18476_v18  ;;  %v5999_v27 = vpop.permute.xlu0 %5998 }
 0xd9c   : > { %v5713_v26 = vpack.c.bf16 %v5703_v19, %v5702_v40  ;;  %15032 = vmatprep.subr.bf16.mxu0 %v21739_v63  ;;  %v21779_v19 = vpack.i.bf16 %v18339_v42, %v18333_v15  ;;  %v15721_v15 = vpop.permute.xlu1 %15720 }
 0xd9d   : > { %v16241_v39 = vpop.eup %16240 }
 0xd9e   : > { %v5701_v60 = vmul.f32 %v16241_v39, %v18482_v16  ;;  %15029 = vmatmul.mubr.msk.bf16.vlgmr.msra.gmra.mxu1 %vm1261_vm5, %v5713_v26  ;;  %v16243_v9 = vpop.eup %16242 }
 0xd9f   : > { %15039 = vmatpush3.bf16.msra.mxu1 %v6046_v37  ;;  %15040 = vmatprep.mubr.msk.bf16.mxu1 %vm16647_vm7, %v21739_v63  ;;  %v5706_v25 = vmul.f32 %v16243_v9, %v18484_v11  ;;  %v15965_v11 = vld [vmem:[%s21618_s15 + $0x8] sm:$0xff]   ;;  %v21780_v37 = vpack.i.bf16 %v18343_v7, %v18337_v1  ;;  %v15716_v42 = vpop.permute.xlu0 %15715 }
 0xda0   : > { %v5712_v54 = vpack.c.bf16 %v5701_v60, %v5700_v22  ;;  %v15717_v1 = vunpack.i.l.bf16 %v15716_v42 }
 0xda1   : > { %v16245_v21 = vpop.eup %16244 }
 0xda2   : > { %v5707_v23 = vmul.f32 %v16245_v21, %v18490_v46  ;;  %15023 = vmatmul.mubr.msk.bf16.vlgmr.msra.gmra.mxu0 %vm1261_vm5, %v5712_v54  ;;  %v16247_v18 = vpop.eup %16246  ;;  %v15966_v46 = vld [vmem:[%s21618_s15] sm:$0xff]  }
 0xda3   : > { %15033 = vmatpush3.bf16.msra.mxu0 %v5999_v27  ;;  %15034 = vmatprep.mubr.msk.bf16.mxu0 %vm16647_vm7, %v21739_v63  ;;  %v5704_v48 = vmul.f32 %v16247_v18, %v18492_v2 }
 0xda4   : > { %v5715_v16 = vpack.c.bf16 %v5707_v23, %v5706_v25  ;;  %15044 = vmatprep.subr.bf16.mxu0 %v15965_v11  ;;  %v15731_v25 = vpop.permute.xlu1 %15730  ;;  %v15726_v23 = vpop.permute.xlu0 %15725 }
 0xda5   : > { %v16249_v58 = vpop.eup %16248 }
 0xda6   : > { %v5705_v33 = vmul.f32 %v16249_v58, %v18498_v51  ;;  %15041 = vmatmul.mubr.msk.bf16.vlgmr.msra.gmra.mxu1 %vm1261_vm5, %v5715_v16 }
 0xda8   : > { %v5714_v14 = vpack.c.bf16 %v5705_v33, %v5704_v48  ;;  %v15741_v27 = vpop.permute.xlu1 %15740  ;;  %v15736_v18 = vpop.permute.xlu0 %15735  ;;  %v15723_v33 = vunpack.i.h.bf16 %v15721_v15 }
 0xdaa   : > { %15035 = vmatmul.mubr.msk.bf16.vlgmr.msra.gmra.mxu0 %vm1261_vm5, %v5714_v14  ;;  %v15722_v14 = vunpack.i.l.bf16 %v15721_v15 }
 0xdab   : > { %15045 = vmatpush3.bf16.msra.mxu0 %v15965_v11  ;;  %v15718_v11 = vunpack.i.h.bf16 %v15716_v42 }
 0xdac   : > { %15046 = vmatprep.subr.bf16.mxu0 %v15966_v46  ;;  %v15751_v16 = vpop.permute.xlu1 %15750  ;;  %v15746_v58 = vpop.permute.xlu0 %15745 }
 0xdaf   : > { %15047 = vmatpush3.bf16.msra.mxu0 %v15966_v46 }
 0xdb0   : > { %v18627_v48 = vpop.permute.xlu1 %15760  ;;  %v18629_v7 = vpop.permute.xlu0 %15755 }
 0xe4e   : > { %v5803_v8 = vpop.f32.mrf.mxu1 }
 0xe50   : > { %v15006_v2 = vpop.f32.mrf.mxu1 }
 0xe51   : > { %v15732_v2 = vunpack.i.l.bf16 %v15731_v25 }
 0xe52   : > { %v5756_v51 = vpop.f32.mrf.mxu0  ;;  %v5806_v55 = vpop.f32.mrf.mxu1 }
 0xe53   : > { %v15764_v5 = vpack.i.bf16 %v5806_v55, %v5803_v8  ;;  %v15733_v8 = vunpack.i.h.bf16 %v15731_v25  ;;  %v15727_v55 = vunpack.i.l.bf16 %v15726_v23 }
 0xe54   : > { %v15000_v4 = vpop.f32.mrf.mxu0  ;;  %v15007_v57 = vpop.f32.mrf.mxu1 }
 0xe55   : > { %15765 = vrot.lane.b32.xlu1 %v15764_v5, %s21668_s29  ;;  %v21781_v57 = vld [vmem:[#allocation21_spill] sm:$0xff] }
 0xe56   : > { %v5759_v41 = vpop.f32.mrf.mxu0  ;;  %v5897_v17 = vpop.f32.mrf.mxu1 }
 0xe57   : > { %v15769_v43 = vpack.i.bf16 %v5759_v41, %v5756_v51  ;;  %v15728_v51 = vunpack.i.h.bf16 %v15726_v23  ;;  %v6287_v41 = vsel %vm1016_vm4, %v21781_v57, %v15723_v33 }
 0xe58   : > { %v15001_v24 = vpop.f32.mrf.mxu0  ;;  %v15018_v50 = vpop.f32.mrf.mxu1 }
 0xe59   : > { %15780 = vrot.lane.b32.xlu1 %v15779_v12, %s21764_s2  ;;  %15770 = vrot.lane.b32.xlu0 %v15769_v43, %s21668_s29  ;;  %v21774_v12 = vld [vmem:[#allocation38_spill] sm:$0xff] }
 0xe5a   : > { %v5850_v61 = vpop.f32.mrf.mxu0  ;;  %v5900_v62 = vpop.f32.mrf.mxu1  ;;  %v21775_v45 = vpack.i.bf16 %v21773_v56, %v21774_v12  ;;  %v21783_v24 = vld [vmem:[#allocation22_spill] sm:$0xff] }
 0xe5b   : > { %v15784_v20 = vpack.i.bf16 %v5900_v62, %v5897_v17  ;;  %v21782_v17 = vld [vmem:[#allocation19_spill] sm:$0xff]  ;;  %v6285_v50 = vsel %vm1016_vm4, %v21783_v24, %v15718_v11  ;;  %v15763_v11 = vunpack.i.h.bf16 %v18627_v48 }
 0xe5c   : > { %v15012_v47 = vpop.f32.mrf.mxu0  ;;  %v15019_v36 = vpop.f32.mrf.mxu1  ;;  %v6286_v43 = vsel %vm1016_vm4, %v21782_v17, %v15722_v14 }
 0xe5d   : > { %15785 = vrot.lane.b32.xlu1 %v15784_v20, %s21668_s29  ;;  %15775 = vrot.lane.b32.xlu0 %v15774_v49, %s21764_s2  ;;  %v21778_v49 = vpack.i.bf16 %v21776_v59, %v21777_v38  ;;  %v6302_v36 = vsel %vm1261_vm5, %v6286_v43, %v15732_v2  ;;  %v15758_v2 = vunpack.i.h.bf16 %v18629_v7 }
 0xe5e   : > { %v5853_v31 = vpop.f32.mrf.mxu0  ;;  %v5991_v6 = vpop.f32.mrf.mxu1 }
 0xe5f   : > { %v15789_v3 = vpack.i.bf16 %v5853_v31, %v5850_v61  ;;  %v21784_v61 = vld [vmem:[#allocation20_spill] sm:$0xff]  ;;  %v6303_v31 = vsel %vm1261_vm5, %v6287_v41, %v15733_v8  ;;  %v15762_v8 = vunpack.i.l.bf16 %v18627_v48  ;;  %v21789_v48 = vld [vmem:[#allocation29_spill] sm:$0xff] }
 0xe60   : > { %v15013_v13 = vpop.f32.mrf.mxu0  ;;  %v15030_v44 = vpop.f32.mrf.mxu1  ;;  %v6284_v62 = vsel %vm1016_vm4, %v21784_v61, %v15717_v1 }
 0xe61   : > { %15800 = vrot.lane.b32.xlu1 %v21775_v45, %s21670_s6  ;;  %15790 = vrot.lane.b32.xlu0 %v15789_v3, %s21668_s29  ;;  %v6300_v13 = vsel %vm1261_vm5, %v6284_v62, %v15727_v55  ;;  %v6301_v44 = vsel %vm1261_vm5, %v6285_v50, %v15728_v51  ;;  %v15743_v45 = vunpack.i.h.bf16 %v15741_v27  ;;  %v15757_v51 = vunpack.i.l.bf16 %v18629_v7  ;;  %v21790_v7 = vld [vmem:[#allocation27_spill] sm:$0xff] }
 0xe62   : > { %v5944_v52 = vpop.f32.mrf.mxu0  ;;  %v5994_v29 = vpop.f32.mrf.mxu1  ;;  %v6295_v62 = vsel %vm1016_vm4, %v21789_v48, %v15763_v11 }
 0xe63   : > { %v15804_v34 = vpack.i.bf16 %v5994_v29, %v5991_v6 }
 0xe64   : > { %v15024_v53 = vpop.f32.mrf.mxu0  ;;  %v15031_v30 = vpop.f32.mrf.mxu1 }
 0xe65   : > { %15805 = vrot.lane.b32.xlu1 %v15804_v34, %s21668_s29  ;;  %15795 = vrot.lane.b32.xlu0 %v21778_v49, %s21670_s6  ;;  %v15742_v34 = vunpack.i.l.bf16 %v15741_v27  ;;  %v15738_v53 = vunpack.i.h.bf16 %v15736_v18  ;;  %v15737_v30 = vunpack.i.l.bf16 %v15736_v18 }
 0xe66   : > { %v5947_v32 = vpop.f32.mrf.mxu0  ;;  %v6085_v28 = vpop.f32.mrf.mxu1 }
 0xe67   : > { %v15809_v10 = vpack.i.bf16 %v5947_v32, %v5944_v52  ;;  %v15753_v32 = vunpack.i.h.bf16 %v15751_v16 }
 0xe68   : > { %v15025_v0 = vpop.f32.mrf.mxu0  ;;  %v15042_v40 = vpop.f32.mrf.mxu1 }
 0xe69   : > { %15820 = vrot.lane.b32.xlu1 %v21779_v19, %s21764_s2  ;;  %15810 = vrot.lane.b32.xlu0 %v15809_v10, %s21668_s29  ;;  %v15748_v0 = vunpack.i.h.bf16 %v15746_v58  ;;  %v15747_v40 = vunpack.i.l.bf16 %v15746_v58 }
 0xe6a   : > { %v6038_v35 = vpop.f32.mrf.mxu0  ;;  %v6088_v26 = vpop.f32.mrf.mxu1 }
 0xe6b   : > { %v15829_v39 = vpack.i.bf16 %v6088_v26, %v6085_v28  ;;  %v15752_v28 = vunpack.i.l.bf16 %v15751_v16  ;;  %v21785_v26 = vld [vmem:[#allocation25_spill] sm:$0xff] }
 0xe6c   : > { %v15036_v22 = vpop.f32.mrf.mxu0  ;;  %v15043_v60 = vpop.f32.mrf.mxu1 }
 0xe6d   : > { %15830 = vrot.lane.b32.xlu1 %v15829_v39, %s21668_s29  ;;  %15815 = vrot.lane.b32.xlu0 %v21780_v37, %s21764_s2  ;;  %v6291_v39 = vsel %vm1016_vm4, %v21785_v26, %v15743_v45  ;;  %v21786_v22 = vld [vmem:[#allocation23_spill] sm:$0xff]  ;;  %v21787_v37 = vld [vmem:[#allocation26_spill] sm:$0xff] }
 0xe6e   : > { %v6041_v9 = vpop.f32.mrf.mxu0  ;;  %v6290_v60 = vsel %vm1016_vm4, %v21786_v22, %v15742_v34  ;;  %v6307_v23 = vsel %vm1261_vm5, %v6291_v39, %v15753_v32 }
 0xe6f   : > { %v15824_v54 = vpack.i.bf16 %v6041_v9, %v6038_v35  ;;  %v6289_v9 = vsel %vm1016_vm4, %v21787_v37, %v15738_v53  ;;  %v6306_v25 = vsel %vm1261_vm5, %v6290_v60, %v15752_v28 }
 0xe70   : > { %v15037_v21 = vpop.f32.mrf.mxu0  ;;  %v6305_v58 = vsel %vm1261_vm5, %v6289_v9, %v15748_v0  ;;  %v21793_v9 = vld [vmem:[#allocation33_spill] sm:$0xff] }
 0xe71   : > { %15825 = vrot.lane.b32.xlu0 %v15824_v54, %s21668_s29  ;;  %v21788_v54 = vld [vmem:[#allocation24_spill] sm:$0xff] }
 0xe72   : > { %v6288_v21 = vsel %vm1016_vm4, %v21788_v54, %v15737_v30 }
 0xe73   : > { %v6304_v16 = vsel %vm1261_vm5, %v6288_v21, %v15747_v40  ;;  %v21794_v21 = vld [vmem:[#allocation31_spill] sm:$0xff] }
 0xec7   : > { %v15766_v46 = vpop.permute.xlu1 %15765 }
 0xec8   : > { %v15768_v5 = vunpack.i.h.bf16 %v15766_v46  ;;  %v15767_v4 = vunpack.i.l.bf16 %v15766_v46 }
 0xeca   : > { %v6320_v56 = vsel %vm6316_vm8, %v6303_v31, %v15768_v5  ;;  %v6319_v12 = vsel %vm6316_vm8, %v6302_v36, %v15767_v4  ;;  %v21791_v36 = vld [vmem:[#allocation30_spill] sm:$0xff] }
 0xecb   : > { %v18639_v20 = vpop.permute.xlu1 %15780  ;;  %v15771_v47 = vpop.permute.xlu0 %15770  ;;  %v6334_v10 = vpack.c.bf16 %v6320_v56, %v6319_v12  ;;  %v6293_v31 = vsel %vm1016_vm4, %v21791_v36, %v15758_v2 }
 0xecc   : > { %v15773_v6 = vunpack.i.h.bf16 %v15771_v47  ;;  %v15772_v3 = vunpack.i.l.bf16 %v15771_v47  ;;  %v15783_v57 = vunpack.i.h.bf16 %v18639_v20  ;;  %v15782_v41 = vunpack.i.l.bf16 %v18639_v20 }
 0xecd   : > { %v6294_v47 = vsel %vm1016_vm4, %v21790_v7, %v15762_v8 }
 0xece   : > { %v6318_v52 = vsel %vm6316_vm8, %v6301_v44, %v15773_v6  ;;  %v6317_v29 = vsel %vm6316_vm8, %v6300_v13, %v15772_v3  ;;  %v21792_v6 = vld [vmem:[#allocation28_spill] sm:$0xff]  ;;  %v6311_v44 = vsel %vm1261_vm5, %v6295_v62, %v15783_v57  ;;  %v6310_v56 = vsel %vm1261_vm5, %v6294_v47, %v15782_v41  ;;  %v18718_v57 = vld [vmem:[%s21619_s16] ss:$0 sm:$0xff]  ;;  %v21798_v62 = vld [vmem:[#allocation5_spill] sm:$0xff] }
 0xecf   : > { %v15786_v59 = vpop.permute.xlu1 %15785  ;;  %v15776_v38 = vpop.permute.xlu0 %15775  ;;  %v6333_v49 = vpack.c.bf16 %v6318_v52, %v6317_v29  ;;  %v6292_v20 = vsel %vm1016_vm4, %v21792_v6, %v15757_v51 }
 0xed0   : > { %v15788_v19 = vunpack.i.h.bf16 %v15786_v59  ;;  %v15787_v35 = vunpack.i.l.bf16 %v15786_v59  ;;  %v15778_v43 = vunpack.i.h.bf16 %v15776_v38  ;;  %v15777_v24 = vunpack.i.l.bf16 %v15776_v38 }
 0xed1   : > { %15048 = vmatprep.mubr.msk.bf16.mxu0 %vm1505_vm6, %v6333_v49 }
 0xed2   : > { %15049 = vmatmul.mubr.msk.bf16.vlgmr.msra.gmra.mxu0 %vm1505_vm6, %v6334_v10  ;;  %v6324_v33 = vsel %vm6316_vm8, %v6307_v23, %v15788_v19  ;;  %v6323_v14 = vsel %vm6316_vm8, %v6306_v25, %v15787_v35  ;;  %v6309_v52 = vsel %vm1261_vm5, %v6293_v31, %v15778_v43  ;;  %v6308_v29 = vsel %vm1261_vm5, %v6292_v20, %v15777_v24  ;;  %v21796_v23 = vld [vmem:[#allocation32_spill] sm:$0xff] }
 0xed3   : > { %v18659_v15 = vpop.permute.xlu1 %15800  ;;  %v15791_v42 = vpop.permute.xlu0 %15790  ;;  %v6336_v17 = vpack.c.bf16 %v6324_v33, %v6323_v14  ;;  %v21799_v20 = vld [vmem:[#allocation4_spill] sm:$0xff] }
 0xed4   : > { %v15793_v27 = vunpack.i.h.bf16 %v15791_v42  ;;  %v15792_v18 = vunpack.i.l.bf16 %v15791_v42  ;;  %v15803_v30 = vunpack.i.h.bf16 %v18659_v15  ;;  %v15802_v49 = vunpack.i.l.bf16 %v18659_v15  ;;  %v21795_v42 = vld [vmem:[#allocation34_spill] sm:$0xff] }
 0xed6   : > { %v6322_v1 = vsel %vm6316_vm8, %v6305_v58, %v15793_v27  ;;  %v6321_v46 = vsel %vm6316_vm8, %v6304_v16, %v15792_v18  ;;  %v6299_v54 = vsel %vm1016_vm4, %v21793_v9, %v15803_v30  ;;  %v6298_v15 = vsel %vm1016_vm4, %v21794_v21, %v15802_v49 }
 0xed7   : > { %v15806_v55 = vpop.permute.xlu1 %15805  ;;  %v15796_v5 = vpop.permute.xlu0 %15795  ;;  %v6335_v4 = vpack.c.bf16 %v6322_v1, %v6321_v46 }
 0xed8   : > { %v15808_v50 = vunpack.i.h.bf16 %v15806_v55  ;;  %v15807_v61 = vunpack.i.l.bf16 %v15806_v55  ;;  %v15798_v32 = vunpack.i.h.bf16 %v15796_v5  ;;  %v15797_v28 = vunpack.i.l.bf16 %v15796_v5 }
 0xed9   : > { %15052 = vmatprep.mubr.msk.bf16.mxu0 %vm1505_vm6, %v6335_v4 }
 0xeda   : > { %15053 = vmatmul.mubr.msk.bf16.gmra.mxu0 %vm1505_vm6, %v6336_v17  ;;  %v6328_v34 = vsel %vm6316_vm8, %v6311_v44, %v15808_v50  ;;  %v6327_v53 = vsel %vm6316_vm8, %v6310_v56, %v15807_v61  ;;  %v6297_v25 = vsel %vm1016_vm4, %v21795_v42, %v15798_v32  ;;  %v6296_v27 = vsel %vm1016_vm4, %v21796_v23, %v15797_v28  ;;  %v21797_v50 = vld [vmem:[#allocation3_spill] sm:$0xff]  ;;  %v21800_v56 = vld [vmem:[#allocation6_spill] sm:$0xff] }
 0xedb   : > { %v15821_v3 = vpop.permute.xlu1 %15820  ;;  %v15811_v13 = vpop.permute.xlu0 %15810  ;;  %v6338_v19 = vpack.c.bf16 %v6328_v34, %v6327_v53  ;;  %v21801_v53 = vld [vmem:[#allocation7_spill] sm:$0xff] }
 0xedc   : > { %v15813_v12 = vunpack.i.h.bf16 %v15811_v13  ;;  %v15812_v45 = vunpack.i.l.bf16 %v15811_v13  ;;  %v15823_v35 = vunpack.i.h.bf16 %v15821_v3  ;;  %v15822_v26 = vunpack.i.l.bf16 %v15821_v3 }
 0xede   : > { %v6326_v59 = vsel %vm6316_vm8, %v6309_v52, %v15813_v12  ;;  %v6325_v38 = vsel %vm6316_vm8, %v6308_v29, %v15812_v45  ;;  %v6315_v16 = vsel %vm1261_vm5, %v6299_v54, %v15823_v35  ;;  %v6314_v58 = vsel %vm1261_vm5, %v6298_v15, %v15822_v26  ;;  %v21805_v15 = vld [vmem:[#allocation11_spill] sm:$0xff] }
 0xedf   : > { %v15831_v10 = vpop.permute.xlu1 %15830  ;;  %v15816_v0 = vpop.permute.xlu0 %15815  ;;  %v6337_v40 = vpack.c.bf16 %v6326_v59, %v6325_v38  ;;  %v21802_v59 = vld [vmem:[#allocation9_spill] sm:$0xff] }
 0xee0   : > { %v15833_v39 = vunpack.i.h.bf16 %v15831_v10  ;;  %v15832_v22 = vunpack.i.l.bf16 %v15831_v10  ;;  %v15818_v60 = vunpack.i.h.bf16 %v15816_v0  ;;  %v15817_v37 = vunpack.i.l.bf16 %v15816_v0 }
 0xee1   : > { %15056 = vmatprep.mubr.msk.bf16.mxu0 %vm1505_vm6, %v6337_v40 }
 0xee2   : > { %15057 = vmatmul.mubr.msk.bf16.gmra.mxu0 %vm1505_vm6, %v6338_v19  ;;  %v6332_v11 = vsel %vm6316_vm8, %v6315_v16, %v15833_v39  ;;  %v6331_v1 = vsel %vm6316_vm8, %v6314_v58, %v15832_v22  ;;  %v6313_v46 = vsel %vm1261_vm5, %v6297_v25, %v15818_v60  ;;  %v6312_v8 = vsel %vm1261_vm5, %v6296_v27, %v15817_v37  ;;  %v21803_v19 = vld [vmem:[#allocation8_spill] sm:$0xff]  ;;  %v21804_v22 = vld [vmem:[#allocation10_spill] sm:$0xff]  ;;  %v21806_v27 = vld [vmem:[#allocation13_spill] sm:$0xff] }
 0xee3   : > { %v15826_v18 = vpop.permute.xlu0 %15825  ;;  %v6340_v5 = vpack.c.bf16 %v6332_v11, %v6331_v1  ;;  %v21807_v11 = vld [vmem:[#allocation12_spill] sm:$0xff] }
 0xee4   : > { %v15828_v33 = vunpack.i.h.bf16 %v15826_v18  ;;  %v15827_v14 = vunpack.i.l.bf16 %v15826_v18 }
 0xee6   : > { %v6330_v2 = vsel %vm6316_vm8, %v6313_v46, %v15828_v33  ;;  %v6329_v51 = vsel %vm6316_vm8, %v6312_v8, %v15827_v14  ;;  %v21808_v46 = vld [vmem:[#allocation14_spill] sm:$0xff] }
 0xee7   : > { %v6339_v55 = vpack.c.bf16 %v6330_v2, %v6329_v51 }
 0xee9   : > { %15060 = vmatprep.mubr.msk.bf16.mxu0 %vm1505_vm6, %v6339_v55 }
 0xeea   : > { %15061 = vmatmul.mubr.msk.bf16.gmra.mxu0 %vm1505_vm6, %v6340_v5 }
 0xf92   : > { %v15050_v4 = vpop.f32.mrf.mxu0 }
 0xf93   : > { %v6431_v17 = vadd.f32 %v15050_v4, %v18718_v57 }
 0xf94   : > { %v6422_v41 = vpop.f32.mrf.mxu0 }
 0xf95   : > { %v6423_v43 = vadd.f32 %v18718_v57, %v6422_v41  ;;  %v18726_v7 = vadd.f32 %v6431_v17, %v21798_v62  ;;  %v21809_v17 = vld [vmem:[#allocation15_spill] sm:$0xff] }
 0xf96   : > { %v15051_v24 = vpop.f32.mrf.mxu0 }
 0xf97   : > { %v18723_v61 = vadd.f32 %v6423_v43, %v21797_v50  ;;  %v6434_v47 = vadd.f32 %v15051_v24, %v18718_v57  ;;  %v6507_v29 = vsel %vm1505_vm6, %v18726_v7, 0.0 }
 0xf98   : > { %v6425_v48 = vpop.f32.mrf.mxu0 }
 0xf99   : > { %v6426_v36 = vadd.f32 %v18718_v57, %v6425_v48  ;;  %v6501_v31 = vsel %vm1505_vm6, %v18723_v61, 0.0  ;;  %v18737_v12 = vadd.f32 %v6434_v47, %v21800_v56  ;;  %v21810_v48 = vld [vmem:[#allocation17_spill] sm:$0xff] }
 0xf9a   : > { %v15054_v6 = vpop.f32.mrf.mxu0  ;;  %6502 = vadd.xlane.f32.xlu0 %v6501_v31 }
 0xf9b   : > { %v18733_v3 = vadd.f32 %v6426_v36, %v21799_v20  ;;  %v6447_v13 = vadd.f32 %v15054_v6, %v18718_v57  ;;  %v6510_v0 = vsel %vm1505_vm6, %v18737_v12, 0.0  ;;  %v21811_v6 = vld [vmem:[#allocation16_spill] sm:$0xff] }
 0xf9c   : > { %v6438_v44 = vpop.f32.mrf.mxu0 }
 0xf9d   : > { %v6439_v45 = vadd.f32 %v18718_v57, %v6438_v44  ;;  %v6504_v52 = vsel %vm1505_vm6, %v18733_v3, 0.0  ;;  %v18748_v38 = vadd.f32 %v6447_v13, %v21802_v59  ;;  %v21812_v13 = vld [vmem:[#allocation18_spill] sm:$0xff] }
 0xf9e   : > { %v15055_v34 = vpop.f32.mrf.mxu0  ;;  %6505 = vadd.xlane.f32.xlu1 %v6504_v52  ;;  %6508 = vadd.xlane.f32.xlu0 %v6507_v29 }
 0xf9f   : > { %v18745_v30 = vadd.f32 %v6439_v45, %v21801_v53  ;;  %v6450_v32 = vadd.f32 %v15055_v34, %v18718_v57  ;;  %v6519_v39 = vsel %vm1505_vm6, %v18748_v38, 0.0 }
 0xfa0   : > { %v6441_v49 = vpop.f32.mrf.mxu0 }
 0xfa1   : > { %v6442_v28 = vadd.f32 %v18718_v57, %v6441_v49  ;;  %v6513_v10 = vsel %vm1505_vm6, %v18745_v30, 0.0  ;;  %v18762_v60 = vadd.f32 %v6450_v32, %v21804_v22 }
 0xfa2   : > { %v15058_v40 = vpop.f32.mrf.mxu0  ;;  %6514 = vadd.xlane.f32.xlu1 %v6513_v10  ;;  %6511 = vadd.xlane.f32.xlu0 %v6510_v0 }
 0xfa3   : > { %v18757_v35 = vadd.f32 %v6442_v28, %v21803_v19  ;;  %v6463_v37 = vadd.f32 %v15058_v40, %v18718_v57  ;;  %v6522_v33 = vsel %vm1505_vm6, %v18762_v60, 0.0 }
 0xfa4   : > { %v6454_v26 = vpop.f32.mrf.mxu0 }
 0xfa5   : > { %v6455_v9 = vadd.f32 %v18718_v57, %v6454_v26  ;;  %v6516_v54 = vsel %vm1505_vm6, %v18757_v35, 0.0  ;;  %v18773_v18 = vadd.f32 %v6463_v37, %v21806_v27 }
 0xfa6   : > { %v15059_v21 = vpop.f32.mrf.mxu0  ;;  %6520 = vadd.xlane.f32.xlu1 %v6519_v39  ;;  %6517 = vadd.xlane.f32.xlu0 %v6516_v54 }
 0xfa7   : > { %v18769_v42 = vadd.f32 %v6455_v9, %v21805_v15  ;;  %v6466_v25 = vadd.f32 %v15059_v21, %v18718_v57  ;;  %v6531_v5 = vsel %vm1505_vm6, %v18773_v18, 0.0 }
 0xfa8   : > { %v6457_v23 = vpop.f32.mrf.mxu0 }
 0xfa9   : > { %v6458_v16 = vadd.f32 %v18718_v57, %v6457_v23  ;;  %v6525_v58 = vsel %vm1505_vm6, %v18769_v42, 0.0  ;;  %v18784_v8 = vadd.f32 %v6466_v25, %v21808_v46 }
 0xfaa   : > { %v15062_v14 = vpop.f32.mrf.mxu0  ;;  %6526 = vadd.xlane.f32.xlu1 %v6525_v58  ;;  %6523 = vadd.xlane.f32.xlu0 %v6522_v33 }
 0xfab   : > { %v18781_v1 = vadd.f32 %v6458_v16, %v21807_v11  ;;  %v6479_v51 = vadd.f32 %v15062_v14, %v18718_v57  ;;  %v6534_v50 = vsel %vm1505_vm6, %v18784_v8, 0.0 }
 0xfac   : > { %v6470_v2 = vpop.f32.mrf.mxu0 }
 0xfad   : > { %v6471_v55 = vadd.f32 %v18718_v57, %v6470_v2  ;;  %v6528_v4 = vsel %vm1505_vm6, %v18781_v1, 0.0  ;;  %v18798_v62 = vadd.f32 %v6479_v51, %v21810_v48 }
 0xfae   : > { %v15063_v41 = vpop.f32.mrf.mxu0  ;;  %6532 = vadd.xlane.f32.xlu1 %v6531_v5  ;;  %6529 = vadd.xlane.f32.xlu0 %v6528_v4 }
 0xfaf   : > { %v18793_v43 = vadd.f32 %v6471_v55, %v21809_v17  ;;  %v6482_v47 = vadd.f32 %v15063_v41, %v18718_v57  ;;  %v6543_v56 = vsel %vm1505_vm6, %v18798_v62, 0.0 }
 0xfb0   : > { %v6473_v24 = vpop.f32.mrf.mxu0 }
 0xfb1   : > { %v6474_v36 = vadd.f32 %v18718_v57, %v6473_v24  ;;  %v6537_v31 = vsel %vm1505_vm6, %v18793_v43, 0.0  ;;  %v18808_v44 = vadd.f32 %v6482_v47, %v21812_v13 }
 0xfb2   : > { %6538 = vadd.xlane.f32.xlu1 %v6537_v31  ;;  %6535 = vadd.xlane.f32.xlu0 %v6534_v50 }
 0xfb3   : > { %v18805_v20 = vadd.f32 %v6474_v36, %v21811_v6  ;;  %v6546_v57 = vsel %vm1505_vm6, %v18808_v44, 0.0 }
 0xfb5   : > { %v6540_v45 = vsel %vm1505_vm6, %v18805_v20, 0.0 }
 0xfb6   : > { %6544 = vadd.xlane.f32.xlu1 %v6543_v56  ;;  %6541 = vadd.xlane.f32.xlu0 %v6540_v45 }
 0xfba   : > { %6547 = vadd.xlane.f32.xlu0 %v6546_v57 }
0x1023   : > { %v6503_v52 = vpop.xlane.xlu0 %6502 }
0x1024   : > { %v6550_v29 = vmul.f32 0.03125, %v6503_v52 }
0x1026   : > { %v18817_v34 = vsub.f32 %v18723_v61, %v6550_v29 }
0x1027   : > { %v6506_v53 = vpop.xlane.xlu1 %6505  ;;  %v6509_v59 = vpop.xlane.xlu0 %6508 }
0x1028   : > { %v6551_v49 = vmul.f32 0.03125, %v6506_v53  ;;  %v6552_v32 = vmul.f32 0.03125, %v6509_v59  ;;  %v6582_v28 = vmul.f32 %v18817_v34, %v18817_v34 }
0x102a   : > { %v18822_v10 = vsub.f32 %v18733_v3, %v6551_v49  ;;  %v18825_v0 = vsub.f32 %v18726_v7, %v6552_v32  ;;  %v6598_v40 = vsel %vm1505_vm6, %v6582_v28, 0.0 }
0x102b   : > { %v6515_v19 = vpop.xlane.xlu1 %6514  ;;  %6599 = vadd.xlane.f32.xlu1 %v6598_v40  ;;  %v6512_v26 = vpop.xlane.xlu0 %6511 }
0x102c   : > { %v6554_v61 = vmul.f32 0.03125, %v6515_v19  ;;  %v6553_v39 = vmul.f32 0.03125, %v6512_v26  ;;  %v6583_v22 = vmul.f32 %v18822_v10, %v18822_v10  ;;  %v6584_v37 = vmul.f32 %v18825_v0, %v18825_v0 }
0x102e   : > { %v18833_v9 = vsub.f32 %v18745_v30, %v6554_v61  ;;  %v18836_v3 = vsub.f32 %v18737_v12, %v6553_v39  ;;  %v6601_v7 = vsel %vm1505_vm6, %v6583_v22, 0.0  ;;  %v6604_v54 = vsel %vm1505_vm6, %v6584_v37, 0.0 }
0x102f   : > { %v6521_v21 = vpop.xlane.xlu1 %6520  ;;  %6602 = vadd.xlane.f32.xlu0 %v6601_v7  ;;  %6605 = vadd.xlane.f32.xlu1 %v6604_v54  ;;  %v6518_v15 = vpop.xlane.xlu0 %6517 }
0x1030   : > { %v6556_v25 = vmul.f32 0.03125, %v6521_v21  ;;  %v6555_v23 = vmul.f32 0.03125, %v6518_v15  ;;  %v6586_v27 = vmul.f32 %v18833_v9, %v18833_v9  ;;  %v6585_v30 = vmul.f32 %v18836_v3, %v18836_v3 }
0x1032   : > { %v18845_v16 = vsub.f32 %v18748_v38, %v6556_v25  ;;  %v18848_v12 = vsub.f32 %v18757_v35, %v6555_v23  ;;  %v6610_v58 = vsel %vm1505_vm6, %v6586_v27, 0.0  ;;  %v6607_v33 = vsel %vm1505_vm6, %v6585_v30, 0.0  ;;  %v15967_v25 = vld [vmem:[%s21620_s17 + $0x8] sm:$0xff]   ;;  %v15969_v23 = vld [vmem:[%s21622_s19 + $0x18] sm:$0xff]  }
0x1033   : > { %v6527_v14 = vpop.xlane.xlu1 %6526  ;;  %6611 = vadd.xlane.f32.xlu1 %v6610_v58  ;;  %6608 = vadd.xlane.f32.xlu0 %v6607_v33  ;;  %v6524_v11 = vpop.xlane.xlu0 %6523 }
0x1034   : > { %v6558_v46 = vmul.f32 0.03125, %v6527_v14  ;;  %v6557_v2 = vmul.f32 0.03125, %v6524_v11  ;;  %v6588_v51 = vmul.f32 %v18845_v16, %v18845_v16  ;;  %v6587_v38 = vmul.f32 %v18848_v12, %v18848_v12  ;;  %15064 = vmatprep.subr.bf16.mxu1 %v15967_v25  ;;  %15084 = vmatprep.subr.bf16.mxu0 %v15969_v23 }
0x1035   : > { %15065 = vmatpush3.bf16.msra.mxu1 %v15967_v25  ;;  %15085 = vmatpush3.bf16.msra.mxu0 %v15969_v23  ;;  %v18933_v25 = vld [vmem:[%s21625_s22] ss:$0 sm:$0xff] }
0x1036   : > { %v18857_v55 = vsub.f32 %v18769_v42, %v6558_v46  ;;  %v18860_v35 = vsub.f32 %v18762_v60, %v6557_v2  ;;  %v6616_v5 = vsel %vm1505_vm6, %v6588_v51, 0.0  ;;  %v6613_v4 = vsel %vm1505_vm6, %v6587_v38, 0.0 }
0x1037   : > { %v6533_v41 = vpop.xlane.xlu1 %6532  ;;  %6617 = vadd.xlane.f32.xlu1 %v6616_v5  ;;  %6614 = vadd.xlane.f32.xlu0 %v6613_v4  ;;  %v6530_v17 = vpop.xlane.xlu0 %6529 }
0x1038   : > { %v6560_v24 = vmul.f32 0.03125, %v6533_v41  ;;  %v6559_v50 = vmul.f32 0.03125, %v6530_v17  ;;  %v6590_v48 = vmul.f32 %v18857_v55, %v18857_v55  ;;  %v6589_v42 = vmul.f32 %v18860_v35, %v18860_v35 }
0x103a   : > { %v18869_v47 = vsub.f32 %v18773_v18, %v6560_v24  ;;  %v18872_v60 = vsub.f32 %v18781_v1, %v6559_v50  ;;  %v6622_v36 = vsel %vm1505_vm6, %v6590_v48, 0.0  ;;  %v6619_v31 = vsel %vm1505_vm6, %v6589_v42, 0.0 }
0x103b   : > { %v6539_v6 = vpop.xlane.xlu1 %6538  ;;  %6623 = vadd.xlane.f32.xlu1 %v6622_v36  ;;  %6620 = vadd.xlane.f32.xlu0 %v6619_v31  ;;  %v6536_v13 = vpop.xlane.xlu0 %6535 }
0x103c   : > { %v6562_v56 = vmul.f32 0.03125, %v6539_v6  ;;  %v6561_v45 = vmul.f32 0.03125, %v6536_v13  ;;  %v6592_v57 = vmul.f32 %v18869_v47, %v18869_v47  ;;  %v6591_v18 = vmul.f32 %v18872_v60, %v18872_v60 }
0x103e   : > { %v18881_v52 = vsub.f32 %v18793_v43, %v6562_v56  ;;  %v18884_v1 = vsub.f32 %v18784_v8, %v6561_v45  ;;  %v6628_v29 = vsel %vm1505_vm6, %v6592_v57, 0.0  ;;  %v6625_v53 = vsel %vm1505_vm6, %v6591_v18, 0.0 }
0x103f   : > { %v6545_v59 = vpop.xlane.xlu1 %6544  ;;  %6629 = vadd.xlane.f32.xlu1 %v6628_v29  ;;  %6626 = vadd.xlane.f32.xlu0 %v6625_v53  ;;  %v6542_v49 = vpop.xlane.xlu0 %6541 }
0x1040   : > { %v6564_v32 = vmul.f32 0.03125, %v6545_v59  ;;  %v6563_v28 = vmul.f32 0.03125, %v6542_v49  ;;  %v6594_v40 = vmul.f32 %v18881_v52, %v18881_v52  ;;  %v6593_v43 = vmul.f32 %v18884_v1, %v18884_v1 }
0x1042   : > { %v18893_v19 = vsub.f32 %v18798_v62, %v6564_v32  ;;  %v18896_v8 = vsub.f32 %v18805_v20, %v6563_v28  ;;  %v6634_v26 = vsel %vm1505_vm6, %v6594_v40, 0.0  ;;  %v6631_v61 = vsel %vm1505_vm6, %v6593_v43, 0.0  ;;  %v18925_v28 = vld [vmem:[%s21624_s21] ss:$0 sm:$0xff] }
0x1043   : > { %6635 = vadd.xlane.f32.xlu1 %v6634_v26  ;;  %6632 = vadd.xlane.f32.xlu0 %v6631_v61  ;;  %v6548_v39 = vpop.xlane.xlu0 %6547 }
0x1044   : > { %v6565_v22 = vmul.f32 0.03125, %v6548_v39  ;;  %v6596_v37 = vmul.f32 %v18893_v19, %v18893_v19  ;;  %v6595_v7 = vmul.f32 %v18896_v8, %v18896_v8 }
0x1046   : > { %v18905_v62 = vsub.f32 %v18808_v44, %v6565_v22  ;;  %v6640_v20 = vsel %vm1505_vm6, %v6596_v37, 0.0  ;;  %v6637_v54 = vsel %vm1505_vm6, %v6595_v7, 0.0  ;;  %v15968_v44 = vld [vmem:[%s21620_s17] sm:$0xff]  }
0x1047   : > { %6641 = vadd.xlane.f32.xlu1 %v6640_v20  ;;  %6638 = vadd.xlane.f32.xlu0 %v6637_v54 }
0x1048   : > { %v6597_v21 = vmul.f32 %v18905_v62, %v18905_v62  ;;  %15066 = vmatprep.subr.bf16.mxu1 %v15968_v44 }
0x1049   : > { %15067 = vmatpush3.bf16.msra.mxu1 %v15968_v44 }
0x104a   : > { %v6643_v15 = vsel %vm1505_vm6, %v6597_v21, 0.0 }
0x104b   : > { %6644 = vadd.xlane.f32.xlu0 %v6643_v15 }
0x10b4   : > { %v6600_v27 = vpop.xlane.xlu1 %6599 }
0x10b5   : > { %v6646_v30 = vmul.f32 0.03125, %v6600_v27 }
0x10b7   : > { %v6662_v58 = vadd.f32 1e-05, %v6646_v30 }
0x10b8   : > { %v6606_v33 = vpop.xlane.xlu1 %6605  ;;  %v6603_v14 = vpop.xlane.xlu0 %6602 }
0x10b9   : > { %16250 = vrsqrt.f32 %v6662_v58  ;;  %v6648_v11 = vmul.f32 0.03125, %v6606_v33  ;;  %v6647_v46 = vmul.f32 0.03125, %v6603_v14 }
0x10bb   : > { %v6664_v2 = vadd.f32 1e-05, %v6648_v11  ;;  %v6663_v51 = vadd.f32 1e-05, %v6647_v46 }
0x10bc   : > { %v6612_v38 = vpop.xlane.xlu1 %6611  ;;  %v6609_v5 = vpop.xlane.xlu0 %6608 }
0x10bd   : > { %16252 = vrsqrt.f32 %v6664_v2  ;;  %v6650_v4 = vmul.f32 0.03125, %v6612_v38  ;;  %v6649_v41 = vmul.f32 0.03125, %v6609_v5 }
0x10be   : > { %16254 = vrsqrt.f32 %v6663_v51 }
0x10bf   : > { %v6666_v17 = vadd.f32 1e-05, %v6650_v4  ;;  %v6665_v24 = vadd.f32 1e-05, %v6649_v41 }
0x10c0   : > { %v6618_v50 = vpop.xlane.xlu1 %6617  ;;  %v6615_v48 = vpop.xlane.xlu0 %6614 }
0x10c1   : > { %16256 = vrsqrt.f32 %v6666_v17  ;;  %v6652_v42 = vmul.f32 0.03125, %v6618_v50  ;;  %v6651_v36 = vmul.f32 0.03125, %v6615_v48 }
0x10c2   : > { %16258 = vrsqrt.f32 %v6665_v24 }
0x10c3   : > { %v6668_v31 = vadd.f32 1e-05, %v6652_v42  ;;  %v6667_v6 = vadd.f32 1e-05, %v6651_v36 }
0x10c4   : > { %v6624_v13 = vpop.xlane.xlu1 %6623  ;;  %v6621_v56 = vpop.xlane.xlu0 %6620 }
0x10c5   : > { %16260 = vrsqrt.f32 %v6668_v31  ;;  %v6654_v45 = vmul.f32 0.03125, %v6624_v13  ;;  %v6653_v57 = vmul.f32 0.03125, %v6621_v56 }
0x10c6   : > { %v16251_v18 = vpop.eup %16250  ;;  %16262 = vrsqrt.f32 %v6667_v6 }
0x10c7   : > { %v6670_v29 = vadd.f32 1e-05, %v6654_v45  ;;  %v6669_v53 = vadd.f32 1e-05, %v6653_v57  ;;  %v6694_v32 = vmul.f32 %v16251_v18, %v18817_v34 }
0x10c8   : > { %v6630_v59 = vpop.xlane.xlu1 %6629  ;;  %v6627_v49 = vpop.xlane.xlu0 %6626 }
0x10c9   : > { %16264 = vrsqrt.f32 %v6670_v29  ;;  %v6656_v40 = vmul.f32 0.03125, %v6630_v59  ;;  %v6655_v43 = vmul.f32 0.03125, %v6627_v49  ;;  %v6716_v34 = vmul.f32 %v18925_v28, %v6694_v32 }
0x10ca   : > { %v16253_v26 = vpop.eup %16252  ;;  %16266 = vrsqrt.f32 %v6669_v53 }
0x10cb   : > { %v16255_v61 = vpop.eup %16254  ;;  %v6696_v39 = vmul.f32 %v16253_v26, %v18825_v0  ;;  %v6672_v22 = vadd.f32 1e-05, %v6656_v40  ;;  %v6671_v37 = vadd.f32 1e-05, %v6655_v43  ;;  %v18939_v11 = vadd.f32 %v18933_v25, %v6716_v34 }
0x10cc   : > { %v6636_v7 = vpop.xlane.xlu1 %6635  ;;  %v6633_v20 = vpop.xlane.xlu0 %6632  ;;  %v6695_v54 = vmul.f32 %v16255_v61, %v18822_v10 }
0x10cd   : > { %16268 = vrsqrt.f32 %v6672_v22  ;;  %v6658_v21 = vmul.f32 0.03125, %v6636_v7  ;;  %v6657_v15 = vmul.f32 0.03125, %v6633_v20  ;;  %v6718_v27 = vmul.f32 %v18925_v28, %v6696_v39 }
0x10ce   : > { %v16257_v44 = vpop.eup %16256  ;;  %16270 = vrsqrt.f32 %v6671_v37  ;;  %v6717_v0 = vmul.f32 %v18925_v28, %v6695_v54 }
0x10cf   : > { %v16259_v23 = vpop.eup %16258  ;;  %v6674_v30 = vadd.f32 1e-05, %v6658_v21  ;;  %v6673_v58 = vadd.f32 1e-05, %v6657_v15  ;;  %v6698_v2 = vmul.f32 %v16257_v44, %v18833_v9  ;;  %v18949_v50 = vadd.f32 %v18933_v25, %v6718_v27 }
0x10d0   : > { %v6697_v10 = vmul.f32 %v16259_v23, %v18836_v3  ;;  %v6642_v33 = vpop.xlane.xlu1 %6641  ;;  %v6639_v14 = vpop.xlane.xlu0 %6638  ;;  %v18942_v46 = vadd.f32 %v18933_v25, %v6717_v0 }
0x10d1   : > { %16272 = vrsqrt.f32 %v6674_v30  ;;  %v6660_v51 = vmul.f32 0.03125, %v6642_v33  ;;  %v6659_v38 = vmul.f32 0.03125, %v6639_v14  ;;  %v6720_v31 = vmul.f32 %v18925_v28, %v6698_v2 }
0x10d2   : > { %v16261_v5 = vpop.eup %16260  ;;  %v6719_v4 = vmul.f32 %v18925_v28, %v6697_v10  ;;  %16274 = vrsqrt.f32 %v6673_v58  ;;  %v6754_v3 = vpack.c.bf16 %v18942_v46, %v18939_v11 }
0x10d3   : > { %v16263_v41 = vpop.eup %16262  ;;  %v6676_v17 = vadd.f32 1e-05, %v6660_v51  ;;  %v6675_v24 = vadd.f32 1e-05, %v6659_v38  ;;  %v6700_v48 = vmul.f32 %v16261_v5, %v18845_v16 }
0x10d4   : > { %15068 = vmatprep.mubr.msk.bf16.mxu1 %vm1505_vm6, %v6754_v3  ;;  %v6645_v9 = vpop.xlane.xlu0 %6644  ;;  %v18954_v42 = vadd.f32 %v18933_v25, %v6719_v4  ;;  %v6699_v36 = vmul.f32 %v16263_v41, %v18848_v12  ;;  %v18965_v12 = vadd.f32 %v18933_v25, %v6720_v31  ;;  %v15970_v41 = vld [vmem:[%s21622_s19 + $0x10] sm:$0xff]  }
0x10d5   : > { %16276 = vrsqrt.f32 %v6676_v17  ;;  %v6661_v6 = vmul.f32 0.03125, %v6645_v9  ;;  %v6722_v59 = vmul.f32 %v18925_v28, %v6700_v48  ;;  %15086 = vmatprep.subr.bf16.mxu0 %v15970_v41  ;;  %v15971_v17 = vld [vmem:[%s21622_s19 + $0x8] sm:$0xff]  }
0x10d6   : > { %v16265_v13 = vpop.eup %16264  ;;  %16278 = vrsqrt.f32 %v6675_v24  ;;  %v6755_v56 = vpack.c.bf16 %v18954_v42, %v18949_v50  ;;  %v6721_v45 = vmul.f32 %v18925_v28, %v6699_v36  ;;  %15087 = vmatpush3.bf16.msra.mxu0 %v15970_v41  ;;  %v15972_v24 = vld [vmem:[%s21622_s19] sm:$0xff]  }
0x10d7   : > { %v16267_v16 = vpop.eup %16266  ;;  %v6677_v57 = vadd.f32 1e-05, %v6661_v6  ;;  %v6702_v18 = vmul.f32 %v16265_v13, %v18857_v55  ;;  %v18978_v26 = vadd.f32 %v18933_v25, %v6722_v59  ;;  %15088 = vmatprep.subr.bf16.mxu0 %v15971_v17  ;;  %v13795_v36 = vld [vmem:[%s21621_s18] ss:$0 sm:$0xff] }
0x10d8   : > { %v6701_v29 = vmul.f32 %v16267_v16, %v18860_v35  ;;  %15069 = vmatmul.mubr.msk.bf16.vlgmr.msra.gmra.mxu1 %vm1505_vm6, %v6755_v56  ;;  %v18968_v53 = vadd.f32 %v18933_v25, %v6721_v45 }
0x10d9   : > { %16280 = vrsqrt.f32 %v6677_v57  ;;  %v6724_v35 = vmul.f32 %v18925_v28, %v6702_v18 }
0x10da   : > { %v16269_v49 = vpop.eup %16268  ;;  %v6756_v32 = vpack.c.bf16 %v18968_v53, %v18965_v12  ;;  %v6723_v40 = vmul.f32 %v18925_v28, %v6701_v29  ;;  %15089 = vmatpush3.bf16.msra.mxu0 %v15971_v17 }
0x10db   : > { %v16271_v55 = vpop.eup %16270  ;;  %v6704_v43 = vmul.f32 %v16269_v49, %v18869_v47  ;;  %v18988_v54 = vadd.f32 %v18933_v25, %v6724_v35  ;;  %15090 = vmatprep.subr.bf16.mxu0 %v15972_v24 }
0x10dc   : > { %15072 = vmatprep.mubr.msk.bf16.mxu1 %vm1505_vm6, %v6756_v32  ;;  %v18981_v61 = vadd.f32 %v18933_v25, %v6723_v40  ;;  %v6703_v39 = vmul.f32 %v16271_v55, %v18872_v60 }
0x10dd   : > { %v6726_v21 = vmul.f32 %v18925_v28, %v6704_v43 }
0x10de   : > { %v16273_v22 = vpop.eup %16272  ;;  %v6757_v37 = vpack.c.bf16 %v18981_v61, %v18978_v26  ;;  %v6725_v7 = vmul.f32 %v18925_v28, %v6703_v39  ;;  %15091 = vmatpush3.bf16.msra.mxu0 %v15972_v24 }
0x10df   : > { %v16275_v20 = vpop.eup %16274  ;;  %v6706_v60 = vmul.f32 %v16273_v22, %v18881_v52 }
0x10e0   : > { %v6705_v47 = vmul.f32 %v16275_v20, %v18884_v1  ;;  %15073 = vmatmul.mubr.msk.bf16.gmra.mxu1 %vm1505_vm6, %v6757_v37  ;;  %v18993_v34 = vadd.f32 %v18933_v25, %v6725_v7  ;;  %v19003_v1 = vadd.f32 %v18933_v25, %v6726_v21 }
0x10e1   : > { %v6728_v52 = vmul.f32 %v18925_v28, %v6706_v60 }
0x10e2   : > { %v16277_v15 = vpop.eup %16276  ;;  %v6758_v44 = vpack.c.bf16 %v18993_v34, %v18988_v54  ;;  %v6727_v0 = vmul.f32 %v18925_v28, %v6705_v47 }
0x10e3   : > { %v16279_v23 = vpop.eup %16278  ;;  %v6708_v27 = vmul.f32 %v16277_v15, %v18893_v19  ;;  %v19017_v51 = vadd.f32 %v18933_v25, %v6728_v52 }
0x10e4   : > { %15076 = vmatprep.mubr.msk.bf16.mxu1 %vm1505_vm6, %v6758_v44  ;;  %v19006_v30 = vadd.f32 %v18933_v25, %v6727_v0  ;;  %v6707_v58 = vmul.f32 %v16279_v23, %v18896_v8 }
0x10e5   : > { %v6730_v2 = vmul.f32 %v18925_v28, %v6708_v27 }
0x10e6   : > { %v16281_v10 = vpop.eup %16280  ;;  %v6759_v33 = vpack.c.bf16 %v19006_v30, %v19003_v1  ;;  %v6729_v14 = vmul.f32 %v18925_v28, %v6707_v58 }
0x10e7   : > { %v6709_v19 = vmul.f32 %v16281_v10, %v18905_v62  ;;  %v19026_v4 = vadd.f32 %v18933_v25, %v6730_v2 }
0x10e8   : > { %15077 = vmatmul.mubr.msk.bf16.gmra.mxu1 %vm1505_vm6, %v6759_v33  ;;  %v19020_v38 = vadd.f32 %v18933_v25, %v6729_v14 }
0x10e9   : > { %v6731_v8 = vmul.f32 %v18925_v28, %v6709_v19 }
0x10ea   : > { %v6760_v5 = vpack.c.bf16 %v19020_v38, %v19017_v51 }
0x10eb   : > { %v19029_v62 = vadd.f32 %v18933_v25, %v6731_v8 }
0x10ec   : > { %15080 = vmatprep.mubr.msk.bf16.mxu1 %vm1505_vm6, %v6760_v5 }
0x10ed   : > { %v6761_v3 = vpack.c.bf16 %v19029_v62, %v19026_v4 }
0x10f0   : > { %15081 = vmatmul.mubr.msk.bf16.gmra.mxu1 %vm1505_vm6, %v6761_v3 }
0x1198   : > { %v15070_v48 = vpop.f32.mrf.mxu1 }
0x1199   : > { %v6852_v56 = vadd.f32 %v15070_v48, %v13795_v36 }
0x119a   : > { %v6843_v9 = vpop.f32.mrf.mxu1 }
0x119b   : > { %v6844_v6 = vadd.f32 %v13795_v36, %v6843_v9  ;;  %v6908_v49 = vmax.f32 %v6852_v56, 0.0 }
0x119c   : > { %v15071_v31 = vpop.f32.mrf.mxu1 }
0x119d   : > { %v6855_v13 = vadd.f32 %v15071_v31, %v13795_v36  ;;  %v6906_v29 = vmax.f32 %v6844_v6, 0.0 }
0x119e   : > { %v6846_v45 = vpop.f32.mrf.mxu1 }
0x119f   : > { %v6847_v16 = vadd.f32 %v13795_v36, %v6846_v45  ;;  %v6909_v57 = vmax.f32 %v6855_v13, 0.0 }
0x11a0   : > { %v15074_v18 = vpop.f32.mrf.mxu1 }
0x11a1   : > { %v6907_v59 = vmax.f32 %v6847_v16, 0.0  ;;  %v6923_v55 = vpack.c.bf16 %v6909_v57, %v6908_v49  ;;  %v6868_v22 = vadd.f32 %v15074_v18, %v13795_v36 }
0x11a2   : > { %v6859_v32 = vpop.f32.mrf.mxu1 }
0x11a3   : > { %v6922_v40 = vpack.c.bf16 %v6907_v59, %v6906_v29  ;;  %v6860_v43 = vadd.f32 %v13795_v36, %v6859_v32  ;;  %v6912_v15 = vmax.f32 %v6868_v22, 0.0  ;;  %v19058_v32 = vld [vmem:[%s21623_s20] ss:$0 sm:$0xff] }
0x11a4   : > { %v15075_v35 = vpop.f32.mrf.mxu1 }
0x11a5   : > { %v6871_v39 = vadd.f32 %v15075_v35, %v13795_v36  ;;  %15092 = vmatprep.mubr.msk.bf16.mxu0 %vm6969_vm9, %v6922_v40  ;;  %v6910_v21 = vmax.f32 %v6860_v43, 0.0 }
0x11a6   : > { %v6862_v37 = vpop.f32.mrf.mxu1  ;;  %15093 = vmatmul.mubr.msk.bf16.vlgmr.msra.gmra.mxu0 %vm6969_vm9, %v6923_v55 }
0x11a7   : > { %v6863_v7 = vadd.f32 %v13795_v36, %v6862_v37  ;;  %v6913_v20 = vmax.f32 %v6871_v39, 0.0 }
0x11a8   : > { %v15078_v47 = vpop.f32.mrf.mxu1 }
0x11a9   : > { %v6911_v60 = vmax.f32 %v6863_v7, 0.0  ;;  %v6925_v23 = vpack.c.bf16 %v6913_v20, %v6912_v15  ;;  %v6884_v10 = vadd.f32 %v15078_v47, %v13795_v36 }
0x11aa   : > { %v6875_v44 = vpop.f32.mrf.mxu1 }
0x11ab   : > { %v6924_v0 = vpack.c.bf16 %v6911_v60, %v6910_v21  ;;  %v6876_v58 = vadd.f32 %v13795_v36, %v6875_v44  ;;  %v6916_v3 = vmax.f32 %v6884_v10, 0.0 }
0x11ac   : > { %v15079_v27 = vpop.f32.mrf.mxu1 }
0x11ad   : > { %v6887_v52 = vadd.f32 %v15079_v27, %v13795_v36  ;;  %15096 = vmatprep.mubr.msk.bf16.mxu0 %vm6969_vm9, %v6924_v0  ;;  %v6914_v8 = vmax.f32 %v6876_v58, 0.0 }
0x11ae   : > { %v6878_v33 = vpop.f32.mrf.mxu1  ;;  %15097 = vmatmul.mubr.msk.bf16.gmra.mxu0 %vm6969_vm9, %v6925_v23 }
0x11af   : > { %v6879_v14 = vadd.f32 %v13795_v36, %v6878_v33  ;;  %v6917_v19 = vmax.f32 %v6887_v52, 0.0 }
0x11b0   : > { %v15082_v2 = vpop.f32.mrf.mxu1 }
0x11b1   : > { %v6915_v5 = vmax.f32 %v6879_v14, 0.0  ;;  %v6927_v24 = vpack.c.bf16 %v6917_v19, %v6916_v3  ;;  %v6900_v6 = vadd.f32 %v15082_v2, %v13795_v36 }
0x11b2   : > { %v6891_v41 = vpop.f32.mrf.mxu1 }
0x11b3   : > { %v6926_v17 = vpack.c.bf16 %v6915_v5, %v6914_v8  ;;  %v6892_v9 = vadd.f32 %v13795_v36, %v6891_v41  ;;  %v6920_v18 = vmax.f32 %v6900_v6, 0.0 }
0x11b4   : > { %v15083_v48 = vpop.f32.mrf.mxu1 }
0x11b5   : > { %v6903_v31 = vadd.f32 %v15083_v48, %v13795_v36  ;;  %15100 = vmatprep.mubr.msk.bf16.mxu0 %vm6969_vm9, %v6926_v17  ;;  %v6918_v16 = vmax.f32 %v6892_v9, 0.0 }
0x11b6   : > { %v6894_v13 = vpop.f32.mrf.mxu1  ;;  %15101 = vmatmul.mubr.msk.bf16.gmra.mxu0 %vm6969_vm9, %v6927_v24 }
0x11b7   : > { %v6895_v56 = vadd.f32 %v13795_v36, %v6894_v13  ;;  %v6921_v45 = vmax.f32 %v6903_v31, 0.0 }
0x11b9   : > { %v6919_v57 = vmax.f32 %v6895_v56, 0.0  ;;  %v6929_v59 = vpack.c.bf16 %v6921_v45, %v6920_v18 }
0x11bb   : > { %v6928_v29 = vpack.c.bf16 %v6919_v57, %v6918_v16 }
0x11bd   : > { %15104 = vmatprep.mubr.msk.bf16.mxu0 %vm6969_vm9, %v6928_v29 }
0x11be   : > { %15105 = vmatmul.mubr.msk.bf16.gmra.mxu0 %vm6969_vm9, %v6929_v59 }
0x1266   : > { %v15094_v49 = vpop.f32.mrf.mxu0 }
0x1267   : > { %v7037_v55 = vadd.f32 %v15094_v49, %v19058_v32 }
0x1268   : > { %v7028_v40 = vpop.f32.mrf.mxu0 }
0x1269   : > { %v7029_v36 = vadd.f32 %v19058_v32, %v7028_v40  ;;  %v19066_v22 = vadd.f32 %v7037_v55, %v18949_v50 }
0x126a   : > { %v15095_v35 = vpop.f32.mrf.mxu0 }
0x126b   : > { %v19063_v43 = vadd.f32 %v7029_v36, %v18939_v11  ;;  %v7040_v37 = vadd.f32 %v15095_v35, %v19058_v32  ;;  %v7113_v0 = vsel %vm1505_vm6, %v19066_v22, 0.0 }
0x126c   : > { %v7031_v39 = vpop.f32.mrf.mxu0 }
0x126d   : > { %v7032_v7 = vadd.f32 %v19058_v32, %v7031_v39  ;;  %v7107_v20 = vsel %vm1505_vm6, %v19063_v43, 0.0  ;;  %v19077_v15 = vadd.f32 %v7040_v37, %v18954_v42 }
0x126e   : > { %7108 = vadd.xlane.f32.xlu1 %v7107_v20  ;;  %v15098_v47 = vpop.f32.mrf.mxu0 }
0x126f   : > { %v19073_v21 = vadd.f32 %v7032_v7, %v18942_v46  ;;  %v7053_v60 = vadd.f32 %v15098_v47, %v19058_v32  ;;  %v7116_v10 = vsel %vm1505_vm6, %v19077_v15, 0.0 }
0x1270   : > { %v7044_v11 = vpop.f32.mrf.mxu0 }
0x1271   : > { %v7045_v50 = vadd.f32 %v19058_v32, %v7044_v11  ;;  %v7110_v44 = vsel %vm1505_vm6, %v19073_v21, 0.0  ;;  %v19088_v27 = vadd.f32 %v7053_v60, %v18978_v26 }
0x1272   : > { %7111 = vadd.xlane.f32.xlu0 %v7110_v44  ;;  %7114 = vadd.xlane.f32.xlu1 %v7113_v0  ;;  %v15099_v23 = vpop.f32.mrf.mxu0 }
0x1273   : > { %v19085_v46 = vadd.f32 %v7045_v50, %v18965_v12  ;;  %v7056_v42 = vadd.f32 %v15099_v23, %v19058_v32  ;;  %v7125_v26 = vsel %vm1505_vm6, %v19088_v27, 0.0 }
0x1274   : > { %v7047_v58 = vpop.f32.mrf.mxu0 }
0x1275   : > { %v7048_v52 = vadd.f32 %v19058_v32, %v7047_v58  ;;  %v7119_v33 = vsel %vm1505_vm6, %v19085_v46, 0.0  ;;  %v19102_v2 = vadd.f32 %v7056_v42, %v18981_v61 }
0x1276   : > { %7117 = vadd.xlane.f32.xlu0 %v7116_v10  ;;  %7120 = vadd.xlane.f32.xlu1 %v7119_v33  ;;  %v15102_v14 = vpop.f32.mrf.mxu0 }
0x1277   : > { %v19097_v12 = vadd.f32 %v7048_v52, %v18968_v53  ;;  %v7069_v8 = vadd.f32 %v15102_v14, %v19058_v32  ;;  %v7128_v9 = vsel %vm1505_vm6, %v19102_v2, 0.0 }
0x1278   : > { %v7060_v19 = vpop.f32.mrf.mxu0 }
0x1279   : > { %v7061_v5 = vadd.f32 %v19058_v32, %v7060_v19  ;;  %v7122_v3 = vsel %vm1505_vm6, %v19097_v12, 0.0  ;;  %v19113_v48 = vadd.f32 %v7069_v8, %v19003_v1 }
0x127a   : > { %7123 = vadd.xlane.f32.xlu0 %v7122_v3  ;;  %7126 = vadd.xlane.f32.xlu1 %v7125_v26  ;;  %v15103_v41 = vpop.f32.mrf.mxu0 }
0x127b   : > { %v19109_v53 = vadd.f32 %v7061_v5, %v18988_v54  ;;  %v7072_v17 = vadd.f32 %v15103_v41, %v19058_v32  ;;  %v7137_v57 = vsel %vm1505_vm6, %v19113_v48, 0.0 }
0x127c   : > { %v7063_v24 = vpop.f32.mrf.mxu0 }
0x127d   : > { %v7064_v61 = vadd.f32 %v19058_v32, %v7063_v24  ;;  %v7131_v31 = vsel %vm1505_vm6, %v19109_v53, 0.0  ;;  %v19124_v13 = vadd.f32 %v7072_v17, %v19006_v30 }
0x127e   : > { %7129 = vadd.xlane.f32.xlu0 %v7128_v9  ;;  %7132 = vadd.xlane.f32.xlu1 %v7131_v31  ;;  %v15106_v6 = vpop.f32.mrf.mxu0 }
0x127f   : > { %v19121_v54 = vadd.f32 %v7064_v61, %v18993_v34  ;;  %v7085_v1 = vadd.f32 %v15106_v6, %v19058_v32  ;;  %v7140_v30 = vsel %vm1505_vm6, %v19124_v13, 0.0 }
0x1280   : > { %v7076_v56 = vpop.f32.mrf.mxu0 }
0x1281   : > { %v7077_v45 = vadd.f32 %v19058_v32, %v7076_v56  ;;  %v7134_v16 = vsel %vm1505_vm6, %v19121_v54, 0.0  ;;  %v19138_v59 = vadd.f32 %v7085_v1, %v19026_v4 }
0x1282   : > { %7135 = vadd.xlane.f32.xlu0 %v7134_v16  ;;  %7138 = vadd.xlane.f32.xlu1 %v7137_v57  ;;  %v15107_v18 = vpop.f32.mrf.mxu0 }
0x1283   : > { %v19133_v34 = vadd.f32 %v7077_v45, %v19017_v51  ;;  %v7088_v49 = vadd.f32 %v15107_v18, %v19058_v32  ;;  %v7149_v4 = vsel %vm1505_vm6, %v19138_v59, 0.0 }
0x1284   : > { %v7079_v29 = vpop.f32.mrf.mxu0 }
0x1285   : > { %v7080_v40 = vadd.f32 %v19058_v32, %v7079_v29  ;;  %v7143_v55 = vsel %vm1505_vm6, %v19133_v34, 0.0  ;;  %v19148_v51 = vadd.f32 %v7088_v49, %v19029_v62 }
0x1286   : > { %7141 = vadd.xlane.f32.xlu0 %v7140_v30  ;;  %7144 = vadd.xlane.f32.xlu1 %v7143_v55 }
0x1287   : > { %v19145_v36 = vadd.f32 %v7080_v40, %v19020_v38  ;;  %v7152_v32 = vsel %vm1505_vm6, %v19148_v51, 0.0 }
0x1289   : > { %v7146_v35 = vsel %vm1505_vm6, %v19145_v36, 0.0 }
0x128a   : > { %7147 = vadd.xlane.f32.xlu0 %v7146_v35  ;;  %7150 = vadd.xlane.f32.xlu1 %v7149_v4 }
0x128e   : > { %7153 = vadd.xlane.f32.xlu0 %v7152_v32 }
0x12f7   : > { %v7109_v39 = vpop.xlane.xlu1 %7108 }
0x12f8   : > { %v7155_v37 = vmul.f32 0.03125, %v7109_v39 }
0x12fa   : > { %v19157_v38 = vsub.f32 %v19063_v43, %v7155_v37 }
0x12fb   : > { %v7115_v7 = vpop.xlane.xlu1 %7114  ;;  %v7112_v62 = vpop.xlane.xlu0 %7111 }
0x12fc   : > { %v7157_v20 = vmul.f32 0.03125, %v7115_v7  ;;  %v7156_v47 = vmul.f32 0.03125, %v7112_v62  ;;  %v7187_v60 = vmul.f32 %v19157_v38, %v19157_v38 }
0x12fe   : > { %v19162_v11 = vsub.f32 %v19066_v22, %v7157_v20  ;;  %v19165_v50 = vsub.f32 %v19073_v21, %v7156_v47  ;;  %v7203_v44 = vsel %vm1505_vm6, %v7187_v60, 0.0 }
0x12ff   : > { %v7121_v0 = vpop.xlane.xlu1 %7120  ;;  %7204 = vadd.xlane.f32.xlu1 %v7203_v44  ;;  %v7118_v23 = vpop.xlane.xlu0 %7117 }
0x1300   : > { %v7159_v43 = vmul.f32 0.03125, %v7121_v0  ;;  %v7158_v58 = vmul.f32 0.03125, %v7118_v23  ;;  %v7189_v42 = vmul.f32 %v19162_v11, %v19162_v11  ;;  %v7188_v52 = vmul.f32 %v19165_v50, %v19165_v50 }
0x1302   : > { %v19173_v10 = vsub.f32 %v19085_v46, %v7159_v43  ;;  %v19176_v22 = vsub.f32 %v19077_v15, %v7158_v58  ;;  %v7209_v21 = vsel %vm1505_vm6, %v7189_v42, 0.0  ;;  %v7206_v33 = vsel %vm1505_vm6, %v7188_v52, 0.0 }
0x1303   : > { %v7127_v14 = vpop.xlane.xlu1 %7126  ;;  %7210 = vadd.xlane.f32.xlu1 %v7209_v21  ;;  %7207 = vadd.xlane.f32.xlu0 %v7206_v33  ;;  %v7124_v19 = vpop.xlane.xlu0 %7123 }
0x1304   : > { %v7161_v26 = vmul.f32 0.03125, %v7127_v14  ;;  %v7160_v8 = vmul.f32 0.03125, %v7124_v19  ;;  %v7191_v5 = vmul.f32 %v19173_v10, %v19173_v10  ;;  %v7190_v46 = vmul.f32 %v19176_v22, %v19176_v22 }
0x1306   : > { %v19185_v3 = vsub.f32 %v19088_v27, %v7161_v26  ;;  %v19188_v15 = vsub.f32 %v19097_v12, %v7160_v8  ;;  %v7215_v41 = vsel %vm1505_vm6, %v7191_v5, 0.0  ;;  %v7212_v17 = vsel %vm1505_vm6, %v7190_v46, 0.0  ;;  %v15973_v5 = vld [vmem:[%s21717_s3 + $0x18] sm:$0xff]   ;;  %v15975_v46 = vld [vmem:[%s21717_s3 + $0x10] sm:$0xff]  }
0x1307   : > { %v7133_v24 = vpop.xlane.xlu1 %7132  ;;  %7216 = vadd.xlane.f32.xlu1 %v7215_v41  ;;  %7213 = vadd.xlane.f32.xlu0 %v7212_v17  ;;  %v7130_v61 = vpop.xlane.xlu0 %7129  ;;  %v15976_v41 = vld [vmem:[%s21718_s30 + $0x10] sm:$0xff]  }
0x1308   : > { %v7163_v9 = vmul.f32 0.03125, %v7133_v24  ;;  %v7162_v31 = vmul.f32 0.03125, %v7130_v61  ;;  %v7193_v6 = vmul.f32 %v19185_v3, %v19185_v3  ;;  %v7192_v27 = vmul.f32 %v19188_v15, %v19188_v15  ;;  %15108 = vmatprep.subr.bf16.mxu1 %v15973_v5 }
0x1309   : > { %15109 = vmatpush3.bf16.msra.mxu1 %v15973_v5 }
0x130a   : > { %v19197_v56 = vsub.f32 %v19109_v53, %v7163_v9  ;;  %v19200_v12 = vsub.f32 %v19102_v2, %v7162_v31  ;;  %v7221_v1 = vsel %vm1505_vm6, %v7193_v6, 0.0  ;;  %v7218_v45 = vsel %vm1505_vm6, %v7192_v27, 0.0  ;;  %15110 = vmatprep.subr.bf16.mxu1 %v15975_v46 }
0x130b   : > { %v7139_v16 = vpop.xlane.xlu1 %7138  ;;  %7222 = vadd.xlane.f32.xlu1 %v7221_v1  ;;  %7219 = vadd.xlane.f32.xlu0 %v7218_v45  ;;  %v7136_v57 = vpop.xlane.xlu0 %7135 }
0x130c   : > { %v7165_v18 = vmul.f32 0.03125, %v7139_v16  ;;  %v7164_v29 = vmul.f32 0.03125, %v7136_v57  ;;  %v7195_v30 = vmul.f32 %v19197_v56, %v19197_v56  ;;  %v7194_v53 = vmul.f32 %v19200_v12, %v19200_v12 }
0x130d   : > { %15111 = vmatpush3.bf16.msra.mxu1 %v15975_v46 }
0x130e   : > { %v19209_v49 = vsub.f32 %v19113_v48, %v7165_v18  ;;  %v19212_v2 = vsub.f32 %v19121_v54, %v7164_v29  ;;  %v7227_v40 = vsel %vm1505_vm6, %v7195_v30, 0.0  ;;  %v7224_v55 = vsel %vm1505_vm6, %v7194_v53, 0.0 }
0x130f   : > { %7228 = vadd.xlane.f32.xlu1 %v7227_v40  ;;  %v7145_v35 = vpop.xlane.xlu1 %7144  ;;  %7225 = vadd.xlane.f32.xlu0 %v7224_v55  ;;  %v7142_v4 = vpop.xlane.xlu0 %7141 }
0x1310   : > { %v7167_v32 = vmul.f32 0.03125, %v7145_v35  ;;  %v7166_v39 = vmul.f32 0.03125, %v7142_v4  ;;  %v7197_v37 = vmul.f32 %v19209_v49, %v19209_v49  ;;  %v7196_v48 = vmul.f32 %v19212_v2, %v19212_v2 }
0x1312   : > { %v19221_v7 = vsub.f32 %v19133_v34, %v7167_v32  ;;  %v19224_v54 = vsub.f32 %v19124_v13, %v7166_v39  ;;  %v7233_v62 = vsel %vm1505_vm6, %v7197_v37, 0.0  ;;  %v7230_v20 = vsel %vm1505_vm6, %v7196_v48, 0.0 }
0x1313   : > { %7234 = vadd.xlane.f32.xlu1 %v7233_v62  ;;  %v7151_v47 = vpop.xlane.xlu1 %7150  ;;  %7231 = vadd.xlane.f32.xlu0 %v7230_v20  ;;  %v7148_v60 = vpop.xlane.xlu0 %7147 }
0x1314   : > { %v7169_v44 = vmul.f32 0.03125, %v7151_v47  ;;  %v7168_v0 = vmul.f32 0.03125, %v7148_v60  ;;  %v7199_v23 = vmul.f32 %v19221_v7, %v19221_v7  ;;  %v7198_v34 = vmul.f32 %v19224_v54, %v19224_v54 }
0x1316   : > { %v19233_v43 = vsub.f32 %v19138_v59, %v7169_v44  ;;  %v19236_v13 = vsub.f32 %v19145_v36, %v7168_v0  ;;  %v7239_v58 = vsel %vm1505_vm6, %v7199_v23, 0.0  ;;  %v7236_v42 = vsel %vm1505_vm6, %v7198_v34, 0.0 }
0x1317   : > { %7240 = vadd.xlane.f32.xlu1 %v7239_v58  ;;  %7237 = vadd.xlane.f32.xlu0 %v7236_v42  ;;  %v7154_v52 = vpop.xlane.xlu0 %7153 }
0x1318   : > { %v7170_v21 = vmul.f32 0.03125, %v7154_v52  ;;  %v7201_v33 = vmul.f32 %v19233_v43, %v19233_v43  ;;  %v7200_v14 = vmul.f32 %v19236_v13, %v19236_v13 }
0x131a   : > { %v19245_v59 = vsub.f32 %v19148_v51, %v7170_v21  ;;  %v7245_v36 = vsel %vm1505_vm6, %v7201_v33, 0.0  ;;  %v7242_v19 = vsel %vm1505_vm6, %v7200_v14, 0.0  ;;  %v15974_v51 = vld [vmem:[%s21718_s30 + $0x18] sm:$0xff]  }
0x131b   : > { %7246 = vadd.xlane.f32.xlu1 %v7245_v36  ;;  %7243 = vadd.xlane.f32.xlu0 %v7242_v19 }
0x131c   : > { %v7202_v26 = vmul.f32 %v19245_v59, %v19245_v59  ;;  %15128 = vmatprep.subr.bf16.mxu0 %v15974_v51 }
0x131d   : > { %15129 = vmatpush3.bf16.msra.mxu0 %v15974_v51 }
0x131e   : > { %v7248_v8 = vsel %vm1505_vm6, %v7202_v26, 0.0  ;;  %15130 = vmatprep.subr.bf16.mxu0 %v15976_v41 }
0x131f   : > { %7249 = vadd.xlane.f32.xlu0 %v7248_v8 }
0x1321   : > { %15131 = vmatpush3.bf16.msra.mxu0 %v15976_v41 }
0x1388   : > { %v7205_v17 = vpop.xlane.xlu1 %7204 }
0x1389   : > { %v7251_v24 = vmul.f32 0.03125, %v7205_v17 }
0x138b   : > { %v7267_v61 = vadd.f32 1e-05, %v7251_v24 }
0x138c   : > { %v7211_v9 = vpop.xlane.xlu1 %7210  ;;  %v7208_v31 = vpop.xlane.xlu0 %7207 }
0x138d   : > { %16282 = vrsqrt.f32 %v7267_v61  ;;  %v7253_v6 = vmul.f32 0.03125, %v7211_v9  ;;  %v7252_v27 = vmul.f32 0.03125, %v7208_v31 }
0x138f   : > { %v7269_v1 = vadd.f32 1e-05, %v7253_v6  ;;  %v7268_v45 = vadd.f32 1e-05, %v7252_v27 }
0x1390   : > { %v7217_v16 = vpop.xlane.xlu1 %7216  ;;  %v7214_v57 = vpop.xlane.xlu0 %7213 }
0x1391   : > { %16284 = vrsqrt.f32 %v7269_v1  ;;  %v7255_v18 = vmul.f32 0.03125, %v7217_v16  ;;  %v7254_v29 = vmul.f32 0.03125, %v7214_v57 }
0x1392   : > { %16286 = vrsqrt.f32 %v7268_v45 }
0x1393   : > { %v7271_v30 = vadd.f32 1e-05, %v7255_v18  ;;  %v7270_v53 = vadd.f32 1e-05, %v7254_v29 }
0x1394   : > { %v7223_v40 = vpop.xlane.xlu1 %7222  ;;  %v7220_v55 = vpop.xlane.xlu0 %7219 }
0x1395   : > { %16288 = vrsqrt.f32 %v7271_v30  ;;  %v7257_v35 = vmul.f32 0.03125, %v7223_v40  ;;  %v7256_v4 = vmul.f32 0.03125, %v7220_v55 }
0x1396   : > { %16290 = vrsqrt.f32 %v7270_v53 }
0x1397   : > { %v7273_v32 = vadd.f32 1e-05, %v7257_v35  ;;  %v7272_v39 = vadd.f32 1e-05, %v7256_v4 }
0x1398   : > { %v7229_v37 = vpop.xlane.xlu1 %7228  ;;  %v7226_v48 = vpop.xlane.xlu0 %7225 }
0x1399   : > { %16292 = vrsqrt.f32 %v7273_v32  ;;  %v7259_v62 = vmul.f32 0.03125, %v7229_v37  ;;  %v7258_v20 = vmul.f32 0.03125, %v7226_v48 }
0x139a   : > { %v16283_v47 = vpop.eup %16282  ;;  %16294 = vrsqrt.f32 %v7272_v39 }
0x139b   : > { %v7275_v60 = vadd.f32 1e-05, %v7259_v62  ;;  %v7274_v44 = vadd.f32 1e-05, %v7258_v20  ;;  %v7299_v34 = vmul.f32 %v16283_v47, %v19157_v38 }
0x139c   : > { %v7235_v0 = vpop.xlane.xlu1 %7234  ;;  %v7232_v23 = vpop.xlane.xlu0 %7231 }
0x139d   : > { %16296 = vrsqrt.f32 %v7275_v60  ;;  %v7261_v58 = vmul.f32 0.03125, %v7235_v0  ;;  %v7260_v42 = vmul.f32 0.03125, %v7232_v23  ;;  %v7315_v5 = vmul.f32 %v18925_v28, %v7299_v34 }
0x139e   : > { %v16285_v52 = vpop.eup %16284  ;;  %16298 = vrsqrt.f32 %v7274_v44 }
0x139f   : > { %v16287_v21 = vpop.eup %16286  ;;  %v7301_v33 = vmul.f32 %v16285_v52, %v19162_v11  ;;  %v7277_v14 = vadd.f32 1e-05, %v7261_v58  ;;  %v7276_v36 = vadd.f32 1e-05, %v7260_v42  ;;  %v19273_v27 = vadd.f32 %v18933_v25, %v7315_v5 }
0x13a0   : > { %v7241_v19 = vpop.xlane.xlu1 %7240  ;;  %v7238_v26 = vpop.xlane.xlu0 %7237  ;;  %v7300_v8 = vmul.f32 %v16287_v21, %v19165_v50 }
0x13a1   : > { %16300 = vrsqrt.f32 %v7277_v14  ;;  %v7263_v51 = vmul.f32 0.03125, %v7241_v19  ;;  %v7262_v46 = vmul.f32 0.03125, %v7238_v26  ;;  %v7317_v24 = vmul.f32 %v18925_v28, %v7301_v33  ;;  %21813 = vst [vmem:[#allocation35_spill] sm:$0xff] %v19273_v27 }
0x13a2   : > { %v16289_v38 = vpop.eup %16288  ;;  %16302 = vrsqrt.f32 %v7276_v36  ;;  %v7316_v41 = vmul.f32 %v18925_v28, %v7300_v8 }
0x13a3   : > { %v16291_v17 = vpop.eup %16290  ;;  %v7279_v61 = vadd.f32 1e-05, %v7263_v51  ;;  %v7278_v11 = vadd.f32 1e-05, %v7262_v46  ;;  %v7303_v9 = vmul.f32 %v16289_v38, %v19173_v10 }
0x13a4   : > { %v7302_v31 = vmul.f32 %v16291_v17, %v19176_v22  ;;  %v7247_v6 = vpop.xlane.xlu1 %7246  ;;  %v7244_v50 = vpop.xlane.xlu0 %7243  ;;  %v19276_v1 = vadd.f32 %v18933_v25, %v7316_v41  ;;  %v19282_v22 = vadd.f32 %v18933_v25, %v7317_v24 }
0x13a5   : > { %16304 = vrsqrt.f32 %v7279_v61  ;;  %v7265_v45 = vmul.f32 0.03125, %v7247_v6  ;;  %v7264_v16 = vmul.f32 0.03125, %v7244_v50  ;;  %v7319_v40 = vmul.f32 %v18925_v28, %v7303_v9 }
0x13a6   : > { %21814 = vst [vmem:[#allocation37_spill] sm:$0xff] %v19276_v1  ;;  %v16293_v57 = vpop.eup %16292  ;;  %v7318_v18 = vmul.f32 %v18925_v28, %v7302_v31  ;;  %16306 = vrsqrt.f32 %v7278_v11  ;;  %v7351_v10 = vpack.c.bf16 %v19276_v1, %v19273_v27  ;;  %21815 = vst [vmem:[#allocation36_spill] sm:$0xff] %v19282_v22 }
0x13a7   : > { %v16295_v29 = vpop.eup %16294  ;;  %v7281_v30 = vadd.f32 1e-05, %v7265_v45  ;;  %v7280_v53 = vadd.f32 1e-05, %v7264_v16  ;;  %v7305_v35 = vmul.f32 %v16293_v57, %v19185_v3  ;;  %v19296_v3 = vadd.f32 %v18933_v25, %v7319_v40  ;;  %v16634_v16 = vld [vmem:[%s21624_s21] ss:$0 sm:$0xff] }
0x13a8   : > { %v19286_v55 = vadd.f32 %v18933_v25, %v7318_v18  ;;  %15112 = vmatprep.mubr.msk.bf16.mxu1 %vm1505_vm6, %v7351_v10  ;;  %15132 = vmatprep.mubr.msk.bf16.mxu0 %vm1505_vm6, %v7351_v10  ;;  %v7250_v4 = vpop.xlane.xlu0 %7249  ;;  %v7304_v32 = vmul.f32 %v16295_v29, %v19188_v15  ;;  %v15977_v29 = vld [vmem:[%s21736_s0 + $0x18] sm:$0xff]  }
0x13a9   : > { %16308 = vrsqrt.f32 %v7281_v30  ;;  %v7266_v39 = vmul.f32 0.03125, %v7250_v4  ;;  %21817 = vst [vmem:[#allocation38_spill] sm:$0xff] %v19296_v3  ;;  %v7321_v0 = vmul.f32 %v18925_v28, %v7305_v35  ;;  %15148 = vmatprep.subr.bf16.mxu1 %v15977_v29  ;;  %v15979_v30 = vld [vmem:[%s21736_s0 + $0x10] sm:$0xff]   ;;  %v15981_v40 = vld [vmem:[%s21738_s10 + $0x18] sm:$0xff]  }
0x13aa   : > { %21816 = vst [vmem:[#allocation40_spill] sm:$0xff] %v19286_v55  ;;  %v16297_v37 = vpop.eup %16296  ;;  %v7352_v48 = vpack.c.bf16 %v19286_v55, %v19282_v22  ;;  %16310 = vrsqrt.f32 %v7280_v53  ;;  %v7320_v62 = vmul.f32 %v18925_v28, %v7304_v32  ;;  %v15980_v53 = vld [vmem:[%s21737_s1 + $0x10] sm:$0xff]  }
0x13ab   : > { %v16299_v20 = vpop.eup %16298  ;;  %v7282_v47 = vadd.f32 1e-05, %v7266_v39  ;;  %v7307_v60 = vmul.f32 %v16297_v37, %v19197_v56  ;;  %v19314_v52 = vadd.f32 %v18933_v25, %v7321_v0 }
0x13ac   : > { %v7306_v44 = vmul.f32 %v16299_v20, %v19200_v12  ;;  %15113 = vmatmul.mubr.msk.bf16.vlgmr.msra.gmra.mxu1 %vm1505_vm6, %v7352_v48  ;;  %15133 = vmatmul.mubr.msk.bf16.vlgmr.msra.gmra.mxu0 %vm1505_vm6, %v7352_v48  ;;  %v19303_v15 = vadd.f32 %v18933_v25, %v7320_v62 }
0x13ad   : > { %16312 = vrsqrt.f32 %v7282_v47  ;;  %v7323_v12 = vmul.f32 %v18925_v28, %v7307_v60  ;;  %21819 = vst [vmem:[#allocation39_spill] sm:$0xff] %v19314_v52  ;;  %15149 = vmatpush3.bf16.msra.mxu1 %v15977_v29 }
0x13ae   : > { %21818 = vst [vmem:[#allocation41_spill] sm:$0xff] %v19303_v15  ;;  %v16301_v23 = vpop.eup %16300  ;;  %v7353_v34 = vpack.c.bf16 %v19303_v15, %v19296_v3  ;;  %v7322_v58 = vmul.f32 %v18925_v28, %v7306_v44  ;;  %15150 = vmatprep.subr.bf16.mxu1 %v15979_v30 }
0x13af   : > { %v16303_v42 = vpop.eup %16302  ;;  %v7309_v56 = vmul.f32 %v16301_v23, %v19209_v49  ;;  %v19324_v26 = vadd.f32 %v18933_v25, %v7323_v12 }
0x13b0   : > { %15116 = vmatprep.mubr.msk.bf16.mxu1 %vm1505_vm6, %v7353_v34  ;;  %15136 = vmatprep.mubr.msk.bf16.mxu0 %vm1505_vm6, %v7353_v34  ;;  %v19317_v21 = vadd.f32 %v18933_v25, %v7322_v58  ;;  %v7308_v33 = vmul.f32 %v16303_v42, %v19212_v2  ;;  %v15982_v58 = vld [vmem:[%s21738_s10 + $0x10] sm:$0xff]  }
0x13b1   : > { %21821 = vst [vmem:[#allocation19_spill] sm:$0xff] %v19324_v26  ;;  %v7325_v8 = vmul.f32 %v18925_v28, %v7309_v56  ;;  %15151 = vmatpush3.bf16.msra.mxu1 %v15979_v30 }
0x13b2   : > { %21820 = vst [vmem:[#allocation21_spill] sm:$0xff] %v19317_v21  ;;  %v16305_v14 = vpop.eup %16304  ;;  %v7354_v36 = vpack.c.bf16 %v19317_v21, %v19314_v52  ;;  %v7324_v49 = vmul.f32 %v18925_v28, %v7308_v33  ;;  %15188 = vmatprep.subr.bf16.mxu1 %v15981_v40 }
0x13b3   : > { %v16307_v19 = vpop.eup %16306  ;;  %v7311_v51 = vmul.f32 %v16305_v14, %v19221_v7 }
0x13b4   : > { %v7310_v5 = vmul.f32 %v16307_v19, %v19224_v54  ;;  %15117 = vmatmul.mubr.msk.bf16.gmra.mxu1 %vm1505_vm6, %v7354_v36  ;;  %15137 = vmatmul.mubr.msk.bf16.gmra.mxu0 %vm1505_vm6, %v7354_v36  ;;  %v19331_v2 = vadd.f32 %v18933_v25, %v7324_v49  ;;  %v19339_v54 = vadd.f32 %v18933_v25, %v7325_v8 }
0x13b5   : > { %v7327_v11 = vmul.f32 %v18925_v28, %v7311_v51 }
0x13b6   : > { %21822 = vst [vmem:[#allocation22_spill] sm:$0xff] %v19331_v2  ;;  %v16309_v46 = vpop.eup %16308  ;;  %v7355_v38 = vpack.c.bf16 %v19331_v2, %v19324_v26  ;;  %v7326_v41 = vmul.f32 %v18925_v28, %v7310_v5  ;;  %21823 = vst [vmem:[#allocation20_spill] sm:$0xff] %v19339_v54 }
0x13b7   : > { %v16311_v17 = vpop.eup %16310  ;;  %v7313_v24 = vmul.f32 %v16309_v46, %v19233_v43  ;;  %v19356_v45 = vadd.f32 %v18933_v25, %v7327_v11 }
0x13b8   : > { %15120 = vmatprep.mubr.msk.bf16.mxu1 %vm1505_vm6, %v7355_v38  ;;  %15140 = vmatprep.mubr.msk.bf16.mxu0 %vm1505_vm6, %v7355_v38  ;;  %v19344_v61 = vadd.f32 %v18933_v25, %v7326_v41  ;;  %v7312_v7 = vmul.f32 %v16311_v17, %v19236_v13 }
0x13b9   : > { %v7329_v50 = vmul.f32 %v18925_v28, %v7313_v24  ;;  %21825 = vst [vmem:[#allocation23_spill] sm:$0xff] %v19356_v45 }
0x13ba   : > { %21824 = vst [vmem:[#allocation25_spill] sm:$0xff] %v19344_v61  ;;  %v16313_v9 = vpop.eup %16312  ;;  %v7356_v31 = vpack.c.bf16 %v19344_v61, %v19339_v54  ;;  %v7328_v43 = vmul.f32 %v18925_v28, %v7312_v7 }
0x13bb   : > { %v7314_v6 = vmul.f32 %v16313_v9, %v19245_v59  ;;  %v19367_v28 = vadd.f32 %v18933_v25, %v7329_v50 }
0x13bc   : > { %15121 = vmatmul.mubr.msk.bf16.gmra.mxu1 %vm1505_vm6, %v7356_v31  ;;  %15141 = vmatmul.mubr.msk.bf16.gmra.mxu0 %vm1505_vm6, %v7356_v31  ;;  %v19359_v13 = vadd.f32 %v18933_v25, %v7328_v43 }
0x13bd   : > { %v7330_v57 = vmul.f32 %v16634_v16, %v7314_v6  ;;  %21827 = vst [vmem:[#allocation24_spill] sm:$0xff] %v19367_v28 }
0x13be   : > { %21826 = vst [vmem:[#allocation26_spill] sm:$0xff] %v19359_v13  ;;  %v7357_v59 = vpack.c.bf16 %v19359_v13, %v19356_v45 }
0x13bf   : > { %v19370_v18 = vadd.f32 %v18933_v25, %v7330_v57  ;;  %v15978_v25 = vld [vmem:[%s21737_s1 + $0x18] sm:$0xff]  }
0x13c0   : > { %15124 = vmatprep.mubr.msk.bf16.mxu1 %vm1505_vm6, %v7357_v59  ;;  %15144 = vmatprep.mubr.msk.bf16.mxu0 %vm1505_vm6, %v7357_v59 }
0x13c1   : > { %21828 = vst [vmem:[#allocation29_spill] sm:$0xff] %v19370_v18  ;;  %v7358_v10 = vpack.c.bf16 %v19370_v18, %v19367_v28  ;;  %15168 = vmatprep.subr.bf16.mxu0 %v15978_v25 }
0x13c2   : > { %15169 = vmatpush3.bf16.msra.mxu0 %v15978_v25 }
0x13c3   : > { %15170 = vmatprep.subr.bf16.mxu0 %v15980_v53 }
0x13c4   : > { %15125 = vmatmul.mubr.msk.bf16.gmra.mxu1 %vm1505_vm6, %v7358_v10  ;;  %15145 = vmatmul.mubr.msk.bf16.gmra.mxu0 %vm1505_vm6, %v7358_v10 }
0x13c6   : > { %15171 = vmatpush3.bf16.msra.mxu0 %v15980_v53 }
0x13c7   : > { %15208 = vmatprep.subr.bf16.mxu0 %v21739_v63 }
0x146c   : > { %v15114_v35 = vpop.f32.mrf.mxu1  ;;  %v15134_v4 = vpop.f32.mrf.mxu0 }
0x146e   : > { %v7434_v32 = vpop.f32.mrf.mxu1  ;;  %v7548_v39 = vpop.f32.mrf.mxu0 }
0x1470   : > { %v15115_v37 = vpop.f32.mrf.mxu1  ;;  %v15135_v48 = vpop.f32.mrf.mxu0 }
0x1471   : > { %v7612_v44 = vpack.c.bf16 %v15115_v37, %v15114_v35  ;;  %v7620_v0 = vpack.c.bf16 %v15135_v48, %v15134_v4  ;;  %v19429_v37 = vld [vmem:[%s21616_s13 + $0x1] ss:$0 sm:$0xff] }
0x1472   : > { %v7437_v62 = vpop.f32.mrf.mxu1  ;;  %v7551_v20 = vpop.f32.mrf.mxu0 }
0x1473   : > { %v7611_v47 = vpack.c.bf16 %v7437_v62, %v7434_v32  ;;  %v7619_v60 = vpack.c.bf16 %v7551_v20, %v7548_v39 }
0x1474   : > { %v15118_v23 = vpop.f32.mrf.mxu1  ;;  %v15138_v34 = vpop.f32.mrf.mxu0 }
0x1475   : > { %15152 = vmatprep.mubr.msk.bf16.mxu1 %vm1505_vm6, %v7611_v47  ;;  %15172 = vmatprep.mubr.msk.bf16.mxu0 %vm1505_vm6, %v7619_v60 }
0x1476   : > { %v7450_v42 = vpop.f32.mrf.mxu1  ;;  %v7564_v56 = vpop.f32.mrf.mxu0  ;;  %15153 = vmatmul.mubr.msk.bf16.vlgmr.msra.gmra.mxu1 %vm1505_vm6, %v7612_v44  ;;  %15173 = vmatmul.mubr.msk.bf16.vlgmr.msra.gmra.mxu0 %vm1505_vm6, %v7620_v0 }
0x1477   : > { %15189 = vmatpush3.bf16.msra.mxu1 %v15981_v40 }
0x1478   : > { %v15119_v12 = vpop.f32.mrf.mxu1  ;;  %v15139_v33 = vpop.f32.mrf.mxu0  ;;  %15190 = vmatprep.subr.bf16.mxu1 %v15982_v58 }
0x1479   : > { %v7614_v8 = vpack.c.bf16 %v15119_v12, %v15118_v23  ;;  %v7622_v5 = vpack.c.bf16 %v15139_v33, %v15138_v34 }
0x147a   : > { %v7453_v14 = vpop.f32.mrf.mxu1  ;;  %v7567_v36 = vpop.f32.mrf.mxu0 }
0x147b   : > { %v7613_v49 = vpack.c.bf16 %v7453_v14, %v7450_v42  ;;  %v7621_v19 = vpack.c.bf16 %v7567_v36, %v7564_v56  ;;  %15191 = vmatpush3.bf16.msra.mxu1 %v15982_v58 }
0x147c   : > { %v15122_v51 = vpop.f32.mrf.mxu1  ;;  %v15142_v46 = vpop.f32.mrf.mxu0  ;;  %15214 = vmatprep.subr.bf16.mxu1 %v21739_v63 }
0x147d   : > { %15156 = vmatprep.mubr.msk.bf16.mxu1 %vm1505_vm6, %v7613_v49  ;;  %15176 = vmatprep.mubr.msk.bf16.mxu0 %vm1505_vm6, %v7621_v19 }
0x147e   : > { %v7466_v38 = vpop.f32.mrf.mxu1  ;;  %v7580_v41 = vpop.f32.mrf.mxu0  ;;  %15157 = vmatmul.mubr.msk.bf16.gmra.mxu1 %vm1505_vm6, %v7614_v8  ;;  %15177 = vmatmul.mubr.msk.bf16.gmra.mxu0 %vm1505_vm6, %v7622_v5 }
0x1480   : > { %v15123_v17 = vpop.f32.mrf.mxu1  ;;  %v15143_v24 = vpop.f32.mrf.mxu0 }
0x1481   : > { %v7616_v43 = vpack.c.bf16 %v15123_v17, %v15122_v51  ;;  %v7624_v6 = vpack.c.bf16 %v15143_v24, %v15142_v46 }
0x1482   : > { %v7469_v7 = vpop.f32.mrf.mxu1  ;;  %v7583_v11 = vpop.f32.mrf.mxu0 }
0x1483   : > { %v7615_v9 = vpack.c.bf16 %v7469_v7, %v7466_v38  ;;  %v7623_v31 = vpack.c.bf16 %v7583_v11, %v7580_v41 }
0x1484   : > { %v15126_v50 = vpop.f32.mrf.mxu1  ;;  %v15146_v16 = vpop.f32.mrf.mxu0 }
0x1485   : > { %15160 = vmatprep.mubr.msk.bf16.mxu1 %vm1505_vm6, %v7615_v9  ;;  %15180 = vmatprep.mubr.msk.bf16.mxu0 %vm1505_vm6, %v7623_v31 }
0x1486   : > { %v7482_v57 = vpop.f32.mrf.mxu1  ;;  %v7596_v59 = vpop.f32.mrf.mxu0  ;;  %15161 = vmatmul.mubr.msk.bf16.gmra.mxu1 %vm1505_vm6, %v7616_v43  ;;  %15181 = vmatmul.mubr.msk.bf16.gmra.mxu0 %vm1505_vm6, %v7624_v6 }
0x1488   : > { %v15127_v10 = vpop.f32.mrf.mxu1  ;;  %v15147_v29 = vpop.f32.mrf.mxu0 }
0x1489   : > { %v7618_v35 = vpack.c.bf16 %v15127_v10, %v15126_v50  ;;  %v7626_v4 = vpack.c.bf16 %v15147_v29, %v15146_v16 }
0x148a   : > { %v7485_v25 = vpop.f32.mrf.mxu1  ;;  %v7599_v30 = vpop.f32.mrf.mxu0 }
0x148b   : > { %v7617_v53 = vpack.c.bf16 %v7485_v25, %v7482_v57  ;;  %v7625_v40 = vpack.c.bf16 %v7599_v30, %v7596_v59 }
0x148d   : > { %15164 = vmatprep.mubr.msk.bf16.mxu1 %vm1505_vm6, %v7617_v53  ;;  %15184 = vmatprep.mubr.msk.bf16.mxu0 %vm1505_vm6, %v7625_v40 }
0x148e   : > { %15165 = vmatmul.mubr.msk.bf16.gmra.mxu1 %vm1505_vm6, %v7618_v35  ;;  %15185 = vmatmul.mubr.msk.bf16.gmra.mxu0 %vm1505_vm6, %v7626_v4 }
0x148f   : > { %15192 = vmatprep.mubr.msk.bf16.mxu1 %vm1505_vm6, %v7619_v60  ;;  %15210 = vmatprep.mubr.msk.bf16.mxu0 %vm16647_vm7, %v21739_v63 }
0x1496   : > { %15193 = vmatmul.mubr.msk.bf16.vlgmr.msra.gmra.mxu1 %vm1505_vm6, %v7620_v0 }
0x1497   : > { %15196 = vmatprep.mubr.msk.bf16.mxu1 %vm1505_vm6, %v7621_v19  ;;  %v19444_v19 = vld [vmem:[%s21615_s12 + $0x1] ss:$0 sm:$0xff] }
0x149e   : > { %15197 = vmatmul.mubr.msk.bf16.gmra.mxu1 %vm1505_vm6, %v7622_v5 }
0x149f   : > { %15200 = vmatprep.mubr.msk.bf16.mxu1 %vm1505_vm6, %v7623_v31 }
0x14a6   : > { %15201 = vmatmul.mubr.msk.bf16.gmra.mxu1 %vm1505_vm6, %v7624_v6 }
0x14a7   : > { %15204 = vmatprep.mubr.msk.bf16.mxu1 %vm1505_vm6, %v7625_v40 }
0x14ae   : > { %15205 = vmatmul.mubr.msk.bf16.gmra.mxu1 %vm1505_vm6, %v7626_v4 }
0x14af   : > { %15216 = vmatprep.mubr.msk.bf16.mxu1 %vm16647_vm7, %v21739_v63 }
0x1536   : > { %v15154_v32 = vpop.f32.mrf.mxu1  ;;  %v15174_v39 = vpop.f32.mrf.mxu0 }
0x1537   : > { %v7865_v60 = vadd.f32 %v15174_v39, %v19429_v37  ;;  %v7719_v24 = vadd.f32 %v15154_v32, %v19444_v19 }
0x1538   : > { %v7710_v48 = vpop.f32.mrf.mxu1  ;;  %v7856_v62 = vpop.f32.mrf.mxu0 }
0x1539   : > { %v7857_v34 = vadd.f32 %v19429_v37, %v7856_v62  ;;  %v7711_v9 = vadd.f32 %v19444_v19, %v7710_v48 }
0x153a   : > { %v15155_v20 = vpop.f32.mrf.mxu1  ;;  %v15175_v47 = vpop.f32.mrf.mxu0 }
0x153b   : > { %v7868_v44 = vadd.f32 %v15175_v47, %v19429_v37  ;;  %v7722_v5 = vadd.f32 %v15155_v20, %v19444_v19 }
0x153c   : > { %v7713_v0 = vpop.f32.mrf.mxu1  ;;  %v7859_v23 = vpop.f32.mrf.mxu0 }
0x153d   : > { %v19434_v58 = vpack.c.bf16 %v7868_v44, %v7865_v60  ;;  %v7860_v42 = vadd.f32 %v19429_v37, %v7859_v23  ;;  %v7714_v38 = vadd.f32 %v19444_v19, %v7713_v0  ;;  %v19460_v50 = vpack.c.bf16 %v7722_v5, %v7719_v24 }
0x153e   : > { %v15158_v56 = vpop.f32.mrf.mxu1  ;;  %v15178_v12 = vpop.f32.mrf.mxu0 }
0x153f   : > { %v19437_v33 = vpack.c.bf16 %v7860_v42, %v7857_v34  ;;  %v8116_v49 = vsel %vm1016_vm4, %v19434_v58, 0  ;;  %v7881_v41 = vadd.f32 %v15178_v12, %v19429_v37  ;;  %v19462_v59 = vpack.c.bf16 %v7714_v38, %v7711_v9 }
0x1540   : > { %v7726_v14 = vpop.f32.mrf.mxu1  ;;  %v7872_v36 = vpop.f32.mrf.mxu0  ;;  %15215 = vmatpush3.bf16.xpose.msra.mxu1 %v8116_v49  ;;  %v7735_v62 = vadd.f32 %v15158_v56, %v19444_v19 }
0x1541   : > { %v8069_v8 = vsel %vm1016_vm4, %v19437_v33, 0  ;;  %15226 = vmatprep.subr.bf16.mxu1 %v21739_v63  ;;  %v7873_v31 = vadd.f32 %v19429_v37, %v7872_v36  ;;  %v7727_v60 = vadd.f32 %v19444_v19, %v7726_v14 }
0x1542   : > { %v15159_v51 = vpop.f32.mrf.mxu1  ;;  %v15179_v46 = vpop.f32.mrf.mxu0  ;;  %15209 = vmatpush3.bf16.xpose.msra.mxu0 %v8069_v8 }
0x1543   : > { %v7884_v17 = vadd.f32 %v15179_v46, %v19429_v37  ;;  %15220 = vmatprep.subr.bf16.mxu0 %v21739_v63  ;;  %v7738_v40 = vadd.f32 %v15159_v51, %v19444_v19 }
0x1544   : > { %v7729_v7 = vpop.f32.mrf.mxu1  ;;  %v7875_v11 = vpop.f32.mrf.mxu0 }
0x1545   : > { %v19457_v43 = vpack.c.bf16 %v7884_v17, %v7881_v41  ;;  %v7876_v6 = vadd.f32 %v19429_v37, %v7875_v11  ;;  %v7730_v32 = vadd.f32 %v19444_v19, %v7729_v7  ;;  %v19490_v34 = vpack.c.bf16 %v7738_v40, %v7735_v62 }
0x1546   : > { %v15162_v16 = vpop.f32.mrf.mxu1  ;;  %v15182_v57 = vpop.f32.mrf.mxu0 }
0x1547   : > { %v19464_v10 = vpack.c.bf16 %v7876_v6, %v7873_v31  ;;  %15217 = vmatmul.mubr.msk.bf16.vlgmr.msra.gmra.mxu1 %vm1016_vm4, %v19460_v50  ;;  %v8210_v30 = vsel %vm1016_vm4, %v19457_v43, 0  ;;  %v7897_v39 = vadd.f32 %v15182_v57, %v19429_v37  ;;  %v19492_v36 = vpack.c.bf16 %v7730_v32, %v7727_v60 }
0x1548   : > { %v7742_v29 = vpop.f32.mrf.mxu1  ;;  %v7888_v25 = vpop.f32.mrf.mxu0  ;;  %15227 = vmatpush3.bf16.xpose.msra.mxu1 %v8210_v30  ;;  %15228 = vmatprep.mubr.msk.bf16.mxu1 %vm16647_vm7, %v21739_v63  ;;  %v7751_v7 = vadd.f32 %v15162_v16, %v19444_v19 }
0x1549   : > { %15211 = vmatmul.mubr.msk.bf16.vlgmr.msra.gmra.mxu0 %vm1016_vm4, %v19462_v59  ;;  %v8163_v53 = vsel %vm1016_vm4, %v19464_v10, 0  ;;  %15238 = vmatprep.subr.bf16.mxu1 %v21739_v63  ;;  %v7889_v44 = vadd.f32 %v19429_v37, %v7888_v25  ;;  %v7743_v31 = vadd.f32 %v19444_v19, %v7742_v29  ;;  %v13886_v29 = vld [vmem:[%s21617_s14 + $0x1] ss:$0 sm:$0xff] }
0x154a   : > { %v15163_v35 = vpop.f32.mrf.mxu1  ;;  %v15183_v4 = vpop.f32.mrf.mxu0  ;;  %15221 = vmatpush3.bf16.xpose.msra.mxu0 %v8163_v53  ;;  %15222 = vmatprep.mubr.msk.bf16.mxu0 %vm16647_vm7, %v21739_v63 }
0x154b   : > { %v7900_v48 = vadd.f32 %v15183_v4, %v19429_v37  ;;  %15232 = vmatprep.subr.bf16.mxu0 %v21739_v63  ;;  %v7754_v51 = vadd.f32 %v15163_v35, %v19444_v19 }
0x154c   : > { %v7745_v20 = vpop.f32.mrf.mxu1  ;;  %v7891_v47 = vpop.f32.mrf.mxu0 }
0x154d   : > { %v19487_v0 = vpack.c.bf16 %v7900_v48, %v7897_v39  ;;  %v7892_v23 = vadd.f32 %v19429_v37, %v7891_v47  ;;  %v7746_v41 = vadd.f32 %v19444_v19, %v7745_v20  ;;  %v19520_v30 = vpack.c.bf16 %v7754_v51, %v7751_v7 }
0x154e   : > { %v15166_v42 = vpop.f32.mrf.mxu1  ;;  %v15186_v12 = vpop.f32.mrf.mxu0 }
0x154f   : > { %v19494_v49 = vpack.c.bf16 %v7892_v23, %v7889_v44  ;;  %15229 = vmatmul.mubr.msk.bf16.vlgmr.msra.gmra.mxu1 %vm1016_vm4, %v19490_v34  ;;  %v8304_v14 = vsel %vm1016_vm4, %v19487_v0, 0  ;;  %v7913_v17 = vadd.f32 %v15186_v12, %v19429_v37  ;;  %v19522_v40 = vpack.c.bf16 %v7746_v41, %v7743_v31 }
0x1550   : > { %v7758_v56 = vpop.f32.mrf.mxu1  ;;  %v7904_v8 = vpop.f32.mrf.mxu0  ;;  %15239 = vmatpush3.bf16.xpose.msra.mxu1 %v8304_v14  ;;  %15240 = vmatprep.mubr.msk.bf16.mxu1 %vm16647_vm7, %v21739_v63  ;;  %v7767_v47 = vadd.f32 %v15166_v42, %v19444_v19 }
0x1551   : > { %15223 = vmatmul.mubr.msk.bf16.vlgmr.msra.gmra.mxu0 %vm1016_vm4, %v19492_v36  ;;  %v8257_v5 = vsel %vm1016_vm4, %v19494_v49, 0  ;;  %15250 = vmatprep.subr.bf16.mxu1 %v21739_v63  ;;  %v7905_v6 = vadd.f32 %v19429_v37, %v7904_v8  ;;  %v7759_v44 = vadd.f32 %v19444_v19, %v7758_v56 }
0x1552   : > { %v15167_v46 = vpop.f32.mrf.mxu1  ;;  %v15187_v38 = vpop.f32.mrf.mxu0  ;;  %15233 = vmatpush3.bf16.xpose.msra.mxu0 %v8257_v5  ;;  %15234 = vmatprep.mubr.msk.bf16.mxu0 %vm16647_vm7, %v21739_v63 }
0x1553   : > { %v7916_v24 = vadd.f32 %v15187_v38, %v19429_v37  ;;  %15244 = vmatprep.subr.bf16.mxu0 %v21739_v63  ;;  %v7770_v32 = vadd.f32 %v15167_v46, %v19444_v19 }
0x1554   : > { %v7761_v11 = vpop.f32.mrf.mxu1  ;;  %v7907_v9 = vpop.f32.mrf.mxu0 }
0x1555   : > { %v19517_v57 = vpack.c.bf16 %v7916_v24, %v7913_v17  ;;  %v7908_v25 = vadd.f32 %v19429_v37, %v7907_v9  ;;  %v7762_v48 = vadd.f32 %v19444_v19, %v7761_v11  ;;  %v19549_v14 = vpack.c.bf16 %v7770_v32, %v7767_v47 }
0x1556   : > { %v15194_v53 = vpop.f32.mrf.mxu1 }
0x1557   : > { %v19524_v35 = vpack.c.bf16 %v7908_v25, %v7905_v6  ;;  %v8398_v16 = vsel %vm1016_vm4, %v19517_v57, 0  ;;  %15241 = vmatmul.mubr.msk.bf16.vlgmr.msra.gmra.mxu1 %vm1016_vm4, %v19520_v30  ;;  %v7987_v62 = vadd.f32 %v15194_v53, %v13886_v29  ;;  %v19551_v51 = vpack.c.bf16 %v7762_v48, %v7759_v44 }
0x1558   : > { %v7978_v4 = vpop.f32.mrf.mxu1  ;;  %15251 = vmatpush3.bf16.xpose.msra.mxu1 %v8398_v16  ;;  %15252 = vmatprep.mubr.msk.bf16.mxu1 %vm16647_vm7, %v21739_v63 }
0x1559   : > { %15235 = vmatmul.mubr.msk.bf16.vlgmr.msra.gmra.mxu0 %vm1016_vm4, %v19522_v40  ;;  %v8351_v37 = vsel %vm1016_vm4, %v19524_v35, 0  ;;  %15262 = vmatprep.subr.bf16.mxu1 %v21739_v63  ;;  %v7979_v23 = vadd.f32 %v13886_v29, %v7978_v4 }
0x155a   : > { %v15195_v39 = vpop.f32.mrf.mxu1  ;;  %15245 = vmatpush3.bf16.xpose.msra.mxu0 %v8351_v37  ;;  %15246 = vmatprep.mubr.msk.bf16.mxu0 %vm16647_vm7, %v21739_v63 }
0x155b   : > { %v7990_v20 = vadd.f32 %v15195_v39, %v13886_v29  ;;  %15256 = vmatprep.subr.bf16.mxu0 %v21739_v63 }
0x155c   : > { %v7981_v60 = vpop.f32.mrf.mxu1 }
0x155d   : > { %v19547_v12 = vpack.c.bf16 %v7990_v20, %v7987_v62  ;;  %v7982_v8 = vadd.f32 %v13886_v29, %v7981_v60 }
0x155e   : > { %v15198_v5 = vpop.f32.mrf.mxu1 }
0x155f   : > { %v19553_v46 = vpack.c.bf16 %v7982_v8, %v7979_v23  ;;  %v8003_v38 = vadd.f32 %v15198_v5, %v13886_v29  ;;  %15253 = vmatmul.mubr.msk.bf16.vlgmr.msra.gmra.mxu1 %vm1016_vm4, %v19549_v14 }
0x1560   : > { %v7994_v42 = vpop.f32.mrf.mxu1  ;;  %15263 = vmatpush3.bf16.msra.mxu1 %v19547_v12  ;;  %15264 = vmatprep.mubr.msk.bf16.mxu1 %vm16647_vm7, %v21739_v63 }
0x1561   : > { %v7995_v41 = vadd.f32 %v13886_v29, %v7994_v42  ;;  %15247 = vmatmul.mubr.msk.bf16.vlgmr.msra.gmra.mxu0 %vm1016_vm4, %v19551_v51  ;;  %15274 = vmatprep.subr.bf16.mxu1 %v21739_v63 }
0x1562   : > { %v15199_v19 = vpop.f32.mrf.mxu1  ;;  %15257 = vmatpush3.bf16.msra.mxu0 %v19553_v46  ;;  %15258 = vmatprep.mubr.msk.bf16.mxu0 %vm16647_vm7, %v21739_v63 }
0x1563   : > { %v8006_v56 = vadd.f32 %v15199_v19, %v13886_v29  ;;  %15268 = vmatprep.subr.bf16.mxu0 %v21739_v63 }
0x1564   : > { %v7997_v17 = vpop.f32.mrf.mxu1 }
0x1565   : > { %v19567_v24 = vpack.c.bf16 %v8006_v56, %v8003_v38  ;;  %v7998_v7 = vadd.f32 %v13886_v29, %v7997_v17 }
0x1566   : > { %v15202_v11 = vpop.f32.mrf.mxu1 }
0x1567   : > { %v19569_v9 = vpack.c.bf16 %v7998_v7, %v7995_v41  ;;  %v8019_v31 = vadd.f32 %v15202_v11, %v13886_v29 }
0x1568   : > { %v8010_v6 = vpop.f32.mrf.mxu1 }
0x1569   : > { %v8011_v25 = vadd.f32 %v13886_v29, %v8010_v6 }
0x156a   : > { %v15203_v53 = vpop.f32.mrf.mxu1 }
0x156b   : > { %v8022_v16 = vadd.f32 %v15203_v53, %v13886_v29 }
0x156c   : > { %v8013_v4 = vpop.f32.mrf.mxu1 }
0x156d   : > { %v19571_v37 = vpack.c.bf16 %v8022_v16, %v8019_v31  ;;  %v8014_v32 = vadd.f32 %v13886_v29, %v8013_v4 }
0x156e   : > { %v15206_v39 = vpop.f32.mrf.mxu1 }
0x156f   : > { %v19573_v48 = vpack.c.bf16 %v8014_v32, %v8011_v25  ;;  %v8035_v62 = vadd.f32 %v15206_v39, %v13886_v29 }
0x1570   : > { %v8026_v20 = vpop.f32.mrf.mxu1 }
0x1571   : > { %v8027_v47 = vadd.f32 %v13886_v29, %v8026_v20 }
0x1572   : > { %v15207_v60 = vpop.f32.mrf.mxu1 }
0x1573   : > { %v8038_v44 = vadd.f32 %v15207_v60, %v13886_v29 }
0x1574   : > { %v8029_v23 = vpop.f32.mrf.mxu1 }
0x1575   : > { %v19575_v8 = vpack.c.bf16 %v8038_v44, %v8035_v62  ;;  %v8030_v5 = vadd.f32 %v13886_v29, %v8029_v23 }
0x1577   : > { %v19577_v38 = vpack.c.bf16 %v8030_v5, %v8027_v47 }
0x1607   : > { %v8152_v42 = vpop.f32.mrf.mxu1 }
0x1608   : > { %v19581_v7 = vmul.f32 0.35355338, %v8152_v42 }
0x1609   : > { %v8105_v41 = vpop.f32.mrf.mxu0  ;;  %v15218_v56 = vpop.f32.mrf.mxu1 }
0x160a   : > { %v19579_v19 = vmul.f32 0.35355338, %v8105_v41  ;;  %v8463_v39 = vsel %vm1261_vm5, %v19581_v7, -inf }
0x160b   : > { %v15212_v17 = vpop.f32.mrf.mxu0  ;;  %v8155_v11 = vpop.f32.mrf.mxu1 }
0x160c   : > { %v8457_v31 = vsel %vm1261_vm5, %v19579_v19, -inf  ;;  %v19587_v16 = vmul.f32 0.35355338, %v8155_v11 }
0x160d   : > { %8458 = vmax.xlane.f32.xlu1 %v8457_v31  ;;  %v8108_v6 = vpop.f32.mrf.mxu0  ;;  %v15219_v53 = vpop.f32.mrf.mxu1 }
0x160e   : > { %v19585_v25 = vmul.f32 0.35355338, %v8108_v6  ;;  %v8466_v42 = vsel %vm1261_vm5, %v19587_v16, -inf }
0x160f   : > { %v15213_v29 = vpop.f32.mrf.mxu0  ;;  %v8246_v4 = vpop.f32.mrf.mxu1 }
0x1610   : > { %v8460_v32 = vsel %vm1261_vm5, %v19585_v25, -inf  ;;  %v19595_v44 = vmul.f32 0.35355338, %v8246_v4 }
0x1611   : > { %8461 = vmax.xlane.f32.xlu0 %v8460_v32  ;;  %v8199_v62 = vpop.f32.mrf.mxu0  ;;  %8464 = vmax.xlane.f32.xlu1 %v8463_v39  ;;  %v15230_v47 = vpop.f32.mrf.mxu1 }
0x1612   : > { %v19593_v20 = vmul.f32 0.35355338, %v8199_v62  ;;  %v8475_v29 = vsel %vm1261_vm5, %v19595_v44, -inf }
0x1613   : > { %v15224_v60 = vpop.f32.mrf.mxu0  ;;  %v8249_v23 = vpop.f32.mrf.mxu1 }
0x1614   : > { %v8469_v5 = vsel %vm1261_vm5, %v19593_v20, -inf  ;;  %v19603_v31 = vmul.f32 0.35355338, %v8249_v23 }
0x1615   : > { %v8202_v41 = vpop.f32.mrf.mxu0  ;;  %8470 = vmax.xlane.f32.xlu1 %v8469_v5  ;;  %8467 = vmax.xlane.f32.xlu0 %v8466_v42  ;;  %v15231_v17 = vpop.f32.mrf.mxu1 }
0x1616   : > { %v19601_v56 = vmul.f32 0.35355338, %v8202_v41  ;;  %v8478_v5 = vsel %vm1261_vm5, %v19603_v31, -inf }
0x1617   : > { %v15225_v11 = vpop.f32.mrf.mxu0  ;;  %v8340_v6 = vpop.f32.mrf.mxu1 }
0x1618   : > { %v8472_v53 = vsel %vm1261_vm5, %v19601_v56, -inf  ;;  %v19611_v47 = vmul.f32 0.35355338, %v8340_v6 }
0x1619   : > { %v8293_v4 = vpop.f32.mrf.mxu0  ;;  %8473 = vmax.xlane.f32.xlu0 %v8472_v53  ;;  %8476 = vmax.xlane.f32.xlu1 %v8475_v29  ;;  %v15242_v39 = vpop.f32.mrf.mxu1 }
0x161a   : > { %v19609_v32 = vmul.f32 0.35355338, %v8293_v4  ;;  %v8487_v4 = vsel %vm1261_vm5, %v19611_v47, -inf }
0x161b   : > { %v15236_v62 = vpop.f32.mrf.mxu0  ;;  %v8343_v60 = vpop.f32.mrf.mxu1 }
0x161c   : > { %v8481_v23 = vsel %vm1261_vm5, %v19609_v32, -inf  ;;  %v19619_v53 = vmul.f32 0.35355338, %v8343_v60 }
0x161d   : > { %v8296_v42 = vpop.f32.mrf.mxu0  ;;  %8482 = vmax.xlane.f32.xlu1 %v8481_v23  ;;  %8479 = vmax.xlane.f32.xlu0 %v8478_v5  ;;  %v15243_v17 = vpop.f32.mrf.mxu1 }
0x161e   : > { %v19617_v41 = vmul.f32 0.35355338, %v8296_v42  ;;  %v8490_v60 = vsel %vm1261_vm5, %v19619_v53, -inf }
0x161f   : > { %v15237_v11 = vpop.f32.mrf.mxu0  ;;  %v8434_v29 = vpop.f32.mrf.mxu1 }
0x1620   : > { %v8484_v6 = vsel %vm1261_vm5, %v19617_v41, -inf  ;;  %v19627_v42 = vmul.f32 0.35355338, %v8434_v29 }
0x1621   : > { %8485 = vmax.xlane.f32.xlu0 %v8484_v6  ;;  %8488 = vmax.xlane.f32.xlu1 %v8487_v4  ;;  %v8387_v39 = vpop.f32.mrf.mxu0  ;;  %v15254_v23 = vpop.f32.mrf.mxu1 }
0x1622   : > { %v19625_v62 = vmul.f32 0.35355338, %v8387_v39  ;;  %v8499_v29 = vsel %vm1261_vm5, %v19627_v42, -inf }
0x1623   : > { %v15248_v5 = vpop.f32.mrf.mxu0  ;;  %v8437_v17 = vpop.f32.mrf.mxu1 }
0x1624   : > { %v8493_v11 = vsel %vm1261_vm5, %v19625_v62, -inf  ;;  %v19635_v39 = vmul.f32 0.35355338, %v8437_v17 }
0x1625   : > { %8491 = vmax.xlane.f32.xlu0 %v8490_v60  ;;  %8494 = vmax.xlane.f32.xlu1 %v8493_v11  ;;  %v8390_v18 = vpop.f32.mrf.mxu0  ;;  %v15255_v13 = vpop.f32.mrf.mxu1 }
0x1626   : > { %v19633_v6 = vmul.f32 0.35355338, %v8390_v18  ;;  %v8502_v5 = vsel %vm1261_vm5, %v19635_v39, -inf }
0x1627   : > { %v15249_v4 = vpop.f32.mrf.mxu0 }
0x1628   : > { %v8496_v23 = vsel %vm1261_vm5, %v19633_v6, -inf }
0x1629   : > { %8500 = vmax.xlane.f32.xlu1 %v8499_v29  ;;  %8497 = vmax.xlane.f32.xlu0 %v8496_v23 }
0x162d   : > { %8503 = vmax.xlane.f32.xlu0 %v8502_v5 }
0x163a   : > { %8997 = vrot.lane.b32.xlu1 %v19437_v33, %s21829_s9 }
0x1696   : > { %v8459_v13 = vpop.xlane.xlu1 %8458 }
0x1697   : > { %v8505_v18 = vsub.f32 %v19579_v19, %v8459_v13 }
0x1699   : > { %v8521_v4 = vmul.f32 1.442695, %v8505_v18 }
0x169a   : > { %v8462_v17 = vpop.xlane.xlu0 %8461  ;;  %v8465_v60 = vpop.xlane.xlu1 %8464 }
0x169b   : > { %v8507_v11 = vsub.f32 %v19581_v7, %v8465_v60  ;;  %v8506_v28 = vsub.f32 %v19585_v25, %v8462_v17 }
0x169d   : > { %v8525_v45 = vmul.f32 1.442695, %v8507_v11  ;;  %v8523_v5 = vmul.f32 1.442695, %v8506_v28 }
0x169e   : > { %v8471_v29 = vpop.xlane.xlu1 %8470  ;;  %v8468_v23 = vpop.xlane.xlu0 %8467 }
0x169f   : > { %v8508_v61 = vsub.f32 %v19587_v16, %v8468_v23  ;;  %16314 = vpow2.f32 %v8525_v45  ;;  %v8509_v54 = vsub.f32 %v19593_v20, %v8471_v29 }
0x16a0   : > { %16316 = vpow2.f32 %v8521_v4 }
0x16a1   : > { %v8527_v2 = vmul.f32 1.442695, %v8508_v61  ;;  %v8529_v18 = vmul.f32 1.442695, %v8509_v54 }
0x16a2   : > { %v8474_v26 = vpop.xlane.xlu0 %8473  ;;  %v8477_v19 = vpop.xlane.xlu1 %8476 }
0x16a3   : > { %v8511_v13 = vsub.f32 %v19595_v44, %v8477_v19  ;;  %16318 = vpow2.f32 %v8527_v2  ;;  %v8510_v25 = vsub.f32 %v19601_v56, %v8474_v26 }
0x16a4   : > { %16320 = vpow2.f32 %v8523_v5 }
0x16a5   : > { %v8533_v7 = vmul.f32 1.442695, %v8511_v13  ;;  %v8531_v61 = vmul.f32 1.442695, %v8510_v25 }
0x16a6   : > { %v8483_v17 = vpop.xlane.xlu1 %8482  ;;  %v8480_v60 = vpop.xlane.xlu0 %8479 }
0x16a7   : > { %v8512_v16 = vsub.f32 %v19603_v31, %v8480_v60  ;;  %16322 = vpow2.f32 %v8533_v7  ;;  %v8513_v28 = vsub.f32 %v19609_v32, %v8483_v17 }
0x16a8   : > { %16324 = vpow2.f32 %v8529_v18 }
0x16a9   : > { %v8535_v45 = vmul.f32 1.442695, %v8512_v16  ;;  %v8537_v26 = vmul.f32 1.442695, %v8513_v28 }
0x16aa   : > { %v8486_v20 = vpop.xlane.xlu0 %8485  ;;  %v8489_v11 = vpop.xlane.xlu1 %8488 }
0x16ab   : > { %v8515_v44 = vsub.f32 %v19611_v47, %v8489_v11  ;;  %16326 = vpow2.f32 %v8535_v45  ;;  %v8514_v56 = vsub.f32 %v19617_v41, %v8486_v20 }
0x16ac   : > { %v19655_v2 = vpop.eup %16314  ;;  %16328 = vpow2.f32 %v8531_v61 }
0x16ad   : > { %v8541_v54 = vmul.f32 1.442695, %v8515_v44  ;;  %v19657_v4 = vpop.eup %16316  ;;  %v8559_v29 = vsel %vm1261_vm5, %v19655_v2, 0.0  ;;  %v8539_v7 = vmul.f32 1.442695, %v8514_v56 }
0x16ae   : > { %v8492_v31 = vpop.xlane.xlu0 %8491  ;;  %v8495_v23 = vpop.xlane.xlu1 %8494  ;;  %8560 = vadd.xlane.f32.xlu1 %v8559_v29  ;;  %v8553_v19 = vsel %vm1261_vm5, %v19657_v4, 0.0 }
0x16af   : > { %v8516_v32 = vsub.f32 %v19619_v53, %v8492_v31  ;;  %16330 = vpow2.f32 %v8541_v54  ;;  %v8517_v41 = vsub.f32 %v19625_v62, %v8495_v23 }
0x16b0   : > { %v19663_v47 = vpop.eup %16318  ;;  %16332 = vpow2.f32 %v8537_v26 }
0x16b1   : > { %v8543_v5 = vmul.f32 1.442695, %v8516_v32  ;;  %v19667_v13 = vpop.eup %16320  ;;  %v8562_v25 = vsel %vm1261_vm5, %v19663_v47, 0.0  ;;  %v8545_v61 = vmul.f32 1.442695, %v8517_v41 }
0x16b2   : > { %v8501_v18 = vpop.xlane.xlu1 %8500  ;;  %v8498_v17 = vpop.xlane.xlu0 %8497  ;;  %8554 = vadd.xlane.f32.xlu1 %v8553_v19  ;;  %8563 = vadd.xlane.f32.xlu0 %v8562_v25  ;;  %v8556_v45 = vsel %vm1261_vm5, %v19667_v13, 0.0 }
0x16b3   : > { %16334 = vpow2.f32 %v8543_v5  ;;  %v8519_v53 = vsub.f32 %v19627_v42, %v8501_v18  ;;  %v8518_v62 = vsub.f32 %v19633_v6, %v8498_v17 }
0x16b4   : > { %v19673_v60 = vpop.eup %16322  ;;  %16336 = vpow2.f32 %v8539_v7 }
0x16b5   : > { %v8549_v16 = vmul.f32 1.442695, %v8519_v53  ;;  %v8571_v28 = vsel %vm1261_vm5, %v19673_v60, 0.0  ;;  %v19680_v11 = vpop.eup %16324  ;;  %v8547_v26 = vmul.f32 1.442695, %v8518_v62 }
0x16b6   : > { %v8504_v20 = vpop.xlane.xlu0 %8503  ;;  %8572 = vadd.xlane.f32.xlu1 %v8571_v28  ;;  %8557 = vadd.xlane.f32.xlu0 %v8556_v45  ;;  %v8565_v56 = vsel %vm1261_vm5, %v19680_v11, 0.0 }
0x16b7   : > { %16338 = vpow2.f32 %v8549_v16  ;;  %v8520_v42 = vsub.f32 %v19635_v39, %v8504_v20  ;;  %v19757_v20 = vpop.permute.xlu1 %8997 }
0x16b8   : > { %v19683_v44 = vpop.eup %16326  ;;  %16340 = vpow2.f32 %v8545_v61 }
0x16b9   : > { %v8551_v54 = vmul.f32 1.442695, %v8520_v42  ;;  %v8574_v6 = vsel %vm1261_vm5, %v19683_v44, 0.0  ;;  %v19689_v31 = vpop.eup %16328 }
0x16ba   : > { %8566 = vadd.xlane.f32.xlu1 %v8565_v56  ;;  %8575 = vadd.xlane.f32.xlu0 %v8574_v6  ;;  %v8568_v23 = vsel %vm1261_vm5, %v19689_v31, 0.0 }
0x16bb   : > { %16342 = vpow2.f32 %v8551_v54 }
0x16bc   : > { %v19691_v29 = vpop.eup %16330  ;;  %16344 = vpow2.f32 %v8547_v26 }
0x16bd   : > { %v8583_v39 = vsel %vm1261_vm5, %v19691_v29, 0.0  ;;  %v19697_v32 = vpop.eup %16332 }
0x16be   : > { %8584 = vadd.xlane.f32.xlu1 %v8583_v39  ;;  %8569 = vadd.xlane.f32.xlu0 %v8568_v23  ;;  %v8577_v7 = vsel %vm1261_vm5, %v19697_v32, 0.0 }
0x16c0   : > { %v19699_v5 = vpop.eup %16334 }
0x16c1   : > { %v8586_v19 = vsel %vm1261_vm5, %v19699_v5, 0.0  ;;  %v19705_v41 = vpop.eup %16336 }
0x16c2   : > { %8578 = vadd.xlane.f32.xlu1 %v8577_v7  ;;  %8587 = vadd.xlane.f32.xlu0 %v8586_v19  ;;  %v8580_v17 = vsel %vm1261_vm5, %v19705_v41, 0.0 }
0x16c4   : > { %v19707_v18 = vpop.eup %16338 }
0x16c5   : > { %v8595_v25 = vsel %vm1261_vm5, %v19707_v18, 0.0  ;;  %v19713_v53 = vpop.eup %16340 }
0x16c6   : > { %8596 = vadd.xlane.f32.xlu1 %v8595_v25  ;;  %8581 = vadd.xlane.f32.xlu0 %v8580_v17  ;;  %v8589_v61 = vsel %vm1261_vm5, %v19713_v53, 0.0 }
0x16c8   : > { %v19715_v16 = vpop.eup %16342 }
0x16c9   : > { %v8598_v45 = vsel %vm1261_vm5, %v19715_v16, 0.0  ;;  %v19721_v62 = vpop.eup %16344 }
0x16ca   : > { %8590 = vadd.xlane.f32.xlu1 %v8589_v61  ;;  %8599 = vadd.xlane.f32.xlu0 %v8598_v45  ;;  %v8592_v28 = vsel %vm1261_vm5, %v19721_v62, 0.0 }
0x16ce   : > { %8593 = vadd.xlane.f32.xlu0 %v8592_v28 }
0x16db   : > { %8994 = vrot.lane.b32.xlu1 %v19462_v59, %s21829_s9 }
0x16df   : > { %9103 = vrot.lane.b32.xlu1 %v19464_v10, %s21829_s9 }
0x16e3   : > { %9156 = vrot.lane.b32.xlu1 %v19457_v43, %s21829_s9 }
0x16e4   : > { %9050 = vrot.lane.b32.xlu0 %v19434_v58, %s21829_s9 }
0x16e7   : > { %9209 = vrot.lane.b32.xlu1 %v19494_v49, %s21829_s9 }
0x16e8   : > { %9047 = vrot.lane.b32.xlu0 %v19460_v50, %s21829_s9 }
0x16eb   : > { %9262 = vrot.lane.b32.xlu1 %v19487_v0, %s21829_s9 }
0x16ec   : > { %9100 = vrot.lane.b32.xlu0 %v19492_v36, %s21829_s9 }
0x16ef   : > { %9315 = vrot.lane.b32.xlu1 %v19524_v35, %s21829_s9 }
0x16f0   : > { %9153 = vrot.lane.b32.xlu0 %v19490_v34, %s21829_s9 }
0x16f3   : > { %9368 = vrot.lane.b32.xlu1 %v19517_v57, %s21829_s9 }
0x16f4   : > { %9206 = vrot.lane.b32.xlu0 %v19522_v40, %s21829_s9 }
0x16f7   : > { %9365 = vrot.lane.b32.xlu1 %v19549_v14, %s21829_s9 }
0x16f8   : > { %9259 = vrot.lane.b32.xlu0 %v19520_v30, %s21829_s9 }
0x16fb   : > { %9618 = vrot.lane.b32.xlu1 %v19553_v46, %s21829_s9 }
0x16fc   : > { %9312 = vrot.lane.b32.xlu0 %v19551_v51, %s21829_s9 }
0x1737   : > { %v8561_v42 = vpop.xlane.xlu1 %8560 }
0x1738   : > { %16346 = vrcp.f32 %v8561_v42 }
0x173b   : > { %v8555_v54 = vpop.xlane.xlu1 %8554  ;;  %v8564_v26 = vpop.xlane.xlu0 %8563 }
0x173c   : > { %16348 = vrcp.f32 %v8564_v26 }
0x173d   : > { %16350 = vrcp.f32 %v8555_v54 }
0x173f   : > { %v8573_v56 = vpop.xlane.xlu1 %8572  ;;  %v8558_v6 = vpop.xlane.xlu0 %8557 }
0x1740   : > { %16352 = vrcp.f32 %v8558_v6 }
0x1741   : > { %16354 = vrcp.f32 %v8573_v56 }
0x1743   : > { %v8567_v39 = vpop.xlane.xlu1 %8566  ;;  %v8576_v23 = vpop.xlane.xlu0 %8575 }
0x1744   : > { %16356 = vrcp.f32 %v8576_v23 }
0x1745   : > { %16358 = vrcp.f32 %v8567_v39  ;;  %v16347_v25 = vpop.eup %16346 }
0x1746   : > { %v8619_v45 = vmul.f32 %v16347_v25, %v19655_v2 }
0x1747   : > { %v8585_v19 = vpop.xlane.xlu1 %8584  ;;  %v8570_v7 = vpop.xlane.xlu0 %8569 }
0x1748   : > { %16360 = vrcp.f32 %v8570_v7 }
0x1749   : > { %v16349_v17 = vpop.eup %16348  ;;  %16362 = vrcp.f32 %v8585_v19 }
0x174a   : > { %v8620_v61 = vmul.f32 %v16349_v17, %v19663_v47  ;;  %v16351_v54 = vpop.eup %16350 }
0x174b   : > { %v8579_v28 = vpop.xlane.xlu1 %8578  ;;  %v8588_v42 = vpop.xlane.xlu0 %8587  ;;  %v8617_v6 = vmul.f32 %v16351_v54, %v19657_v4 }
0x174c   : > { %16364 = vrcp.f32 %v8588_v42  ;;  %v8634_v26 = vpack.c.bf16 %v8620_v61, %v8619_v45 }
0x174d   : > { %v16353_v56 = vpop.eup %16352  ;;  %16366 = vrcp.f32 %v8579_v28 }
0x174e   : > { %v8618_v39 = vmul.f32 %v16353_v56, %v19667_v13  ;;  %15265 = vmatmul.mubr.msk.bf16.vlgmr.msra.gmra.mxu1 %vm1261_vm5, %v8634_v26  ;;  %v16355_v21 = vpop.eup %16354 }
0x174f   : > { %v8597_v23 = vpop.xlane.xlu1 %8596  ;;  %v8582_v7 = vpop.xlane.xlu0 %8581  ;;  %15275 = vmatpush3.bf16.msra.mxu1 %v19567_v24  ;;  %15276 = vmatprep.mubr.msk.bf16.mxu1 %vm16647_vm7, %v21739_v63  ;;  %v8623_v4 = vmul.f32 %v16355_v21, %v19673_v60 }
0x1750   : > { %16368 = vrcp.f32 %v8582_v7  ;;  %v8633_v2 = vpack.c.bf16 %v8618_v39, %v8617_v6  ;;  %15286 = vmatprep.subr.bf16.mxu1 %v21739_v63 }
0x1751   : > { %v16357_v47 = vpop.eup %16356  ;;  %16370 = vrcp.f32 %v8597_v23 }
0x1752   : > { %v8624_v13 = vmul.f32 %v16357_v47, %v19683_v44  ;;  %15259 = vmatmul.mubr.msk.bf16.vlgmr.msra.gmra.mxu0 %vm1261_vm5, %v8633_v2  ;;  %v16359_v17 = vpop.eup %16358 }
0x1753   : > { %v8591_v19 = vpop.xlane.xlu1 %8590  ;;  %v8600_v25 = vpop.xlane.xlu0 %8599  ;;  %15269 = vmatpush3.bf16.msra.mxu0 %v19569_v9  ;;  %15270 = vmatprep.mubr.msk.bf16.mxu0 %vm16647_vm7, %v21739_v63  ;;  %v8621_v21 = vmul.f32 %v16359_v17, %v19680_v11 }
0x1754   : > { %16372 = vrcp.f32 %v8600_v25  ;;  %v8636_v45 = vpack.c.bf16 %v8624_v13, %v8623_v4  ;;  %15280 = vmatprep.subr.bf16.mxu0 %v21739_v63 }
0x1755   : > { %v16361_v61 = vpop.eup %16360  ;;  %16374 = vrcp.f32 %v8591_v19 }
0x1756   : > { %v8622_v60 = vmul.f32 %v16361_v61, %v19689_v31  ;;  %15277 = vmatmul.mubr.msk.bf16.vlgmr.msra.gmra.mxu1 %vm1261_vm5, %v8636_v45  ;;  %v16363_v28 = vpop.eup %16362 }
0x1757   : > { %v8594_v44 = vpop.xlane.xlu0 %8593  ;;  %15287 = vmatpush3.bf16.msra.mxu1 %v19571_v37  ;;  %v8995_v42 = vpop.permute.xlu1 %8994  ;;  %15288 = vmatprep.mubr.msk.bf16.mxu1 %vm16647_vm7, %v21739_v63  ;;  %v8627_v56 = vmul.f32 %v16363_v28, %v19691_v29 }
0x1758   : > { %16376 = vrcp.f32 %v8594_v44  ;;  %v8635_v54 = vpack.c.bf16 %v8622_v60, %v8621_v21  ;;  %15298 = vmatprep.subr.bf16.mxu1 %v21739_v63  ;;  %v9003_v44 = vsel %vm1016_vm4, %v19757_v20, 0 }
0x1759   : > { %v16365_v26 = vpop.eup %16364 }
0x175a   : > { %v8628_v11 = vmul.f32 %v16365_v26, %v19699_v5  ;;  %15271 = vmatmul.mubr.msk.bf16.vlgmr.msra.gmra.mxu0 %vm1261_vm5, %v8635_v54  ;;  %v16367_v31 = vpop.eup %16366 }
0x175b   : > { %15281 = vmatpush3.bf16.msra.mxu0 %v19573_v48  ;;  %15282 = vmatprep.mubr.msk.bf16.mxu0 %vm16647_vm7, %v21739_v63  ;;  %v9104_v23 = vpop.permute.xlu1 %9103  ;;  %v8625_v7 = vmul.f32 %v16367_v31, %v19697_v32  ;;  %v9051_v5 = vpop.permute.xlu0 %9050 }
0x175c   : > { %v8638_v6 = vpack.c.bf16 %v8628_v11, %v8627_v56  ;;  %15292 = vmatprep.subr.bf16.mxu0 %v21739_v63  ;;  %v9109_v54 = vsel %vm1016_vm4, %v9104_v23, 0 }
0x175d   : > { %v16369_v39 = vpop.eup %16368 }
0x175e   : > { %v8626_v2 = vmul.f32 %v16369_v39, %v19705_v41  ;;  %15289 = vmatmul.mubr.msk.bf16.vlgmr.msra.gmra.mxu1 %vm1261_vm5, %v8638_v6  ;;  %v16371_v29 = vpop.eup %16370 }
0x175f   : > { %15299 = vmatpush3.bf16.msra.mxu1 %v19575_v8  ;;  %15300 = vmatprep.mubr.msk.bf16.mxu1 %vm16647_vm7, %v21739_v63  ;;  %v8631_v19 = vmul.f32 %v16371_v29, %v19707_v18  ;;  %v9157_v41 = vpop.permute.xlu1 %9156  ;;  %v9048_v21 = vpop.permute.xlu0 %9047  ;;  %v9056_v18 = vsel %vm1016_vm4, %v9051_v5, 0 }
0x1760   : > { %v8637_v47 = vpack.c.bf16 %v8626_v2, %v8625_v7  ;;  %15310 = vmatprep.subr.bf16.mxu1 %v21739_v63 }
0x1761   : > { %v16373_v4 = vpop.eup %16372 }
0x1762   : > { %v16375_v13 = vpop.eup %16374  ;;  %v8632_v32 = vmul.f32 %v16373_v4, %v19715_v16  ;;  %15283 = vmatmul.mubr.msk.bf16.vlgmr.msra.gmra.mxu0 %vm1261_vm5, %v8637_v47 }
0x1763   : > { %15293 = vmatpush3.bf16.msra.mxu0 %v19577_v38  ;;  %15294 = vmatprep.mubr.msk.bf16.mxu0 %vm16647_vm7, %v21739_v63  ;;  %v8629_v45 = vmul.f32 %v16375_v13, %v19713_v53  ;;  %v9210_v60 = vpop.permute.xlu1 %9209  ;;  %v9101_v53 = vpop.permute.xlu0 %9100 }
0x1764   : > { %v8640_v17 = vpack.c.bf16 %v8632_v32, %v8631_v19  ;;  %15304 = vmatprep.subr.bf16.mxu0 %v21739_v63 }
0x1765   : > { %v16377_v25 = vpop.eup %16376 }
0x1766   : > { %v8630_v61 = vmul.f32 %v16377_v25, %v19721_v62  ;;  %15301 = vmatmul.mubr.msk.bf16.vlgmr.msra.gmra.mxu1 %vm1261_vm5, %v8640_v17  ;;  %v9162_v62 = vsel %vm1016_vm4, %v9157_v41, 0 }
0x1767   : > { %15311 = vmatpush3.bf16.xpose.msra.mxu1 %v9056_v18  ;;  %15312 = vmatprep.mubr.msk.bf16.mxu1 %vm16647_vm7, %v21739_v63  ;;  %v9263_v28 = vpop.permute.xlu1 %9262  ;;  %v9154_v20 = vpop.permute.xlu0 %9153 }
0x1768   : > { %v8639_v16 = vpack.c.bf16 %v8630_v61, %v8629_v45  ;;  %15322 = vmatprep.subr.bf16.mxu1 %v21739_v63  ;;  %v9268_v56 = vsel %vm1016_vm4, %v9263_v28, 0 }
0x176a   : > { %15295 = vmatmul.mubr.msk.bf16.vlgmr.msra.gmra.mxu0 %vm1261_vm5, %v8639_v16 }
0x176b   : > { %15305 = vmatpush3.bf16.xpose.msra.mxu0 %v9003_v44  ;;  %15306 = vmatprep.mubr.msk.bf16.mxu0 %vm16647_vm7, %v21739_v63  ;;  %v9316_v26 = vpop.permute.xlu1 %9315  ;;  %v9207_v11 = vpop.permute.xlu0 %9206 }
0x176c   : > { %15316 = vmatprep.subr.bf16.mxu0 %v21739_v63  ;;  %v9321_v23 = vsel %vm1016_vm4, %v9316_v26, 0 }
0x176e   : > { %15313 = vmatmul.mubr.msk.bf16.vlgmr.msra.gmra.mxu1 %vm1016_vm4, %v9048_v21 }
0x176f   : > { %15323 = vmatpush3.bf16.xpose.msra.mxu1 %v9162_v62  ;;  %15324 = vmatprep.mubr.msk.bf16.mxu1 %vm16647_vm7, %v21739_v63  ;;  %v9369_v31 = vpop.permute.xlu1 %9368  ;;  %v9260_v6 = vpop.permute.xlu0 %9259 }
0x1770   : > { %15334 = vmatprep.subr.bf16.mxu1 %v21739_v63  ;;  %v9374_v39 = vsel %vm1016_vm4, %v9369_v31, 0 }
0x1772   : > { %15307 = vmatmul.mubr.msk.bf16.vlgmr.msra.gmra.mxu0 %vm1016_vm4, %v8995_v42  ;;  %v9215_v42 = vsel %vm1016_vm4, %v9210_v60, 0 }
0x1773   : > { %15317 = vmatpush3.bf16.xpose.msra.mxu0 %v9109_v54  ;;  %15318 = vmatprep.mubr.msk.bf16.mxu0 %vm16647_vm7, %v21739_v63  ;;  %v9366_v7 = vpop.permute.xlu1 %9365  ;;  %v9313_v2 = vpop.permute.xlu0 %9312 }
0x1774   : > { %15328 = vmatprep.subr.bf16.mxu0 %v21739_v63 }
0x1776   : > { %15325 = vmatmul.mubr.msk.bf16.vlgmr.msra.gmra.mxu1 %vm1016_vm4, %v9154_v20 }
0x1777   : > { %15335 = vmatpush3.bf16.xpose.msra.mxu1 %v9268_v56  ;;  %15336 = vmatprep.mubr.msk.bf16.mxu1 %vm16647_vm7, %v21739_v63  ;;  %v9619_v29 = vpop.permute.xlu1 %9618 }
0x1778   : > { %15346 = vmatprep.subr.bf16.mxu1 %v21739_v63 }
0x177a   : > { %15319 = vmatmul.mubr.msk.bf16.vlgmr.msra.gmra.mxu0 %vm1016_vm4, %v9101_v53 }
0x177b   : > { %15329 = vmatpush3.bf16.xpose.msra.mxu0 %v9215_v42  ;;  %15330 = vmatprep.mubr.msk.bf16.mxu0 %vm16647_vm7, %v21739_v63 }
0x177c   : > { %15340 = vmatprep.subr.bf16.mxu0 %v21739_v63 }
0x177e   : > { %15337 = vmatmul.mubr.msk.bf16.vlgmr.msra.gmra.mxu1 %vm1016_vm4, %v9260_v6 }
0x177f   : > { %15347 = vmatpush3.bf16.xpose.msra.mxu1 %v9374_v39  ;;  %15348 = vmatprep.mubr.msk.bf16.mxu1 %vm16647_vm7, %v21739_v63 }
0x1780   : > { %15358 = vmatprep.subr.bf16.mxu1 %v21739_v63 }
0x1782   : > { %15331 = vmatmul.mubr.msk.bf16.vlgmr.msra.gmra.mxu0 %vm1016_vm4, %v9207_v11 }
0x1783   : > { %15341 = vmatpush3.bf16.xpose.msra.mxu0 %v9321_v23  ;;  %15342 = vmatprep.mubr.msk.bf16.mxu0 %vm16647_vm7, %v21739_v63 }
0x1784   : > { %15352 = vmatprep.subr.bf16.mxu0 %v21739_v63 }
0x1786   : > { %15349 = vmatmul.mubr.msk.bf16.vlgmr.msra.gmra.mxu1 %vm1016_vm4, %v9366_v7 }
0x1787   : > { %15360 = vmatprep.mubr.msk.bf16.mxu1 %vm16647_vm7, %v21739_v63 }
0x178a   : > { %15343 = vmatmul.mubr.msk.bf16.vlgmr.msra.gmra.mxu0 %vm1016_vm4, %v9313_v2 }
0x178b   : > { %15353 = vmatpush3.bf16.msra.mxu0 %v9619_v29  ;;  %15354 = vmatprep.mubr.msk.bf16.mxu0 %vm16647_vm7, %v21739_v63 }
0x178c   : > { %15364 = vmatprep.subr.bf16.mxu0 %v21739_v63 }
0x180e   : > { %v19853_v5 = vpop.f32.mrf.mxu1 }
0x180f   : > { %21830 = vst [vmem:[#allocation27_spill] sm:$0xff] %v19853_v5 }
0x1810   : > { %v15266_v47 = vpop.f32.mrf.mxu1 }
0x1812   : > { %v19855_v4 = vpop.f32.mrf.mxu0  ;;  %v19857_v13 = vpop.f32.mrf.mxu1 }
0x1813   : > { %21831 = vst [vmem:[#allocation30_spill] sm:$0xff] %v19855_v4  ;;  %21832 = vst [vmem:[#allocation28_spill] sm:$0xff] %v19857_v13 }
0x1814   : > { %v15260_v19 = vpop.f32.mrf.mxu0  ;;  %v15267_v32 = vpop.f32.mrf.mxu1 }
0x1816   : > { %v19859_v41 = vpop.f32.mrf.mxu0  ;;  %v19861_v25 = vpop.f32.mrf.mxu1 }
0x1817   : > { %21833 = vst [vmem:[#allocation33_spill] sm:$0xff] %v19859_v41  ;;  %21834 = vst [vmem:[#allocation31_spill] sm:$0xff] %v19861_v25 }
0x1818   : > { %v15261_v17 = vpop.f32.mrf.mxu0  ;;  %v15278_v45 = vpop.f32.mrf.mxu1 }
0x181a   : > { %v19863_v61 = vpop.f32.mrf.mxu0  ;;  %v19865_v21 = vpop.f32.mrf.mxu1 }
0x181b   : > { %21835 = vst [vmem:[#allocation34_spill] sm:$0xff] %v19863_v61  ;;  %21836 = vst [vmem:[#allocation32_spill] sm:$0xff] %v19865_v21 }
0x181c   : > { %v15272_v18 = vpop.f32.mrf.mxu0  ;;  %v15279_v16 = vpop.f32.mrf.mxu1 }
0x181e   : > { %v19867_v60 = vpop.f32.mrf.mxu0  ;;  %v19869_v44 = vpop.f32.mrf.mxu1 }
0x181f   : > { %21837 = vst [vmem:[#allocation3_spill] sm:$0xff] %v19867_v60  ;;  %21838 = vst [vmem:[#allocation5_spill] sm:$0xff] %v19869_v44 }
0x1820   : > { %v15273_v53 = vpop.f32.mrf.mxu0  ;;  %v15290_v62 = vpop.f32.mrf.mxu1 }
0x1822   : > { %v19871_v28 = vpop.f32.mrf.mxu0  ;;  %v19873_v20 = vpop.f32.mrf.mxu1 }
0x1823   : > { %21839 = vst [vmem:[#allocation4_spill] sm:$0xff] %v19871_v28  ;;  %21840 = vst [vmem:[#allocation6_spill] sm:$0xff] %v19873_v20 }
0x1824   : > { %v15284_v54 = vpop.f32.mrf.mxu0  ;;  %v15291_v26 = vpop.f32.mrf.mxu1 }
0x1826   : > { %v19875_v56 = vpop.f32.mrf.mxu0  ;;  %v19877_v11 = vpop.f32.mrf.mxu1 }
0x1827   : > { %21841 = vst [vmem:[#allocation7_spill] sm:$0xff] %v19875_v56  ;;  %21842 = vst [vmem:[#allocation9_spill] sm:$0xff] %v19877_v11 }
0x1828   : > { %v15285_v42 = vpop.f32.mrf.mxu0  ;;  %v15302_v31 = vpop.f32.mrf.mxu1 }
0x182a   : > { %v19879_v6 = vpop.f32.mrf.mxu0  ;;  %v19881_v39 = vpop.f32.mrf.mxu1 }
0x182b   : > { %21843 = vst [vmem:[#allocation8_spill] sm:$0xff] %v19879_v6  ;;  %21844 = vst [vmem:[#allocation10_spill] sm:$0xff] %v19881_v39 }
0x182c   : > { %v15296_v23 = vpop.f32.mrf.mxu0  ;;  %v15303_v7 = vpop.f32.mrf.mxu1 }
0x182e   : > { %v19883_v2 = vpop.f32.mrf.mxu0  ;;  %v9092_v29 = vpop.f32.mrf.mxu1 }
0x182f   : > { %21845 = vst [vmem:[#allocation11_spill] sm:$0xff] %v19883_v2  ;;  %v19885_v47 = vmul.f32 0.35355338, %v9092_v29 }
0x1830   : > { %v15297_v19 = vpop.f32.mrf.mxu0  ;;  %v15314_v32 = vpop.f32.mrf.mxu1 }
0x1831   : > { %v9439_v17 = vsel %vm1261_vm5, %v19885_v47, -inf }
0x1832   : > { %9440 = vmax.xlane.f32.xlu0 %v9439_v17  ;;  %v9039_v45 = vpop.f32.mrf.mxu0  ;;  %v9095_v18 = vpop.f32.mrf.mxu1 }
0x1833   : > { %v19889_v16 = vmul.f32 0.35355338, %v9039_v45  ;;  %v19891_v54 = vmul.f32 0.35355338, %v9095_v18 }
0x1834   : > { %v15308_v53 = vpop.f32.mrf.mxu0  ;;  %v15315_v62 = vpop.f32.mrf.mxu1 }
0x1835   : > { %v9433_v26 = vsel %vm1261_vm5, %v19889_v16, -inf  ;;  %v9442_v32 = vsel %vm1261_vm5, %v19891_v54, -inf }
0x1836   : > { %v9198_v42 = vpop.f32.mrf.mxu1  ;;  %9434 = vmax.xlane.f32.xlu0 %v9433_v26  ;;  %v9042_v31 = vpop.f32.mrf.mxu0 }
0x1837   : > { %v19895_v23 = vmul.f32 0.35355338, %v9042_v31  ;;  %v19897_v19 = vmul.f32 0.35355338, %v9198_v42 }
0x1838   : > { %v15309_v7 = vpop.f32.mrf.mxu0  ;;  %v15326_v29 = vpop.f32.mrf.mxu1 }
0x1839   : > { %v9436_v17 = vsel %vm1261_vm5, %v19895_v23, -inf  ;;  %v9451_v7 = vsel %vm1261_vm5, %v19897_v19, -inf }
0x183a   : > { %v9201_v45 = vpop.f32.mrf.mxu1  ;;  %9443 = vmax.xlane.f32.xlu0 %v9442_v32  ;;  %9437 = vmax.xlane.f32.xlu1 %v9436_v17  ;;  %v9145_v18 = vpop.f32.mrf.mxu0 }
0x183b   : > { %v19903_v53 = vmul.f32 0.35355338, %v9201_v45  ;;  %v19905_v31 = vmul.f32 0.35355338, %v9145_v18 }
0x183c   : > { %v15320_v62 = vpop.f32.mrf.mxu0  ;;  %v15327_v26 = vpop.f32.mrf.mxu1 }
0x183d   : > { %v9454_v42 = vsel %vm1261_vm5, %v19903_v53, -inf  ;;  %v9445_v18 = vsel %vm1261_vm5, %v19905_v31, -inf }
0x183e   : > { %v9304_v29 = vpop.f32.mrf.mxu1  ;;  %9455 = vmax.xlane.f32.xlu0 %v9454_v42  ;;  %9452 = vmax.xlane.f32.xlu1 %v9451_v7  ;;  %v9148_v15 = vpop.f32.mrf.mxu0 }
0x183f   : > { %v19911_v52 = vmul.f32 0.35355338, %v9148_v15  ;;  %v19913_v45 = vmul.f32 0.35355338, %v9304_v29 }
0x1840   : > { %v15321_v32 = vpop.f32.mrf.mxu0  ;;  %v15338_v17 = vpop.f32.mrf.mxu1 }
0x1841   : > { %v9448_v62 = vsel %vm1261_vm5, %v19911_v52, -inf  ;;  %v9463_v29 = vsel %vm1261_vm5, %v19913_v45, -inf }
0x1842   : > { %v9307_v26 = vpop.f32.mrf.mxu1  ;;  %9446 = vmax.xlane.f32.xlu1 %v9445_v18  ;;  %9449 = vmax.xlane.f32.xlu0 %v9448_v62  ;;  %v9251_v3 = vpop.f32.mrf.mxu0 }
0x1843   : > { %v19919_v55 = vmul.f32 0.35355338, %v9307_v26  ;;  %v19921_v15 = vmul.f32 0.35355338, %v9251_v3 }
0x1844   : > { %v15332_v42 = vpop.f32.mrf.mxu0  ;;  %v15339_v7 = vpop.f32.mrf.mxu1 }
0x1845   : > { %v9466_v32 = vsel %vm1261_vm5, %v19919_v55, -inf  ;;  %v9457_v3 = vsel %vm1261_vm5, %v19921_v15, -inf }
0x1846   : > { %v9410_v17 = vpop.f32.mrf.mxu1  ;;  %9464 = vmax.xlane.f32.xlu1 %v9463_v29  ;;  %9467 = vmax.xlane.f32.xlu0 %v9466_v32  ;;  %v9254_v1 = vpop.f32.mrf.mxu0 }
0x1847   : > { %v19927_v22 = vmul.f32 0.35355338, %v9254_v1  ;;  %v19929_v26 = vmul.f32 0.35355338, %v9410_v17 }
0x1848   : > { %v15333_v18 = vpop.f32.mrf.mxu0  ;;  %v15350_v62 = vpop.f32.mrf.mxu1 }
0x1849   : > { %v9460_v42 = vsel %vm1261_vm5, %v19927_v22, -inf  ;;  %v9475_v17 = vsel %vm1261_vm5, %v19929_v26, -inf }
0x184a   : > { %v9413_v7 = vpop.f32.mrf.mxu1  ;;  %9458 = vmax.xlane.f32.xlu1 %v9457_v3  ;;  %9461 = vmax.xlane.f32.xlu0 %v9460_v42  ;;  %v9357_v27 = vpop.f32.mrf.mxu0 }
0x184b   : > { %v19935_v6 = vmul.f32 0.35355338, %v9413_v7  ;;  %v19937_v1 = vmul.f32 0.35355338, %v9357_v27 }
0x184c   : > { %v15344_v29 = vpop.f32.mrf.mxu0  ;;  %v15351_v32 = vpop.f32.mrf.mxu1 }
0x184d   : > { %v9478_v18 = vsel %vm1261_vm5, %v19935_v6, -inf  ;;  %v9469_v42 = vsel %vm1261_vm5, %v19937_v1, -inf }
0x184e   : > { %9476 = vmax.xlane.f32.xlu1 %v9475_v17  ;;  %9479 = vmax.xlane.f32.xlu0 %v9478_v18  ;;  %v9360_v62 = vpop.f32.mrf.mxu0 }
0x184f   : > { %v19943_v2 = vmul.f32 0.35355338, %v9360_v62 }
0x1850   : > { %v15345_v3 = vpop.f32.mrf.mxu0 }
0x1851   : > { %v9472_v7 = vsel %vm1261_vm5, %v19943_v2, -inf }
0x1852   : > { %9470 = vmax.xlane.f32.xlu1 %v9469_v42  ;;  %9473 = vmax.xlane.f32.xlu0 %v9472_v7 }
0x1863   : > { %9714 = vrot.lane.b32.xlu1 %v19569_v9, %s21829_s9 }
0x1867   : > { %9762 = vrot.lane.b32.xlu1 %v19567_v24, %s21829_s9 }
0x1868   : > { %9666 = vrot.lane.b32.xlu0 %v19547_v12, %s21829_s9 }
0x186b   : > { %9858 = vrot.lane.b32.xlu1 %v19571_v37, %s21829_s9 }
0x186c   : > { %9810 = vrot.lane.b32.xlu0 %v19573_v48, %s21829_s9 }
0x186f   : > { %9954 = vrot.lane.b32.xlu1 %v19575_v8, %s21829_s9 }
0x1870   : > { %9906 = vrot.lane.b32.xlu0 %v19577_v38, %s21829_s9  ;;  %s21865_s9 = smov 24  }
0x18bb   : > { %v9441_v27 = vpop.xlane.xlu0 %9440 }
0x18bc   : > { %v9483_v29 = vsub.f32 %v19885_v47, %v9441_v27 }
0x18be   : > { %v9501_v32 = vmul.f32 1.442695, %v9483_v29 }
0x18bf   : > { %v9435_v17 = vpop.xlane.xlu0 %9434 }
0x18c0   : > { %16378 = vpow2.f32 %v9501_v32  ;;  %v9481_v18 = vsub.f32 %v19889_v16, %v9435_v17 }
0x18c2   : > { %v9497_v62 = vmul.f32 1.442695, %v9481_v18 }
0x18c3   : > { %v9444_v3 = vpop.xlane.xlu0 %9443  ;;  %v9438_v42 = vpop.xlane.xlu1 %9437 }
0x18c4   : > { %16380 = vpow2.f32 %v9497_v62  ;;  %v9484_v7 = vsub.f32 %v19891_v54, %v9444_v3  ;;  %v9482_v11 = vsub.f32 %v19895_v23, %v9438_v42 }
0x18c6   : > { %v9503_v39 = vmul.f32 1.442695, %v9484_v7  ;;  %v9499_v28 = vmul.f32 1.442695, %v9482_v11 }
0x18c7   : > { %v9456_v56 = vpop.xlane.xlu0 %9455  ;;  %v9453_v44 = vpop.xlane.xlu1 %9452 }
0x18c8   : > { %16382 = vpow2.f32 %v9503_v39  ;;  %v9488_v47 = vsub.f32 %v19903_v53, %v9456_v56  ;;  %v9487_v27 = vsub.f32 %v19897_v19, %v9453_v44 }
0x18c9   : > { %16384 = vpow2.f32 %v9499_v28 }
0x18ca   : > { %v9511_v29 = vmul.f32 1.442695, %v9488_v47  ;;  %v9509_v16 = vmul.f32 1.442695, %v9487_v27 }
0x18cb   : > { %v9447_v32 = vpop.xlane.xlu1 %9446  ;;  %v9450_v17 = vpop.xlane.xlu0 %9449 }
0x18cc   : > { %16386 = vpow2.f32 %v9511_v29  ;;  %v9485_v18 = vsub.f32 %v19905_v31, %v9447_v32  ;;  %v9486_v54 = vsub.f32 %v19911_v52, %v9450_v17 }
0x18cd   : > { %v19971_v23 = vpop.eup %16378  ;;  %16388 = vpow2.f32 %v9509_v16 }
0x18ce   : > { %v9505_v11 = vmul.f32 1.442695, %v9485_v18  ;;  %v9507_v62 = vmul.f32 1.442695, %v9486_v54  ;;  %v9535_v56 = vsel %vm1261_vm5, %v19971_v23, 0.0 }
0x18cf   : > { %v9465_v39 = vpop.xlane.xlu1 %9464  ;;  %v9468_v44 = vpop.xlane.xlu0 %9467  ;;  %9536 = vadd.xlane.f32.xlu1 %v9535_v56 }
0x18d0   : > { %16390 = vpow2.f32 %v9505_v11  ;;  %v9491_v28 = vsub.f32 %v19913_v45, %v9465_v39  ;;  %v9492_v19 = vsub.f32 %v19919_v55, %v9468_v44 }
0x18d1   : > { %v19977_v53 = vpop.eup %16380  ;;  %16392 = vpow2.f32 %v9507_v62 }
0x18d2   : > { %v9517_v52 = vmul.f32 1.442695, %v9491_v28  ;;  %v9519_v31 = vmul.f32 1.442695, %v9492_v19  ;;  %v9529_v3 = vsel %vm1261_vm5, %v19977_v53, 0.0 }
0x18d3   : > { %v9459_v42 = vpop.xlane.xlu1 %9458  ;;  %v9462_v7 = vpop.xlane.xlu0 %9461  ;;  %9530 = vadd.xlane.f32.xlu1 %v9529_v3 }
0x18d4   : > { %16394 = vpow2.f32 %v9517_v52  ;;  %v9489_v47 = vsub.f32 %v19921_v15, %v9459_v42  ;;  %v9490_v27 = vsub.f32 %v19927_v22, %v9462_v7 }
0x18d5   : > { %v19983_v29 = vpop.eup %16382  ;;  %16396 = vpow2.f32 %v9519_v31 }
0x18d6   : > { %v9513_v55 = vmul.f32 1.442695, %v9489_v47  ;;  %v9515_v45 = vmul.f32 1.442695, %v9490_v27  ;;  %v9538_v16 = vsel %vm1261_vm5, %v19983_v29, 0.0  ;;  %v19987_v32 = vpop.eup %16384 }
0x18d7   : > { %v9477_v17 = vpop.xlane.xlu1 %9476  ;;  %v9480_v18 = vpop.xlane.xlu0 %9479  ;;  %9539 = vadd.xlane.f32.xlu0 %v9538_v16  ;;  %v9532_v39 = vsel %vm1261_vm5, %v19987_v32, 0.0 }
0x18d8   : > { %16398 = vpow2.f32 %v9513_v55  ;;  %v9495_v54 = vsub.f32 %v19929_v26, %v9477_v17  ;;  %v9496_v15 = vsub.f32 %v19935_v6, %v9480_v18 }
0x18d9   : > { %v19991_v11 = vpop.eup %16386  ;;  %16400 = vpow2.f32 %v9515_v45 }
0x18da   : > { %v19993_v22 = vpop.eup %16388  ;;  %v9525_v62 = vmul.f32 1.442695, %v9495_v54  ;;  %v9527_v56 = vmul.f32 1.442695, %v9496_v15  ;;  %v9550_v31 = vsel %vm1261_vm5, %v19991_v11, 0.0 }
0x18db   : > { %v9547_v44 = vsel %vm1261_vm5, %v19993_v22, 0.0  ;;  %v9471_v28 = vpop.xlane.xlu1 %9470  ;;  %9533 = vadd.xlane.f32.xlu0 %v9532_v39  ;;  %v9474_v19 = vpop.xlane.xlu0 %9473 }
0x18dc   : > { %16402 = vpow2.f32 %v9525_v62  ;;  %9548 = vadd.xlane.f32.xlu1 %v9547_v44  ;;  %v9493_v6 = vsub.f32 %v19937_v1, %v9471_v28  ;;  %v9494_v26 = vsub.f32 %v19943_v2, %v9474_v19 }
0x18dd   : > { %v20001_v52 = vpop.eup %16390  ;;  %16404 = vpow2.f32 %v9527_v56 }
0x18de   : > { %v9521_v3 = vmul.f32 1.442695, %v9493_v6  ;;  %v9523_v42 = vmul.f32 1.442695, %v9494_v26  ;;  %v9541_v7 = vsel %vm1261_vm5, %v20001_v52, 0.0  ;;  %v20007_v47 = vpop.eup %16392 }
0x18df   : > { %9551 = vadd.xlane.f32.xlu0 %v9550_v31  ;;  %v9667_v27 = vpop.permute.xlu0 %9666  ;;  %v9544_v55 = vsel %vm1261_vm5, %v20007_v47, 0.0  ;;  %v9715_v31 = vpop.permute.xlu1 %9714 }
0x18e0   : > { %16406 = vpow2.f32 %v9521_v3  ;;  %9542 = vadd.xlane.f32.xlu1 %v9541_v7  ;;  %15359 = vmatpush3.bf16.msra.mxu1 %v9667_v27 }
0x18e1   : > { %v20009_v1 = vpop.eup %16394  ;;  %15370 = vmatprep.subr.bf16.mxu1 %v21739_v63  ;;  %16408 = vpow2.f32 %v9523_v42 }
0x18e2   : > { %v9559_v2 = vsel %vm1261_vm5, %v20009_v1, 0.0  ;;  %v20016_v45 = vpop.eup %16396 }
0x18e3   : > { %9545 = vadd.xlane.f32.xlu0 %v9544_v55  ;;  %v9562_v18 = vsel %vm1261_vm5, %v20016_v45, 0.0  ;;  %v9763_v3 = vpop.permute.xlu1 %9762  ;;  %v20078_v7 = vpop.permute.xlu0 %9810 }
0x18e4   : > { %9560 = vadd.xlane.f32.xlu1 %v9559_v2 }
0x18e5   : > { %v20018_v16 = vpop.eup %16398 }
0x18e6   : > { %v9553_v17 = vsel %vm1261_vm5, %v20018_v16, 0.0  ;;  %v20024_v54 = vpop.eup %16400 }
0x18e7   : > { %9563 = vadd.xlane.f32.xlu0 %v9562_v18  ;;  %v9556_v56 = vsel %vm1261_vm5, %v20024_v54, 0.0  ;;  %v9859_v42 = vpop.permute.xlu1 %9858  ;;  %v20082_v55 = vpop.permute.xlu0 %9906 }
0x18e8   : > { %9554 = vadd.xlane.f32.xlu1 %v9553_v17 }
0x18e9   : > { %v20026_v15 = vpop.eup %16402 }
0x18ea   : > { %v9571_v62 = vsel %vm1261_vm5, %v20026_v15, 0.0  ;;  %v20032_v39 = vpop.eup %16404 }
0x18eb   : > { %9557 = vadd.xlane.f32.xlu0 %v9556_v56  ;;  %v9574_v19 = vsel %vm1261_vm5, %v20032_v39, 0.0  ;;  %v20080_v27 = vpop.permute.xlu1 %9954 }
0x18ec   : > { %9572 = vadd.xlane.f32.xlu1 %v9571_v62 }
0x18ed   : > { %v20034_v44 = vpop.eup %16406 }
0x18ee   : > { %v9565_v28 = vsel %vm1261_vm5, %v20034_v44, 0.0  ;;  %v20040_v6 = vpop.eup %16408 }
0x18ef   : > { %9575 = vadd.xlane.f32.xlu0 %v9574_v19  ;;  %v9568_v26 = vsel %vm1261_vm5, %v20040_v6, 0.0 }
0x18f0   : > { %9566 = vadd.xlane.f32.xlu1 %v9565_v28 }
0x18f3   : > { %9569 = vadd.xlane.f32.xlu0 %v9568_v26 }
0x1901   : > { %10054 = vrot.lane.b32.xlu1 %v19434_v58, %s21846_s28 }
0x1905   : > { %10105 = vrot.lane.b32.xlu1 %v19464_v10, %s21846_s28 }
0x1909   : > { %10156 = vrot.lane.b32.xlu1 %v19457_v43, %s21846_s28  ;;  %10003 = vrot.lane.b32.xlu0 %v19437_v33, %s21846_s28 }
0x190d   : > { %10207 = vrot.lane.b32.xlu1 %v19494_v49, %s21846_s28  ;;  %10001 = vrot.lane.b32.xlu0 %v19462_v59, %s21846_s28 }
0x1911   : > { %10258 = vrot.lane.b32.xlu1 %v19487_v0, %s21846_s28  ;;  %10052 = vrot.lane.b32.xlu0 %v19460_v50, %s21846_s28 }
0x1915   : > { %10309 = vrot.lane.b32.xlu1 %v19524_v35, %s21846_s28  ;;  %10103 = vrot.lane.b32.xlu0 %v19492_v36, %s21846_s28 }
0x1919   : > { %10360 = vrot.lane.b32.xlu1 %v19517_v57, %s21846_s28  ;;  %10154 = vrot.lane.b32.xlu0 %v19490_v34, %s21846_s28 }
0x191d   : > { %10358 = vrot.lane.b32.xlu1 %v19549_v14, %s21846_s28  ;;  %10205 = vrot.lane.b32.xlu0 %v19522_v40, %s21846_s28 }
0x1921   : > { %10609 = vrot.lane.b32.xlu1 %v19553_v46, %s21846_s28  ;;  %10256 = vrot.lane.b32.xlu0 %v19520_v30, %s21846_s28 }
0x1925   : > { %10307 = vrot.lane.b32.xlu0 %v19551_v51, %s21846_s28 }
0x1958   : > { %v9537_v2 = vpop.xlane.xlu1 %9536 }
0x1959   : > { %16410 = vrcp.f32 %v9537_v2 }
0x195c   : > { %v9531_v17 = vpop.xlane.xlu1 %9530 }
0x1960   : > { %v9540_v18 = vpop.xlane.xlu0 %9539 }
0x1961   : > { %16412 = vrcp.f32 %v9540_v18 }
0x1962   : > { %16414 = vrcp.f32 %v9531_v17 }
0x1964   : > { %v9534_v62 = vpop.xlane.xlu0 %9533 }
0x1965   : > { %v9549_v56 = vpop.xlane.xlu1 %9548  ;;  %16416 = vrcp.f32 %v9534_v62 }
0x1966   : > { %16418 = vrcp.f32 %v9549_v56  ;;  %v16411_v26 = vpop.eup %16410 }
0x1967   : > { %v9595_v25 = vmul.f32 %v16411_v26, %v19971_v23 }
0x1968   : > { %v9552_v28 = vpop.xlane.xlu0 %9551 }
0x1969   : > { %v9543_v19 = vpop.xlane.xlu1 %9542  ;;  %16420 = vrcp.f32 %v9552_v28 }
0x196a   : > { %16422 = vrcp.f32 %v9543_v19 }
0x196c   : > { %v9546_v20 = vpop.xlane.xlu0 %9545 }
0x196d   : > { %v9561_v61 = vpop.xlane.xlu1 %9560  ;;  %16424 = vrcp.f32 %v9546_v20 }
0x196e   : > { %v16413_v60 = vpop.eup %16412  ;;  %16426 = vrcp.f32 %v9561_v61 }
0x196f   : > { %v9596_v2 = vmul.f32 %v16413_v60, %v19983_v29  ;;  %v16415_v18 = vpop.eup %16414 }
0x1970   : > { %v9564_v17 = vpop.xlane.xlu0 %9563  ;;  %v9593_v4 = vmul.f32 %v16415_v18, %v19977_v53 }
0x1971   : > { %v9555_v21 = vpop.xlane.xlu1 %9554  ;;  %16428 = vrcp.f32 %v9564_v17  ;;  %v9610_v62 = vpack.c.bf16 %v9596_v2, %v9595_v25 }
0x1972   : > { %v16417_v56 = vpop.eup %16416  ;;  %16430 = vrcp.f32 %v9555_v21 }
0x1973   : > { %v9594_v28 = vmul.f32 %v16417_v56, %v19987_v32  ;;  %15361 = vmatmul.mubr.msk.bf16.vlgmr.msra.gmra.mxu1 %vm1261_vm5, %v9610_v62  ;;  %v16419_v20 = vpop.eup %16418 }
0x1974   : > { %15371 = vmatpush3.bf16.msra.mxu1 %v9763_v3  ;;  %v9558_v19 = vpop.xlane.xlu0 %9557  ;;  %15372 = vmatprep.mubr.msk.bf16.mxu1 %vm16647_vm7, %v21739_v63  ;;  %v9599_v23 = vmul.f32 %v16419_v20, %v19993_v22 }
0x1975   : > { %v9573_v61 = vpop.xlane.xlu1 %9572  ;;  %16432 = vrcp.f32 %v9558_v19  ;;  %v9609_v60 = vpack.c.bf16 %v9594_v28, %v9593_v4  ;;  %15382 = vmatprep.subr.bf16.mxu1 %v21739_v63 }
0x1976   : > { %v16421_v25 = vpop.eup %16420  ;;  %16434 = vrcp.f32 %v9573_v61 }
0x1977   : > { %v9600_v53 = vmul.f32 %v16421_v25, %v19991_v11  ;;  %15355 = vmatmul.mubr.msk.bf16.vlgmr.msra.gmra.mxu0 %vm1261_vm5, %v9609_v60  ;;  %v16423_v21 = vpop.eup %16422 }
0x1978   : > { %15365 = vmatpush3.bf16.msra.mxu0 %v9715_v31  ;;  %v9576_v29 = vpop.xlane.xlu0 %9575  ;;  %15366 = vmatprep.mubr.msk.bf16.mxu0 %vm16647_vm7, %v21739_v63  ;;  %v9597_v26 = vmul.f32 %v16423_v21, %v20001_v52 }
0x1979   : > { %v9567_v32 = vpop.xlane.xlu1 %9566  ;;  %16436 = vrcp.f32 %v9576_v29  ;;  %v9612_v3 = vpack.c.bf16 %v9600_v53, %v9599_v23  ;;  %15376 = vmatprep.subr.bf16.mxu0 %v21739_v63 }
0x197a   : > { %v16425_v4 = vpop.eup %16424  ;;  %16438 = vrcp.f32 %v9567_v32 }
0x197b   : > { %v9598_v22 = vmul.f32 %v16425_v4, %v20007_v47  ;;  %15373 = vmatmul.mubr.msk.bf16.vlgmr.msra.gmra.mxu1 %vm1261_vm5, %v9612_v3  ;;  %v16427_v11 = vpop.eup %16426 }
0x197c   : > { %15383 = vmatpush3.bf16.msra.mxu1 %v9859_v42  ;;  %v9570_v31 = vpop.xlane.xlu0 %9569  ;;  %15384 = vmatprep.mubr.msk.bf16.mxu1 %vm16647_vm7, %v21739_v63  ;;  %v9603_v62 = vmul.f32 %v16427_v11, %v20009_v1 }
0x197d   : > { %v10055_v2 = vpop.permute.xlu1 %10054  ;;  %16440 = vrcp.f32 %v9570_v31  ;;  %v9611_v18 = vpack.c.bf16 %v9598_v22, %v9597_v26  ;;  %15394 = vmatprep.subr.bf16.mxu1 %v21739_v63 }
0x197e   : > { %v16429_v17 = vpop.eup %16428 }
0x197f   : > { %v9604_v52 = vmul.f32 %v16429_v17, %v20016_v45  ;;  %15367 = vmatmul.mubr.msk.bf16.vlgmr.msra.gmra.mxu0 %vm1261_vm5, %v9611_v18  ;;  %v16431_v47 = vpop.eup %16430 }
0x1980   : > { %15377 = vmatpush3.bf16.msra.mxu0 %v20078_v7  ;;  %v10004_v42 = vpop.permute.xlu0 %10003  ;;  %15378 = vmatprep.mubr.msk.bf16.mxu0 %vm16647_vm7, %v21739_v63  ;;  %v9601_v19 = vmul.f32 %v16431_v47, %v20018_v16 }
0x1981   : > { %v9614_v56 = vpack.c.bf16 %v9604_v52, %v9603_v62  ;;  %15388 = vmatprep.subr.bf16.mxu0 %v21739_v63  ;;  %v10106_v20 = vpop.permute.xlu1 %10105  ;;  %v10009_v3 = vsel %vm1016_vm4, %v10004_v42, 0 }
0x1982   : > { %v16433_v28 = vpop.eup %16432  ;;  %v10111_v22 = vsel %vm1016_vm4, %v10106_v20, 0 }
0x1983   : > { %v9602_v1 = vmul.f32 %v16433_v28, %v20024_v54  ;;  %15385 = vmatmul.mubr.msk.bf16.vlgmr.msra.gmra.mxu1 %vm1261_vm5, %v9614_v56  ;;  %v16435_v45 = vpop.eup %16434 }
0x1984   : > { %15395 = vmatpush3.bf16.msra.mxu1 %v20080_v27  ;;  %v10002_v61 = vpop.permute.xlu0 %10001  ;;  %15396 = vmatprep.mubr.msk.bf16.mxu1 %vm16647_vm7, %v21739_v63  ;;  %v9607_v25 = vmul.f32 %v16435_v45, %v20026_v15  ;;  %v10060_v15 = vsel %vm1016_vm4, %v10055_v2, 0 }
0x1985   : > { %v9613_v7 = vpack.c.bf16 %v9602_v1, %v9601_v19  ;;  %15406 = vmatprep.subr.bf16.mxu1 %v21739_v63  ;;  %v10157_v54 = vpop.permute.xlu1 %10156 }
0x1986   : > { %v16437_v60 = vpop.eup %16436 }
0x1987   : > { %v9608_v23 = vmul.f32 %v16437_v60, %v20032_v39  ;;  %15379 = vmatmul.mubr.msk.bf16.vlgmr.msra.gmra.mxu0 %vm1261_vm5, %v9613_v7  ;;  %v16439_v16 = vpop.eup %16438 }
0x1988   : > { %15389 = vmatpush3.bf16.msra.mxu0 %v20082_v55  ;;  %15390 = vmatprep.mubr.msk.bf16.mxu0 %vm16647_vm7, %v21739_v63  ;;  %v10053_v21 = vpop.permute.xlu0 %10052  ;;  %v9605_v29 = vmul.f32 %v16439_v16, %v20034_v44  ;;  %v10162_v44 = vsel %vm1016_vm4, %v10157_v54, 0 }
0x1989   : > { %v9616_v27 = vpack.c.bf16 %v9608_v23, %v9607_v25  ;;  %15400 = vmatprep.subr.bf16.mxu0 %v21739_v63  ;;  %v10208_v32 = vpop.permute.xlu1 %10207 }
0x198a   : > { %v16441_v53 = vpop.eup %16440  ;;  %v10213_v18 = vsel %vm1016_vm4, %v10208_v32, 0 }
0x198b   : > { %v9606_v39 = vmul.f32 %v16441_v53, %v20040_v6  ;;  %15397 = vmatmul.mubr.msk.bf16.vlgmr.msra.gmra.mxu1 %vm1261_vm5, %v9616_v27 }
0x198c   : > { %15407 = vmatpush3.bf16.xpose.msra.mxu1 %v10060_v15  ;;  %15408 = vmatprep.mubr.msk.bf16.mxu1 %vm16647_vm7, %v21739_v63  ;;  %v10104_v4 = vpop.permute.xlu0 %10103 }
0x198d   : > { %v9615_v55 = vpack.c.bf16 %v9606_v39, %v9605_v29  ;;  %15418 = vmatprep.subr.bf16.mxu1 %v21739_v63  ;;  %v10259_v6 = vpop.permute.xlu1 %10258 }
0x198e   : > { %v10264_v31 = vsel %vm1016_vm4, %v10259_v6, 0 }
0x198f   : > { %15391 = vmatmul.mubr.msk.bf16.vlgmr.msra.gmra.mxu0 %vm1261_vm5, %v9615_v55 }
0x1990   : > { %15401 = vmatpush3.bf16.xpose.msra.mxu0 %v10009_v3  ;;  %15402 = vmatprep.mubr.msk.bf16.mxu0 %vm16647_vm7, %v21739_v63  ;;  %v10155_v26 = vpop.permute.xlu0 %10154 }
0x1991   : > { %15412 = vmatprep.subr.bf16.mxu0 %v21739_v63  ;;  %v10310_v11 = vpop.permute.xlu1 %10309 }
0x1992   : > { %v10315_v47 = vsel %vm1016_vm4, %v10310_v11, 0 }
0x1993   : > { %15409 = vmatmul.mubr.msk.bf16.vlgmr.msra.gmra.mxu1 %vm1016_vm4, %v10053_v21 }
0x1994   : > { %15419 = vmatpush3.bf16.xpose.msra.mxu1 %v10162_v44  ;;  %15420 = vmatprep.mubr.msk.bf16.mxu1 %vm16647_vm7, %v21739_v63  ;;  %v10206_v2 = vpop.permute.xlu0 %10205 }
0x1995   : > { %15430 = vmatprep.subr.bf16.mxu1 %v21739_v63  ;;  %v10361_v17 = vpop.permute.xlu1 %10360 }
0x1996   : > { %v10366_v52 = vsel %vm1016_vm4, %v10361_v17, 0 }
0x1997   : > { %15403 = vmatmul.mubr.msk.bf16.vlgmr.msra.gmra.mxu0 %vm1016_vm4, %v10002_v61 }
0x1998   : > { %15413 = vmatpush3.bf16.xpose.msra.mxu0 %v10111_v22  ;;  %15414 = vmatprep.mubr.msk.bf16.mxu0 %vm16647_vm7, %v21739_v63  ;;  %v10257_v62 = vpop.permute.xlu0 %10256 }
0x1999   : > { %15424 = vmatprep.subr.bf16.mxu0 %v21739_v63  ;;  %v10359_v42 = vpop.permute.xlu1 %10358 }
0x199b   : > { %15421 = vmatmul.mubr.msk.bf16.vlgmr.msra.gmra.mxu1 %vm1016_vm4, %v10155_v26 }
0x199c   : > { %15431 = vmatpush3.bf16.xpose.msra.mxu1 %v10264_v31  ;;  %15432 = vmatprep.mubr.msk.bf16.mxu1 %vm16647_vm7, %v21739_v63  ;;  %v10308_v56 = vpop.permute.xlu0 %10307 }
0x199d   : > { %15442 = vmatprep.subr.bf16.mxu1 %v21739_v63  ;;  %v10610_v28 = vpop.permute.xlu1 %10609 }
0x199f   : > { %15415 = vmatmul.mubr.msk.bf16.vlgmr.msra.gmra.mxu0 %vm1016_vm4, %v10104_v4 }
0x19a0   : > { %15425 = vmatpush3.bf16.xpose.msra.mxu0 %v10213_v18  ;;  %15426 = vmatprep.mubr.msk.bf16.mxu0 %vm16647_vm7, %v21739_v63 }
0x19a1   : > { %15436 = vmatprep.subr.bf16.mxu0 %v21739_v63 }
0x19a3   : > { %15433 = vmatmul.mubr.msk.bf16.vlgmr.msra.gmra.mxu1 %vm1016_vm4, %v10257_v62 }
0x19a4   : > { %15443 = vmatpush3.bf16.xpose.msra.mxu1 %v10366_v52  ;;  %15444 = vmatprep.mubr.msk.bf16.mxu1 %vm16647_vm7, %v21739_v63 }
0x19a5   : > { %15454 = vmatprep.subr.bf16.mxu1 %v21739_v63 }
0x19a7   : > { %15427 = vmatmul.mubr.msk.bf16.vlgmr.msra.gmra.mxu0 %vm1016_vm4, %v10206_v2 }
0x19a8   : > { %15437 = vmatpush3.bf16.xpose.msra.mxu0 %v10315_v47  ;;  %15438 = vmatprep.mubr.msk.bf16.mxu0 %vm16647_vm7, %v21739_v63 }
0x19a9   : > { %15448 = vmatprep.subr.bf16.mxu0 %v21739_v63 }
0x19ab   : > { %15445 = vmatmul.mubr.msk.bf16.vlgmr.msra.gmra.mxu1 %vm1016_vm4, %v10359_v42 }
0x19ac   : > { %15456 = vmatprep.mubr.msk.bf16.mxu1 %vm16647_vm7, %v21739_v63 }
0x19af   : > { %15439 = vmatmul.mubr.msk.bf16.vlgmr.msra.gmra.mxu0 %vm1016_vm4, %v10308_v56 }
0x19b0   : > { %15449 = vmatpush3.bf16.msra.mxu0 %v10610_v28  ;;  %15450 = vmatprep.mubr.msk.bf16.mxu0 %vm16647_vm7, %v21739_v63 }
0x19b1   : > { %15460 = vmatprep.subr.bf16.mxu0 %v21739_v63 }
0x1a33   : > { %v20174_v20 = vpop.f32.mrf.mxu1 }
0x1a35   : > { %v15362_v19 = vpop.f32.mrf.mxu1 }
0x1a37   : > { %v20176_v1 = vpop.f32.mrf.mxu0  ;;  %v20178_v45 = vpop.f32.mrf.mxu1 }
0x1a39   : > { %v15356_v7 = vpop.f32.mrf.mxu0  ;;  %v15363_v60 = vpop.f32.mrf.mxu1 }
0x1a3b   : > { %v20182_v25 = vpop.f32.mrf.mxu0  ;;  %v20184_v23 = vpop.f32.mrf.mxu1 }
0x1a3d   : > { %v15357_v54 = vpop.f32.mrf.mxu0  ;;  %v15374_v27 = vpop.f32.mrf.mxu1 }
0x1a3f   : > { %v20188_v53 = vpop.f32.mrf.mxu0  ;;  %v20190_v21 = vpop.f32.mrf.mxu1 }
0x1a40   : > { %21847 = vst [vmem:[#allocation13_spill] sm:$0xff] %v20188_v53 }
0x1a41   : > { %v15368_v15 = vpop.f32.mrf.mxu0  ;;  %v15375_v39 = vpop.f32.mrf.mxu1 }
0x1a43   : > { %v20194_v55 = vpop.f32.mrf.mxu0  ;;  %v20196_v32 = vpop.f32.mrf.mxu1 }
0x1a45   : > { %v15369_v4 = vpop.f32.mrf.mxu0  ;;  %v15386_v44 = vpop.f32.mrf.mxu1 }
0x1a47   : > { %v20200_v6 = vpop.f32.mrf.mxu0  ;;  %v20202_v26 = vpop.f32.mrf.mxu1 }
0x1a48   : > { %21848 = vst [vmem:[#allocation12_spill] sm:$0xff] %v20200_v6 }
0x1a49   : > { %v15380_v11 = vpop.f32.mrf.mxu0  ;;  %v15387_v31 = vpop.f32.mrf.mxu1 }
0x1a4b   : > { %v20206_v2 = vpop.f32.mrf.mxu0  ;;  %v20208_v18 = vpop.f32.mrf.mxu1 }
0x1a4c   : > { %21849 = vst [vmem:[#allocation14_spill] sm:$0xff] %v20206_v2  ;;  %21850 = vst [vmem:[#allocation15_spill] sm:$0xff] %v20208_v18 }
0x1a4d   : > { %v15381_v62 = vpop.f32.mrf.mxu0  ;;  %v15398_v52 = vpop.f32.mrf.mxu1 }
0x1a4f   : > { %v20212_v47 = vpop.f32.mrf.mxu0  ;;  %v20214_v42 = vpop.f32.mrf.mxu1 }
0x1a50   : > { %21851 = vst [vmem:[#allocation17_spill] sm:$0xff] %v20212_v47  ;;  %21852 = vst [vmem:[#allocation16_spill] sm:$0xff] %v20214_v42 }
0x1a51   : > { %v15392_v28 = vpop.f32.mrf.mxu0  ;;  %v15399_v19 = vpop.f32.mrf.mxu1 }
0x1a53   : > { %v20218_v7 = vpop.f32.mrf.mxu0  ;;  %v10096_v60 = vpop.f32.mrf.mxu1 }
0x1a54   : > { %21853 = vst [vmem:[#allocation18_spill] sm:$0xff] %v20218_v7  ;;  %v20222_v27 = vmul.f32 0.35355338, %v10096_v60 }
0x1a55   : > { %v15393_v15 = vpop.f32.mrf.mxu0  ;;  %v15410_v39 = vpop.f32.mrf.mxu1 }
0x1a56   : > { %v10431_v4 = vsel %vm1261_vm5, %v20222_v27, -inf }
0x1a57   : > { %10432 = vmax.xlane.f32.xlu0 %v10431_v4  ;;  %v10045_v44 = vpop.f32.mrf.mxu0  ;;  %v10099_v11 = vpop.f32.mrf.mxu1 }
0x1a58   : > { %v20226_v31 = vmul.f32 0.35355338, %v10045_v44  ;;  %v20228_v28 = vmul.f32 0.35355338, %v10099_v11 }
0x1a59   : > { %v15404_v62 = vpop.f32.mrf.mxu0  ;;  %v15411_v52 = vpop.f32.mrf.mxu1 }
0x1a5a   : > { %v10425_v19 = vsel %vm1261_vm5, %v20226_v31, -inf  ;;  %v10434_v4 = vsel %vm1261_vm5, %v20228_v28, -inf }
0x1a5b   : > { %v10198_v54 = vpop.f32.mrf.mxu1  ;;  %10426 = vmax.xlane.f32.xlu0 %v10425_v19  ;;  %v10048_v60 = vpop.f32.mrf.mxu0 }
0x1a5c   : > { %v20232_v15 = vmul.f32 0.35355338, %v10048_v60  ;;  %v20234_v17 = vmul.f32 0.35355338, %v10198_v54 }
0x1a5d   : > { %v15405_v39 = vpop.f32.mrf.mxu0  ;;  %v15422_v56 = vpop.f32.mrf.mxu1 }
0x1a5e   : > { %v10428_v44 = vsel %vm1261_vm5, %v20232_v15, -inf  ;;  %v10443_v54 = vsel %vm1261_vm5, %v20234_v17, -inf }
0x1a5f   : > { %v10201_v11 = vpop.f32.mrf.mxu1  ;;  %10435 = vmax.xlane.f32.xlu0 %v10434_v4  ;;  %10429 = vmax.xlane.f32.xlu1 %v10428_v44  ;;  %v10147_v62 = vpop.f32.mrf.mxu0 }
0x1a60   : > { %v20240_v52 = vmul.f32 0.35355338, %v10201_v11  ;;  %v20242_v60 = vmul.f32 0.35355338, %v10147_v62 }
0x1a61   : > { %v15416_v19 = vpop.f32.mrf.mxu0  ;;  %v15423_v3 = vpop.f32.mrf.mxu1 }
0x1a62   : > { %v10446_v56 = vsel %vm1261_vm5, %v20240_v52, -inf  ;;  %v10437_v3 = vsel %vm1261_vm5, %v20242_v60, -inf }
0x1a63   : > { %v10300_v39 = vpop.f32.mrf.mxu1  ;;  %10447 = vmax.xlane.f32.xlu0 %v10446_v56  ;;  %10444 = vmax.xlane.f32.xlu1 %v10443_v54  ;;  %v10150_v22 = vpop.f32.mrf.mxu0 }
0x1a64   : > { %v20248_v16 = vmul.f32 0.35355338, %v10150_v22  ;;  %v20250_v11 = vmul.f32 0.35355338, %v10300_v39 }
0x1a65   : > { %v15417_v4 = vpop.f32.mrf.mxu0  ;;  %v15434_v44 = vpop.f32.mrf.mxu1 }
0x1a66   : > { %v10440_v62 = vsel %vm1261_vm5, %v20248_v16, -inf  ;;  %v10455_v39 = vsel %vm1261_vm5, %v20250_v11, -inf }
0x1a67   : > { %v10303_v19 = vpop.f32.mrf.mxu1  ;;  %10438 = vmax.xlane.f32.xlu1 %v10437_v3  ;;  %10441 = vmax.xlane.f32.xlu0 %v10440_v62  ;;  %v10249_v29 = vpop.f32.mrf.mxu0 }
0x1a68   : > { %v20256_v61 = vmul.f32 0.35355338, %v10303_v19  ;;  %v20258_v22 = vmul.f32 0.35355338, %v10249_v29 }
0x1a69   : > { %v15428_v56 = vpop.f32.mrf.mxu0  ;;  %v15435_v54 = vpop.f32.mrf.mxu1 }
0x1a6a   : > { %v10458_v4 = vsel %vm1261_vm5, %v20256_v61, -inf  ;;  %v10449_v29 = vsel %vm1261_vm5, %v20258_v22, -inf }
0x1a6b   : > { %v10402_v44 = vpop.f32.mrf.mxu1  ;;  %10456 = vmax.xlane.f32.xlu1 %v10455_v39  ;;  %10459 = vmax.xlane.f32.xlu0 %v10458_v4  ;;  %v10252_v41 = vpop.f32.mrf.mxu0 }
0x1a6c   : > { %v20264_v5 = vmul.f32 0.35355338, %v10252_v41  ;;  %v20266_v19 = vmul.f32 0.35355338, %v10402_v44 }
0x1a6d   : > { %v15429_v3 = vpop.f32.mrf.mxu0  ;;  %v15446_v62 = vpop.f32.mrf.mxu1 }
0x1a6e   : > { %v10452_v56 = vsel %vm1261_vm5, %v20264_v5, -inf  ;;  %v10467_v44 = vsel %vm1261_vm5, %v20266_v19, -inf }
0x1a6f   : > { %v10405_v54 = vpop.f32.mrf.mxu1  ;;  %10450 = vmax.xlane.f32.xlu1 %v10449_v29  ;;  %10453 = vmax.xlane.f32.xlu0 %v10452_v56  ;;  %v10351_v13 = vpop.f32.mrf.mxu0 }
0x1a70   : > { %v20272_v47 = vmul.f32 0.35355338, %v10405_v54  ;;  %v20274_v41 = vmul.f32 0.35355338, %v10351_v13 }
0x1a71   : > { %v15440_v39 = vpop.f32.mrf.mxu0  ;;  %v15447_v4 = vpop.f32.mrf.mxu1 }
0x1a72   : > { %v10470_v3 = vsel %vm1261_vm5, %v20272_v47, -inf  ;;  %v10461_v56 = vsel %vm1261_vm5, %v20274_v41, -inf }
0x1a73   : > { %10468 = vmax.xlane.f32.xlu1 %v10467_v44  ;;  %10471 = vmax.xlane.f32.xlu0 %v10470_v3  ;;  %v10354_v62 = vpop.f32.mrf.mxu0 }
0x1a74   : > { %v20280_v7 = vmul.f32 0.35355338, %v10354_v62 }
0x1a75   : > { %v15441_v29 = vpop.f32.mrf.mxu0 }
0x1a76   : > { %v10464_v54 = vsel %vm1261_vm5, %v20280_v7, -inf }
0x1a77   : > { %10462 = vmax.xlane.f32.xlu1 %v10461_v56  ;;  %10465 = vmax.xlane.f32.xlu0 %v10464_v54 }
0x1a88   : > { %10703 = vrot.lane.b32.xlu1 %v19569_v9, %s21846_s28 }
0x1a8c   : > { %10750 = vrot.lane.b32.xlu1 %v19567_v24, %s21846_s28 }
0x1a8d   : > { %10656 = vrot.lane.b32.xlu0 %v19547_v12, %s21846_s28 }
0x1a90   : > { %10844 = vrot.lane.b32.xlu1 %v19571_v37, %s21846_s28 }
0x1a91   : > { %10797 = vrot.lane.b32.xlu0 %v19573_v48, %s21846_s28 }
0x1a94   : > { %10938 = vrot.lane.b32.xlu1 %v19575_v8, %s21846_s28 }
0x1a95   : > { %10891 = vrot.lane.b32.xlu0 %v19577_v38, %s21846_s28 }
0x1ae0   : > { %v10433_v13 = vpop.xlane.xlu0 %10432 }
0x1ae1   : > { %v10475_v39 = vsub.f32 %v20222_v27, %v10433_v13 }
0x1ae3   : > { %v10493_v4 = vmul.f32 1.442695, %v10475_v39 }
0x1ae4   : > { %v10427_v44 = vpop.xlane.xlu0 %10426 }
0x1ae5   : > { %16442 = vpow2.f32 %v10493_v4  ;;  %v10473_v3 = vsub.f32 %v20226_v31, %v10427_v44 }
0x1ae7   : > { %v10489_v62 = vmul.f32 1.442695, %v10473_v3 }
0x1ae8   : > { %v10436_v29 = vpop.xlane.xlu0 %10435  ;;  %v10430_v56 = vpop.xlane.xlu1 %10429 }
0x1ae9   : > { %16444 = vpow2.f32 %v10489_v62  ;;  %v10476_v54 = vsub.f32 %v20228_v28, %v10436_v29  ;;  %v10474_v18 = vsub.f32 %v20232_v15, %v10430_v56 }
0x1aeb   : > { %v10495_v42 = vmul.f32 1.442695, %v10476_v54  ;;  %v10491_v6 = vmul.f32 1.442695, %v10474_v18 }
0x1aec   : > { %v10448_v2 = vpop.xlane.xlu0 %10447  ;;  %v10445_v53 = vpop.xlane.xlu1 %10444 }
0x1aed   : > { %16446 = vpow2.f32 %v10495_v42  ;;  %v10480_v27 = vsub.f32 %v20240_v52, %v10448_v2  ;;  %v10479_v13 = vsub.f32 %v20234_v17, %v10445_v53 }
0x1aee   : > { %16448 = vpow2.f32 %v10491_v6 }
0x1aef   : > { %v10503_v39 = vmul.f32 1.442695, %v10480_v27  ;;  %v10501_v31 = vmul.f32 1.442695, %v10479_v13 }
0x1af0   : > { %v10439_v4 = vpop.xlane.xlu1 %10438  ;;  %v10442_v44 = vpop.xlane.xlu0 %10441 }
0x1af1   : > { %16450 = vpow2.f32 %v10503_v39  ;;  %v10477_v3 = vsub.f32 %v20242_v60, %v10439_v4  ;;  %v10478_v28 = vsub.f32 %v20248_v16, %v10442_v44 }
0x1af2   : > { %v20308_v15 = vpop.eup %16442  ;;  %16452 = vpow2.f32 %v10501_v31 }
0x1af3   : > { %v10497_v18 = vmul.f32 1.442695, %v10477_v3  ;;  %v10499_v62 = vmul.f32 1.442695, %v10478_v28  ;;  %v10527_v2 = vsel %vm1261_vm5, %v20308_v15, 0.0 }
0x1af4   : > { %v10457_v42 = vpop.xlane.xlu1 %10456  ;;  %v10460_v53 = vpop.xlane.xlu0 %10459  ;;  %10528 = vadd.xlane.f32.xlu1 %v10527_v2 }
0x1af5   : > { %16454 = vpow2.f32 %v10497_v18  ;;  %v10483_v6 = vsub.f32 %v20250_v11, %v10457_v42  ;;  %v10484_v17 = vsub.f32 %v20256_v61, %v10460_v53 }
0x1af6   : > { %v20314_v52 = vpop.eup %16444  ;;  %16456 = vpow2.f32 %v10499_v62 }
0x1af7   : > { %v10509_v16 = vmul.f32 1.442695, %v10483_v6  ;;  %v10511_v60 = vmul.f32 1.442695, %v10484_v17  ;;  %v10521_v29 = vsel %vm1261_vm5, %v20314_v52, 0.0 }
0x1af8   : > { %v10451_v56 = vpop.xlane.xlu1 %10450  ;;  %v10454_v54 = vpop.xlane.xlu0 %10453  ;;  %10522 = vadd.xlane.f32.xlu1 %v10521_v29 }
0x1af9   : > { %16458 = vpow2.f32 %v10509_v16  ;;  %v10481_v27 = vsub.f32 %v20258_v22, %v10451_v56  ;;  %v10482_v13 = vsub.f32 %v20264_v5, %v10454_v54 }
0x1afa   : > { %v20320_v39 = vpop.eup %16446  ;;  %16460 = vpow2.f32 %v10511_v60 }
0x1afb   : > { %v10505_v61 = vmul.f32 1.442695, %v10481_v27  ;;  %v10507_v11 = vmul.f32 1.442695, %v10482_v13  ;;  %v10530_v31 = vsel %vm1261_vm5, %v20320_v39, 0.0  ;;  %v20324_v4 = vpop.eup %16448 }
0x1afc   : > { %v10469_v44 = vpop.xlane.xlu1 %10468  ;;  %v10472_v3 = vpop.xlane.xlu0 %10471  ;;  %10531 = vadd.xlane.f32.xlu0 %v10530_v31  ;;  %v10524_v42 = vsel %vm1261_vm5, %v20324_v4, 0.0 }
0x1afd   : > { %16462 = vpow2.f32 %v10505_v61  ;;  %v10487_v28 = vsub.f32 %v20266_v19, %v10469_v44  ;;  %v10488_v22 = vsub.f32 %v20272_v47, %v10472_v3 }
0x1afe   : > { %v20328_v18 = vpop.eup %16450  ;;  %16464 = vpow2.f32 %v10507_v11 }
0x1aff   : > { %v20330_v5 = vpop.eup %16452  ;;  %v10517_v62 = vmul.f32 1.442695, %v10487_v28  ;;  %v10519_v2 = vmul.f32 1.442695, %v10488_v22  ;;  %v10542_v60 = vsel %vm1261_vm5, %v20328_v18, 0.0 }
0x1b00   : > { %v10539_v53 = vsel %vm1261_vm5, %v20330_v5, 0.0  ;;  %v10463_v6 = vpop.xlane.xlu1 %10462  ;;  %10525 = vadd.xlane.f32.xlu0 %v10524_v42  ;;  %v10466_v17 = vpop.xlane.xlu0 %10465 }
0x1b01   : > { %16466 = vpow2.f32 %v10517_v62  ;;  %10540 = vadd.xlane.f32.xlu1 %v10539_v53  ;;  %v10485_v47 = vsub.f32 %v20274_v41, %v10463_v6  ;;  %v10486_v19 = vsub.f32 %v20280_v7, %v10466_v17 }
0x1b02   : > { %v20338_v16 = vpop.eup %16454  ;;  %16468 = vpow2.f32 %v10519_v2 }
0x1b03   : > { %v10513_v29 = vmul.f32 1.442695, %v10485_v47  ;;  %v10515_v56 = vmul.f32 1.442695, %v10486_v19  ;;  %v10533_v54 = vsel %vm1261_vm5, %v20338_v16, 0.0  ;;  %v20344_v27 = vpop.eup %16456 }
0x1b04   : > { %10543 = vadd.xlane.f32.xlu0 %v10542_v60  ;;  %v10657_v13 = vpop.permute.xlu0 %10656  ;;  %v10536_v61 = vsel %vm1261_vm5, %v20344_v27, 0.0 }
0x1b05   : > { %16470 = vpow2.f32 %v10513_v29  ;;  %10534 = vadd.xlane.f32.xlu1 %v10533_v54  ;;  %15455 = vmatpush3.bf16.msra.mxu1 %v10657_v13 }
0x1b06   : > { %v20346_v41 = vpop.eup %16458  ;;  %15466 = vmatprep.subr.bf16.mxu1 %v21739_v63  ;;  %16472 = vpow2.f32 %v10515_v56 }
0x1b07   : > { %v10551_v7 = vsel %vm1261_vm5, %v20346_v41, 0.0  ;;  %v20353_v11 = vpop.eup %16460 }
0x1b08   : > { %10537 = vadd.xlane.f32.xlu0 %v10536_v61  ;;  %v10554_v3 = vsel %vm1261_vm5, %v20353_v11, 0.0 }
0x1b09   : > { %10552 = vadd.xlane.f32.xlu1 %v10551_v7 }
0x1b0a   : > { %v20355_v31 = vpop.eup %16462 }
0x1b0b   : > { %v10545_v44 = vsel %vm1261_vm5, %v20355_v31, 0.0  ;;  %v20361_v28 = vpop.eup %16464 }
0x1b0c   : > { %10555 = vadd.xlane.f32.xlu0 %v10554_v3  ;;  %v10548_v2 = vsel %vm1261_vm5, %v20361_v28, 0.0 }
0x1b0d   : > { %10546 = vadd.xlane.f32.xlu1 %v10545_v44 }
0x1b0e   : > { %v20363_v22 = vpop.eup %16466 }
0x1b0f   : > { %v10563_v62 = vsel %vm1261_vm5, %v20363_v22, 0.0  ;;  %v20369_v42 = vpop.eup %16468 }
0x1b10   : > { %10549 = vadd.xlane.f32.xlu0 %v10548_v2  ;;  %v10566_v17 = vsel %vm1261_vm5, %v20369_v42, 0.0 }
0x1b11   : > { %10564 = vadd.xlane.f32.xlu1 %v10563_v62 }
0x1b12   : > { %v20371_v53 = vpop.eup %16470 }
0x1b13   : > { %v10557_v6 = vsel %vm1261_vm5, %v20371_v53, 0.0  ;;  %v20377_v47 = vpop.eup %16472 }
0x1b14   : > { %10567 = vadd.xlane.f32.xlu0 %v10566_v17  ;;  %v10560_v19 = vsel %vm1261_vm5, %v20377_v47, 0.0 }
0x1b15   : > { %10558 = vadd.xlane.f32.xlu1 %v10557_v6 }
0x1b18   : > { %10561 = vadd.xlane.f32.xlu0 %v10560_v19 }
0x1b26   : > { %11038 = vrot.lane.b32.xlu1 %v19434_v58, %s21854_s7  ;;  %v10704_v58 = vpop.permute.xlu1 %10703 }
0x1b2a   : > { %11089 = vrot.lane.b32.xlu1 %v19464_v10, %s21854_s7 }
0x1b2e   : > { %11140 = vrot.lane.b32.xlu1 %v19457_v43, %s21854_s7  ;;  %10987 = vrot.lane.b32.xlu0 %v19437_v33, %s21854_s7  ;;  %v10751_v33 = vpop.permute.xlu1 %10750 }
0x1b32   : > { %11191 = vrot.lane.b32.xlu1 %v19494_v49, %s21854_s7  ;;  %10985 = vrot.lane.b32.xlu0 %v19462_v59, %s21854_s7  ;;  %v10845_v43 = vpop.permute.xlu1 %10844 }
0x1b36   : > { %11242 = vrot.lane.b32.xlu1 %v19487_v0, %s21854_s7  ;;  %11036 = vrot.lane.b32.xlu0 %v19460_v50, %s21854_s7  ;;  %v20415_v50 = vpop.permute.xlu0 %10797  ;;  %v20417_v59 = vpop.permute.xlu1 %10938 }
0x1b3a   : > { %11293 = vrot.lane.b32.xlu1 %v19524_v35, %s21854_s7  ;;  %11087 = vrot.lane.b32.xlu0 %v19492_v36, %s21854_s7  ;;  %v20419_v0 = vpop.permute.xlu0 %10891 }
0x1b3e   : > { %11344 = vrot.lane.b32.xlu1 %v19517_v57, %s21854_s7  ;;  %11138 = vrot.lane.b32.xlu0 %v19490_v34, %s21854_s7 }
0x1b42   : > { %11342 = vrot.lane.b32.xlu1 %v19549_v14, %s21854_s7  ;;  %11189 = vrot.lane.b32.xlu0 %v19522_v40, %s21854_s7 }
0x1b46   : > { %11593 = vrot.lane.b32.xlu1 %v19553_v46, %s21854_s7  ;;  %11240 = vrot.lane.b32.xlu0 %v19520_v30, %s21854_s7 }
0x1b4a   : > { %11291 = vrot.lane.b32.xlu0 %v19551_v51, %s21854_s7 }
0x1b7d   : > { %v10529_v10 = vpop.xlane.xlu1 %10528 }
0x1b7e   : > { %16474 = vrcp.f32 %v10529_v10 }
0x1b81   : > { %v10523_v34 = vpop.xlane.xlu1 %10522 }
0x1b85   : > { %v10532_v36 = vpop.xlane.xlu0 %10531 }
0x1b86   : > { %16476 = vrcp.f32 %v10532_v36 }
0x1b87   : > { %16478 = vrcp.f32 %v10523_v34 }
0x1b89   : > { %v10526_v49 = vpop.xlane.xlu0 %10525 }
0x1b8a   : > { %v10541_v57 = vpop.xlane.xlu1 %10540  ;;  %16480 = vrcp.f32 %v10526_v49 }
0x1b8b   : > { %16482 = vrcp.f32 %v10541_v57  ;;  %v16475_v35 = vpop.eup %16474 }
0x1b8c   : > { %v10587_v60 = vmul.f32 %v16475_v35, %v20308_v15 }
0x1b8d   : > { %v10544_v30 = vpop.xlane.xlu0 %10543 }
0x1b8e   : > { %v10535_v40 = vpop.xlane.xlu1 %10534  ;;  %16484 = vrcp.f32 %v10544_v30 }
0x1b8f   : > { %16486 = vrcp.f32 %v10535_v40 }
0x1b91   : > { %v10538_v14 = vpop.xlane.xlu0 %10537 }
0x1b92   : > { %v10553_v51 = vpop.xlane.xlu1 %10552  ;;  %16488 = vrcp.f32 %v10538_v14 }
0x1b93   : > { %v16477_v46 = vpop.eup %16476  ;;  %16490 = vrcp.f32 %v10553_v51 }
0x1b94   : > { %v10588_v29 = vmul.f32 %v16477_v46, %v20320_v39  ;;  %v16479_v56 = vpop.eup %16478 }
0x1b95   : > { %v10556_v54 = vpop.xlane.xlu0 %10555  ;;  %v10585_v44 = vmul.f32 %v16479_v56, %v20314_v52 }
0x1b96   : > { %v10547_v13 = vpop.xlane.xlu1 %10546  ;;  %16492 = vrcp.f32 %v10556_v54  ;;  %v10602_v7 = vpack.c.bf16 %v10588_v29, %v10587_v60 }
0x1b97   : > { %v16481_v61 = vpop.eup %16480  ;;  %16494 = vrcp.f32 %v10547_v13 }
0x1b98   : > { %v10586_v3 = vmul.f32 %v16481_v61, %v20324_v4  ;;  %15457 = vmatmul.mubr.msk.bf16.vlgmr.msra.gmra.mxu1 %vm1261_vm5, %v10602_v7  ;;  %v16483_v62 = vpop.eup %16482 }
0x1b99   : > { %15467 = vmatpush3.bf16.msra.mxu1 %v10751_v33  ;;  %v10550_v2 = vpop.xlane.xlu0 %10549  ;;  %15468 = vmatprep.mubr.msk.bf16.mxu1 %vm16647_vm7, %v21739_v63  ;;  %v10591_v17 = vmul.f32 %v16483_v62, %v20330_v5 }
0x1b9a   : > { %v10565_v15 = vpop.xlane.xlu1 %10564  ;;  %16496 = vrcp.f32 %v10550_v2  ;;  %v10601_v39 = vpack.c.bf16 %v10586_v3, %v10585_v44  ;;  %15478 = vmatprep.subr.bf16.mxu1 %v21739_v63 }
0x1b9b   : > { %v16485_v6 = vpop.eup %16484  ;;  %16498 = vrcp.f32 %v10565_v15 }
0x1b9c   : > { %v10592_v52 = vmul.f32 %v16485_v6, %v20328_v18  ;;  %15451 = vmatmul.mubr.msk.bf16.vlgmr.msra.gmra.mxu0 %vm1261_vm5, %v10601_v39  ;;  %v16487_v4 = vpop.eup %16486 }
0x1b9d   : > { %15461 = vmatpush3.bf16.msra.mxu0 %v10704_v58  ;;  %v10568_v19 = vpop.xlane.xlu0 %10567  ;;  %15462 = vmatprep.mubr.msk.bf16.mxu0 %vm16647_vm7, %v21739_v63  ;;  %v10589_v36 = vmul.f32 %v16487_v4, %v20338_v16 }
0x1b9e   : > { %v10559_v33 = vpop.xlane.xlu1 %10558  ;;  %16500 = vrcp.f32 %v10568_v19  ;;  %v10604_v10 = vpack.c.bf16 %v10592_v52, %v10591_v17  ;;  %15472 = vmatprep.subr.bf16.mxu0 %v21739_v63 }
0x1b9f   : > { %v16489_v34 = vpop.eup %16488  ;;  %16502 = vrcp.f32 %v10559_v33 }
0x1ba0   : > { %v10590_v5 = vmul.f32 %v16489_v34, %v20344_v27  ;;  %15469 = vmatmul.mubr.msk.bf16.vlgmr.msra.gmra.mxu1 %vm1261_vm5, %v10604_v10  ;;  %v16491_v18 = vpop.eup %16490 }
0x1ba1   : > { %15479 = vmatpush3.bf16.msra.mxu1 %v10845_v43  ;;  %v10562_v58 = vpop.xlane.xlu0 %10561  ;;  %15480 = vmatprep.mubr.msk.bf16.mxu1 %vm16647_vm7, %v21739_v63  ;;  %v10595_v40 = vmul.f32 %v16491_v18, %v20346_v41 }
0x1ba2   : > { %v11039_v49 = vpop.permute.xlu1 %11038  ;;  %16504 = vrcp.f32 %v10562_v58  ;;  %v10603_v57 = vpack.c.bf16 %v10590_v5, %v10589_v36  ;;  %15490 = vmatprep.subr.bf16.mxu1 %v21739_v63 }
0x1ba3   : > { %v16493_v30 = vpop.eup %16492 }
0x1ba4   : > { %v10596_v16 = vmul.f32 %v16493_v30, %v20353_v11  ;;  %15463 = vmatmul.mubr.msk.bf16.vlgmr.msra.gmra.mxu0 %vm1261_vm5, %v10603_v57  ;;  %v16495_v27 = vpop.eup %16494 }
0x1ba5   : > { %15473 = vmatpush3.bf16.msra.mxu0 %v20415_v50  ;;  %v10988_v43 = vpop.permute.xlu0 %10987  ;;  %15474 = vmatprep.mubr.msk.bf16.mxu0 %vm16647_vm7, %v21739_v63  ;;  %v10593_v46 = vmul.f32 %v16495_v27, %v20355_v31 }
0x1ba6   : > { %v10606_v35 = vpack.c.bf16 %v10596_v16, %v10595_v40  ;;  %15484 = vmatprep.subr.bf16.mxu0 %v21739_v63  ;;  %v11090_v51 = vpop.permute.xlu1 %11089  ;;  %v10993_v3 = vsel %vm1016_vm4, %v10988_v43, 0 }
0x1ba7   : > { %v16497_v14 = vpop.eup %16496  ;;  %v11095_v15 = vsel %vm1016_vm4, %v11090_v51, 0 }
0x1ba8   : > { %v10594_v41 = vmul.f32 %v16497_v14, %v20361_v28  ;;  %15481 = vmatmul.mubr.msk.bf16.vlgmr.msra.gmra.mxu1 %vm1261_vm5, %v10606_v35  ;;  %v16499_v11 = vpop.eup %16498 }
0x1ba9   : > { %15491 = vmatpush3.bf16.msra.mxu1 %v20417_v59  ;;  %v10986_v60 = vpop.permute.xlu0 %10985  ;;  %15492 = vmatprep.mubr.msk.bf16.mxu1 %vm16647_vm7, %v21739_v63  ;;  %v10599_v56 = vmul.f32 %v16499_v11, %v20363_v22  ;;  %v11044_v22 = vsel %vm1016_vm4, %v11039_v49, 0 }
0x1baa   : > { %v10605_v50 = vpack.c.bf16 %v10594_v41, %v10593_v46  ;;  %15502 = vmatprep.subr.bf16.mxu1 %v21739_v63  ;;  %v11141_v28 = vpop.permute.xlu1 %11140 }
0x1bab   : > { %v16501_v29 = vpop.eup %16500 }
0x1bac   : > { %v10600_v54 = vmul.f32 %v16501_v29, %v20369_v42  ;;  %15475 = vmatmul.mubr.msk.bf16.vlgmr.msra.gmra.mxu0 %vm1261_vm5, %v10605_v50  ;;  %v16503_v31 = vpop.eup %16502 }
0x1bad   : > { %15485 = vmatpush3.bf16.msra.mxu0 %v20419_v0  ;;  %15486 = vmatprep.mubr.msk.bf16.mxu0 %vm16647_vm7, %v21739_v63  ;;  %v11037_v7 = vpop.permute.xlu0 %11036  ;;  %v10597_v61 = vmul.f32 %v16503_v31, %v20371_v53  ;;  %v11146_v53 = vsel %vm1016_vm4, %v11141_v28, 0 }
0x1bae   : > { %v10608_v59 = vpack.c.bf16 %v10600_v54, %v10599_v56  ;;  %15496 = vmatprep.subr.bf16.mxu0 %v21739_v63  ;;  %v11192_v44 = vpop.permute.xlu1 %11191 }
0x1baf   : > { %v16505_v13 = vpop.eup %16504  ;;  %v11197_v52 = vsel %vm1016_vm4, %v11192_v44, 0 }
0x1bb0   : > { %v10598_v42 = vmul.f32 %v16505_v13, %v20377_v47  ;;  %15493 = vmatmul.mubr.msk.bf16.vlgmr.msra.gmra.mxu1 %vm1261_vm5, %v10608_v59 }
0x1bb1   : > { %15503 = vmatpush3.bf16.xpose.msra.mxu1 %v11044_v22  ;;  %15504 = vmatprep.mubr.msk.bf16.mxu1 %vm16647_vm7, %v21739_v63  ;;  %v11088_v62 = vpop.permute.xlu0 %11087 }
0x1bb2   : > { %v10607_v0 = vpack.c.bf16 %v10598_v42, %v10597_v61  ;;  %15514 = vmatprep.subr.bf16.mxu1 %v21739_v63  ;;  %v11243_v47 = vpop.permute.xlu1 %11242 }
0x1bb3   : > { %v11248_v6 = vsel %vm1016_vm4, %v11243_v47, 0 }
0x1bb4   : > { %15487 = vmatmul.mubr.msk.bf16.vlgmr.msra.gmra.mxu0 %vm1261_vm5, %v10607_v0 }
0x1bb5   : > { %15497 = vmatpush3.bf16.xpose.msra.mxu0 %v10993_v3  ;;  %15498 = vmatprep.mubr.msk.bf16.mxu0 %vm16647_vm7, %v21739_v63  ;;  %v11139_v2 = vpop.permute.xlu0 %11138 }
0x1bb6   : > { %15508 = vmatprep.subr.bf16.mxu0 %v21739_v63  ;;  %v11294_v39 = vpop.permute.xlu1 %11293 }
0x1bb7   : > { %v11299_v10 = vsel %vm1016_vm4, %v11294_v39, 0 }
0x1bb8   : > { %15505 = vmatmul.mubr.msk.bf16.vlgmr.msra.gmra.mxu1 %vm1016_vm4, %v11037_v7 }
0x1bb9   : > { %15515 = vmatpush3.bf16.xpose.msra.mxu1 %v11146_v53  ;;  %15516 = vmatprep.mubr.msk.bf16.mxu1 %vm16647_vm7, %v21739_v63  ;;  %v11190_v17 = vpop.permute.xlu0 %11189 }
0x1bba   : > { %15526 = vmatprep.subr.bf16.mxu1 %v21739_v63  ;;  %v11345_v4 = vpop.permute.xlu1 %11344 }
0x1bbb   : > { %v11350_v33 = vsel %vm1016_vm4, %v11345_v4, 0 }
0x1bbc   : > { %15499 = vmatmul.mubr.msk.bf16.vlgmr.msra.gmra.mxu0 %vm1016_vm4, %v10986_v60 }
0x1bbd   : > { %15509 = vmatpush3.bf16.xpose.msra.mxu0 %v11095_v15  ;;  %15510 = vmatprep.mubr.msk.bf16.mxu0 %vm16647_vm7, %v21739_v63  ;;  %v11241_v19 = vpop.permute.xlu0 %11240 }
0x1bbe   : > { %15520 = vmatprep.subr.bf16.mxu0 %v21739_v63  ;;  %v11343_v34 = vpop.permute.xlu1 %11342 }
0x1bc0   : > { %15517 = vmatmul.mubr.msk.bf16.vlgmr.msra.gmra.mxu1 %vm1016_vm4, %v11139_v2 }
0x1bc1   : > { %15527 = vmatpush3.bf16.xpose.msra.mxu1 %v11248_v6  ;;  %15528 = vmatprep.mubr.msk.bf16.mxu1 %vm16647_vm7, %v21739_v63  ;;  %v11292_v36 = vpop.permute.xlu0 %11291 }
0x1bc2   : > { %15538 = vmatprep.subr.bf16.mxu1 %v21739_v63  ;;  %v11594_v5 = vpop.permute.xlu1 %11593 }
0x1bc4   : > { %15511 = vmatmul.mubr.msk.bf16.vlgmr.msra.gmra.mxu0 %vm1016_vm4, %v11088_v62 }
0x1bc5   : > { %15521 = vmatpush3.bf16.xpose.msra.mxu0 %v11197_v52  ;;  %15522 = vmatprep.mubr.msk.bf16.mxu0 %vm16647_vm7, %v21739_v63 }
0x1bc6   : > { %15532 = vmatprep.subr.bf16.mxu0 %v21739_v63 }
0x1bc8   : > { %15529 = vmatmul.mubr.msk.bf16.vlgmr.msra.gmra.mxu1 %vm1016_vm4, %v11241_v19 }
0x1bc9   : > { %15539 = vmatpush3.bf16.xpose.msra.mxu1 %v11350_v33  ;;  %15540 = vmatprep.mubr.msk.bf16.mxu1 %vm16647_vm7, %v21739_v63 }
0x1bca   : > { %15550 = vmatprep.subr.bf16.mxu1 %v21739_v63 }
0x1bcc   : > { %15523 = vmatmul.mubr.msk.bf16.vlgmr.msra.gmra.mxu0 %vm1016_vm4, %v11190_v17 }
0x1bcd   : > { %15533 = vmatpush3.bf16.xpose.msra.mxu0 %v11299_v10  ;;  %15534 = vmatprep.mubr.msk.bf16.mxu0 %vm16647_vm7, %v21739_v63 }
0x1bce   : > { %15544 = vmatprep.subr.bf16.mxu0 %v21739_v63 }
0x1bd0   : > { %15541 = vmatmul.mubr.msk.bf16.vlgmr.msra.gmra.mxu1 %vm1016_vm4, %v11343_v34 }
0x1bd1   : > { %15552 = vmatprep.mubr.msk.bf16.mxu1 %vm16647_vm7, %v21739_v63 }
0x1bd4   : > { %15535 = vmatmul.mubr.msk.bf16.vlgmr.msra.gmra.mxu0 %vm1016_vm4, %v11292_v36 }
0x1bd5   : > { %15545 = vmatpush3.bf16.msra.mxu0 %v11594_v5  ;;  %15546 = vmatprep.mubr.msk.bf16.mxu0 %vm16647_vm7, %v21739_v63 }
0x1bd6   : > { %15556 = vmatprep.subr.bf16.mxu0 %v21739_v63 }
0x1c58   : > { %v20511_v18 = vpop.f32.mrf.mxu1 }
0x1c5a   : > { %v15458_v58 = vpop.f32.mrf.mxu1 }
0x1c5c   : > { %v20513_v49 = vpop.f32.mrf.mxu0  ;;  %v20515_v57 = vpop.f32.mrf.mxu1 }
0x1c5d   : > { %v15849_v30 = vpack.i.bf16 %v20515_v57, %v20511_v18 }
0x1c5e   : > { %v15452_v40 = vpop.f32.mrf.mxu0  ;;  %v15459_v16 = vpop.f32.mrf.mxu1 }
0x1c60   : > { %v20519_v27 = vpop.f32.mrf.mxu0  ;;  %v20521_v43 = vpop.f32.mrf.mxu1 }
0x1c61   : > { %v15844_v35 = vpack.i.bf16 %v20519_v27, %v20513_v49 }
0x1c62   : > { %v15453_v14 = vpop.f32.mrf.mxu0  ;;  %v15470_v51 = vpop.f32.mrf.mxu1 }
0x1c64   : > { %v20525_v46 = vpop.f32.mrf.mxu0  ;;  %v20527_v41 = vpop.f32.mrf.mxu1 }
0x1c65   : > { %v15869_v11 = vpack.i.bf16 %v20527_v41, %v20521_v43 }
0x1c66   : > { %v15464_v60 = vpop.f32.mrf.mxu0  ;;  %v15471_v50 = vpop.f32.mrf.mxu1 }
0x1c68   : > { %v20531_v29 = vpop.f32.mrf.mxu0  ;;  %v20533_v56 = vpop.f32.mrf.mxu1 }
0x1c69   : > { %v15864_v54 = vpack.i.bf16 %v20531_v29, %v20525_v46 }
0x1c6a   : > { %v15465_v31 = vpop.f32.mrf.mxu0  ;;  %v15482_v28 = vpop.f32.mrf.mxu1 }
0x1c6c   : > { %v20537_v59 = vpop.f32.mrf.mxu0  ;;  %v20539_v13 = vpop.f32.mrf.mxu1 }
0x1c6d   : > { %v15899_v7 = vpack.i.bf16 %v20539_v13, %v20533_v56  ;;  %v21866_v13 = vld [vmem:[#allocation16_spill] sm:$0xff] }
0x1c6e   : > { %v15476_v61 = vpop.f32.mrf.mxu0  ;;  %v15483_v22 = vpop.f32.mrf.mxu1 }
0x1c70   : > { %v20543_v42 = vpop.f32.mrf.mxu0  ;;  %v20545_v0 = vpop.f32.mrf.mxu1 }
0x1c71   : > { %v15894_v44 = vpack.i.bf16 %v20543_v42, %v20537_v59  ;;  %v21869_v59 = vld [vmem:[#allocation18_spill] sm:$0xff]  ;;  %v21870_v42 = vld [vmem:[#allocation17_spill] sm:$0xff] }
0x1c72   : > { %v15477_v3 = vpop.f32.mrf.mxu0  ;;  %v15494_v62 = vpop.f32.mrf.mxu1 }
0x1c74   : > { %v20549_v53 = vpop.f32.mrf.mxu0  ;;  %v20551_v47 = vpop.f32.mrf.mxu1 }
0x1c76   : > { %v15488_v15 = vpop.f32.mrf.mxu0  ;;  %v15495_v39 = vpop.f32.mrf.mxu1 }
0x1c78   : > { %v20555_v6 = vpop.f32.mrf.mxu0  ;;  %v11080_v17 = vpop.f32.mrf.mxu1 }
0x1c79   : > { %v20559_v4 = vmul.f32 0.35355338, %v11080_v17 }
0x1c7a   : > { %v15489_v19 = vpop.f32.mrf.mxu0  ;;  %v15506_v33 = vpop.f32.mrf.mxu1 }
0x1c7b   : > { %v11415_v10 = vsel %vm1261_vm5, %v20559_v4, -inf }
0x1c7c   : > { %11416 = vmax.xlane.f32.xlu0 %v11415_v10  ;;  %v11029_v34 = vpop.f32.mrf.mxu0  ;;  %v11083_v36 = vpop.f32.mrf.mxu1 }
0x1c7d   : > { %v20563_v5 = vmul.f32 0.35355338, %v11029_v34  ;;  %v20565_v16 = vmul.f32 0.35355338, %v11083_v36 }
0x1c7e   : > { %v15500_v58 = vpop.f32.mrf.mxu0  ;;  %v15507_v40 = vpop.f32.mrf.mxu1 }
0x1c7f   : > { %v11409_v14 = vsel %vm1261_vm5, %v20563_v5, -inf  ;;  %v11418_v22 = vsel %vm1261_vm5, %v20565_v16, -inf }
0x1c80   : > { %v11182_v51 = vpop.f32.mrf.mxu1  ;;  %11410 = vmax.xlane.f32.xlu0 %v11409_v14  ;;  %v11032_v60 = vpop.f32.mrf.mxu0 }
0x1c81   : > { %v20569_v50 = vmul.f32 0.35355338, %v11032_v60  ;;  %v20571_v61 = vmul.f32 0.35355338, %v11182_v51 }
0x1c82   : > { %v15501_v31 = vpop.f32.mrf.mxu0  ;;  %v15518_v28 = vpop.f32.mrf.mxu1 }
0x1c83   : > { %v11412_v3 = vsel %vm1261_vm5, %v20569_v50, -inf  ;;  %v11427_v34 = vsel %vm1261_vm5, %v20571_v61, -inf }
0x1c84   : > { %v11185_v62 = vpop.f32.mrf.mxu1  ;;  %11419 = vmax.xlane.f32.xlu0 %v11418_v22  ;;  %11413 = vmax.xlane.f32.xlu1 %v11412_v3  ;;  %v11131_v15 = vpop.f32.mrf.mxu0 }
0x1c85   : > { %v20577_v39 = vmul.f32 0.35355338, %v11185_v62  ;;  %v20579_v33 = vmul.f32 0.35355338, %v11131_v15 }
0x1c86   : > { %v15512_v17 = vpop.f32.mrf.mxu0  ;;  %v15519_v19 = vpop.f32.mrf.mxu1 }
0x1c87   : > { %v11430_v10 = vsel %vm1261_vm5, %v20577_v39, -inf  ;;  %v11421_v31 = vsel %vm1261_vm5, %v20579_v33, -inf }
0x1c88   : > { %v11284_v36 = vpop.f32.mrf.mxu1  ;;  %11431 = vmax.xlane.f32.xlu0 %v11430_v10  ;;  %11428 = vmax.xlane.f32.xlu1 %v11427_v34  ;;  %v11134_v58 = vpop.f32.mrf.mxu0 }
0x1c89   : > { %v20585_v40 = vmul.f32 0.35355338, %v11134_v58  ;;  %v20587_v60 = vmul.f32 0.35355338, %v11284_v36 }
0x1c8a   : > { %v15513_v14 = vpop.f32.mrf.mxu0  ;;  %v15530_v51 = vpop.f32.mrf.mxu1 }
0x1c8b   : > { %v11424_v28 = vsel %vm1261_vm5, %v20585_v40, -inf  ;;  %v11439_v10 = vsel %vm1261_vm5, %v20587_v60, -inf }
0x1c8c   : > { %v11287_v22 = vpop.f32.mrf.mxu1  ;;  %11422 = vmax.xlane.f32.xlu1 %v11421_v31  ;;  %11425 = vmax.xlane.f32.xlu0 %v11424_v28  ;;  %v11233_v3 = vpop.f32.mrf.mxu0 }
0x1c8d   : > { %v20593_v62 = vmul.f32 0.35355338, %v11287_v22  ;;  %v20595_v19 = vmul.f32 0.35355338, %v11233_v3 }
0x1c8e   : > { %v15524_v15 = vpop.f32.mrf.mxu0  ;;  %v15531_v17 = vpop.f32.mrf.mxu1 }
0x1c8f   : > { %v11442_v34 = vsel %vm1261_vm5, %v20593_v62, -inf  ;;  %v11433_v22 = vsel %vm1261_vm5, %v20595_v19, -inf }
0x1c90   : > { %v11386_v36 = vpop.f32.mrf.mxu1  ;;  %11440 = vmax.xlane.f32.xlu1 %v11439_v10  ;;  %11443 = vmax.xlane.f32.xlu0 %v11442_v34  ;;  %v11236_v58 = vpop.f32.mrf.mxu0 }
0x1c91   : > { %v20601_v14 = vmul.f32 0.35355338, %v11236_v58  ;;  %v20603_v28 = vmul.f32 0.35355338, %v11386_v36 }
0x1c92   : > { %v15525_v51 = vpop.f32.mrf.mxu0  ;;  %v15542_v31 = vpop.f32.mrf.mxu1 }
0x1c93   : > { %v11436_v3 = vsel %vm1261_vm5, %v20601_v14, -inf  ;;  %v11451_v36 = vsel %vm1261_vm5, %v20603_v28, -inf }
0x1c94   : > { %v11389_v15 = vpop.f32.mrf.mxu1  ;;  %11434 = vmax.xlane.f32.xlu1 %v11433_v22  ;;  %11437 = vmax.xlane.f32.xlu0 %v11436_v3  ;;  %v11335_v17 = vpop.f32.mrf.mxu0 }
0x1c95   : > { %v20609_v52 = vmul.f32 0.35355338, %v11389_v15  ;;  %v20611_v58 = vmul.f32 0.35355338, %v11335_v17 }
0x1c96   : > { %v15536_v10 = vpop.f32.mrf.mxu0  ;;  %v15543_v34 = vpop.f32.mrf.mxu1 }
0x1c97   : > { %v11454_v51 = vsel %vm1261_vm5, %v20609_v52, -inf  ;;  %v11445_v3 = vsel %vm1261_vm5, %v20611_v58, -inf }
0x1c98   : > { %11452 = vmax.xlane.f32.xlu1 %v11451_v36  ;;  %11455 = vmax.xlane.f32.xlu0 %v11454_v51  ;;  %v11338_v31 = vpop.f32.mrf.mxu0 }
0x1c99   : > { %v20617_v2 = vmul.f32 0.35355338, %v11338_v31 }
0x1c9a   : > { %v15537_v22 = vpop.f32.mrf.mxu0 }
0x1c9b   : > { %v11448_v15 = vsel %vm1261_vm5, %v20617_v2, -inf }
0x1c9c   : > { %11446 = vmax.xlane.f32.xlu1 %v11445_v3  ;;  %11449 = vmax.xlane.f32.xlu0 %v11448_v15 }
0x1cad   : > { %11687 = vrot.lane.b32.xlu1 %v19569_v9, %s21854_s7 }
0x1cb1   : > { %11734 = vrot.lane.b32.xlu1 %v19567_v24, %s21854_s7 }
0x1cb2   : > { %11640 = vrot.lane.b32.xlu0 %v19547_v12, %s21854_s7 }
0x1cb5   : > { %11828 = vrot.lane.b32.xlu1 %v19571_v37, %s21854_s7 }
0x1cb6   : > { %11781 = vrot.lane.b32.xlu0 %v19573_v48, %s21854_s7 }
0x1d05   : > { %v11417_v17 = vpop.xlane.xlu0 %11416 }
0x1d06   : > { %v11459_v10 = vsub.f32 %v20559_v4, %v11417_v17 }
0x1d08   : > { %v11477_v34 = vmul.f32 1.442695, %v11459_v10 }
0x1d09   : > { %v11411_v36 = vpop.xlane.xlu0 %11410 }
0x1d0a   : > { %16506 = vpow2.f32 %v11477_v34  ;;  %v11457_v9 = vsub.f32 %v20563_v5, %v11411_v36 }
0x1d0c   : > { %v11473_v51 = vmul.f32 1.442695, %v11457_v9 }
0x1d0d   : > { %v11420_v31 = vpop.xlane.xlu0 %11419  ;;  %v11414_v24 = vpop.xlane.xlu1 %11413 }
0x1d0e   : > { %16508 = vpow2.f32 %v11473_v51  ;;  %v11460_v12 = vsub.f32 %v20565_v16, %v11420_v31  ;;  %v11458_v22 = vsub.f32 %v20569_v50, %v11414_v24 }
0x1d10   : > { %v11479_v37 = vmul.f32 1.442695, %v11460_v12  ;;  %v11475_v3 = vmul.f32 1.442695, %v11458_v22 }
0x1d11   : > { %v11432_v15 = vpop.xlane.xlu0 %11431  ;;  %v11429_v48 = vpop.xlane.xlu1 %11428 }
0x1d12   : > { %16510 = vpow2.f32 %v11479_v37  ;;  %v11464_v4 = vsub.f32 %v20577_v39, %v11432_v15  ;;  %v11463_v17 = vsub.f32 %v20571_v61, %v11429_v48 }
0x1d13   : > { %16512 = vpow2.f32 %v11475_v3 }
0x1d14   : > { %v11487_v10 = vmul.f32 1.442695, %v11464_v4  ;;  %v11485_v5 = vmul.f32 1.442695, %v11463_v17 }
0x1d15   : > { %v11423_v34 = vpop.xlane.xlu1 %11422  ;;  %v11426_v36 = vpop.xlane.xlu0 %11425 }
0x1d16   : > { %16514 = vpow2.f32 %v11487_v10  ;;  %v11461_v9 = vsub.f32 %v20579_v33, %v11423_v34  ;;  %v11462_v16 = vsub.f32 %v20585_v40, %v11426_v36 }
0x1d17   : > { %v20641_v50 = vpop.eup %16506  ;;  %16516 = vpow2.f32 %v11485_v5 }
0x1d18   : > { %v11481_v51 = vmul.f32 1.442695, %v11461_v9  ;;  %v11483_v31 = vmul.f32 1.442695, %v11462_v16  ;;  %v11511_v39 = vsel %vm1261_vm5, %v20641_v50, 0.0 }
0x1d19   : > { %v11441_v24 = vpop.xlane.xlu1 %11440  ;;  %v11444_v61 = vpop.xlane.xlu0 %11443  ;;  %11512 = vadd.xlane.f32.xlu1 %v11511_v39 }
0x1d1a   : > { %16518 = vpow2.f32 %v11481_v51  ;;  %v11467_v12 = vsub.f32 %v20587_v60, %v11441_v24  ;;  %v11468_v22 = vsub.f32 %v20593_v62, %v11444_v61 }
0x1d1b   : > { %v20647_v37 = vpop.eup %16508  ;;  %16520 = vpow2.f32 %v11483_v31 }
0x1d1c   : > { %v11493_v33 = vmul.f32 1.442695, %v11467_v12  ;;  %v11495_v40 = vmul.f32 1.442695, %v11468_v22  ;;  %v11505_v3 = vsel %vm1261_vm5, %v20647_v37, 0.0 }
0x1d1d   : > { %v11435_v15 = vpop.xlane.xlu1 %11434  ;;  %v11438_v48 = vpop.xlane.xlu0 %11437  ;;  %11506 = vadd.xlane.f32.xlu1 %v11505_v3 }
0x1d1e   : > { %16522 = vpow2.f32 %v11493_v33  ;;  %v11465_v4 = vsub.f32 %v20595_v19, %v11435_v15  ;;  %v11466_v17 = vsub.f32 %v20601_v14, %v11438_v48 }
0x1d1f   : > { %v20653_v10 = vpop.eup %16510  ;;  %16524 = vpow2.f32 %v11495_v40 }
0x1d20   : > { %v11489_v60 = vmul.f32 1.442695, %v11465_v4  ;;  %v11491_v62 = vmul.f32 1.442695, %v11466_v17  ;;  %v11514_v5 = vsel %vm1261_vm5, %v20653_v10, 0.0  ;;  %v20657_v34 = vpop.eup %16512 }
0x1d21   : > { %v11453_v36 = vpop.xlane.xlu1 %11452  ;;  %v11456_v9 = vpop.xlane.xlu0 %11455  ;;  %11515 = vadd.xlane.f32.xlu0 %v11514_v5  ;;  %v11508_v24 = vsel %vm1261_vm5, %v20657_v34, 0.0 }
0x1d22   : > { %16526 = vpow2.f32 %v11489_v60  ;;  %v11471_v16 = vsub.f32 %v20603_v28, %v11453_v36  ;;  %v11472_v19 = vsub.f32 %v20609_v52, %v11456_v9 }
0x1d23   : > { %v20661_v51 = vpop.eup %16514  ;;  %16528 = vpow2.f32 %v11491_v62 }
0x1d24   : > { %v20663_v14 = vpop.eup %16516  ;;  %v11501_v31 = vmul.f32 1.442695, %v11471_v16  ;;  %v11503_v39 = vmul.f32 1.442695, %v11472_v19  ;;  %v11526_v40 = vsel %vm1261_vm5, %v20661_v51, 0.0 }
0x1d25   : > { %v11523_v61 = vsel %vm1261_vm5, %v20663_v14, 0.0  ;;  %v11447_v12 = vpop.xlane.xlu1 %11446  ;;  %11509 = vadd.xlane.f32.xlu0 %v11508_v24  ;;  %v11450_v22 = vpop.xlane.xlu0 %11449 }
0x1d26   : > { %16530 = vpow2.f32 %v11501_v31  ;;  %11524 = vadd.xlane.f32.xlu1 %v11523_v61  ;;  %v11469_v52 = vsub.f32 %v20611_v58, %v11447_v12  ;;  %v11470_v28 = vsub.f32 %v20617_v2, %v11450_v22 }
0x1d27   : > { %v20671_v33 = vpop.eup %16518  ;;  %16532 = vpow2.f32 %v11503_v39 }
0x1d28   : > { %v11497_v3 = vmul.f32 1.442695, %v11469_v52  ;;  %v11499_v15 = vmul.f32 1.442695, %v11470_v28  ;;  %v11517_v48 = vsel %vm1261_vm5, %v20671_v33, 0.0  ;;  %v20677_v4 = vpop.eup %16520 }
0x1d29   : > { %11527 = vadd.xlane.f32.xlu0 %v11526_v40  ;;  %v11641_v17 = vpop.permute.xlu0 %11640  ;;  %v11520_v60 = vsel %vm1261_vm5, %v20677_v4, 0.0  ;;  %v21856_v40 = vpack.i.bf16 %v20178_v45, %v20174_v20  ;;  %v21860_v20 = vld [vmem:[#allocation13_spill] sm:$0xff]  ;;  %v21862_v45 = vld [vmem:[#allocation14_spill] sm:$0xff] }
0x1d2a   : > { %16534 = vpow2.f32 %v11497_v3  ;;  %11518 = vadd.xlane.f32.xlu1 %v11517_v48  ;;  %15551 = vmatpush3.bf16.msra.mxu1 %v11641_v17  ;;  %v21857_v3 = vpack.i.bf16 %v20190_v21, %v20184_v23  ;;  %v11688_v21 = vpop.permute.xlu1 %11687 }
0x1d2b   : > { %v20679_v58 = vpop.eup %16522  ;;  %15562 = vmatprep.subr.bf16.mxu1 %v21739_v63  ;;  %16536 = vpow2.f32 %v11499_v15 }
0x1d2c   : > { %v11535_v2 = vsel %vm1261_vm5, %v20679_v58, 0.0  ;;  %v20686_v62 = vpop.eup %16524 }
0x1d2d   : > { %11521 = vadd.xlane.f32.xlu0 %v11520_v60  ;;  %v11538_v9 = vsel %vm1261_vm5, %v20686_v62, 0.0 }
0x1d2e   : > { %11536 = vadd.xlane.f32.xlu1 %v11535_v2  ;;  %v11735_v18 = vpop.permute.xlu1 %11734 }
0x1d2f   : > { %v20688_v5 = vpop.eup %16526 }
0x1d30   : > { %v11529_v36 = vsel %vm1261_vm5, %v20688_v5, 0.0  ;;  %v20694_v16 = vpop.eup %16528 }
0x1d31   : > { %11539 = vadd.xlane.f32.xlu0 %v11538_v9  ;;  %v11532_v39 = vsel %vm1261_vm5, %v20694_v16, 0.0 }
0x1d32   : > { %11530 = vadd.xlane.f32.xlu1 %v11529_v36  ;;  %v11829_v49 = vpop.permute.xlu1 %11828 }
0x1d33   : > { %v20696_v19 = vpop.eup %16530 }
0x1d34   : > { %v11547_v31 = vsel %vm1261_vm5, %v20696_v19, 0.0  ;;  %v20702_v24 = vpop.eup %16532 }
0x1d35   : > { %11533 = vadd.xlane.f32.xlu0 %v11532_v39  ;;  %v11550_v22 = vsel %vm1261_vm5, %v20702_v24, 0.0 }
0x1d36   : > { %11548 = vadd.xlane.f32.xlu1 %v11547_v31 }
0x1d37   : > { %v20704_v61 = vpop.eup %16534 }
0x1d38   : > { %v11541_v12 = vsel %vm1261_vm5, %v20704_v61, 0.0  ;;  %v20710_v52 = vpop.eup %16536 }
0x1d39   : > { %11551 = vadd.xlane.f32.xlu0 %v11550_v22  ;;  %v11544_v28 = vsel %vm1261_vm5, %v20710_v52, 0.0 }
0x1d3a   : > { %11542 = vadd.xlane.f32.xlu1 %v11541_v12 }
0x1d3d   : > { %11545 = vadd.xlane.f32.xlu0 %v11544_v28 }
0x1d4b   : > { %11922 = vrot.lane.b32.xlu1 %v19575_v8, %s21854_s7  ;;  %v21858_v8 = vpack.i.bf16 %v20182_v25, %v20176_v1  ;;  %v21861_v1 = vpack.i.bf16 %v20194_v55, %v21860_v20  ;;  %v21863_v25 = vld [vmem:[#allocation12_spill] sm:$0xff] }
0x1d4c   : > { %v21864_v23 = vpack.i.bf16 %v21862_v45, %v21863_v25 }
0x1d4f   : > { %15840 = vrot.lane.b32.xlu1 %v21856_v40, %s21855_s4 }
0x1d53   : > { %15850 = vrot.lane.b32.xlu1 %v15849_v30, %s21764_s2  ;;  %11875 = vrot.lane.b32.xlu0 %v19577_v38, %s21854_s7  ;;  %v21859_v38 = vpack.i.bf16 %v20202_v26, %v20196_v32  ;;  %v20758_v26 = vpop.permute.xlu0 %11781 }
0x1d57   : > { %15860 = vrot.lane.b32.xlu1 %v21857_v3, %s21855_s4  ;;  %15835 = vrot.lane.b32.xlu0 %v21858_v8, %s21855_s4 }
0x1d5b   : > { %15870 = vrot.lane.b32.xlu1 %v15869_v11, %s21764_s2  ;;  %15845 = vrot.lane.b32.xlu0 %v15844_v35, %s21764_s2 }
0x1d5f   : > { %15880 = vrot.lane.b32.xlu1 %v21859_v38, %s21855_s4  ;;  %15855 = vrot.lane.b32.xlu0 %v21861_v1, %s21855_s4 }
0x1d63   : > { %15865 = vrot.lane.b32.xlu0 %v15864_v54, %s21764_s2 }
0x1d67   : > { %15875 = vrot.lane.b32.xlu0 %v21864_v23, %s21855_s4 }
0x1da2   : > { %v11513_v32 = vpop.xlane.xlu1 %11512 }
0x1da3   : > { %16538 = vrcp.f32 %v11513_v32 }
0x1da6   : > { %v11507_v57 = vpop.xlane.xlu1 %11506 }
0x1daa   : > { %v11516_v55 = vpop.xlane.xlu0 %11515 }
0x1dab   : > { %16540 = vrcp.f32 %v11516_v55 }
0x1dac   : > { %16542 = vrcp.f32 %v11507_v57 }
0x1dae   : > { %v11510_v30 = vpop.xlane.xlu0 %11509 }
0x1daf   : > { %v11525_v27 = vpop.xlane.xlu1 %11524  ;;  %16544 = vrcp.f32 %v11510_v30 }
0x1db0   : > { %16546 = vrcp.f32 %v11525_v27  ;;  %v16539_v46 = vpop.eup %16538 }
0x1db1   : > { %v11571_v54 = vmul.f32 %v16539_v46, %v20641_v50 }
0x1db2   : > { %v11528_v43 = vpop.xlane.xlu0 %11527 }
0x1db3   : > { %v11519_v35 = vpop.xlane.xlu1 %11518  ;;  %16548 = vrcp.f32 %v11528_v43 }
0x1db4   : > { %16550 = vrcp.f32 %v11519_v35 }
0x1db6   : > { %v11522_v41 = vpop.xlane.xlu0 %11521 }
0x1db7   : > { %v11537_v11 = vpop.xlane.xlu1 %11536  ;;  %16552 = vrcp.f32 %v11522_v41 }
0x1db8   : > { %v16541_v29 = vpop.eup %16540  ;;  %16554 = vrcp.f32 %v11537_v11 }
0x1db9   : > { %v11572_v15 = vmul.f32 %v16541_v29, %v20653_v10  ;;  %v16543_v48 = vpop.eup %16542 }
0x1dba   : > { %v11540_v17 = vpop.xlane.xlu0 %11539  ;;  %v11569_v9 = vmul.f32 %v16543_v48, %v20647_v37 }
0x1dbb   : > { %v11531_v2 = vpop.xlane.xlu1 %11530  ;;  %16556 = vrcp.f32 %v11540_v17  ;;  %v11586_v60 = vpack.c.bf16 %v11572_v15, %v11571_v54 }
0x1dbc   : > { %v16545_v36 = vpop.eup %16544  ;;  %16558 = vrcp.f32 %v11531_v2 }
0x1dbd   : > { %v11570_v31 = vmul.f32 %v16545_v36, %v20657_v34  ;;  %15553 = vmatmul.mubr.msk.bf16.vlgmr.msra.gmra.mxu1 %vm1261_vm5, %v11586_v60  ;;  %v16547_v39 = vpop.eup %16546 }
0x1dbe   : > { %15563 = vmatpush3.bf16.msra.mxu1 %v11735_v18  ;;  %v11534_v12 = vpop.xlane.xlu0 %11533  ;;  %15564 = vmatprep.mubr.msk.bf16.mxu1 %vm16647_vm7, %v21739_v63  ;;  %v11575_v28 = vmul.f32 %v16547_v39, %v20663_v14 }
0x1dbf   : > { %v11549_v50 = vpop.xlane.xlu1 %11548  ;;  %16560 = vrcp.f32 %v11534_v12  ;;  %v11585_v10 = vpack.c.bf16 %v11570_v31, %v11569_v9  ;;  %15574 = vmatprep.subr.bf16.mxu1 %v21739_v63 }
0x1dc0   : > { %v16549_v22 = vpop.eup %16548  ;;  %16562 = vrcp.f32 %v11549_v50 }
0x1dc1   : > { %v11576_v37 = vmul.f32 %v16549_v22, %v20661_v51  ;;  %15547 = vmatmul.mubr.msk.bf16.vlgmr.msra.gmra.mxu0 %vm1261_vm5, %v11585_v10  ;;  %v16551_v34 = vpop.eup %16550 }
0x1dc2   : > { %15557 = vmatpush3.bf16.msra.mxu0 %v11688_v21  ;;  %v11552_v40 = vpop.xlane.xlu0 %11551  ;;  %15558 = vmatprep.mubr.msk.bf16.mxu0 %vm16647_vm7, %v21739_v63  ;;  %v11573_v20 = vmul.f32 %v16551_v34, %v20671_v33 }
0x1dc3   : > { %v11543_v3 = vpop.xlane.xlu1 %11542  ;;  %16564 = vrcp.f32 %v11552_v40  ;;  %v11588_v8 = vpack.c.bf16 %v11576_v37, %v11575_v28  ;;  %15568 = vmatprep.subr.bf16.mxu0 %v21739_v63 }
0x1dc4   : > { %v16553_v38 = vpop.eup %16552  ;;  %16566 = vrcp.f32 %v11543_v3 }
0x1dc5   : > { %v11574_v14 = vmul.f32 %v16553_v38, %v20677_v4  ;;  %15565 = vmatmul.mubr.msk.bf16.vlgmr.msra.gmra.mxu1 %vm1261_vm5, %v11588_v8  ;;  %v16555_v51 = vpop.eup %16554 }
0x1dc6   : > { %15575 = vmatpush3.bf16.msra.mxu1 %v11829_v49  ;;  %v11546_v1 = vpop.xlane.xlu0 %11545  ;;  %15576 = vmatprep.mubr.msk.bf16.mxu1 %vm16647_vm7, %v21739_v63  ;;  %v11579_v23 = vmul.f32 %v16555_v51, %v20679_v58 }
0x1dc7   : > { %16568 = vrcp.f32 %v11546_v1  ;;  %v11587_v45 = vpack.c.bf16 %v11574_v14, %v11573_v20  ;;  %15586 = vmatprep.subr.bf16.mxu1 %v21739_v63  ;;  %v11923_v57 = vpop.permute.xlu1 %11922 }
0x1dc8   : > { %v16557_v25 = vpop.eup %16556 }
0x1dc9   : > { %v11580_v33 = vmul.f32 %v16557_v25, %v20686_v62  ;;  %15559 = vmatmul.mubr.msk.bf16.vlgmr.msra.gmra.mxu0 %vm1261_vm5, %v11587_v45  ;;  %v16559_v4 = vpop.eup %16558 }
0x1dca   : > { %15569 = vmatpush3.bf16.msra.mxu0 %v20758_v26  ;;  %15570 = vmatprep.mubr.msk.bf16.mxu0 %vm16647_vm7, %v21739_v63  ;;  %v11577_v49 = vmul.f32 %v16559_v4, %v20688_v5  ;;  %v11876_v27 = vpop.permute.xlu0 %11875 }
0x1dcb   : > { %v11590_v21 = vpack.c.bf16 %v11580_v33, %v11579_v23  ;;  %15580 = vmatprep.subr.bf16.mxu0 %v21739_v63  ;;  %v21872_v23 = vpack.i.bf16 %v20551_v47, %v20545_v0  ;;  %v15841_v0 = vpop.permute.xlu1 %15840 }
0x1dcc   : > { %v16561_v18 = vpop.eup %16560 }
0x1dcd   : > { %v11578_v32 = vmul.f32 %v16561_v18, %v20694_v16  ;;  %15577 = vmatmul.mubr.msk.bf16.vlgmr.msra.gmra.mxu1 %vm1261_vm5, %v11590_v21  ;;  %v16563_v58 = vpop.eup %16562 }
0x1dce   : > { %15587 = vmatpush3.bf16.msra.mxu1 %v11923_v57  ;;  %15588 = vmatprep.mubr.msk.bf16.mxu1 %vm16647_vm7, %v21739_v63  ;;  %v11583_v55 = vmul.f32 %v16563_v58, %v20696_v19  ;;  %v15983_v19 = vld [vmem:[%s21618_s15 + $0x18] sm:$0xff]   ;;  %v15836_v47 = vpop.permute.xlu0 %15835 }
0x1dcf   : > { %v11589_v62 = vpack.c.bf16 %v11578_v32, %v11577_v49  ;;  %v21873_v32 = vpack.i.bf16 %v20555_v6, %v20549_v53  ;;  %v15837_v53 = vunpack.i.l.bf16 %v15836_v47 }
0x1dd0   : > { %v16565_v26 = vpop.eup %16564 }
0x1dd1   : > { %v11584_v30 = vmul.f32 %v16565_v26, %v20702_v24  ;;  %15571 = vmatmul.mubr.msk.bf16.vlgmr.msra.gmra.mxu0 %vm1261_vm5, %v11589_v62  ;;  %v16567_v5 = vpop.eup %16566  ;;  %v15851_v26 = vpop.permute.xlu1 %15850 }
0x1dd2   : > { %15581 = vmatpush3.bf16.msra.mxu0 %v11876_v27  ;;  %15582 = vmatprep.mubr.msk.bf16.mxu0 %vm16647_vm7, %v21739_v63  ;;  %v11581_v35 = vmul.f32 %v16567_v5, %v20704_v61  ;;  %v15984_v63 = vld [vmem:[%s21618_s15 + $0x10] sm:$0xff]  }
0x1dd3   : > { %v11592_v16 = vpack.c.bf16 %v11584_v30, %v11583_v55  ;;  %15592 = vmatprep.subr.bf16.mxu0 %v15983_v19  ;;  %v15846_v55 = vpop.permute.xlu0 %15845 }
0x1dd4   : > { %v16569_v43 = vpop.eup %16568 }
0x1dd5   : > { %v11582_v46 = vmul.f32 %v16569_v43, %v20710_v52  ;;  %15589 = vmatmul.mubr.msk.bf16.vlgmr.msra.gmra.mxu1 %vm1261_vm5, %v11592_v16  ;;  %v15861_v30 = vpop.permute.xlu1 %15860 }
0x1dd7   : > { %v11591_v41 = vpack.c.bf16 %v11582_v46, %v11581_v35  ;;  %v15856_v27 = vpop.permute.xlu0 %15855  ;;  %v15843_v35 = vunpack.i.h.bf16 %v15841_v0  ;;  %v15842_v46 = vunpack.i.l.bf16 %v15841_v0 }
0x1dd9   : > { %15583 = vmatmul.mubr.msk.bf16.vlgmr.msra.gmra.mxu0 %vm1261_vm5, %v11591_v41  ;;  %v15871_v5 = vpop.permute.xlu1 %15870  ;;  %v15838_v41 = vunpack.i.h.bf16 %v15836_v47 }
0x1dda   : > { %15593 = vmatpush3.bf16.msra.mxu0 %v15983_v19 }
0x1ddb   : > { %15594 = vmatprep.subr.bf16.mxu0 %v15984_v63  ;;  %v15866_v16 = vpop.permute.xlu0 %15865 }
0x1ddd   : > { %v20839_v43 = vpop.permute.xlu1 %15880 }
0x1dde   : > { %15595 = vmatpush3.bf16.msra.mxu0 %v15984_v63  ;;  %v15853_v63 = vunpack.i.h.bf16 %v15851_v26 }
0x1ddf   : > { %v20841_v6 = vpop.permute.xlu0 %15875 }
0x1e7d   : > { %v11680_v24 = vpop.f32.mrf.mxu1 }
0x1e7f   : > { %v15554_v61 = vpop.f32.mrf.mxu1 }
0x1e80   : > { %v15848_v61 = vunpack.i.h.bf16 %v15846_v55 }
0x1e81   : > { %v11633_v52 = vpop.f32.mrf.mxu0  ;;  %v11683_v11 = vpop.f32.mrf.mxu1 }
0x1e82   : > { %v15884_v29 = vpack.i.bf16 %v11683_v11, %v11680_v24  ;;  %v15852_v24 = vunpack.i.l.bf16 %v15851_v26 }
0x1e83   : > { %v15548_v54 = vpop.f32.mrf.mxu0  ;;  %v15555_v15 = vpop.f32.mrf.mxu1 }
0x1e84   : > { %15885 = vrot.lane.b32.xlu1 %v15884_v29, %s21865_s9  ;;  %v21874_v54 = vld [vmem:[#allocation28_spill] sm:$0xff] }
0x1e85   : > { %v11636_v48 = vpop.f32.mrf.mxu0  ;;  %v11774_v17 = vpop.f32.mrf.mxu1  ;;  %v12164_v15 = vsel %vm1016_vm4, %v21874_v54, %v15843_v35 }
0x1e86   : > { %v15889_v2 = vpack.i.bf16 %v11636_v48, %v11633_v52  ;;  %v15847_v52 = vunpack.i.l.bf16 %v15846_v55  ;;  %v21875_v48 = vld [vmem:[#allocation27_spill] sm:$0xff] }
0x1e87   : > { %v15549_v60 = vpop.f32.mrf.mxu0  ;;  %v15566_v36 = vpop.f32.mrf.mxu1 }
0x1e88   : > { %15900 = vrot.lane.b32.xlu1 %v15899_v7, %s21764_s2  ;;  %15890 = vrot.lane.b32.xlu0 %v15889_v2, %s21865_s9  ;;  %v21867_v7 = vld [vmem:[#allocation15_spill] sm:$0xff]  ;;  %v21876_v2 = vld [vmem:[#allocation33_spill] sm:$0xff]  ;;  %v21877_v36 = vld [vmem:[#allocation30_spill] sm:$0xff] }
0x1e89   : > { %v11727_v9 = vpop.f32.mrf.mxu0  ;;  %v11777_v31 = vpop.f32.mrf.mxu1  ;;  %v21868_v34 = vpack.i.bf16 %v21866_v13, %v21867_v7  ;;  %v12162_v60 = vsel %vm1016_vm4, %v21876_v2, %v15838_v41  ;;  %v15863_v7 = vunpack.i.h.bf16 %v15861_v30 }
0x1e8a   : > { %v15904_v39 = vpack.i.bf16 %v11777_v31, %v11774_v17  ;;  %v12163_v17 = vsel %vm1016_vm4, %v21875_v48, %v15842_v46  ;;  %v15883_v46 = vunpack.i.h.bf16 %v20839_v43 }
0x1e8b   : > { %v15560_v12 = vpop.f32.mrf.mxu0  ;;  %v15567_v50 = vpop.f32.mrf.mxu1 }
0x1e8c   : > { %15905 = vrot.lane.b32.xlu1 %v15904_v39, %s21865_s9  ;;  %15895 = vrot.lane.b32.xlu0 %v15894_v44, %s21764_s2  ;;  %v21871_v44 = vpack.i.bf16 %v21869_v59, %v21870_v42  ;;  %v12179_v12 = vsel %vm1261_vm5, %v12163_v17, %v15852_v24  ;;  %v12180_v50 = vsel %vm1261_vm5, %v12164_v15, %v15853_v63  ;;  %v15878_v63 = vunpack.i.h.bf16 %v20841_v6 }
0x1e8d   : > { %v11730_v10 = vpop.f32.mrf.mxu0  ;;  %v11868_v22 = vpop.f32.mrf.mxu1  ;;  %v15877_v24 = vunpack.i.l.bf16 %v20841_v6  ;;  %v21883_v6 = vld [vmem:[#allocation5_spill] sm:$0xff] }
0x1e8e   : > { %v15909_v28 = vpack.i.bf16 %v11730_v10, %v11727_v9  ;;  %v12161_v9 = vsel %vm1016_vm4, %v21877_v36, %v15837_v53 }
0x1e8f   : > { %v15561_v37 = vpop.f32.mrf.mxu0  ;;  %v15578_v56 = vpop.f32.mrf.mxu1 }
0x1e90   : > { %15920 = vrot.lane.b32.xlu1 %v21868_v34, %s21855_s4  ;;  %15910 = vrot.lane.b32.xlu0 %v15909_v28, %s21865_s9  ;;  %v12177_v28 = vsel %vm1261_vm5, %v12161_v9, %v15847_v52  ;;  %v12178_v37 = vsel %vm1261_vm5, %v12162_v60, %v15848_v61 }
0x1e91   : > { %v11821_v40 = vpop.f32.mrf.mxu0  ;;  %v11871_v3 = vpop.f32.mrf.mxu1 }
0x1e92   : > { %v15924_v8 = vpack.i.bf16 %v11871_v3, %v11868_v22  ;;  %v15862_v3 = vunpack.i.l.bf16 %v15861_v30 }
0x1e93   : > { %v15572_v38 = vpop.f32.mrf.mxu0  ;;  %v15579_v20 = vpop.f32.mrf.mxu1 }
0x1e94   : > { %15925 = vrot.lane.b32.xlu1 %v15924_v8, %s21865_s9  ;;  %15915 = vrot.lane.b32.xlu0 %v21871_v44, %s21855_s4  ;;  %v15858_v8 = vunpack.i.h.bf16 %v15856_v27  ;;  %v15857_v38 = vunpack.i.l.bf16 %v15856_v27  ;;  %v15873_v44 = vunpack.i.h.bf16 %v15871_v5 }
0x1e95   : > { %v11824_v14 = vpop.f32.mrf.mxu0  ;;  %v11962_v51 = vpop.f32.mrf.mxu1 }
0x1e96   : > { %v15929_v1 = vpack.i.bf16 %v11824_v14, %v11821_v40  ;;  %v15872_v14 = vunpack.i.l.bf16 %v15871_v5 }
0x1e97   : > { %v15573_v45 = vpop.f32.mrf.mxu0  ;;  %v15590_v25 = vpop.f32.mrf.mxu1 }
0x1e98   : > { %15940 = vrot.lane.b32.xlu1 %v21872_v23, %s21764_s2  ;;  %15930 = vrot.lane.b32.xlu0 %v15929_v1, %s21865_s9  ;;  %v15868_v1 = vunpack.i.h.bf16 %v15866_v16  ;;  %v15867_v45 = vunpack.i.l.bf16 %v15866_v16 }
0x1e99   : > { %v11915_v33 = vpop.f32.mrf.mxu0  ;;  %v11965_v4 = vpop.f32.mrf.mxu1 }
0x1e9a   : > { %v15949_v21 = vpack.i.bf16 %v11965_v4, %v11962_v51 }
0x1e9b   : > { %v15584_v18 = vpop.f32.mrf.mxu0  ;;  %v15591_v49 = vpop.f32.mrf.mxu1 }
0x1e9c   : > { %15950 = vrot.lane.b32.xlu1 %v15949_v21, %s21865_s9  ;;  %15935 = vrot.lane.b32.xlu0 %v21873_v32, %s21764_s2  ;;  %v21879_v21 = vld [vmem:[#allocation31_spill] sm:$0xff] }
0x1e9d   : > { %v11918_v57 = vpop.f32.mrf.mxu0  ;;  %v12167_v18 = vsel %vm1016_vm4, %v21879_v21, %v15862_v3  ;;  %v21880_v49 = vld [vmem:[#allocation3_spill] sm:$0xff] }
0x1e9e   : > { %v15944_v58 = vpack.i.bf16 %v11918_v57, %v11915_v33  ;;  %v21878_v33 = vld [vmem:[#allocation32_spill] sm:$0xff]  ;;  %v12166_v32 = vsel %vm1016_vm4, %v21880_v49, %v15858_v8  ;;  %v21881_v57 = vld [vmem:[#allocation34_spill] sm:$0xff]  ;;  %v12183_v47 = vsel %vm1261_vm5, %v12167_v18, %v15872_v14 }
0x1e9f   : > { %v15585_v62 = vpop.f32.mrf.mxu0  ;;  %v12168_v4 = vsel %vm1016_vm4, %v21878_v33, %v15863_v7  ;;  %v12182_v5 = vsel %vm1261_vm5, %v12166_v32, %v15868_v1  ;;  %v21886_v49 = vld [vmem:[#allocation10_spill] sm:$0xff] }
0x1ea0   : > { %15945 = vrot.lane.b32.xlu0 %v15944_v58, %s21865_s9  ;;  %v12165_v58 = vsel %vm1016_vm4, %v21881_v57, %v15857_v38  ;;  %v12184_v26 = vsel %vm1261_vm5, %v12168_v4, %v15873_v44  ;;  %v21887_v57 = vld [vmem:[#allocation9_spill] sm:$0xff]  ;;  %s21551_s9 = scalar_lea.vmem %s21630_s27, %s21906_s8 }
0x1ea1   : > { %v12181_v27 = vsel %vm1261_vm5, %v12165_v58, %v15867_v45 }
0x1ef6   : > { %v15886_v19 = vpop.permute.xlu1 %15885 }
0x1ef7   : > { %v15888_v11 = vunpack.i.h.bf16 %v15886_v19  ;;  %v15887_v29 = vunpack.i.l.bf16 %v15886_v19  ;;  %v15882_v19 = vunpack.i.l.bf16 %v20839_v43  ;;  %v21882_v43 = vld [vmem:[#allocation6_spill] sm:$0xff] }
0x1ef8   : > { %v12172_v36 = vsel %vm1016_vm4, %v21882_v43, %v15883_v46  ;;  %v21891_v43 = vld [vmem:[#allocation36_spill] sm:$0xff] }
0x1ef9   : > { %v12196_v56 = vsel %vm6316_vm8, %v12180_v50, %v15888_v11  ;;  %v12195_v13 = vsel %vm6316_vm8, %v12179_v12, %v15887_v29  ;;  %v12171_v9 = vsel %vm1016_vm4, %v21883_v6, %v15882_v19  ;;  %v21885_v50 = vld [vmem:[#allocation4_spill] sm:$0xff] }
0x1efa   : > { %v20851_v31 = vpop.permute.xlu1 %15900  ;;  %v15891_v39 = vpop.permute.xlu0 %15890  ;;  %v12210_v51 = vpack.c.bf16 %v12196_v56, %v12195_v13 }
0x1efb   : > { %v15893_v10 = vunpack.i.h.bf16 %v15891_v39  ;;  %v15892_v22 = vunpack.i.l.bf16 %v15891_v39  ;;  %v15903_v29 = vunpack.i.h.bf16 %v20851_v31  ;;  %v15902_v54 = vunpack.i.l.bf16 %v20851_v31  ;;  %v21884_v39 = vld [vmem:[#allocation7_spill] sm:$0xff] }
0x1efc   : > { %v12170_v12 = vsel %vm1016_vm4, %v21884_v39, %v15878_v63  ;;  %v12169_v31 = vsel %vm1016_vm4, %v21885_v50, %v15877_v24  ;;  %v21892_v50 = vld [vmem:[#allocation37_spill] sm:$0xff] }
0x1efd   : > { %v12194_v34 = vsel %vm6316_vm8, %v12178_v37, %v15893_v10  ;;  %v12193_v40 = vsel %vm6316_vm8, %v12177_v28, %v15892_v22  ;;  %v12188_v28 = vsel %vm1261_vm5, %v12172_v36, %v15903_v29  ;;  %v12187_v37 = vsel %vm1261_vm5, %v12171_v9, %v15902_v54 }
0x1efe   : > { %v12209_v20 = vpack.c.bf16 %v12194_v34, %v12193_v40  ;;  %v15906_v59 = vpop.permute.xlu1 %15905  ;;  %v15896_v42 = vpop.permute.xlu0 %15895 }
0x1eff   : > { %v15908_v25 = vunpack.i.h.bf16 %v15906_v59  ;;  %v15907_v23 = vunpack.i.l.bf16 %v15906_v59  ;;  %v15898_v48 = vunpack.i.h.bf16 %v15896_v42  ;;  %v15897_v17 = vunpack.i.l.bf16 %v15896_v42 }
0x1f00   : > { %15596 = vmatprep.mubr.msk.bf16.mxu0 %vm1505_vm6, %v12209_v20 }
0x1f01   : > { %15597 = vmatmul.mubr.msk.bf16.vlgmr.msra.gmra.mxu0 %vm1505_vm6, %v12210_v51  ;;  %v12200_v16 = vsel %vm6316_vm8, %v12184_v26, %v15908_v25  ;;  %v12199_v35 = vsel %vm6316_vm8, %v12183_v47, %v15907_v23  ;;  %v12186_v7 = vsel %vm1261_vm5, %v12170_v12, %v15898_v48  ;;  %v12185_v34 = vsel %vm1261_vm5, %v12169_v31, %v15897_v17  ;;  %v21889_v47 = vld [vmem:[#allocation8_spill] sm:$0xff]  ;;  %v21890_v17 = vld [vmem:[#allocation35_spill] sm:$0xff] }
0x1f02   : > { %v20871_v62 = vpop.permute.xlu1 %15920  ;;  %v15911_v0 = vpop.permute.xlu0 %15910  ;;  %v12212_v15 = vpack.c.bf16 %v12200_v16, %v12199_v35 }
0x1f03   : > { %v15913_v55 = vunpack.i.h.bf16 %v15911_v0  ;;  %v15912_v30 = vunpack.i.l.bf16 %v15911_v0  ;;  %v15923_v8 = vunpack.i.h.bf16 %v20871_v62  ;;  %v15922_v59 = vunpack.i.l.bf16 %v20871_v62  ;;  %v21888_v62 = vld [vmem:[#allocation11_spill] sm:$0xff] }
0x1f05   : > { %v12198_v41 = vsel %vm6316_vm8, %v12182_v5, %v15913_v55  ;;  %v12197_v53 = vsel %vm6316_vm8, %v12181_v27, %v15912_v30  ;;  %v12176_v32 = vsel %vm1016_vm4, %v21886_v49, %v15923_v8  ;;  %v12175_v58 = vsel %vm1016_vm4, %v21887_v57, %v15922_v59  ;;  %v21895_v8 = vld [vmem:[#allocation39_spill] sm:$0xff] }
0x1f06   : > { %v12211_v61 = vpack.c.bf16 %v12198_v41, %v12197_v53  ;;  %v15926_v52 = vpop.permute.xlu1 %15925  ;;  %v15916_v11 = vpop.permute.xlu0 %15915  ;;  %v21898_v57 = vld [vmem:[#allocation19_spill] sm:$0xff] }
0x1f07   : > { %v15928_v2 = vunpack.i.h.bf16 %v15926_v52  ;;  %v15927_v60 = vunpack.i.l.bf16 %v15926_v52  ;;  %v15918_v42 = vunpack.i.h.bf16 %v15916_v11  ;;  %v15917_v44 = vunpack.i.l.bf16 %v15916_v11  ;;  %v20930_v11 = vld [vmem:[%s21619_s16 + $0x1] ss:$0 sm:$0xff] }
0x1f08   : > { %15600 = vmatprep.mubr.msk.bf16.mxu0 %vm1505_vm6, %v12211_v61 }
0x1f09   : > { %15601 = vmatmul.mubr.msk.bf16.gmra.mxu0 %vm1505_vm6, %v12212_v15  ;;  %v12204_v40 = vsel %vm6316_vm8, %v12188_v28, %v15928_v2  ;;  %v12203_v3 = vsel %vm6316_vm8, %v12187_v37, %v15927_v60  ;;  %v12174_v0 = vsel %vm1016_vm4, %v21888_v62, %v15918_v42  ;;  %v12173_v26 = vsel %vm1016_vm4, %v21889_v47, %v15917_v44  ;;  %v21893_v28 = vld [vmem:[#allocation40_spill] sm:$0xff] }
0x1f0a   : > { %v15941_v10 = vpop.permute.xlu1 %15940  ;;  %v15931_v22 = vpop.permute.xlu0 %15930  ;;  %v12214_v45 = vpack.c.bf16 %v12204_v40, %v12203_v3  ;;  %v21894_v40 = vld [vmem:[#allocation38_spill] sm:$0xff]  ;;  %v21899_v47 = vld [vmem:[#allocation20_spill] sm:$0xff] }
0x1f0b   : > { %v15933_v56 = vunpack.i.h.bf16 %v15931_v22  ;;  %v15932_v13 = vunpack.i.l.bf16 %v15931_v22  ;;  %v15943_v25 = vunpack.i.h.bf16 %v15941_v10  ;;  %v15942_v23 = vunpack.i.l.bf16 %v15941_v10 }
0x1f0d   : > { %v12202_v38 = vsel %vm6316_vm8, %v12186_v7, %v15933_v56  ;;  %v12201_v20 = vsel %vm6316_vm8, %v12185_v34, %v15932_v13  ;;  %v12192_v30 = vsel %vm1261_vm5, %v12176_v32, %v15943_v25  ;;  %v12191_v27 = vsel %vm1261_vm5, %v12175_v58, %v15942_v23 }
0x1f0e   : > { %v12213_v14 = vpack.c.bf16 %v12202_v38, %v12201_v20  ;;  %v15951_v51 = vpop.permute.xlu1 %15950  ;;  %v15936_v1 = vpop.permute.xlu0 %15935 }
0x1f0f   : > { %v15953_v33 = vunpack.i.h.bf16 %v15951_v51  ;;  %v15952_v4 = vunpack.i.l.bf16 %v15951_v51  ;;  %v15938_v21 = vunpack.i.h.bf16 %v15936_v1  ;;  %v15937_v18 = vunpack.i.l.bf16 %v15936_v1  ;;  %v21896_v1 = vld [vmem:[#allocation41_spill] sm:$0xff] }
0x1f10   : > { %15604 = vmatprep.mubr.msk.bf16.mxu0 %vm1505_vm6, %v12213_v14 }
0x1f11   : > { %15605 = vmatmul.mubr.msk.bf16.gmra.mxu0 %vm1505_vm6, %v12214_v45  ;;  %v12208_v35 = vsel %vm6316_vm8, %v12192_v30, %v15953_v33  ;;  %v12207_v46 = vsel %vm6316_vm8, %v12191_v27, %v15952_v4  ;;  %v12190_v41 = vsel %vm1261_vm5, %v12174_v0, %v15938_v21  ;;  %v12189_v53 = vsel %vm1261_vm5, %v12173_v26, %v15937_v18  ;;  %v21897_v33 = vld [vmem:[#allocation21_spill] sm:$0xff] }
0x1f12   : > { %v15946_v55 = vpop.permute.xlu0 %15945  ;;  %v12216_v61 = vpack.c.bf16 %v12208_v35, %v12207_v46  ;;  %v21901_v46 = vld [vmem:[#allocation25_spill] sm:$0xff] }
0x1f13   : > { %v15948_v5 = vunpack.i.h.bf16 %v15946_v55  ;;  %v15947_v16 = vunpack.i.l.bf16 %v15946_v55 }
0x1f15   : > { %v12206_v19 = vsel %vm6316_vm8, %v12190_v41, %v15948_v5  ;;  %v12205_v63 = vsel %vm6316_vm8, %v12189_v53, %v15947_v16  ;;  %v21900_v16 = vld [vmem:[#allocation22_spill] sm:$0xff] }
0x1f16   : > { %v12215_v24 = vpack.c.bf16 %v12206_v19, %v12205_v63 }
0x1f18   : > { %15608 = vmatprep.mubr.msk.bf16.mxu0 %vm1505_vm6, %v12215_v24 }
0x1f19   : > { %15609 = vmatmul.mubr.msk.bf16.gmra.mxu0 %vm1505_vm6, %v12216_v61 }
0x1fc1   : > { %v15598_v52 = vpop.f32.mrf.mxu0 }
0x1fc2   : > { %v12309_v54 = vadd.f32 %v15598_v52, %v20930_v11 }
0x1fc3   : > { %v12300_v29 = vpop.f32.mrf.mxu0 }
0x1fc4   : > { %v12301_v15 = vadd.f32 %v20930_v11, %v12300_v29  ;;  %v20938_v36 = vadd.f32 %v12309_v54, %v21891_v43  ;;  %v21902_v29 = vld [vmem:[#allocation23_spill] sm:$0xff] }
0x1fc5   : > { %v15599_v48 = vpop.f32.mrf.mxu0 }
0x1fc6   : > { %v20935_v2 = vadd.f32 %v12301_v15, %v21890_v17  ;;  %v12312_v6 = vadd.f32 %v15599_v48, %v20930_v11  ;;  %v12385_v7 = vsel %vm1505_vm6, %v20938_v36, 0.0  ;;  %v21903_v17 = vld [vmem:[#allocation24_spill] sm:$0xff] }
0x1fc7   : > { %v12303_v60 = vpop.f32.mrf.mxu0 }
0x1fc8   : > { %v12304_v9 = vadd.f32 %v20930_v11, %v12303_v60  ;;  %v12379_v39 = vsel %vm1505_vm6, %v20935_v2, 0.0  ;;  %v20949_v37 = vadd.f32 %v12312_v6, %v21893_v28 }
0x1fc9   : > { %v15602_v12 = vpop.f32.mrf.mxu0  ;;  %12380 = vadd.xlane.f32.xlu0 %v12379_v39  ;;  %v21904_v39 = vld [vmem:[#allocation26_spill] sm:$0xff] }
0x1fca   : > { %v20945_v31 = vadd.f32 %v12304_v9, %v21892_v50  ;;  %v12325_v10 = vadd.f32 %v15602_v12, %v20930_v11  ;;  %v12388_v14 = vsel %vm1505_vm6, %v20949_v37, 0.0  ;;  %v21905_v50 = vld [vmem:[#allocation29_spill] sm:$0xff] }
0x1fcb   : > { %v12316_v22 = vpop.f32.mrf.mxu0 }
0x1fcc   : > { %v12317_v56 = vadd.f32 %v20930_v11, %v12316_v22  ;;  %v12382_v13 = vsel %vm1505_vm6, %v20945_v31, 0.0  ;;  %v20960_v38 = vadd.f32 %v12325_v10, %v21895_v8 }
0x1fcd   : > { %v15603_v34 = vpop.f32.mrf.mxu0  ;;  %12383 = vadd.xlane.f32.xlu1 %v12382_v13  ;;  %12386 = vadd.xlane.f32.xlu0 %v12385_v7 }
0x1fce   : > { %v20957_v3 = vadd.f32 %v12317_v56, %v21894_v40  ;;  %v12328_v59 = vadd.f32 %v15603_v34, %v20930_v11  ;;  %v12397_v23 = vsel %vm1505_vm6, %v20960_v38, 0.0 }
0x1fcf   : > { %v12319_v20 = vpop.f32.mrf.mxu0 }
0x1fd0   : > { %v12320_v42 = vadd.f32 %v20930_v11, %v12319_v20  ;;  %v12391_v44 = vsel %vm1505_vm6, %v20957_v3, 0.0  ;;  %v20974_v4 = vadd.f32 %v12328_v59, %v21897_v33 }
0x1fd1   : > { %v15606_v51 = vpop.f32.mrf.mxu0  ;;  %12392 = vadd.xlane.f32.xlu1 %v12391_v44  ;;  %12389 = vadd.xlane.f32.xlu0 %v12388_v14 }
0x1fd2   : > { %v20969_v45 = vadd.f32 %v12320_v42, %v21896_v1  ;;  %v12341_v21 = vadd.f32 %v15606_v51, %v20930_v11  ;;  %v12400_v27 = vsel %vm1505_vm6, %v20974_v4, 0.0 }
0x1fd3   : > { %v12332_v25 = vpop.f32.mrf.mxu0 }
0x1fd4   : > { %v12333_v18 = vadd.f32 %v20930_v11, %v12332_v25  ;;  %v12394_v49 = vsel %vm1505_vm6, %v20969_v45, 0.0  ;;  %v20985_v26 = vadd.f32 %v12341_v21, %v21899_v47 }
0x1fd5   : > { %v15607_v32 = vpop.f32.mrf.mxu0  ;;  %12398 = vadd.xlane.f32.xlu1 %v12397_v23  ;;  %12395 = vadd.xlane.f32.xlu0 %v12394_v49 }
0x1fd6   : > { %v20981_v58 = vadd.f32 %v12333_v18, %v21898_v57  ;;  %v12344_v62 = vadd.f32 %v15607_v32, %v20930_v11  ;;  %v12409_v24 = vsel %vm1505_vm6, %v20985_v26, 0.0 }
0x1fd7   : > { %v12335_v0 = vpop.f32.mrf.mxu0 }
0x1fd8   : > { %v12336_v55 = vadd.f32 %v20930_v11, %v12335_v0  ;;  %v12403_v30 = vsel %vm1505_vm6, %v20981_v58, 0.0  ;;  %v20996_v41 = vadd.f32 %v12344_v62, %v21901_v46 }
0x1fd9   : > { %v15610_v5 = vpop.f32.mrf.mxu0  ;;  %12404 = vadd.xlane.f32.xlu1 %v12403_v30  ;;  %12401 = vadd.xlane.f32.xlu0 %v12400_v27 }
0x1fda   : > { %v20993_v35 = vadd.f32 %v12336_v55, %v21900_v16  ;;  %v12357_v19 = vadd.f32 %v15610_v5, %v20930_v11  ;;  %v12412_v48 = vsel %vm1505_vm6, %v20996_v41, 0.0 }
0x1fdb   : > { %v12348_v53 = vpop.f32.mrf.mxu0 }
0x1fdc   : > { %v12349_v63 = vadd.f32 %v20930_v11, %v12348_v53  ;;  %v12406_v61 = vsel %vm1505_vm6, %v20993_v35, 0.0  ;;  %v21010_v60 = vadd.f32 %v12357_v19, %v21903_v17 }
0x1fdd   : > { %v15611_v52 = vpop.f32.mrf.mxu0  ;;  %12410 = vadd.xlane.f32.xlu1 %v12409_v24  ;;  %12407 = vadd.xlane.f32.xlu0 %v12406_v61 }
0x1fde   : > { %v21005_v54 = vadd.f32 %v12349_v63, %v21902_v29  ;;  %v12360_v43 = vadd.f32 %v15611_v52, %v20930_v11  ;;  %v12421_v22 = vsel %vm1505_vm6, %v21010_v60, 0.0 }
0x1fdf   : > { %v12351_v15 = vpop.f32.mrf.mxu0 }
0x1fe0   : > { %v12352_v6 = vadd.f32 %v20930_v11, %v12351_v15  ;;  %v12415_v9 = vsel %vm1505_vm6, %v21005_v54, 0.0  ;;  %v21020_v10 = vadd.f32 %v12360_v43, %v21905_v50 }
0x1fe1   : > { %12416 = vadd.xlane.f32.xlu1 %v12415_v9  ;;  %12413 = vadd.xlane.f32.xlu0 %v12412_v48 }
0x1fe2   : > { %v21017_v12 = vadd.f32 %v12352_v6, %v21904_v39  ;;  %v12424_v11 = vsel %vm1505_vm6, %v21020_v10, 0.0 }
0x1fe4   : > { %v12418_v28 = vsel %vm1505_vm6, %v21017_v12, 0.0 }
0x1fe5   : > { %12422 = vadd.xlane.f32.xlu1 %v12421_v22  ;;  %12419 = vadd.xlane.f32.xlu0 %v12418_v28 }
0x1fe9   : > { %12425 = vadd.xlane.f32.xlu0 %v12424_v11 }
0x2052   : > { %v12381_v56 = vpop.xlane.xlu0 %12380 }
0x2053   : > { %v12427_v13 = vmul.f32 0.03125, %v12381_v56 }
0x2055   : > { %v21029_v7 = vsub.f32 %v20935_v2, %v12427_v13 }
0x2056   : > { %v12384_v34 = vpop.xlane.xlu1 %12383  ;;  %v12387_v40 = vpop.xlane.xlu0 %12386 }
0x2057   : > { %v12428_v8 = vmul.f32 0.03125, %v12384_v34  ;;  %v12429_v20 = vmul.f32 0.03125, %v12387_v40  ;;  %v12459_v59 = vmul.f32 %v21029_v7, %v21029_v7 }
0x2059   : > { %v21034_v42 = vsub.f32 %v20945_v31, %v12428_v8  ;;  %v21037_v44 = vsub.f32 %v20938_v36, %v12429_v20  ;;  %v12475_v14 = vsel %vm1505_vm6, %v12459_v59, 0.0 }
0x205a   : > { %v12393_v51 = vpop.xlane.xlu1 %12392  ;;  %12476 = vadd.xlane.f32.xlu1 %v12475_v14  ;;  %v12390_v1 = vpop.xlane.xlu0 %12389 }
0x205b   : > { %v12431_v2 = vmul.f32 0.03125, %v12393_v51  ;;  %v12430_v25 = vmul.f32 0.03125, %v12390_v1  ;;  %v12460_v23 = vmul.f32 %v21034_v42, %v21034_v42  ;;  %v12461_v33 = vmul.f32 %v21037_v44, %v21037_v44 }
0x205d   : > { %v21045_v21 = vsub.f32 %v20957_v3, %v12431_v2  ;;  %v21048_v31 = vsub.f32 %v20949_v37, %v12430_v25  ;;  %v12478_v36 = vsel %vm1505_vm6, %v12460_v23, 0.0  ;;  %v12481_v18 = vsel %vm1505_vm6, %v12461_v33, 0.0 }
0x205e   : > { %v12399_v49 = vpop.xlane.xlu1 %12398  ;;  %12479 = vadd.xlane.f32.xlu0 %v12478_v36  ;;  %12482 = vadd.xlane.f32.xlu1 %v12481_v18  ;;  %v12396_v32 = vpop.xlane.xlu0 %12395 }
0x205f   : > { %v12433_v57 = vmul.f32 0.03125, %v12399_v49  ;;  %v12432_v62 = vmul.f32 0.03125, %v12396_v32  ;;  %v12463_v0 = vmul.f32 %v21045_v21, %v21045_v21  ;;  %v12462_v3 = vmul.f32 %v21048_v31, %v21048_v31  ;;  %v15985_v32 = vld [vmem:[%s21620_s17 + $0x18] sm:$0xff]  }
0x2060   : > { %15612 = vmatprep.subr.bf16.mxu1 %v15985_v32 }
0x2061   : > { %v21057_v47 = vsub.f32 %v20960_v38, %v12433_v57  ;;  %v21060_v37 = vsub.f32 %v20969_v45, %v12432_v62  ;;  %v12487_v55 = vsel %vm1505_vm6, %v12463_v0, 0.0  ;;  %v12484_v30 = vsel %vm1505_vm6, %v12462_v3, 0.0  ;;  %15613 = vmatpush3.bf16.msra.mxu1 %v15985_v32  ;;  %v15987_v57 = vld [vmem:[%s21622_s19 + $0x38] sm:$0xff]  }
0x2062   : > { %v12405_v27 = vpop.xlane.xlu1 %12404  ;;  %12488 = vadd.xlane.f32.xlu1 %v12487_v55  ;;  %12485 = vadd.xlane.f32.xlu0 %v12484_v30  ;;  %v12402_v5 = vpop.xlane.xlu0 %12401 }
0x2063   : > { %v12435_v16 = vmul.f32 0.03125, %v12405_v27  ;;  %v12434_v46 = vmul.f32 0.03125, %v12402_v5  ;;  %v12465_v53 = vmul.f32 %v21057_v47, %v21057_v47  ;;  %v12464_v38 = vmul.f32 %v21060_v37, %v21060_v37  ;;  %15632 = vmatprep.subr.bf16.mxu0 %v15987_v57 }
0x2064   : > { %15633 = vmatpush3.bf16.msra.mxu0 %v15987_v57 }
0x2065   : > { %v21069_v19 = vsub.f32 %v20981_v58, %v12435_v16  ;;  %v21072_v45 = vsub.f32 %v20974_v4, %v12434_v46  ;;  %v12493_v63 = vsel %vm1505_vm6, %v12465_v53, 0.0  ;;  %v12490_v24 = vsel %vm1505_vm6, %v12464_v38, 0.0 }
0x2066   : > { %v12411_v61 = vpop.xlane.xlu1 %12410  ;;  %12494 = vadd.xlane.f32.xlu1 %v12493_v63  ;;  %12491 = vadd.xlane.f32.xlu0 %v12490_v24  ;;  %v12408_v52 = vpop.xlane.xlu0 %12407 }
0x2067   : > { %v12437_v29 = vmul.f32 0.03125, %v12411_v61  ;;  %v12436_v15 = vmul.f32 0.03125, %v12408_v52  ;;  %v12467_v48 = vmul.f32 %v21069_v19, %v21069_v19  ;;  %v12466_v58 = vmul.f32 %v21072_v45, %v21072_v45 }
0x2069   : > { %v21081_v17 = vsub.f32 %v20985_v26, %v12437_v29  ;;  %v21084_v4 = vsub.f32 %v20993_v35, %v12436_v15  ;;  %v12499_v43 = vsel %vm1505_vm6, %v12467_v48, 0.0  ;;  %v12496_v6 = vsel %vm1505_vm6, %v12466_v58, 0.0 }
0x206a   : > { %v12417_v9 = vpop.xlane.xlu1 %12416  ;;  %12500 = vadd.xlane.f32.xlu1 %v12499_v43  ;;  %12497 = vadd.xlane.f32.xlu0 %v12496_v6  ;;  %v12414_v39 = vpop.xlane.xlu0 %12413 }
0x206b   : > { %v12439_v50 = vmul.f32 0.03125, %v12417_v9  ;;  %v12438_v22 = vmul.f32 0.03125, %v12414_v39  ;;  %v12469_v28 = vmul.f32 %v21081_v17, %v21081_v17  ;;  %v12468_v26 = vmul.f32 %v21084_v4, %v21084_v4 }
0x206d   : > { %v21093_v11 = vsub.f32 %v21005_v54, %v12439_v50  ;;  %v21096_v35 = vsub.f32 %v20996_v41, %v12438_v22  ;;  %v12505_v56 = vsel %vm1505_vm6, %v12469_v28, 0.0  ;;  %v12502_v13 = vsel %vm1505_vm6, %v12468_v26, 0.0 }
0x206e   : > { %v12423_v34 = vpop.xlane.xlu1 %12422  ;;  %12506 = vadd.xlane.f32.xlu1 %v12505_v56  ;;  %12503 = vadd.xlane.f32.xlu0 %v12502_v13  ;;  %v12420_v40 = vpop.xlane.xlu0 %12419 }
0x206f   : > { %v12441_v8 = vmul.f32 0.03125, %v12423_v34  ;;  %v12440_v20 = vmul.f32 0.03125, %v12420_v40  ;;  %v12471_v59 = vmul.f32 %v21093_v11, %v21093_v11  ;;  %v12470_v54 = vmul.f32 %v21096_v35, %v21096_v35 }
0x2071   : > { %v21105_v14 = vsub.f32 %v21010_v60, %v12441_v8  ;;  %v21108_v41 = vsub.f32 %v21017_v12, %v12440_v20  ;;  %v12511_v51 = vsel %vm1505_vm6, %v12471_v59, 0.0  ;;  %v12508_v1 = vsel %vm1505_vm6, %v12470_v54, 0.0  ;;  %v21137_v8 = vld [vmem:[%s21624_s21 + $0x1] ss:$0 sm:$0xff] }
0x2072   : > { %12512 = vadd.xlane.f32.xlu1 %v12511_v51  ;;  %12509 = vadd.xlane.f32.xlu0 %v12508_v1  ;;  %v12426_v2 = vpop.xlane.xlu0 %12425 }
0x2073   : > { %v12442_v25 = vmul.f32 0.03125, %v12426_v2  ;;  %v12473_v23 = vmul.f32 %v21105_v14, %v21105_v14  ;;  %v12472_v33 = vmul.f32 %v21108_v41, %v21108_v41 }
0x2075   : > { %v21117_v60 = vsub.f32 %v21020_v10, %v12442_v25  ;;  %v12517_v12 = vsel %vm1505_vm6, %v12473_v23, 0.0  ;;  %v12514_v36 = vsel %vm1505_vm6, %v12472_v33, 0.0  ;;  %v15986_v10 = vld [vmem:[%s21620_s17 + $0x10] sm:$0xff]  }
0x2076   : > { %12518 = vadd.xlane.f32.xlu1 %v12517_v12  ;;  %12515 = vadd.xlane.f32.xlu0 %v12514_v36 }
0x2077   : > { %v12474_v18 = vmul.f32 %v21117_v60, %v21117_v60  ;;  %15614 = vmatprep.subr.bf16.mxu1 %v15986_v10 }
0x2078   : > { %15615 = vmatpush3.bf16.msra.mxu1 %v15986_v10 }
0x2079   : > { %v12520_v49 = vsel %vm1505_vm6, %v12474_v18, 0.0 }
0x207a   : > { %12521 = vadd.xlane.f32.xlu0 %v12520_v49  ;;  %v21145_v49 = vld [vmem:[%s21625_s22 + $0x1] ss:$0 sm:$0xff] }
0x20e3   : > { %v12477_v62 = vpop.xlane.xlu1 %12476 }
0x20e4   : > { %v12523_v0 = vmul.f32 0.03125, %v12477_v62 }
0x20e6   : > { %v12539_v3 = vadd.f32 1e-05, %v12523_v0 }
0x20e7   : > { %v12483_v55 = vpop.xlane.xlu1 %12482  ;;  %v12480_v30 = vpop.xlane.xlu0 %12479 }
0x20e8   : > { %16570 = vrsqrt.f32 %v12539_v3  ;;  %v12525_v27 = vmul.f32 0.03125, %v12483_v55  ;;  %v12524_v5 = vmul.f32 0.03125, %v12480_v30 }
0x20ea   : > { %v12541_v16 = vadd.f32 1e-05, %v12525_v27  ;;  %v12540_v46 = vadd.f32 1e-05, %v12524_v5 }
0x20eb   : > { %v12489_v53 = vpop.xlane.xlu1 %12488  ;;  %v12486_v38 = vpop.xlane.xlu0 %12485 }
0x20ec   : > { %16572 = vrsqrt.f32 %v12541_v16  ;;  %v12527_v63 = vmul.f32 0.03125, %v12489_v53  ;;  %v12526_v24 = vmul.f32 0.03125, %v12486_v38 }
0x20ed   : > { %16574 = vrsqrt.f32 %v12540_v46 }
0x20ee   : > { %v12543_v61 = vadd.f32 1e-05, %v12527_v63  ;;  %v12542_v52 = vadd.f32 1e-05, %v12526_v24 }
0x20ef   : > { %v12495_v29 = vpop.xlane.xlu1 %12494  ;;  %v12492_v15 = vpop.xlane.xlu0 %12491 }
0x20f0   : > { %16576 = vrsqrt.f32 %v12543_v61  ;;  %v12529_v48 = vmul.f32 0.03125, %v12495_v29  ;;  %v12528_v58 = vmul.f32 0.03125, %v12492_v15 }
0x20f1   : > { %16578 = vrsqrt.f32 %v12542_v52 }
0x20f2   : > { %v12545_v43 = vadd.f32 1e-05, %v12529_v48  ;;  %v12544_v6 = vadd.f32 1e-05, %v12528_v58 }
0x20f3   : > { %v12501_v9 = vpop.xlane.xlu1 %12500  ;;  %v12498_v39 = vpop.xlane.xlu0 %12497 }
0x20f4   : > { %16580 = vrsqrt.f32 %v12545_v43  ;;  %v12531_v50 = vmul.f32 0.03125, %v12501_v9  ;;  %v12530_v22 = vmul.f32 0.03125, %v12498_v39 }
0x20f5   : > { %v16571_v28 = vpop.eup %16570  ;;  %16582 = vrsqrt.f32 %v12544_v6 }
0x20f6   : > { %v12547_v26 = vadd.f32 1e-05, %v12531_v50  ;;  %v12546_v56 = vadd.f32 1e-05, %v12530_v22  ;;  %v12571_v40 = vmul.f32 %v16571_v28, %v21029_v7 }
0x20f7   : > { %v12507_v13 = vpop.xlane.xlu1 %12506  ;;  %v12504_v34 = vpop.xlane.xlu0 %12503 }
0x20f8   : > { %16584 = vrsqrt.f32 %v12547_v26  ;;  %v12533_v20 = vmul.f32 0.03125, %v12507_v13  ;;  %v12532_v59 = vmul.f32 0.03125, %v12504_v34  ;;  %v12593_v7 = vmul.f32 %v21137_v8, %v12571_v40 }
0x20f9   : > { %v16573_v54 = vpop.eup %16572  ;;  %16586 = vrsqrt.f32 %v12546_v56 }
0x20fa   : > { %v16575_v51 = vpop.eup %16574  ;;  %v12573_v1 = vmul.f32 %v16573_v54, %v21037_v44  ;;  %v12549_v2 = vadd.f32 1e-05, %v12533_v20  ;;  %v12548_v25 = vadd.f32 1e-05, %v12532_v59  ;;  %v21151_v30 = vadd.f32 %v21145_v49, %v12593_v7 }
0x20fb   : > { %v12513_v23 = vpop.xlane.xlu1 %12512  ;;  %v12510_v33 = vpop.xlane.xlu0 %12509  ;;  %v12572_v12 = vmul.f32 %v16575_v51, %v21034_v42 }
0x20fc   : > { %16588 = vrsqrt.f32 %v12549_v2  ;;  %v12535_v36 = vmul.f32 0.03125, %v12513_v23  ;;  %v12534_v18 = vmul.f32 0.03125, %v12510_v33  ;;  %v12595_v57 = vmul.f32 %v21137_v8, %v12573_v1 }
0x20fd   : > { %v16577_v32 = vpop.eup %16576  ;;  %16590 = vrsqrt.f32 %v12548_v25  ;;  %v12594_v44 = vmul.f32 %v21137_v8, %v12572_v12 }
0x20fe   : > { %v16579_v10 = vpop.eup %16578  ;;  %v12551_v62 = vadd.f32 1e-05, %v12535_v36  ;;  %v12550_v0 = vadd.f32 1e-05, %v12534_v18  ;;  %v12575_v5 = vmul.f32 %v16577_v32, %v21045_v21  ;;  %v21161_v52 = vadd.f32 %v21145_v49, %v12595_v57 }
0x20ff   : > { %v12574_v42 = vmul.f32 %v16579_v10, %v21048_v31  ;;  %v12519_v3 = vpop.xlane.xlu1 %12518  ;;  %v12516_v55 = vpop.xlane.xlu0 %12515  ;;  %v21154_v27 = vadd.f32 %v21145_v49, %v12594_v44 }
0x2100   : > { %16592 = vrsqrt.f32 %v12551_v62  ;;  %v12537_v16 = vmul.f32 0.03125, %v12519_v3  ;;  %v12536_v46 = vmul.f32 0.03125, %v12516_v55  ;;  %v12597_v58 = vmul.f32 %v21137_v8, %v12575_v5 }
0x2101   : > { %v16581_v53 = vpop.eup %16580  ;;  %v12596_v38 = vmul.f32 %v21137_v8, %v12574_v42  ;;  %16594 = vrsqrt.f32 %v12550_v0  ;;  %v12631_v31 = vpack.c.bf16 %v21154_v27, %v21151_v30 }
0x2102   : > { %v16583_v63 = vpop.eup %16582  ;;  %v12553_v24 = vadd.f32 1e-05, %v12537_v16  ;;  %v12552_v61 = vadd.f32 1e-05, %v12536_v46  ;;  %v12577_v29 = vmul.f32 %v16581_v53, %v21057_v47 }
0x2103   : > { %15616 = vmatprep.mubr.msk.bf16.mxu1 %vm1505_vm6, %v12631_v31  ;;  %v12522_v21 = vpop.xlane.xlu0 %12521  ;;  %v21166_v15 = vadd.f32 %v21145_v49, %v12596_v38  ;;  %v12576_v48 = vmul.f32 %v16583_v63, %v21060_v37  ;;  %v21177_v37 = vadd.f32 %v21145_v49, %v12597_v58  ;;  %v15988_v31 = vld [vmem:[%s21622_s19 + $0x30] sm:$0xff]   ;;  %v15989_v63 = vld [vmem:[%s21622_s19 + $0x28] sm:$0xff]  }
0x2104   : > { %16596 = vrsqrt.f32 %v12553_v24  ;;  %v12538_v43 = vmul.f32 0.03125, %v12522_v21  ;;  %v12599_v56 = vmul.f32 %v21137_v8, %v12577_v29  ;;  %15634 = vmatprep.subr.bf16.mxu0 %v15988_v31  ;;  %v15990_v24 = vld [vmem:[%s21622_s19 + $0x20] sm:$0xff]  }
0x2105   : > { %v16585_v6 = vpop.eup %16584  ;;  %16598 = vrsqrt.f32 %v12552_v61  ;;  %v12632_v9 = vpack.c.bf16 %v21166_v15, %v21161_v52  ;;  %v12598_v39 = vmul.f32 %v21137_v8, %v12576_v48  ;;  %15635 = vmatpush3.bf16.msra.mxu0 %v15988_v31  ;;  %v13984_v21 = vld [vmem:[%s21621_s18 + $0x1] ss:$0 sm:$0xff] }
0x2106   : > { %v16587_v47 = vpop.eup %16586  ;;  %v12554_v50 = vadd.f32 1e-05, %v12538_v43  ;;  %v12579_v22 = vmul.f32 %v16585_v6, %v21069_v19  ;;  %v21190_v59 = vadd.f32 %v21145_v49, %v12599_v56  ;;  %15636 = vmatprep.subr.bf16.mxu0 %v15989_v63 }
0x2107   : > { %v12578_v28 = vmul.f32 %v16587_v47, %v21072_v45  ;;  %15617 = vmatmul.mubr.msk.bf16.vlgmr.msra.gmra.mxu1 %vm1505_vm6, %v12632_v9  ;;  %v21180_v26 = vadd.f32 %v21145_v49, %v12598_v39 }
0x2108   : > { %16600 = vrsqrt.f32 %v12554_v50  ;;  %v12601_v45 = vmul.f32 %v21137_v8, %v12579_v22 }
0x2109   : > { %v16589_v13 = vpop.eup %16588  ;;  %v12633_v34 = vpack.c.bf16 %v21180_v26, %v21177_v37  ;;  %v12600_v40 = vmul.f32 %v21137_v8, %v12578_v28  ;;  %15637 = vmatpush3.bf16.msra.mxu0 %v15989_v63 }
0x210a   : > { %v16591_v19 = vpop.eup %16590  ;;  %v12581_v20 = vmul.f32 %v16589_v13, %v21081_v17  ;;  %v21200_v33 = vadd.f32 %v21145_v49, %v12601_v45  ;;  %15638 = vmatprep.subr.bf16.mxu0 %v15990_v24 }
0x210b   : > { %15620 = vmatprep.mubr.msk.bf16.mxu1 %vm1505_vm6, %v12633_v34  ;;  %v21193_v54 = vadd.f32 %v21145_v49, %v12600_v40  ;;  %v12580_v51 = vmul.f32 %v16591_v19, %v21084_v4 }
0x210c   : > { %v12603_v7 = vmul.f32 %v21137_v8, %v12581_v20 }
0x210d   : > { %v16593_v1 = vpop.eup %16592  ;;  %v12634_v2 = vpack.c.bf16 %v21193_v54, %v21190_v59  ;;  %v12602_v25 = vmul.f32 %v21137_v8, %v12580_v51  ;;  %15639 = vmatpush3.bf16.msra.mxu0 %v15990_v24 }
0x210e   : > { %v16595_v23 = vpop.eup %16594  ;;  %v12583_v4 = vmul.f32 %v16593_v1, %v21093_v11 }
0x210f   : > { %v12582_v17 = vmul.f32 %v16595_v23, %v21096_v35  ;;  %15621 = vmatmul.mubr.msk.bf16.gmra.mxu1 %vm1505_vm6, %v12634_v2  ;;  %v21205_v12 = vadd.f32 %v21145_v49, %v12602_v25  ;;  %v21215_v35 = vadd.f32 %v21145_v49, %v12603_v7 }
0x2110   : > { %v12605_v11 = vmul.f32 %v21137_v8, %v12583_v4 }
0x2111   : > { %v16597_v36 = vpop.eup %16596  ;;  %v12635_v18 = vpack.c.bf16 %v21205_v12, %v21200_v33  ;;  %v12604_v32 = vmul.f32 %v21137_v8, %v12582_v17 }
0x2112   : > { %v16599_v44 = vpop.eup %16598  ;;  %v12585_v10 = vmul.f32 %v16597_v36, %v21105_v14  ;;  %v21229_v5 = vadd.f32 %v21145_v49, %v12605_v11 }
0x2113   : > { %15624 = vmatprep.mubr.msk.bf16.mxu1 %vm1505_vm6, %v12635_v18  ;;  %v21218_v57 = vadd.f32 %v21145_v49, %v12604_v32  ;;  %v12584_v62 = vmul.f32 %v16599_v44, %v21108_v41 }
0x2114   : > { %v12607_v55 = vmul.f32 %v21137_v8, %v12585_v10 }
0x2115   : > { %v16601_v0 = vpop.eup %16600  ;;  %v12636_v42 = vpack.c.bf16 %v21218_v57, %v21215_v35  ;;  %v12606_v3 = vmul.f32 %v21137_v8, %v12584_v62 }
0x2116   : > { %v12586_v14 = vmul.f32 %v16601_v0, %v21117_v60  ;;  %v21238_v53 = vadd.f32 %v21145_v49, %v12607_v55 }
0x2117   : > { %15625 = vmatmul.mubr.msk.bf16.gmra.mxu1 %vm1505_vm6, %v12636_v42  ;;  %v21232_v16 = vadd.f32 %v21145_v49, %v12606_v3 }
0x2118   : > { %v12608_v41 = vmul.f32 %v21137_v8, %v12586_v14 }
0x2119   : > { %v12637_v46 = vpack.c.bf16 %v21232_v16, %v21229_v5 }
0x211a   : > { %v21241_v60 = vadd.f32 %v21145_v49, %v12608_v41 }
0x211b   : > { %15628 = vmatprep.mubr.msk.bf16.mxu1 %vm1505_vm6, %v12637_v46 }
0x211c   : > { %v12638_v38 = vpack.c.bf16 %v21241_v60, %v21238_v53 }
0x211f   : > { %15629 = vmatmul.mubr.msk.bf16.gmra.mxu1 %vm1505_vm6, %v12638_v38 }
0x21c7   : > { %v15618_v61 = vpop.f32.mrf.mxu1 }
0x21c8   : > { %v12731_v6 = vadd.f32 %v15618_v61, %v13984_v21 }
0x21c9   : > { %v12722_v29 = vpop.f32.mrf.mxu1 }
0x21ca   : > { %v12723_v58 = vadd.f32 %v13984_v21, %v12722_v29  ;;  %v12787_v56 = vmax.f32 %v12731_v6, 0.0 }
0x21cb   : > { %v15619_v48 = vpop.f32.mrf.mxu1 }
0x21cc   : > { %v12734_v43 = vadd.f32 %v15619_v48, %v13984_v21  ;;  %v12785_v22 = vmax.f32 %v12723_v58, 0.0 }
0x21cd   : > { %v12725_v9 = vpop.f32.mrf.mxu1 }
0x21ce   : > { %v12726_v39 = vadd.f32 %v13984_v21, %v12725_v9  ;;  %v12788_v47 = vmax.f32 %v12734_v43, 0.0 }
0x21cf   : > { %v15622_v50 = vpop.f32.mrf.mxu1 }
0x21d0   : > { %v12786_v28 = vmax.f32 %v12726_v39, 0.0  ;;  %v12802_v40 = vpack.c.bf16 %v12788_v47, %v12787_v56  ;;  %v12747_v51 = vadd.f32 %v15622_v50, %v13984_v21  ;;  %v21270_v56 = vld [vmem:[%s21623_s20 + $0x1] ss:$0 sm:$0xff] }
0x21d1   : > { %v12738_v13 = vpop.f32.mrf.mxu1 }
0x21d2   : > { %v12801_v34 = vpack.c.bf16 %v12786_v28, %v12785_v22  ;;  %v12739_v45 = vadd.f32 %v13984_v21, %v12738_v13  ;;  %v12791_v4 = vmax.f32 %v12747_v51, 0.0 }
0x21d3   : > { %v15623_v19 = vpop.f32.mrf.mxu1 }
0x21d4   : > { %v12750_v20 = vadd.f32 %v15623_v19, %v13984_v21  ;;  %15640 = vmatprep.mubr.msk.bf16.mxu0 %vm6969_vm9, %v12801_v34  ;;  %v12789_v17 = vmax.f32 %v12739_v45, 0.0 }
0x21d5   : > { %v12741_v1 = vpop.f32.mrf.mxu1  ;;  %15641 = vmatmul.mubr.msk.bf16.vlgmr.msra.gmra.mxu0 %vm6969_vm9, %v12802_v40 }
0x21d6   : > { %v12742_v2 = vadd.f32 %v13984_v21, %v12741_v1  ;;  %v12792_v25 = vmax.f32 %v12750_v20, 0.0 }
0x21d7   : > { %v15626_v23 = vpop.f32.mrf.mxu1 }
0x21d8   : > { %v12790_v7 = vmax.f32 %v12742_v2, 0.0  ;;  %v12804_v32 = vpack.c.bf16 %v12792_v25, %v12791_v4  ;;  %v12763_v11 = vadd.f32 %v15626_v23, %v13984_v21 }
0x21d9   : > { %v12754_v36 = vpop.f32.mrf.mxu1 }
0x21da   : > { %v12803_v18 = vpack.c.bf16 %v12790_v7, %v12789_v17  ;;  %v12755_v10 = vadd.f32 %v13984_v21, %v12754_v36  ;;  %v12795_v46 = vmax.f32 %v12763_v11, 0.0 }
0x21db   : > { %v15627_v44 = vpop.f32.mrf.mxu1 }
0x21dc   : > { %v12766_v62 = vadd.f32 %v15627_v44, %v13984_v21  ;;  %15644 = vmatprep.mubr.msk.bf16.mxu0 %vm6969_vm9, %v12803_v18  ;;  %v12793_v55 = vmax.f32 %v12755_v10, 0.0 }
0x21dd   : > { %v12757_v0 = vpop.f32.mrf.mxu1  ;;  %15645 = vmatmul.mubr.msk.bf16.gmra.mxu0 %vm6969_vm9, %v12804_v32 }
0x21de   : > { %v12758_v42 = vadd.f32 %v13984_v21, %v12757_v0  ;;  %v12796_v3 = vmax.f32 %v12766_v62, 0.0 }
0x21df   : > { %v15630_v14 = vpop.f32.mrf.mxu1 }
0x21e0   : > { %v12794_v41 = vmax.f32 %v12758_v42, 0.0  ;;  %v12806_v63 = vpack.c.bf16 %v12796_v3, %v12795_v46  ;;  %v12779_v48 = vadd.f32 %v15630_v14, %v13984_v21 }
0x21e1   : > { %v12770_v38 = vpop.f32.mrf.mxu1 }
0x21e2   : > { %v12805_v31 = vpack.c.bf16 %v12794_v41, %v12793_v55  ;;  %v12771_v61 = vadd.f32 %v13984_v21, %v12770_v38  ;;  %v12799_v47 = vmax.f32 %v12779_v48, 0.0 }
0x21e3   : > { %v15631_v24 = vpop.f32.mrf.mxu1 }
0x21e4   : > { %v12782_v29 = vadd.f32 %v15631_v24, %v13984_v21  ;;  %15648 = vmatprep.mubr.msk.bf16.mxu0 %vm6969_vm9, %v12805_v31  ;;  %v12797_v9 = vmax.f32 %v12771_v61, 0.0 }
0x21e5   : > { %v12773_v58 = vpop.f32.mrf.mxu1  ;;  %15649 = vmatmul.mubr.msk.bf16.gmra.mxu0 %vm6969_vm9, %v12806_v63 }
0x21e6   : > { %v12774_v43 = vadd.f32 %v13984_v21, %v12773_v58  ;;  %v12800_v6 = vmax.f32 %v12782_v29, 0.0 }
0x21e8   : > { %v12798_v39 = vmax.f32 %v12774_v43, 0.0  ;;  %v12808_v22 = vpack.c.bf16 %v12800_v6, %v12799_v47 }
0x21ea   : > { %v12807_v50 = vpack.c.bf16 %v12798_v39, %v12797_v9 }
0x21ec   : > { %15652 = vmatprep.mubr.msk.bf16.mxu0 %vm6969_vm9, %v12807_v50 }
0x21ed   : > { %15653 = vmatmul.mubr.msk.bf16.gmra.mxu0 %vm6969_vm9, %v12808_v22 }
0x2295   : > { %v15642_v28 = vpop.f32.mrf.mxu0 }
0x2296   : > { %v12917_v34 = vadd.f32 %v15642_v28, %v21270_v56 }
0x2297   : > { %v12908_v13 = vpop.f32.mrf.mxu0 }
0x2298   : > { %v12909_v21 = vadd.f32 %v21270_v56, %v12908_v13  ;;  %v21278_v20 = vadd.f32 %v12917_v34, %v21161_v52 }
0x2299   : > { %v15643_v40 = vpop.f32.mrf.mxu0 }
0x229a   : > { %v21275_v19 = vadd.f32 %v12909_v21, %v21151_v30  ;;  %v12920_v51 = vadd.f32 %v15643_v40, %v21270_v56  ;;  %v12993_v36 = vsel %vm1505_vm6, %v21278_v20, 0.0 }
0x229b   : > { %v12911_v45 = vpop.f32.mrf.mxu0 }
0x229c   : > { %v12912_v1 = vadd.f32 %v21270_v56, %v12911_v45  ;;  %v12987_v2 = vsel %vm1505_vm6, %v21275_v19, 0.0  ;;  %v21289_v7 = vadd.f32 %v12920_v51, %v21166_v15 }
0x229d   : > { %12988 = vadd.xlane.f32.xlu1 %v12987_v2  ;;  %v15646_v25 = vpop.f32.mrf.mxu0 }
0x229e   : > { %v21285_v23 = vadd.f32 %v12912_v1, %v21154_v27  ;;  %v12933_v17 = vadd.f32 %v15646_v25, %v21270_v56  ;;  %v12996_v62 = vsel %vm1505_vm6, %v21289_v7, 0.0 }
0x229f   : > { %v12924_v30 = vpop.f32.mrf.mxu0 }
0x22a0   : > { %v12925_v52 = vadd.f32 %v21270_v56, %v12924_v30  ;;  %v12990_v4 = vsel %vm1505_vm6, %v21285_v23, 0.0  ;;  %v21300_v32 = vadd.f32 %v12933_v17, %v21190_v59 }
0x22a1   : > { %12991 = vadd.xlane.f32.xlu0 %v12990_v4  ;;  %12994 = vadd.xlane.f32.xlu1 %v12993_v36  ;;  %v15647_v18 = vpop.f32.mrf.mxu0 }
0x22a2   : > { %v21297_v27 = vadd.f32 %v12925_v52, %v21177_v37  ;;  %v12936_v15 = vadd.f32 %v15647_v18, %v21270_v56  ;;  %v13005_v59 = vsel %vm1505_vm6, %v21300_v32, 0.0 }
0x22a3   : > { %v12927_v44 = vpop.f32.mrf.mxu0 }
0x22a4   : > { %v12928_v10 = vadd.f32 %v21270_v56, %v12927_v44  ;;  %v12999_v11 = vsel %vm1505_vm6, %v21297_v27, 0.0  ;;  %v21314_v3 = vadd.f32 %v12936_v15, %v21193_v54 }
0x22a5   : > { %12997 = vadd.xlane.f32.xlu0 %v12996_v62  ;;  %13000 = vadd.xlane.f32.xlu1 %v12999_v11  ;;  %v15650_v0 = vpop.f32.mrf.mxu0 }
0x22a6   : > { %v21309_v37 = vadd.f32 %v12928_v10, %v21180_v26  ;;  %v12949_v14 = vadd.f32 %v15650_v0, %v21270_v56  ;;  %v13008_v24 = vsel %vm1505_vm6, %v21314_v3, 0.0 }
0x22a7   : > { %v12940_v42 = vpop.f32.mrf.mxu0 }
0x22a8   : > { %v12941_v55 = vadd.f32 %v21270_v56, %v12940_v42  ;;  %v13002_v41 = vsel %vm1505_vm6, %v21309_v37, 0.0  ;;  %v21325_v63 = vadd.f32 %v12949_v14, %v21215_v35 }
0x22a9   : > { %13003 = vadd.xlane.f32.xlu0 %v13002_v41  ;;  %13006 = vadd.xlane.f32.xlu1 %v13005_v59  ;;  %v15651_v46 = vpop.f32.mrf.mxu0 }
0x22aa   : > { %v21321_v26 = vadd.f32 %v12941_v55, %v21200_v33  ;;  %v12952_v38 = vadd.f32 %v15651_v46, %v21270_v56  ;;  %v13017_v9 = vsel %vm1505_vm6, %v21325_v63, 0.0 }
0x22ab   : > { %v12943_v31 = vpop.f32.mrf.mxu0 }
0x22ac   : > { %v12944_v54 = vadd.f32 %v21270_v56, %v12943_v31  ;;  %v13011_v61 = vsel %vm1505_vm6, %v21321_v26, 0.0  ;;  %v21336_v48 = vadd.f32 %v12952_v38, %v21218_v57 }
0x22ad   : > { %13009 = vadd.xlane.f32.xlu0 %v13008_v24  ;;  %13012 = vadd.xlane.f32.xlu1 %v13011_v61  ;;  %v15654_v29 = vpop.f32.mrf.mxu0 }
0x22ae   : > { %v21333_v33 = vadd.f32 %v12944_v54, %v21205_v12  ;;  %v12965_v35 = vadd.f32 %v15654_v29, %v21270_v56  ;;  %v13020_v57 = vsel %vm1505_vm6, %v21336_v48, 0.0 }
0x22af   : > { %v12956_v58 = vpop.f32.mrf.mxu0 }
0x22b0   : > { %v12957_v43 = vadd.f32 %v21270_v56, %v12956_v58  ;;  %v13014_v6 = vsel %vm1505_vm6, %v21333_v33, 0.0  ;;  %v21350_v50 = vadd.f32 %v12965_v35, %v21238_v53 }
0x22b1   : > { %13015 = vadd.xlane.f32.xlu0 %v13014_v6  ;;  %13018 = vadd.xlane.f32.xlu1 %v13017_v9  ;;  %v15655_v39 = vpop.f32.mrf.mxu0 }
0x22b2   : > { %v21345_v12 = vadd.f32 %v12957_v43, %v21229_v5  ;;  %v12968_v22 = vadd.f32 %v15655_v39, %v21270_v56  ;;  %v13029_v53 = vsel %vm1505_vm6, %v21350_v50, 0.0 }
0x22b3   : > { %v12959_v47 = vpop.f32.mrf.mxu0 }
0x22b4   : > { %v12960_v28 = vadd.f32 %v21270_v56, %v12959_v47  ;;  %v13023_v13 = vsel %vm1505_vm6, %v21345_v12, 0.0  ;;  %v21360_v5 = vadd.f32 %v12968_v22, %v21241_v60 }
0x22b5   : > { %13021 = vadd.xlane.f32.xlu0 %v13020_v57  ;;  %13024 = vadd.xlane.f32.xlu1 %v13023_v13 }
0x22b6   : > { %v21357_v34 = vadd.f32 %v12960_v28, %v21232_v16  ;;  %v13032_v56 = vsel %vm1505_vm6, %v21360_v5, 0.0 }
0x22b8   : > { %v13026_v21 = vsel %vm1505_vm6, %v21357_v34, 0.0 }
0x22b9   : > { %13027 = vadd.xlane.f32.xlu0 %v13026_v21  ;;  %13030 = vadd.xlane.f32.xlu1 %v13029_v53 }
0x22bd   : > { %13033 = vadd.xlane.f32.xlu0 %v13032_v56 }
0x2326   : > { %v12989_v40 = vpop.xlane.xlu1 %12988 }
0x2327   : > { %v13035_v45 = vmul.f32 0.03125, %v12989_v40 }
0x2329   : > { %v21369_v16 = vsub.f32 %v21275_v19, %v13035_v45 }
0x232a   : > { %v12995_v51 = vpop.xlane.xlu1 %12994  ;;  %v12992_v60 = vpop.xlane.xlu0 %12991 }
0x232b   : > { %v13037_v1 = vmul.f32 0.03125, %v12995_v51  ;;  %v13036_v2 = vmul.f32 0.03125, %v12992_v60  ;;  %v13067_v25 = vmul.f32 %v21369_v16, %v21369_v16 }
0x232d   : > { %v21374_v17 = vsub.f32 %v21278_v20, %v13037_v1  ;;  %v21377_v30 = vsub.f32 %v21285_v23, %v13036_v2  ;;  %v13083_v52 = vsel %vm1505_vm6, %v13067_v25, 0.0 }
0x232e   : > { %v13001_v4 = vpop.xlane.xlu1 %13000  ;;  %13084 = vadd.xlane.f32.xlu1 %v13083_v52  ;;  %v12998_v36 = vpop.xlane.xlu0 %12997 }
0x232f   : > { %v13039_v19 = vmul.f32 0.03125, %v13001_v4  ;;  %v13038_v18 = vmul.f32 0.03125, %v12998_v36  ;;  %v13069_v44 = vmul.f32 %v21374_v17, %v21374_v17  ;;  %v13068_v15 = vmul.f32 %v21377_v30, %v21377_v30 }
0x2331   : > { %v21385_v10 = vsub.f32 %v21297_v27, %v13039_v19  ;;  %v21388_v20 = vsub.f32 %v21289_v7, %v13038_v18  ;;  %v13089_v23 = vsel %vm1505_vm6, %v13069_v44, 0.0  ;;  %v13086_v62 = vsel %vm1505_vm6, %v13068_v15, 0.0 }
0x2332   : > { %v13007_v11 = vpop.xlane.xlu1 %13006  ;;  %13090 = vadd.xlane.f32.xlu1 %v13089_v23  ;;  %13087 = vadd.xlane.f32.xlu0 %v13086_v62  ;;  %v13004_v0 = vpop.xlane.xlu0 %13003 }
0x2333   : > { %v13041_v42 = vmul.f32 0.03125, %v13007_v11  ;;  %v13040_v59 = vmul.f32 0.03125, %v13004_v0  ;;  %v13071_v14 = vmul.f32 %v21385_v10, %v21385_v10  ;;  %v13070_v27 = vmul.f32 %v21388_v20, %v21388_v20 }
0x2335   : > { %v21397_v55 = vsub.f32 %v21300_v32, %v13041_v42  ;;  %v21400_v7 = vsub.f32 %v21309_v37, %v13040_v59  ;;  %v13095_v41 = vsel %vm1505_vm6, %v13071_v14, 0.0  ;;  %v13092_v46 = vsel %vm1505_vm6, %v13070_v27, 0.0  ;;  %v15991_v59 = vld [vmem:[%s21626_s23 + $0x8] sm:$0xff]  }
0x2336   : > { %v13013_v38 = vpop.xlane.xlu1 %13012  ;;  %13096 = vadd.xlane.f32.xlu1 %v13095_v41  ;;  %13093 = vadd.xlane.f32.xlu0 %v13092_v46  ;;  %v13010_v31 = vpop.xlane.xlu0 %13009 }
0x2337   : > { %v13043_v54 = vmul.f32 0.03125, %v13013_v38  ;;  %v13042_v24 = vmul.f32 0.03125, %v13010_v31  ;;  %v13073_v61 = vmul.f32 %v21397_v55, %v21397_v55  ;;  %v13072_v32 = vmul.f32 %v21400_v7, %v21400_v7  ;;  %15656 = vmatprep.subr.bf16.mxu1 %v15991_v59 }
0x2338   : > { %15657 = vmatpush3.bf16.msra.mxu1 %v15991_v59 }
0x2339   : > { %v21409_v29 = vsub.f32 %v21321_v26, %v13043_v54  ;;  %v21412_v37 = vsub.f32 %v21314_v3, %v13042_v24  ;;  %v13101_v58 = vsel %vm1505_vm6, %v13073_v61, 0.0  ;;  %v13098_v35 = vsel %vm1505_vm6, %v13072_v32, 0.0 }
0x233a   : > { %v13019_v43 = vpop.xlane.xlu1 %13018  ;;  %13102 = vadd.xlane.f32.xlu1 %v13101_v58  ;;  %13099 = vadd.xlane.f32.xlu0 %v13098_v35  ;;  %v13016_v6 = vpop.xlane.xlu0 %13015 }
0x233b   : > { %v13045_v9 = vmul.f32 0.03125, %v13019_v43  ;;  %v13044_v39 = vmul.f32 0.03125, %v13016_v6  ;;  %v13075_v47 = vmul.f32 %v21409_v29, %v21409_v29  ;;  %v13074_v26 = vmul.f32 %v21412_v37, %v21412_v37 }
0x233d   : > { %v21421_v57 = vsub.f32 %v21325_v63, %v13045_v9  ;;  %v21424_v3 = vsub.f32 %v21333_v33, %v13044_v39  ;;  %v13107_v22 = vsel %vm1505_vm6, %v13075_v47, 0.0  ;;  %v13104_v28 = vsel %vm1505_vm6, %v13074_v26, 0.0 }
0x233e   : > { %13108 = vadd.xlane.f32.xlu1 %v13107_v22  ;;  %v13025_v13 = vpop.xlane.xlu1 %13024  ;;  %13105 = vadd.xlane.f32.xlu0 %v13104_v28  ;;  %v13022_v21 = vpop.xlane.xlu0 %13021 }
0x233f   : > { %v13047_v53 = vmul.f32 0.03125, %v13025_v13  ;;  %v13046_v56 = vmul.f32 0.03125, %v13022_v21  ;;  %v13077_v40 = vmul.f32 %v21421_v57, %v21421_v57  ;;  %v13076_v63 = vmul.f32 %v21424_v3, %v21424_v3 }
0x2341   : > { %v21433_v45 = vsub.f32 %v21345_v12, %v13047_v53  ;;  %v21436_v33 = vsub.f32 %v21336_v48, %v13046_v56  ;;  %v13113_v51 = vsel %vm1505_vm6, %v13077_v40, 0.0  ;;  %v13110_v60 = vsel %vm1505_vm6, %v13076_v63, 0.0 }
0x2342   : > { %13114 = vadd.xlane.f32.xlu1 %v13113_v51  ;;  %v13031_v1 = vpop.xlane.xlu1 %13030  ;;  %13111 = vadd.xlane.f32.xlu0 %v13110_v60  ;;  %v13028_v2 = vpop.xlane.xlu0 %13027 }
0x2343   : > { %v13049_v25 = vmul.f32 0.03125, %v13031_v1  ;;  %v13048_v52 = vmul.f32 0.03125, %v13028_v2  ;;  %v13079_v4 = vmul.f32 %v21433_v45, %v21433_v45  ;;  %v13078_v12 = vmul.f32 %v21436_v33, %v21436_v33 }
0x2345   : > { %v21445_v36 = vsub.f32 %v21350_v50, %v13049_v25  ;;  %v21448_v48 = vsub.f32 %v21357_v34, %v13048_v52  ;;  %v13119_v19 = vsel %vm1505_vm6, %v13079_v4, 0.0  ;;  %v13116_v18 = vsel %vm1505_vm6, %v13078_v12, 0.0 }
0x2346   : > { %13120 = vadd.xlane.f32.xlu1 %v13119_v19  ;;  %13117 = vadd.xlane.f32.xlu0 %v13116_v18  ;;  %v13034_v44 = vpop.xlane.xlu0 %13033 }
0x2347   : > { %v13050_v15 = vmul.f32 0.03125, %v13034_v44  ;;  %v13081_v23 = vmul.f32 %v21445_v36, %v21445_v36  ;;  %v13080_v62 = vmul.f32 %v21448_v48, %v21448_v48 }
0x2349   : > { %v21457_v50 = vsub.f32 %v21360_v5, %v13050_v15  ;;  %v13125_v34 = vsel %vm1505_vm6, %v13081_v23, 0.0  ;;  %v13122_v11 = vsel %vm1505_vm6, %v13080_v62, 0.0  ;;  %v15992_v5 = vld [vmem:[%s21626_s23] sm:$0xff]  }
0x234a   : > { %13126 = vadd.xlane.f32.xlu1 %v13125_v34  ;;  %13123 = vadd.xlane.f32.xlu0 %v13122_v11 }
0x234b   : > { %v13082_v0 = vmul.f32 %v21457_v50, %v21457_v50  ;;  %15658 = vmatprep.subr.bf16.mxu1 %v15992_v5 }
0x234c   : > { %15659 = vmatpush3.bf16.msra.mxu1 %v15992_v5 }
0x234d   : > { %v13128_v42 = vsel %vm1505_vm6, %v13082_v0, 0.0 }
0x234e   : > { %13129 = vadd.xlane.f32.xlu0 %v13128_v42 }
0x23b7   : > { %v13085_v14 = vpop.xlane.xlu1 %13084 }
0x23b8   : > { %v13131_v27 = vmul.f32 0.03125, %v13085_v14 }
0x23ba   : > { %v13147_v41 = vadd.f32 1e-05, %v13131_v27 }
0x23bb   : > { %v13091_v46 = vpop.xlane.xlu1 %13090  ;;  %v13088_v38 = vpop.xlane.xlu0 %13087 }
0x23bc   : > { %16602 = vrsqrt.f32 %v13147_v41  ;;  %v13133_v31 = vmul.f32 0.03125, %v13091_v46  ;;  %v13132_v54 = vmul.f32 0.03125, %v13088_v38 }
0x23be   : > { %v13149_v24 = vadd.f32 1e-05, %v13133_v31  ;;  %v13148_v61 = vadd.f32 1e-05, %v13132_v54 }
0x23bf   : > { %v13097_v32 = vpop.xlane.xlu1 %13096  ;;  %v13094_v58 = vpop.xlane.xlu0 %13093 }
0x23c0   : > { %16604 = vrsqrt.f32 %v13149_v24  ;;  %v13135_v35 = vmul.f32 0.03125, %v13097_v32  ;;  %v13134_v43 = vmul.f32 0.03125, %v13094_v58 }
0x23c1   : > { %16606 = vrsqrt.f32 %v13148_v61 }
0x23c2   : > { %v13151_v6 = vadd.f32 1e-05, %v13135_v35  ;;  %v13150_v9 = vadd.f32 1e-05, %v13134_v43 }
0x23c3   : > { %v13103_v39 = vpop.xlane.xlu1 %13102  ;;  %v13100_v47 = vpop.xlane.xlu0 %13099 }
0x23c4   : > { %16608 = vrsqrt.f32 %v13151_v6  ;;  %v13137_v26 = vmul.f32 0.03125, %v13103_v39  ;;  %v13136_v22 = vmul.f32 0.03125, %v13100_v47 }
0x23c5   : > { %16610 = vrsqrt.f32 %v13150_v9 }
0x23c6   : > { %v13153_v28 = vadd.f32 1e-05, %v13137_v26  ;;  %v13152_v13 = vadd.f32 1e-05, %v13136_v22 }
0x23c7   : > { %v13109_v21 = vpop.xlane.xlu1 %13108  ;;  %v13106_v53 = vpop.xlane.xlu0 %13105 }
0x23c8   : > { %16612 = vrsqrt.f32 %v13153_v28  ;;  %v13139_v56 = vmul.f32 0.03125, %v13109_v21  ;;  %v13138_v40 = vmul.f32 0.03125, %v13106_v53 }
0x23c9   : > { %v16603_v63 = vpop.eup %16602  ;;  %16614 = vrsqrt.f32 %v13152_v13 }
0x23ca   : > { %v13155_v51 = vadd.f32 1e-05, %v13139_v56  ;;  %v13154_v60 = vadd.f32 1e-05, %v13138_v40  ;;  %v13179_v25 = vmul.f32 %v16603_v63, %v21369_v16 }
0x23cb   : > { %v13115_v1 = vpop.xlane.xlu1 %13114  ;;  %v13112_v2 = vpop.xlane.xlu0 %13111 }
0x23cc   : > { %16616 = vrsqrt.f32 %v13155_v51  ;;  %v13141_v52 = vmul.f32 0.03125, %v13115_v1  ;;  %v13140_v4 = vmul.f32 0.03125, %v13112_v2  ;;  %v13195_v11 = vmul.f32 %v21137_v8, %v13179_v25 }
0x23cd   : > { %v16605_v12 = vpop.eup %16604  ;;  %16618 = vrsqrt.f32 %v13154_v60 }
0x23ce   : > { %v16607_v19 = vpop.eup %16606  ;;  %v13181_v18 = vmul.f32 %v16605_v12, %v21374_v17  ;;  %v13157_v44 = vadd.f32 1e-05, %v13141_v52  ;;  %v13156_v15 = vadd.f32 1e-05, %v13140_v4 }
0x23cf   : > { %v13121_v23 = vpop.xlane.xlu1 %13120  ;;  %v13118_v62 = vpop.xlane.xlu0 %13117  ;;  %v13180_v34 = vmul.f32 %v16607_v19, %v21377_v30  ;;  %v13211_v30 = vadd.f32 %v21145_v49, %v13195_v11 }
0x23d0   : > { %16620 = vrsqrt.f32 %v13157_v44  ;;  %v13143_v0 = vmul.f32 0.03125, %v13121_v23  ;;  %v13142_v42 = vmul.f32 0.03125, %v13118_v62  ;;  %v13197_v14 = vmul.f32 %v21137_v8, %v13181_v18 }
0x23d1   : > { %v16609_v16 = vpop.eup %16608  ;;  %16622 = vrsqrt.f32 %v13156_v15  ;;  %v13196_v59 = vmul.f32 %v21137_v8, %v13180_v34 }
0x23d2   : > { %v16611_v5 = vpop.eup %16610  ;;  %v13159_v27 = vadd.f32 1e-05, %v13143_v0  ;;  %v13158_v17 = vadd.f32 1e-05, %v13142_v42  ;;  %v13183_v54 = vmul.f32 %v16609_v16, %v21385_v10  ;;  %v13213_v6 = vadd.f32 %v21145_v49, %v13197_v14 }
0x23d3   : > { %v13182_v41 = vmul.f32 %v16611_v5, %v21388_v20  ;;  %v13127_v46 = vpop.xlane.xlu1 %13126  ;;  %v13124_v38 = vpop.xlane.xlu0 %13123  ;;  %v13212_v31 = vadd.f32 %v21145_v49, %v13196_v59 }
0x23d4   : > { %16624 = vrsqrt.f32 %v13159_v27  ;;  %v13145_v24 = vmul.f32 0.03125, %v13127_v46  ;;  %v13144_v61 = vmul.f32 0.03125, %v13124_v38  ;;  %v13199_v22 = vmul.f32 %v21137_v8, %v13183_v54 }
0x23d5   : > { %v16613_v32 = vpop.eup %16612  ;;  %v13198_v58 = vmul.f32 %v21137_v8, %v13182_v41  ;;  %16626 = vrsqrt.f32 %v13158_v17  ;;  %v13231_v35 = vpack.c.bf16 %v13212_v31, %v13211_v30 }
0x23d6   : > { %v16615_v43 = vpop.eup %16614  ;;  %v13161_v20 = vadd.f32 1e-05, %v13145_v24  ;;  %v13160_v9 = vadd.f32 1e-05, %v13144_v61  ;;  %v13185_v47 = vmul.f32 %v16613_v32, %v21397_v55  ;;  %v13215_v51 = vadd.f32 %v21145_v49, %v13199_v22 }
0x23d7   : > { %v13214_v39 = vadd.f32 %v21145_v49, %v13198_v58  ;;  %15660 = vmatprep.mubr.msk.bf16.mxu1 %vm1505_vm6, %v13231_v35  ;;  %v13130_v10 = vpop.xlane.xlu0 %13129  ;;  %v13184_v26 = vmul.f32 %v16615_v43, %v21400_v7 }
0x23d8   : > { %16628 = vrsqrt.f32 %v13161_v20  ;;  %v13146_v28 = vmul.f32 0.03125, %v13130_v10  ;;  %v13201_v60 = vmul.f32 %v21137_v8, %v13185_v47 }
0x23d9   : > { %v16617_v13 = vpop.eup %16616  ;;  %v13232_v21 = vpack.c.bf16 %v13214_v39, %v13213_v6  ;;  %16630 = vrsqrt.f32 %v13160_v9  ;;  %v13200_v53 = vmul.f32 %v21137_v8, %v13184_v26 }
0x23da   : > { %v16619_v56 = vpop.eup %16618  ;;  %v13162_v40 = vadd.f32 1e-05, %v13146_v28  ;;  %v13187_v63 = vmul.f32 %v16617_v13, %v21409_v29 }
0x23db   : > { %v13186_v55 = vmul.f32 %v16619_v56, %v21412_v37  ;;  %15661 = vmatmul.mubr.msk.bf16.vlgmr.msra.gmra.mxu1 %vm1505_vm6, %v13232_v21  ;;  %v13216_v7 = vadd.f32 %v21145_v49, %v13200_v53  ;;  %v13217_v37 = vadd.f32 %v21145_v49, %v13201_v60 }
0x23dc   : > { %16632 = vrsqrt.f32 %v13162_v40  ;;  %v13203_v4 = vmul.f32 %v21137_v8, %v13187_v63 }
0x23dd   : > { %v16621_v1 = vpop.eup %16620  ;;  %v13233_v2 = vpack.c.bf16 %v13216_v7, %v13215_v51  ;;  %v13202_v25 = vmul.f32 %v21137_v8, %v13186_v55 }
0x23de   : > { %v16623_v52 = vpop.eup %16622  ;;  %v13189_v29 = vmul.f32 %v16621_v1, %v21421_v57  ;;  %v13219_v62 = vadd.f32 %v21145_v49, %v13203_v4 }
0x23df   : > { %15664 = vmatprep.mubr.msk.bf16.mxu1 %vm1505_vm6, %v13233_v2  ;;  %v13218_v12 = vadd.f32 %v21145_v49, %v13202_v25  ;;  %v13188_v19 = vmul.f32 %v16623_v52, %v21424_v3 }
0x23e0   : > { %v13205_v11 = vmul.f32 %v21137_v8, %v13189_v29 }
0x23e1   : > { %v16625_v18 = vpop.eup %16624  ;;  %v13234_v44 = vpack.c.bf16 %v13218_v12, %v13217_v37  ;;  %v13204_v15 = vmul.f32 %v21137_v8, %v13188_v19 }
0x23e2   : > { %v16627_v23 = vpop.eup %16626  ;;  %v13191_v0 = vmul.f32 %v16625_v18, %v21433_v45  ;;  %v13221_v14 = vadd.f32 %v21145_v49, %v13205_v11 }
0x23e3   : > { %v13190_v34 = vmul.f32 %v16627_v23, %v21436_v33  ;;  %15665 = vmatmul.mubr.msk.bf16.gmra.mxu1 %vm1505_vm6, %v13234_v44  ;;  %v13220_v57 = vadd.f32 %v21145_v49, %v13204_v15 }
0x23e4   : > { %v13207_v17 = vmul.f32 %v21137_v8, %v13191_v0 }
0x23e5   : > { %v16629_v42 = vpop.eup %16628  ;;  %v13235_v16 = vpack.c.bf16 %v13220_v57, %v13219_v62  ;;  %v13206_v3 = vmul.f32 %v21137_v8, %v13190_v34 }
0x23e6   : > { %v16631_v59 = vpop.eup %16630  ;;  %v13193_v5 = vmul.f32 %v16629_v42, %v21445_v36  ;;  %v13223_v36 = vadd.f32 %v21145_v49, %v13207_v17 }
0x23e7   : > { %15668 = vmatprep.mubr.msk.bf16.mxu1 %vm1505_vm6, %v13235_v16  ;;  %v13222_v33 = vadd.f32 %v21145_v49, %v13206_v3  ;;  %v13192_v27 = vmul.f32 %v16631_v59, %v21448_v48 }
0x23e8   : > { %v13209_v30 = vmul.f32 %v21137_v8, %v13193_v5 }
0x23e9   : > { %v16633_v41 = vpop.eup %16632  ;;  %v13236_v46 = vpack.c.bf16 %v13222_v33, %v13221_v14  ;;  %v13208_v45 = vmul.f32 %v21137_v8, %v13192_v27 }
0x23ea   : > { %v13194_v38 = vmul.f32 %v16633_v41, %v21457_v50  ;;  %v13225_v48 = vadd.f32 %v21145_v49, %v13209_v30  ;;  %v15993_v50 = vld [vmem:[%s21628_s25] sm:$0xff]  }
0x23eb   : > { %15669 = vmatmul.mubr.msk.bf16.gmra.mxu1 %vm1505_vm6, %v13236_v46  ;;  %v13224_v31 = vadd.f32 %v21145_v49, %v13208_v45  ;;  %15676 = vmatprep.subr.bf16.mxu0 %v15993_v50 }
0x23ec   : > { %v13210_v54 = vmul.f32 %v21137_v8, %v13194_v38  ;;  %15677 = vmatpush3.bf16.msra.mxu0 %v15993_v50  ;;  %v14017_v8 = vld [vmem:[%s21627_s24] ss:$0 sm:$0xff] }
0x23ed   : > { %v13237_v24 = vpack.c.bf16 %v13224_v31, %v13223_v36  ;;  %v21543_v31 = vld [vmem:[%s21629_s26] ss:$0 sm:$0xff] }
0x23ee   : > { %v13226_v61 = vadd.f32 %v21145_v49, %v13210_v54 }
0x23ef   : > { %15672 = vmatprep.mubr.msk.bf16.mxu1 %vm1505_vm6, %v13237_v24 }
0x23f0   : > { %v13238_v32 = vpack.c.bf16 %v13226_v61, %v13225_v48 }
0x23f3   : > { %15673 = vmatmul.mubr.msk.bf16.gmra.mxu1 %vm1505_vm6, %v13238_v32 }
0x249b   : > { %v15662_v58 = vpop.f32.mrf.mxu1 }
0x249c   : > { %v13325_v20 = vadd.f32 %v15662_v58, %v14017_v8 }
0x249d   : > { %v13316_v35 = vpop.f32.mrf.mxu1 }
0x249e   : > { %v13317_v6 = vadd.f32 %v14017_v8, %v13316_v35  ;;  %v13381_v28 = vmax.f32 %v13325_v20, 0.0 }
0x249f   : > { %v15663_v43 = vpop.f32.mrf.mxu1 }
0x24a0   : > { %v13328_v49 = vadd.f32 %v15663_v43, %v14017_v8  ;;  %v13379_v26 = vmax.f32 %v13317_v6, 0.0 }
0x24a1   : > { %v13319_v9 = vpop.f32.mrf.mxu1 }
0x24a2   : > { %v13320_v39 = vadd.f32 %v14017_v8, %v13319_v9  ;;  %v13382_v47 = vmax.f32 %v13328_v49, 0.0 }
0x24a3   : > { %v15666_v10 = vpop.f32.mrf.mxu1 }
0x24a4   : > { %v13380_v22 = vmax.f32 %v13320_v39, 0.0  ;;  %v13398_v53 = vpack.c.bf16 %v13382_v47, %v13381_v28  ;;  %v13341_v55 = vadd.f32 %v15666_v10, %v14017_v8 }
0x24a5   : > { %v13332_v13 = vpop.f32.mrf.mxu1 }
0x24a6   : > { %v13397_v21 = vpack.c.bf16 %v13380_v22, %v13379_v26  ;;  %v13333_v40 = vadd.f32 %v14017_v8, %v13332_v13  ;;  %v13385_v52 = vmax.f32 %v13341_v55, 0.0 }
0x24a7   : > { %v15667_v56 = vpop.f32.mrf.mxu1 }
0x24a8   : > { %v13344_v63 = vadd.f32 %v15667_v56, %v14017_v8  ;;  %15678 = vmatprep.mubr.msk.bf16.mxu0 %vm1261_vm5, %v13397_v21  ;;  %v13383_v2 = vmax.f32 %v13333_v40, 0.0 }
0x24a9   : > { %v13335_v51 = vpop.f32.mrf.mxu1  ;;  %15679 = vmatmul.mubr.msk.bf16.vlgmr.msra.gmra.mxu0 %vm1261_vm5, %v13398_v53 }
0x24aa   : > { %v13336_v7 = vadd.f32 %v14017_v8, %v13335_v51  ;;  %v13386_v60 = vmax.f32 %v13344_v63, 0.0 }
0x24ab   : > { %v15670_v1 = vpop.f32.mrf.mxu1 }
0x24ac   : > { %v13384_v25 = vmax.f32 %v13336_v7, 0.0  ;;  %v13400_v37 = vpack.c.bf16 %v13386_v60, %v13385_v52  ;;  %v13357_v44 = vadd.f32 %v15670_v1, %v14017_v8 }
0x24ad   : > { %v13348_v4 = vpop.f32.mrf.mxu1 }
0x24ae   : > { %v13399_v29 = vpack.c.bf16 %v13384_v25, %v13383_v2  ;;  %v13349_v19 = vadd.f32 %v14017_v8, %v13348_v4  ;;  %v13389_v0 = vmax.f32 %v13357_v44, 0.0 }
0x24af   : > { %v15671_v12 = vpop.f32.mrf.mxu1 }
0x24b0   : > { %v13360_v18 = vadd.f32 %v15671_v12, %v14017_v8  ;;  %15682 = vmatprep.mubr.msk.bf16.mxu0 %vm1261_vm5, %v13399_v29  ;;  %v13387_v57 = vmax.f32 %v13349_v19, 0.0 }
0x24b1   : > { %v13351_v15 = vpop.f32.mrf.mxu1  ;;  %15683 = vmatmul.mubr.msk.bf16.gmra.mxu0 %vm1261_vm5, %v13400_v37 }
0x24b2   : > { %v13352_v23 = vadd.f32 %v14017_v8, %v13351_v15  ;;  %v13390_v62 = vmax.f32 %v13360_v18, 0.0 }
0x24b3   : > { %v15674_v34 = vpop.f32.mrf.mxu1 }
0x24b4   : > { %v13388_v11 = vmax.f32 %v13352_v23, 0.0  ;;  %v13402_v3 = vpack.c.bf16 %v13390_v62, %v13389_v0  ;;  %v13373_v33 = vadd.f32 %v15674_v34, %v14017_v8 }
0x24b5   : > { %v13364_v42 = vpop.f32.mrf.mxu1 }
0x24b6   : > { %v13401_v16 = vpack.c.bf16 %v13388_v11, %v13387_v57  ;;  %v13365_v5 = vadd.f32 %v14017_v8, %v13364_v42  ;;  %v13393_v38 = vmax.f32 %v13373_v33, 0.0 }
0x24b7   : > { %v15675_v59 = vpop.f32.mrf.mxu1 }
0x24b8   : > { %v13376_v14 = vadd.f32 %v15675_v59, %v14017_v8  ;;  %15686 = vmatprep.mubr.msk.bf16.mxu0 %vm1261_vm5, %v13401_v16  ;;  %v13391_v46 = vmax.f32 %v13365_v5, 0.0 }
0x24b9   : > { %v13367_v27 = vpop.f32.mrf.mxu1  ;;  %15687 = vmatmul.mubr.msk.bf16.gmra.mxu0 %vm1261_vm5, %v13402_v3 }
0x24ba   : > { %v13368_v17 = vadd.f32 %v14017_v8, %v13367_v27  ;;  %v13394_v41 = vmax.f32 %v13376_v14, 0.0 }
0x24bc   : > { %v13392_v45 = vmax.f32 %v13368_v17, 0.0  ;;  %v13404_v36 = vpack.c.bf16 %v13394_v41, %v13393_v38 }
0x24be   : > { %v13403_v30 = vpack.c.bf16 %v13392_v45, %v13391_v46 }
0x24c0   : > { %15690 = vmatprep.mubr.msk.bf16.mxu0 %vm1261_vm5, %v13403_v30 }
0x24c1   : > { %15691 = vmatmul.mubr.msk.bf16.gmra.mxu0 %vm1261_vm5, %v13404_v36 }
0x2569   : > { %v15680_v54 = vpop.f32.mrf.mxu0 }
0x256a   : > { %v13485_v24 = vadd.f32 %v15680_v54, %v21543_v31 }
0x256b   : > { %v13476_v48 = vpop.f32.mrf.mxu0 }
0x256c   : > { %v13541_v61 = vmax.f32 %v13485_v24, 0.0  ;;  %v13477_v32 = vadd.f32 %v21543_v31, %v13476_v48 }
0x256d   : > { %v15681_v50 = vpop.f32.mrf.mxu0 }
0x256e   : > { %13558 = vst.msk [vmem:[%s21551_s9 + $0x10] sm:$0xff] %vm13555_vm10, %v13541_v61  ;;  %v13539_v58 = vmax.f32 %v13477_v32, 0.0  ;;  %v13488_v35 = vadd.f32 %v15681_v50, %v21543_v31 }
0x256f   : > { %v13479_v8 = vpop.f32.mrf.mxu0 }
0x2570   : > { %13556 = vst.msk [vmem:[%s21551_s9] sm:$0xff] %vm13555_vm10, %v13539_v58  ;;  %v13542_v43 = vmax.f32 %v13488_v35, 0.0  ;;  %v13480_v6 = vadd.f32 %v21543_v31, %v13479_v8 }
0x2571   : > { %v15684_v49 = vpop.f32.mrf.mxu0 }
0x2572   : > { %13559 = vst.msk [vmem:[%s21551_s9 + $0x18] sm:$0xff] %vm13555_vm10, %v13542_v43  ;;  %v13540_v20 = vmax.f32 %v13480_v6, 0.0  ;;  %v13501_v9 = vadd.f32 %v15684_v49, %v21543_v31 }
0x2573   : > { %v13492_v39 = vpop.f32.mrf.mxu0 }
0x2574   : > { %13557 = vst.msk [vmem:[%s21551_s9 + $0x8] sm:$0xff] %vm13555_vm10, %v13540_v20  ;;  %v13545_v47 = vmax.f32 %v13501_v9, 0.0  ;;  %v13493_v10 = vadd.f32 %v21543_v31, %v13492_v39 }
0x2575   : > { %v15685_v26 = vpop.f32.mrf.mxu0 }
0x2576   : > { %13562 = vst.msk [vmem:[%s21551_s9 + $0x30] sm:$0xff] %vm13555_vm10, %v13545_v47  ;;  %v13543_v22 = vmax.f32 %v13493_v10, 0.0  ;;  %v13504_v28 = vadd.f32 %v15685_v26, %v21543_v31 }
0x2577   : > { %v13495_v13 = vpop.f32.mrf.mxu0 }
0x2578   : > { %13560 = vst.msk [vmem:[%s21551_s9 + $0x20] sm:$0xff] %vm13555_vm10, %v13543_v22  ;;  %v13546_v21 = vmax.f32 %v13504_v28, 0.0  ;;  %v13496_v53 = vadd.f32 %v21543_v31, %v13495_v13 }
0x2579   : > { %v15688_v56 = vpop.f32.mrf.mxu0 }
0x257a   : > { %13563 = vst.msk [vmem:[%s21551_s9 + $0x38] sm:$0xff] %vm13555_vm10, %v13546_v21  ;;  %v13544_v40 = vmax.f32 %v13496_v53, 0.0  ;;  %v13517_v63 = vadd.f32 %v15688_v56, %v21543_v31 }
0x257b   : > { %v13508_v55 = vpop.f32.mrf.mxu0 }
0x257c   : > { %13561 = vst.msk [vmem:[%s21551_s9 + $0x28] sm:$0xff] %vm13555_vm10, %v13544_v40  ;;  %v13549_v51 = vmax.f32 %v13517_v63, 0.0  ;;  %v13509_v7 = vadd.f32 %v21543_v31, %v13508_v55 }
0x257d   : > { %v15689_v60 = vpop.f32.mrf.mxu0 }
0x257e   : > { %13566 = vst.msk [vmem:[%s21551_s9 + $0x50] sm:$0xff] %vm13555_vm10, %v13549_v51  ;;  %v13547_v1 = vmax.f32 %v13509_v7, 0.0  ;;  %v13520_v2 = vadd.f32 %v15689_v60, %v21543_v31 }
0x257f   : > { %v13511_v25 = vpop.f32.mrf.mxu0 }
0x2580   : > { %13564 = vst.msk [vmem:[%s21551_s9 + $0x40] sm:$0xff] %vm13555_vm10, %v13547_v1  ;;  %v13550_v52 = vmax.f32 %v13520_v2, 0.0  ;;  %v13512_v4 = vadd.f32 %v21543_v31, %v13511_v25 }
0x2581   : > { %v15692_v29 = vpop.f32.mrf.mxu0 }
0x2582   : > { %13567 = vst.msk [vmem:[%s21551_s9 + $0x58] sm:$0xff] %vm13555_vm10, %v13550_v52  ;;  %v13548_v37 = vmax.f32 %v13512_v4, 0.0  ;;  %v13533_v12 = vadd.f32 %v15692_v29, %v21543_v31 }
0x2583   : > { %v13524_v19 = vpop.f32.mrf.mxu0 }
0x2584   : > { %13565 = vst.msk [vmem:[%s21551_s9 + $0x48] sm:$0xff] %vm13555_vm10, %v13548_v37  ;;  %v13553_v18 = vmax.f32 %v13533_v12, 0.0  ;;  %v13525_v44 = vadd.f32 %v21543_v31, %v13524_v19 }
0x2585   : > { %v15693_v15 = vpop.f32.mrf.mxu0 }
0x2586   : > { %13570 = vst.msk [vmem:[%s21551_s9 + $0x70] sm:$0xff] %vm13555_vm10, %v13553_v18  ;;  %v13551_v23 = vmax.f32 %v13525_v44, 0.0  ;;  %v13536_v62 = vadd.f32 %v15693_v15, %v21543_v31 }
0x2587   : > { %v13527_v34 = vpop.f32.mrf.mxu0 }
0x2588   : > { %13568 = vst.msk [vmem:[%s21551_s9 + $0x60] sm:$0xff] %vm13555_vm10, %v13551_v23  ;;  %v13554_v57 = vmax.f32 %v13536_v62, 0.0  ;;  %v13528_v11 = vadd.f32 %v21543_v31, %v13527_v34 }
0x258a   : > { %13571 = vst.msk [vmem:[%s21551_s9 + $0x78] sm:$0xff] %vm13555_vm10, %v13554_v57  ;;  %v13552_v0 = vmax.f32 %v13528_v11, 0.0 }
0x258c   : > { %13569 = vst.msk [vmem:[%s21551_s9 + $0x68] sm:$0xff] %vm13555_vm10, %v13552_v0 }
0x258d PF: > { %s21907_s5 = sld [smem:[#allocation2_spill]] }
0x2593   : > { %s37_s7 = sadd.s32 1, %s21907_s5  }
0x2594   : > { %p34_p4 = scmp.ge.s32.totalorder %s37_s7, 4  }
0x2596   :  { %36 = sbr.rel (!%p34_p4) target bundleno = 13 (0xd), region = 174 }

</bundles_post_ra>
